<compile_context>
chip_gen: v5e
topology: v5e:2x2
jax: 0.10.0
libtpu: 0.0.40
codegen_flags: <defaults>
</compile_context>

<pallas_src>
import functools

import jax
import jax.numpy as jnp
from jax.experimental import pallas as pl
from jax.experimental.pallas import tpu as pltpu


# ----------------------------------------------------------------------------
# Helpers
# ----------------------------------------------------------------------------
def _round_up(x, m):
    return ((x + m - 1) // m) * m


def _pad_gate_cols(w, H, HP):
    """Pad each of the 4 gate blocks along the last axis from H to HP (zeros)."""
    wr = w.reshape(w.shape[:-1] + (4, H))
    out = jnp.zeros(w.shape[:-1] + (4, HP), w.dtype).at[..., :H].set(wr)
    return out.reshape(w.shape[:-1] + (4 * HP,))


def _pad_rows(w, RP):
    """Zero-pad the leading axis of a 2D array up to RP rows."""
    return jnp.zeros((RP,) + w.shape[1:], w.dtype).at[: w.shape[0]].set(w)


def _num_tensorcores():
    """Best-effort #TensorCores per chip (1 on v5e/v6e, 2 on v7x)."""
    try:
        info = pltpu.get_tpu_info()
        for attr in ("num_cores", "num_tensorcores", "tensorcores_per_chip",
                     "cores_per_chip"):
            v = getattr(info, attr, None)
            if isinstance(v, int) and v > 0:
                return v
    except Exception:
        pass
    return 1


# ----------------------------------------------------------------------------
# Kernel
# ----------------------------------------------------------------------------
def _lstm_cell(gates, c_prev, HP):
    """PyTorch LSTM cell; gate order (i, f, g, o); 128-lane-aligned slices."""
    i = jax.nn.sigmoid(gates[:, 0 * HP:1 * HP])
    f = jax.nn.sigmoid(gates[:, 1 * HP:2 * HP])
    g = jnp.tanh(gates[:, 2 * HP:3 * HP])
    o = jax.nn.sigmoid(gates[:, 3 * HP:4 * HP])
    c = f * c_prev + i * g
    h = o * jnp.tanh(c)
    return h, c


def stgcn_lstm_kernel(x_ref, wpre_ref, b1_ref, whh1_t_ref, wih2_t_ref,
                      whh2_t_ref, b2_ref, wfc_t_ref, bfc_ref, out_ref,
                      *, T, BB, H1P, H2P):
    # x_ref: (1, T*BB, N*Cin), rows ordered (t, b_local), cols (node*Cin + c).
    x2 = x_ref[0]

    # Graph-conv + 1x1-conv + LSTM-1 input projection: ONE matmul (folded).
    GX = jnp.dot(x2, wpre_ref[...],
                 preferred_element_type=jnp.float32) + b1_ref[...]

    whh1_t = whh1_t_ref[...]      # (H1P, 4*H1P)
    wih2_t = wih2_t_ref[...]      # (H1P, 4*H2P)
    whh2_t = whh2_t_ref[...]      # (H2P, 4*H2P)
    b2_b = jnp.broadcast_to(b2_ref[...], (BB, 4 * H2P))   # hoisted broadcast

    h1 = jnp.zeros((BB, H1P), jnp.float32)
    c1 = jnp.zeros((BB, H1P), jnp.float32)
    h2 = jnp.zeros((BB, H2P), jnp.float32)
    c2 = jnp.zeros((BB, H2P), jnp.float32)

    # Wavefront-pipelined stacked 2-layer LSTM over T steps (static unroll).
    # h1 starts at exactly 0, so the t=0 recurrent term vanishes.
    gates1 = GX[0:BB, :]
    for t in range(T):
        h1, c1 = _lstm_cell(gates1, c1, H1P)
        # Issue layer-1's matmul for step t+1 now; it only depends on h1[t],
        # so it overlaps with layer-2's processing of h1[t] below.
        if t + 1 < T:
            gates1 = GX[(t + 1) * BB:(t + 2) * BB, :] + jnp.dot(
                h1, whh1_t, preferred_element_type=jnp.float32)
        # Layer-2: two dots accumulated in f32 (no concat/relayout).
        gates2 = (jnp.dot(h1, wih2_t, preferred_element_type=jnp.float32)
                  + jnp.dot(h2, whh2_t, preferred_element_type=jnp.float32)
                  + b2_b)
        h2, c2 = _lstm_cell(gates2, c2, H2P)

    # Final linear head; output is lane-padded to 128 -> unmasked store.
    out_ref[0] = (jnp.dot(h2, wfc_t_ref[...],
                          preferred_element_type=jnp.float32) + bfc_ref[...])


# ----------------------------------------------------------------------------
# Wrapper (static weight folding, done once)
# ----------------------------------------------------------------------------
def prepare_params(params, N, Cin):
    A = params["A"].astype(jnp.float32)
    wconv = params["wconv"].astype(jnp.float32)   # (C2, Cin)
    bconv = params["bconv"].astype(jnp.float32)   # (C2,)
    wih1, whh1 = params["wih1"], params["whh1"]   # (4H1, N*C2), (4H1, H1)
    wih2, whh2 = params["wih2"], params["whh2"]   # (4H2, H1),  (4H2, H2)
    wfc, bfc = params["wfc"], params["bfc"]       # (ncls, H2), (ncls,)

    C2 = wconv.shape[0]
    H1 = whh1.shape[1]
    H2 = whh2.shape[1]
    ncls = wfc.shape[0]
    H1P = _round_up(H1, 128)                      # 128-lane-aligned gates
    H2P = _round_up(H2, 128)
    NCP = _round_up(max(ncls, 128), 128)          # lane-pad the logits

    # W_pre[(m,c), h] = sum_{n,o} A[n,m] * Wconv[o,c] * Wih1[h, n*C2 + o]
    w1r = wih1.reshape(4 * H1, N, C2)
    wpre = jnp.einsum("nm,oc,hno->mch", A, wconv, w1r).reshape(N * Cin, 4 * H1)

    # Conv bias folded through Wih1 into the LSTM-1 bias.
    b1_eff = (params["bih1"] + params["bhh1"]
              + jnp.tile(bconv, N) @ wih1.T).reshape(1, 4 * H1)

    # Gate-wise lane padding (zero columns => padded state lanes stay 0).
    wpre_p = _pad_gate_cols(wpre, H1, H1P)                      # (N*Cin, 4*H1P)
    b1_p = _pad_gate_cols(b1_eff, H1, H1P)                      # (1, 4*H1P)
    whh1_t = _pad_rows(_pad_gate_cols(whh1.T, H1, H1P), H1P)    # (H1P, 4*H1P)
    wih2_t = _pad_rows(_pad_gate_cols(wih2.T, H2, H2P), H1P)    # (H1P, 4*H2P)
    whh2_t = _pad_rows(_pad_gate_cols(whh2.T, H2, H2P), H2P)    # (H2P, 4*H2P)
    b2_p = _pad_gate_cols((params["bih2"] + params["bhh2"]).reshape(1, 4 * H2),
                          H2, H2P)                              # (1, 4*H2P)

    wfc_t = jnp.zeros((H2P, NCP), jnp.float32).at[:H2, :ncls].set(wfc.T)
    bfc_p = jnp.zeros((1, NCP), jnp.float32).at[:, :ncls].set(bfc)

    return dict(wpre=wpre_p, b1=b1_p, whh1_t=whh1_t, wih2_t=wih2_t,
                whh2_t=whh2_t, b2=b2_p, wfc_t=wfc_t, bfc=bfc_p,
                H1P=H1P, H2P=H2P, ncls=ncls, NCP=NCP)


def stgcn_lstm_forward(x, prep):
    B, T, N, Cin = x.shape
    H1P, H2P = prep["H1P"], prep["H2P"]
    ncls, NCP = prep["ncls"], prep["NCP"]
    Fin = N * Cin

    # Batch split only where it buys parallelism (multi-TensorCore chips).
    nc = _num_tensorcores()
    nb = nc if (nc > 1 and B % nc == 0) else 1
    BB = B // nb
    BBp = _round_up(BB, 8)            # sublane-aligned slices & full-tile store
    TBB = T * BBp

    # Per-block layout: rows ordered (t, b_local), cols (node*Cin + c).
    x_blk = x.astype(jnp.float32).reshape(nb, BB, T, Fin)
    if BBp != BB:
        x_blk = jnp.pad(x_blk, ((0, 0), (0, BBp - BB), (0, 0), (0, 0)))
    x_r = x_blk.transpose(0, 2, 1, 3).reshape(nb, TBB, Fin)

    args = (x_r, prep["wpre"], prep["b1"], prep["whh1_t"], prep["wih2_t"],
            prep["whh2_t"], prep["b2"], prep["wfc_t"], prep["bfc"])

    in_specs = [pl.BlockSpec((1, TBB, Fin), lambda i: (i, 0, 0))]
    for a in args[1:]:
        nd = a.ndim
        in_specs.append(pl.BlockSpec(a.shape, lambda i, _nd=nd: (0,) * _nd))

    kern = functools.partial(stgcn_lstm_kernel, T=T, BB=BBp, H1P=H1P, H2P=H2P)

    out = pl.pallas_call(
        kern,
        out_shape=jax.ShapeDtypeStruct((nb, BBp, NCP), jnp.float32),
        grid_spec=pltpu.PrefetchScalarGridSpec(
            num_scalar_prefetch=0,
            grid=(nb,),
            in_specs=in_specs,
            out_specs=pl.BlockSpec((1, BBp, NCP), lambda i: (i, 0, 0)),
        ),
        compiler_params=pltpu.CompilerParams(
            dimension_semantics=("parallel",)),
    )(*args)

    # Drop padded batch rows and padded logit lanes.
    return out[:, :BB, :ncls].reshape(B, ncls)


# ----------------------------------------------------------------------------
# Parameters & pure-JAX reference (literal replica of the PyTorch forward)
# ----------------------------------------------------------------------------
def init_params(key, N, Cin, Hg, Hl, ncls):
    C2 = 2 * Hg
    F = N * C2
    ks = jax.random.split(key, 12)
    u = lambda k, shp: jax.random.uniform(k, shp, jnp.float32, -0.1, 0.1)
    return {
        "A": jnp.eye(N, dtype=jnp.float32),            # torch.eye(num_nodes)
        "wconv": u(ks[0], (C2, Cin)),                  # Conv2d(in, 2*Hg, 1x1)
        "bconv": u(ks[1], (C2,)),
        "wih1": u(ks[2], (4 * Hg, F)),                 # LSTM(F -> Hg)
        "whh1": u(ks[3], (4 * Hg, Hg)),
        "bih1": u(ks[4], (4 * Hg,)),
        "bhh1": u(ks[5], (4 * Hg,)),
        "wih2": u(ks[6], (4 * Hl, Hg)),                # LSTM(Hg -> Hl)
        "whh2": u(ks[7], (4 * Hl, Hl)),
        "bih2": u(ks[8], (4 * Hl,)),
        "bhh2": u(ks[9], (4 * Hl,)),
        "wfc": u(ks[10], (ncls, Hl)),                  # Linear(Hl -> ncls)
        "bfc": u(ks[11], (ncls,)),
    }


def reference_forward(x, p):
    """Pure-JAX replica of the PyTorch forward (for verification)."""
    B, T, N, Cin = x.shape
    C2 = p["wconv"].shape[0]
    xp = jnp.transpose(x, (0, 3, 2, 1))                                # (B,Cin,N,T)
    h = jnp.einsum("nm,bcmt->bcnt", p["A"], xp)
    g = jnp.einsum("oc,bcnt->bont", p["wconv"], h) + p["bconv"][None, :, None, None]
    g = jnp.transpose(g, (0, 3, 2, 1)).reshape(B, T, N * C2)

    def run_lstm(seq, wih, whh, bih, bhh):
        Bq, Tq, _ = seq.shape
        H = whh.shape[1]
        hh = jnp.zeros((Bq, H), jnp.float32)
        cc = jnp.zeros((Bq, H), jnp.float32)
        outs = []
        for t in range(Tq):
            gates = seq[:, t] @ wih.T + hh @ whh.T + bih + bhh
            i = jax.nn.sigmoid(gates[:, :H])
            f = jax.nn.sigmoid(gates[:, H:2 * H])
            gg = jnp.tanh(gates[:, 2 * H:3 * H])
            o = jax.nn.sigmoid(gates[:, 3 * H:])
            cc = f * cc + i * gg
            hh = o * jnp.tanh(cc)
            outs.append(hh)
        return jnp.stack(outs, axis=1)

    s1 = run_lstm(g, p["wih1"], p["whh1"], p["bih1"], p["bhh1"])
    s2 = run_lstm(s1, p["wih2"], p["whh2"], p["bih2"], p["bhh2"])
    return s2[:, -1] @ p["wfc"].T + p["bfc"]


# ----------------------------------------------------------------------------
# Self-test
# ----------------------------------------------------------------------------
if __name__ == "__main__":
    # x is (batch, seq, nodes, in_channels) — small shapes consistent w/ module
    B, T, N, Cin = 4, 8, 8, 4
    Hg, Hl, ncls = 16, 32, 8          # hidden_gcn, lstm_hidden_size, num_classes

    key = jax.random.PRNGKey(0)
    kx, kp, ka = jax.random.split(key, 3)
    x = jax.random.normal(kx, (B, T, N, Cin), jnp.float32)

    # 1) Module-faithful check: A = identity (torch.eye), as in the PyTorch spec.
    params = init_params(kp, N, Cin, Hg, Hl, ncls)
    prep = prepare_params(params, N, Cin)
    out = jax.block_until_ready(stgcn_lstm_forward(x, prep))
    ref = reference_forward(x, params)
    assert out.shape == (B, ncls), out.shape
    if not jnp.allclose(out, ref, atol=1e-4, rtol=1e-4):
        raise AssertionError(f"kernel/ref mismatch (A=eye):\n{out}\nvs\n{ref}")

    # 2) Extra check with a random dense A — exercises the A/conv/Wih1 fusion
    #    algebra beyond the trivial identity adjacency.
    params_rnd = dict(params, A=0.3 * jax.random.normal(ka, (N, N), jnp.float32))
    prep_rnd = prepare_params(params_rnd, N, Cin)
    out_rnd = jax.block_until_ready(stgcn_lstm_forward(x, prep_rnd))
    ref_rnd = reference_forward(x, params_rnd)
    if not jnp.allclose(out_rnd, ref_rnd, atol=1e-4, rtol=1e-4):
        raise AssertionError(
            f"kernel/ref mismatch (random A):\n{out_rnd}\nvs\n{ref_rnd}")

    print("KERNEL_OK")
</pallas_src>

<mosaic_0001>
module attributes {stable_mosaic.version = 11 : i64} {
  func.func @stgcn_lstm_kernel(%arg0: i32, %arg1: memref<1x64x32xf32, #tpu.memory_space<vmem>>, %arg2: memref<32x512xf32, #tpu.memory_space<vmem>>, %arg3: memref<1x512xf32, #tpu.memory_space<vmem>>, %arg4: memref<128x512xf32, #tpu.memory_space<vmem>>, %arg5: memref<128x512xf32, #tpu.memory_space<vmem>>, %arg6: memref<128x512xf32, #tpu.memory_space<vmem>>, %arg7: memref<1x512xf32, #tpu.memory_space<vmem>>, %arg8: memref<128x128xf32, #tpu.memory_space<vmem>>, %arg9: memref<1x128xf32, #tpu.memory_space<vmem>>, %arg10: memref<1x8x128xf32, #tpu.memory_space<vmem>>) attributes {dimension_semantics = [#tpu.dimension_semantics<parallel>], iteration_bounds = array<i64: 1>, scalar_prefetch = 0 : i64, scratch_operands = 0 : i64, tpu.core_type = #tpu.core_type<tc>, window_params = [{transform_indices = @transform_0, window_bounds = array<i64: 1, 64, 32>}, {pipeline_mode = #tpu.pipeline_mode<synchronous>, transform_indices = @transform_1, window_bounds = array<i64: 32, 512>}, {pipeline_mode = #tpu.pipeline_mode<synchronous>, transform_indices = @transform_2, window_bounds = array<i64: 1, 512>}, {pipeline_mode = #tpu.pipeline_mode<synchronous>, transform_indices = @transform_3, window_bounds = array<i64: 128, 512>}, {pipeline_mode = #tpu.pipeline_mode<synchronous>, transform_indices = @transform_4, window_bounds = array<i64: 128, 512>}, {pipeline_mode = #tpu.pipeline_mode<synchronous>, transform_indices = @transform_5, window_bounds = array<i64: 128, 512>}, {pipeline_mode = #tpu.pipeline_mode<synchronous>, transform_indices = @transform_6, window_bounds = array<i64: 1, 512>}, {pipeline_mode = #tpu.pipeline_mode<synchronous>, transform_indices = @transform_7, window_bounds = array<i64: 128, 128>}, {pipeline_mode = #tpu.pipeline_mode<synchronous>, transform_indices = @transform_8, window_bounds = array<i64: 1, 128>}, {transform_indices = @transform_9, window_bounds = array<i64: 1, 8, 128>}]} {
    %c0 = arith.constant 0 : index
    %c0_0 = arith.constant 0 : index
    %c0_1 = arith.constant 0 : index
    %0 = vector.load %arg1[%c0, %c0_0, %c0_1] : memref<1x64x32xf32, #tpu.memory_space<vmem>>, vector<1x64x32xf32>
    %1 = vector.shape_cast %0 : vector<1x64x32xf32> to vector<64x32xf32>
    %c0_2 = arith.constant 0 : index
    %c0_3 = arith.constant 0 : index
    %2 = vector.load %arg2[%c0_2, %c0_3] : memref<32x512xf32, #tpu.memory_space<vmem>>, vector<32x512xf32>
    %cst = arith.constant dense<0.000000e+00> : vector<64x512xf32>
    %3 = tpu.matmul %1, %2, %cst {dimension_numbers = #tpu.dot_dimension_numbers<[1], [0], [0], [1], [0, 0, 1, 1], [], []>} : vector<64x32xf32>, vector<32x512xf32>, vector<64x512xf32> -> vector<64x512xf32>
    %c0_4 = arith.constant 0 : index
    %c0_5 = arith.constant 0 : index
    %4 = vector.load %arg3[%c0_4, %c0_5] : memref<1x512xf32, #tpu.memory_space<vmem>>, vector<1x512xf32>
    %5 = vector.broadcast %4 : vector<1x512xf32> to vector<64x512xf32>
    %6 = arith.addf %3, %5 : vector<64x512xf32>
    %c0_6 = arith.constant 0 : index
    %c0_7 = arith.constant 0 : index
    %7 = vector.load %arg4[%c0_6, %c0_7] : memref<128x512xf32, #tpu.memory_space<vmem>>, vector<128x512xf32>
    %c0_8 = arith.constant 0 : index
    %c0_9 = arith.constant 0 : index
    %8 = vector.load %arg5[%c0_8, %c0_9] : memref<128x512xf32, #tpu.memory_space<vmem>>, vector<128x512xf32>
    %c0_10 = arith.constant 0 : index
    %c0_11 = arith.constant 0 : index
    %9 = vector.load %arg6[%c0_10, %c0_11] : memref<128x512xf32, #tpu.memory_space<vmem>>, vector<128x512xf32>
    %c0_12 = arith.constant 0 : index
    %c0_13 = arith.constant 0 : index
    %10 = vector.load %arg7[%c0_12, %c0_13] : memref<1x512xf32, #tpu.memory_space<vmem>>, vector<1x512xf32>
    %11 = vector.shape_cast %10 : vector<1x512xf32> to vector<1x512xf32>
    %12 = vector.broadcast %11 : vector<1x512xf32> to vector<8x512xf32>
    %cst_14 = arith.constant 0.000000e+00 : f32
    %13 = vector.broadcast %cst_14 : f32 to vector<8x128xf32>
    %cst_15 = arith.constant 0.000000e+00 : f32
    %14 = vector.broadcast %cst_15 : f32 to vector<8x128xf32>
    %cst_16 = arith.constant 0.000000e+00 : f32
    %15 = vector.broadcast %cst_16 : f32 to vector<8x128xf32>
    %16 = vector.extract_strided_slice %6 {offsets = [0, 0], sizes = [8, 512], strides = [1, 1]} : vector<64x512xf32> to vector<8x512xf32>
    %17 = vector.extract_strided_slice %16 {offsets = [0, 0], sizes = [8, 128], strides = [1, 1]} : vector<8x512xf32> to vector<8x128xf32>
    %18 = arith.negf %17 : vector<8x128xf32>
    %19 = math.exp %18 : vector<8x128xf32>
    %cst_17 = arith.constant 1.000000e+00 : f32
    %20 = vector.broadcast %cst_17 : f32 to vector<8x128xf32>
    %21 = arith.addf %20, %19 : vector<8x128xf32>
    %22 = arith.divf %20, %21 : vector<8x128xf32>
    %23 = vector.extract_strided_slice %16 {offsets = [0, 128], sizes = [8, 128], strides = [1, 1]} : vector<8x512xf32> to vector<8x128xf32>
    %24 = arith.negf %23 : vector<8x128xf32>
    %25 = math.exp %24 : vector<8x128xf32>
    %cst_18 = arith.constant 1.000000e+00 : f32
    %26 = vector.broadcast %cst_18 : f32 to vector<8x128xf32>
    %27 = arith.addf %26, %25 : vector<8x128xf32>
    %28 = arith.divf %26, %27 : vector<8x128xf32>
    %29 = vector.extract_strided_slice %16 {offsets = [0, 256], sizes = [8, 128], strides = [1, 1]} : vector<8x512xf32> to vector<8x128xf32>
    %30 = math.tanh %29 : vector<8x128xf32>
    %31 = vector.extract_strided_slice %16 {offsets = [0, 384], sizes = [8, 128], strides = [1, 1]} : vector<8x512xf32> to vector<8x128xf32>
    %32 = arith.negf %31 : vector<8x128xf32>
    %33 = math.exp %32 : vector<8x128xf32>
    %cst_19 = arith.constant 1.000000e+00 : f32
    %34 = vector.broadcast %cst_19 : f32 to vector<8x128xf32>
    %35 = arith.addf %34, %33 : vector<8x128xf32>
    %36 = arith.divf %34, %35 : vector<8x128xf32>
    %37 = arith.mulf %28, %13 : vector<8x128xf32>
    %38 = arith.mulf %22, %30 : vector<8x128xf32>
    %39 = arith.addf %37, %38 : vector<8x128xf32>
    %40 = math.tanh %39 : vector<8x128xf32>
    %41 = arith.mulf %36, %40 : vector<8x128xf32>
    %42 = vector.extract_strided_slice %6 {offsets = [8, 0], sizes = [8, 512], strides = [1, 1]} : vector<64x512xf32> to vector<8x512xf32>
    %cst_20 = arith.constant dense<0.000000e+00> : vector<8x512xf32>
    %43 = tpu.matmul %41, %7, %cst_20 {dimension_numbers = #tpu.dot_dimension_numbers<[1], [0], [0], [1], [0, 0, 1, 1], [], []>} : vector<8x128xf32>, vector<128x512xf32>, vector<8x512xf32> -> vector<8x512xf32>
    %44 = arith.addf %42, %43 : vector<8x512xf32>
    %cst_21 = arith.constant dense<0.000000e+00> : vector<8x512xf32>
    %45 = tpu.matmul %41, %8, %cst_21 {dimension_numbers = #tpu.dot_dimension_numbers<[1], [0], [0], [1], [0, 0, 1, 1], [], []>} : vector<8x128xf32>, vector<128x512xf32>, vector<8x512xf32> -> vector<8x512xf32>
    %cst_22 = arith.constant dense<0.000000e+00> : vector<8x512xf32>
    %46 = tpu.matmul %14, %9, %cst_22 {dimension_numbers = #tpu.dot_dimension_numbers<[1], [0], [0], [1], [0, 0, 1, 1], [], []>} : vector<8x128xf32>, vector<128x512xf32>, vector<8x512xf32> -> vector<8x512xf32>
    %47 = arith.addf %45, %46 : vector<8x512xf32>
    %48 = arith.addf %47, %12 : vector<8x512xf32>
    %49 = vector.extract_strided_slice %48 {offsets = [0, 0], sizes = [8, 128], strides = [1, 1]} : vector<8x512xf32> to vector<8x128xf32>
    %50 = arith.negf %49 : vector<8x128xf32>
    %51 = math.exp %50 : vector<8x128xf32>
    %cst_23 = arith.constant 1.000000e+00 : f32
    %52 = vector.broadcast %cst_23 : f32 to vector<8x128xf32>
    %53 = arith.addf %52, %51 : vector<8x128xf32>
    %54 = arith.divf %52, %53 : vector<8x128xf32>
    %55 = vector.extract_strided_slice %48 {offsets = [0, 128], sizes = [8, 128], strides = [1, 1]} : vector<8x512xf32> to vector<8x128xf32>
    %56 = arith.negf %55 : vector<8x128xf32>
    %57 = math.exp %56 : vector<8x128xf32>
    %cst_24 = arith.constant 1.000000e+00 : f32
    %58 = vector.broadcast %cst_24 : f32 to vector<8x128xf32>
    %59 = arith.addf %58, %57 : vector<8x128xf32>
    %60 = arith.divf %58, %59 : vector<8x128xf32>
    %61 = vector.extract_strided_slice %48 {offsets = [0, 256], sizes = [8, 128], strides = [1, 1]} : vector<8x512xf32> to vector<8x128xf32>
    %62 = math.tanh %61 : vector<8x128xf32>
    %63 = vector.extract_strided_slice %48 {offsets = [0, 384], sizes = [8, 128], strides = [1, 1]} : vector<8x512xf32> to vector<8x128xf32>
    %64 = arith.negf %63 : vector<8x128xf32>
    %65 = math.exp %64 : vector<8x128xf32>
    %cst_25 = arith.constant 1.000000e+00 : f32
    %66 = vector.broadcast %cst_25 : f32 to vector<8x128xf32>
    %67 = arith.addf %66, %65 : vector<8x128xf32>
    %68 = arith.divf %66, %67 : vector<8x128xf32>
    %69 = arith.mulf %60, %15 : vector<8x128xf32>
    %70 = arith.mulf %54, %62 : vector<8x128xf32>
    %71 = arith.addf %69, %70 : vector<8x128xf32>
    %72 = math.tanh %71 : vector<8x128xf32>
    %73 = arith.mulf %68, %72 : vector<8x128xf32>
    %74 = vector.extract_strided_slice %44 {offsets = [0, 0], sizes = [8, 128], strides = [1, 1]} : vector<8x512xf32> to vector<8x128xf32>
    %75 = arith.negf %74 : vector<8x128xf32>
    %76 = math.exp %75 : vector<8x128xf32>
    %cst_26 = arith.constant 1.000000e+00 : f32
    %77 = vector.broadcast %cst_26 : f32 to vector<8x128xf32>
    %78 = arith.addf %77, %76 : vector<8x128xf32>
    %79 = arith.divf %77, %78 : vector<8x128xf32>
    %80 = vector.extract_strided_slice %44 {offsets = [0, 128], sizes = [8, 128], strides = [1, 1]} : vector<8x512xf32> to vector<8x128xf32>
    %81 = arith.negf %80 : vector<8x128xf32>
    %82 = math.exp %81 : vector<8x128xf32>
    %cst_27 = arith.constant 1.000000e+00 : f32
    %83 = vector.broadcast %cst_27 : f32 to vector<8x128xf32>
    %84 = arith.addf %83, %82 : vector<8x128xf32>
    %85 = arith.divf %83, %84 : vector<8x128xf32>
    %86 = vector.extract_strided_slice %44 {offsets = [0, 256], sizes = [8, 128], strides = [1, 1]} : vector<8x512xf32> to vector<8x128xf32>
    %87 = math.tanh %86 : vector<8x128xf32>
    %88 = vector.extract_strided_slice %44 {offsets = [0, 384], sizes = [8, 128], strides = [1, 1]} : vector<8x512xf32> to vector<8x128xf32>
    %89 = arith.negf %88 : vector<8x128xf32>
    %90 = math.exp %89 : vector<8x128xf32>
    %cst_28 = arith.constant 1.000000e+00 : f32
    %91 = vector.broadcast %cst_28 : f32 to vector<8x128xf32>
    %92 = arith.addf %91, %90 : vector<8x128xf32>
    %93 = arith.divf %91, %92 : vector<8x128xf32>
    %94 = arith.mulf %85, %39 : vector<8x128xf32>
    %95 = arith.mulf %79, %87 : vector<8x128xf32>
    %96 = arith.addf %94, %95 : vector<8x128xf32>
    %97 = math.tanh %96 : vector<8x128xf32>
    %98 = arith.mulf %93, %97 : vector<8x128xf32>
    %99 = vector.extract_strided_slice %6 {offsets = [16, 0], sizes = [8, 512], strides = [1, 1]} : vector<64x512xf32> to vector<8x512xf32>
    %cst_29 = arith.constant dense<0.000000e+00> : vector<8x512xf32>
    %100 = tpu.matmul %98, %7, %cst_29 {dimension_numbers = #tpu.dot_dimension_numbers<[1], [0], [0], [1], [0, 0, 1, 1], [], []>} : vector<8x128xf32>, vector<128x512xf32>, vector<8x512xf32> -> vector<8x512xf32>
    %101 = arith.addf %99, %100 : vector<8x512xf32>
    %cst_30 = arith.constant dense<0.000000e+00> : vector<8x512xf32>
    %102 = tpu.matmul %98, %8, %cst_30 {dimension_numbers = #tpu.dot_dimension_numbers<[1], [0], [0], [1], [0, 0, 1, 1], [], []>} : vector<8x128xf32>, vector<128x512xf32>, vector<8x512xf32> -> vector<8x512xf32>
    %cst_31 = arith.constant dense<0.000000e+00> : vector<8x512xf32>
    %103 = tpu.matmul %73, %9, %cst_31 {dimension_numbers = #tpu.dot_dimension_numbers<[1], [0], [0], [1], [0, 0, 1, 1], [], []>} : vector<8x128xf32>, vector<128x512xf32>, vector<8x512xf32> -> vector<8x512xf32>
    %104 = arith.addf %102, %103 : vector<8x512xf32>
    %105 = arith.addf %104, %12 : vector<8x512xf32>
    %106 = vector.extract_strided_slice %105 {offsets = [0, 0], sizes = [8, 128], strides = [1, 1]} : vector<8x512xf32> to vector<8x128xf32>
    %107 = arith.negf %106 : vector<8x128xf32>
    %108 = math.exp %107 : vector<8x128xf32>
    %cst_32 = arith.constant 1.000000e+00 : f32
    %109 = vector.broadcast %cst_32 : f32 to vector<8x128xf32>
    %110 = arith.addf %109, %108 : vector<8x128xf32>
    %111 = arith.divf %109, %110 : vector<8x128xf32>
    %112 = vector.extract_strided_slice %105 {offsets = [0, 128], sizes = [8, 128], strides = [1, 1]} : vector<8x512xf32> to vector<8x128xf32>
    %113 = arith.negf %112 : vector<8x128xf32>
    %114 = math.exp %113 : vector<8x128xf32>
    %cst_33 = arith.constant 1.000000e+00 : f32
    %115 = vector.broadcast %cst_33 : f32 to vector<8x128xf32>
    %116 = arith.addf %115, %114 : vector<8x128xf32>
    %117 = arith.divf %115, %116 : vector<8x128xf32>
    %118 = vector.extract_strided_slice %105 {offsets = [0, 256], sizes = [8, 128], strides = [1, 1]} : vector<8x512xf32> to vector<8x128xf32>
    %119 = math.tanh %118 : vector<8x128xf32>
    %120 = vector.extract_strided_slice %105 {offsets = [0, 384], sizes = [8, 128], strides = [1, 1]} : vector<8x512xf32> to vector<8x128xf32>
    %121 = arith.negf %120 : vector<8x128xf32>
    %122 = math.exp %121 : vector<8x128xf32>
    %cst_34 = arith.constant 1.000000e+00 : f32
    %123 = vector.broadcast %cst_34 : f32 to vector<8x128xf32>
    %124 = arith.addf %123, %122 : vector<8x128xf32>
    %125 = arith.divf %123, %124 : vector<8x128xf32>
    %126 = arith.mulf %117, %71 : vector<8x128xf32>
    %127 = arith.mulf %111, %119 : vector<8x128xf32>
    %128 = arith.addf %126, %127 : vector<8x128xf32>
    %129 = math.tanh %128 : vector<8x128xf32>
    %130 = arith.mulf %125, %129 : vector<8x128xf32>
    %131 = vector.extract_strided_slice %101 {offsets = [0, 0], sizes = [8, 128], strides = [1, 1]} : vector<8x512xf32> to vector<8x128xf32>
    %132 = arith.negf %131 : vector<8x128xf32>
    %133 = math.exp %132 : vector<8x128xf32>
    %cst_35 = arith.constant 1.000000e+00 : f32
    %134 = vector.broadcast %cst_35 : f32 to vector<8x128xf32>
    %135 = arith.addf %134, %133 : vector<8x128xf32>
    %136 = arith.divf %134, %135 : vector<8x128xf32>
    %137 = vector.extract_strided_slice %101 {offsets = [0, 128], sizes = [8, 128], strides = [1, 1]} : vector<8x512xf32> to vector<8x128xf32>
    %138 = arith.negf %137 : vector<8x128xf32>
    %139 = math.exp %138 : vector<8x128xf32>
    %cst_36 = arith.constant 1.000000e+00 : f32
    %140 = vector.broadcast %cst_36 : f32 to vector<8x128xf32>
    %141 = arith.addf %140, %139 : vector<8x128xf32>
    %142 = arith.divf %140, %141 : vector<8x128xf32>
    %143 = vector.extract_strided_slice %101 {offsets = [0, 256], sizes = [8, 128], strides = [1, 1]} : vector<8x512xf32> to vector<8x128xf32>
    %144 = math.tanh %143 : vector<8x128xf32>
    %145 = vector.extract_strided_slice %101 {offsets = [0, 384], sizes = [8, 128], strides = [1, 1]} : vector<8x512xf32> to vector<8x128xf32>
    %146 = arith.negf %145 : vector<8x128xf32>
    %147 = math.exp %146 : vector<8x128xf32>
    %cst_37 = arith.constant 1.000000e+00 : f32
    %148 = vector.broadcast %cst_37 : f32 to vector<8x128xf32>
    %149 = arith.addf %148, %147 : vector<8x128xf32>
    %150 = arith.divf %148, %149 : vector<8x128xf32>
    %151 = arith.mulf %142, %96 : vector<8x128xf32>
    %152 = arith.mulf %136, %144 : vector<8x128xf32>
    %153 = arith.addf %151, %152 : vector<8x128xf32>
    %154 = math.tanh %153 : vector<8x128xf32>
    %155 = arith.mulf %150, %154 : vector<8x128xf32>
    %156 = vector.extract_strided_slice %6 {offsets = [24, 0], sizes = [8, 512], strides = [1, 1]} : vector<64x512xf32> to vector<8x512xf32>
    %cst_38 = arith.constant dense<0.000000e+00> : vector<8x512xf32>
    %157 = tpu.matmul %155, %7, %cst_38 {dimension_numbers = #tpu.dot_dimension_numbers<[1], [0], [0], [1], [0, 0, 1, 1], [], []>} : vector<8x128xf32>, vector<128x512xf32>, vector<8x512xf32> -> vector<8x512xf32>
    %158 = arith.addf %156, %157 : vector<8x512xf32>
    %cst_39 = arith.constant dense<0.000000e+00> : vector<8x512xf32>
    %159 = tpu.matmul %155, %8, %cst_39 {dimension_numbers = #tpu.dot_dimension_numbers<[1], [0], [0], [1], [0, 0, 1, 1], [], []>} : vector<8x128xf32>, vector<128x512xf32>, vector<8x512xf32> -> vector<8x512xf32>
    %cst_40 = arith.constant dense<0.000000e+00> : vector<8x512xf32>
    %160 = tpu.matmul %130, %9, %cst_40 {dimension_numbers = #tpu.dot_dimension_numbers<[1], [0], [0], [1], [0, 0, 1, 1], [], []>} : vector<8x128xf32>, vector<128x512xf32>, vector<8x512xf32> -> vector<8x512xf32>
    %161 = arith.addf %159, %160 : vector<8x512xf32>
    %162 = arith.addf %161, %12 : vector<8x512xf32>
    %163 = vector.extract_strided_slice %162 {offsets = [0, 0], sizes = [8, 128], strides = [1, 1]} : vector<8x512xf32> to vector<8x128xf32>
    %164 = arith.negf %163 : vector<8x128xf32>
    %165 = math.exp %164 : vector<8x128xf32>
    %cst_41 = arith.constant 1.000000e+00 : f32
    %166 = vector.broadcast %cst_41 : f32 to vector<8x128xf32>
    %167 = arith.addf %166, %165 : vector<8x128xf32>
    %168 = arith.divf %166, %167 : vector<8x128xf32>
    %169 = vector.extract_strided_slice %162 {offsets = [0, 128], sizes = [8, 128], strides = [1, 1]} : vector<8x512xf32> to vector<8x128xf32>
    %170 = arith.negf %169 : vector<8x128xf32>
    %171 = math.exp %170 : vector<8x128xf32>
    %cst_42 = arith.constant 1.000000e+00 : f32
    %172 = vector.broadcast %cst_42 : f32 to vector<8x128xf32>
    %173 = arith.addf %172, %171 : vector<8x128xf32>
    %174 = arith.divf %172, %173 : vector<8x128xf32>
    %175 = vector.extract_strided_slice %162 {offsets = [0, 256], sizes = [8, 128], strides = [1, 1]} : vector<8x512xf32> to vector<8x128xf32>
    %176 = math.tanh %175 : vector<8x128xf32>
    %177 = vector.extract_strided_slice %162 {offsets = [0, 384], sizes = [8, 128], strides = [1, 1]} : vector<8x512xf32> to vector<8x128xf32>
    %178 = arith.negf %177 : vector<8x128xf32>
    %179 = math.exp %178 : vector<8x128xf32>
    %cst_43 = arith.constant 1.000000e+00 : f32
    %180 = vector.broadcast %cst_43 : f32 to vector<8x128xf32>
    %181 = arith.addf %180, %179 : vector<8x128xf32>
    %182 = arith.divf %180, %181 : vector<8x128xf32>
    %183 = arith.mulf %174, %128 : vector<8x128xf32>
    %184 = arith.mulf %168, %176 : vector<8x128xf32>
    %185 = arith.addf %183, %184 : vector<8x128xf32>
    %186 = math.tanh %185 : vector<8x128xf32>
    %187 = arith.mulf %182, %186 : vector<8x128xf32>
    %188 = vector.extract_strided_slice %158 {offsets = [0, 0], sizes = [8, 128], strides = [1, 1]} : vector<8x512xf32> to vector<8x128xf32>
    %189 = arith.negf %188 : vector<8x128xf32>
    %190 = math.exp %189 : vector<8x128xf32>
    %cst_44 = arith.constant 1.000000e+00 : f32
    %191 = vector.broadcast %cst_44 : f32 to vector<8x128xf32>
    %192 = arith.addf %191, %190 : vector<8x128xf32>
    %193 = arith.divf %191, %192 : vector<8x128xf32>
    %194 = vector.extract_strided_slice %158 {offsets = [0, 128], sizes = [8, 128], strides = [1, 1]} : vector<8x512xf32> to vector<8x128xf32>
    %195 = arith.negf %194 : vector<8x128xf32>
    %196 = math.exp %195 : vector<8x128xf32>
    %cst_45 = arith.constant 1.000000e+00 : f32
    %197 = vector.broadcast %cst_45 : f32 to vector<8x128xf32>
    %198 = arith.addf %197, %196 : vector<8x128xf32>
    %199 = arith.divf %197, %198 : vector<8x128xf32>
    %200 = vector.extract_strided_slice %158 {offsets = [0, 256], sizes = [8, 128], strides = [1, 1]} : vector<8x512xf32> to vector<8x128xf32>
    %201 = math.tanh %200 : vector<8x128xf32>
    %202 = vector.extract_strided_slice %158 {offsets = [0, 384], sizes = [8, 128], strides = [1, 1]} : vector<8x512xf32> to vector<8x128xf32>
    %203 = arith.negf %202 : vector<8x128xf32>
    %204 = math.exp %203 : vector<8x128xf32>
    %cst_46 = arith.constant 1.000000e+00 : f32
    %205 = vector.broadcast %cst_46 : f32 to vector<8x128xf32>
    %206 = arith.addf %205, %204 : vector<8x128xf32>
    %207 = arith.divf %205, %206 : vector<8x128xf32>
    %208 = arith.mulf %199, %153 : vector<8x128xf32>
    %209 = arith.mulf %193, %201 : vector<8x128xf32>
    %210 = arith.addf %208, %209 : vector<8x128xf32>
    %211 = math.tanh %210 : vector<8x128xf32>
    %212 = arith.mulf %207, %211 : vector<8x128xf32>
    %213 = vector.extract_strided_slice %6 {offsets = [32, 0], sizes = [8, 512], strides = [1, 1]} : vector<64x512xf32> to vector<8x512xf32>
    %cst_47 = arith.constant dense<0.000000e+00> : vector<8x512xf32>
    %214 = tpu.matmul %212, %7, %cst_47 {dimension_numbers = #tpu.dot_dimension_numbers<[1], [0], [0], [1], [0, 0, 1, 1], [], []>} : vector<8x128xf32>, vector<128x512xf32>, vector<8x512xf32> -> vector<8x512xf32>
    %215 = arith.addf %213, %214 : vector<8x512xf32>
    %cst_48 = arith.constant dense<0.000000e+00> : vector<8x512xf32>
    %216 = tpu.matmul %212, %8, %cst_48 {dimension_numbers = #tpu.dot_dimension_numbers<[1], [0], [0], [1], [0, 0, 1, 1], [], []>} : vector<8x128xf32>, vector<128x512xf32>, vector<8x512xf32> -> vector<8x512xf32>
    %cst_49 = arith.constant dense<0.000000e+00> : vector<8x512xf32>
    %217 = tpu.matmul %187, %9, %cst_49 {dimension_numbers = #tpu.dot_dimension_numbers<[1], [0], [0], [1], [0, 0, 1, 1], [], []>} : vector<8x128xf32>, vector<128x512xf32>, vector<8x512xf32> -> vector<8x512xf32>
    %218 = arith.addf %216, %217 : vector<8x512xf32>
    %219 = arith.addf %218, %12 : vector<8x512xf32>
    %220 = vector.extract_strided_slice %219 {offsets = [0, 0], sizes = [8, 128], strides = [1, 1]} : vector<8x512xf32> to vector<8x128xf32>
    %221 = arith.negf %220 : vector<8x128xf32>
    %222 = math.exp %221 : vector<8x128xf32>
    %cst_50 = arith.constant 1.000000e+00 : f32
    %223 = vector.broadcast %cst_50 : f32 to vector<8x128xf32>
    %224 = arith.addf %223, %222 : vector<8x128xf32>
    %225 = arith.divf %223, %224 : vector<8x128xf32>
    %226 = vector.extract_strided_slice %219 {offsets = [0, 128], sizes = [8, 128], strides = [1, 1]} : vector<8x512xf32> to vector<8x128xf32>
    %227 = arith.negf %226 : vector<8x128xf32>
    %228 = math.exp %227 : vector<8x128xf32>
    %cst_51 = arith.constant 1.000000e+00 : f32
    %229 = vector.broadcast %cst_51 : f32 to vector<8x128xf32>
    %230 = arith.addf %229, %228 : vector<8x128xf32>
    %231 = arith.divf %229, %230 : vector<8x128xf32>
    %232 = vector.extract_strided_slice %219 {offsets = [0, 256], sizes = [8, 128], strides = [1, 1]} : vector<8x512xf32> to vector<8x128xf32>
    %233 = math.tanh %232 : vector<8x128xf32>
    %234 = vector.extract_strided_slice %219 {offsets = [0, 384], sizes = [8, 128], strides = [1, 1]} : vector<8x512xf32> to vector<8x128xf32>
    %235 = arith.negf %234 : vector<8x128xf32>
    %236 = math.exp %235 : vector<8x128xf32>
    %cst_52 = arith.constant 1.000000e+00 : f32
    %237 = vector.broadcast %cst_52 : f32 to vector<8x128xf32>
    %238 = arith.addf %237, %236 : vector<8x128xf32>
    %239 = arith.divf %237, %238 : vector<8x128xf32>
    %240 = arith.mulf %231, %185 : vector<8x128xf32>
    %241 = arith.mulf %225, %233 : vector<8x128xf32>
    %242 = arith.addf %240, %241 : vector<8x128xf32>
    %243 = math.tanh %242 : vector<8x128xf32>
    %244 = arith.mulf %239, %243 : vector<8x128xf32>
    %245 = vector.extract_strided_slice %215 {offsets = [0, 0], sizes = [8, 128], strides = [1, 1]} : vector<8x512xf32> to vector<8x128xf32>
    %246 = arith.negf %245 : vector<8x128xf32>
    %247 = math.exp %246 : vector<8x128xf32>
    %cst_53 = arith.constant 1.000000e+00 : f32
    %248 = vector.broadcast %cst_53 : f32 to vector<8x128xf32>
    %249 = arith.addf %248, %247 : vector<8x128xf32>
    %250 = arith.divf %248, %249 : vector<8x128xf32>
    %251 = vector.extract_strided_slice %215 {offsets = [0, 128], sizes = [8, 128], strides = [1, 1]} : vector<8x512xf32> to vector<8x128xf32>
    %252 = arith.negf %251 : vector<8x128xf32>
    %253 = math.exp %252 : vector<8x128xf32>
    %cst_54 = arith.constant 1.000000e+00 : f32
    %254 = vector.broadcast %cst_54 : f32 to vector<8x128xf32>
    %255 = arith.addf %254, %253 : vector<8x128xf32>
    %256 = arith.divf %254, %255 : vector<8x128xf32>
    %257 = vector.extract_strided_slice %215 {offsets = [0, 256], sizes = [8, 128], strides = [1, 1]} : vector<8x512xf32> to vector<8x128xf32>
    %258 = math.tanh %257 : vector<8x128xf32>
    %259 = vector.extract_strided_slice %215 {offsets = [0, 384], sizes = [8, 128], strides = [1, 1]} : vector<8x512xf32> to vector<8x128xf32>
    %260 = arith.negf %259 : vector<8x128xf32>
    %261 = math.exp %260 : vector<8x128xf32>
    %cst_55 = arith.constant 1.000000e+00 : f32
    %262 = vector.broadcast %cst_55 : f32 to vector<8x128xf32>
    %263 = arith.addf %262, %261 : vector<8x128xf32>
    %264 = arith.divf %262, %263 : vector<8x128xf32>
    %265 = arith.mulf %256, %210 : vector<8x128xf32>
    %266 = arith.mulf %250, %258 : vector<8x128xf32>
    %267 = arith.addf %265, %266 : vector<8x128xf32>
    %268 = math.tanh %267 : vector<8x128xf32>
    %269 = arith.mulf %264, %268 : vector<8x128xf32>
    %270 = vector.extract_strided_slice %6 {offsets = [40, 0], sizes = [8, 512], strides = [1, 1]} : vector<64x512xf32> to vector<8x512xf32>
    %cst_56 = arith.constant dense<0.000000e+00> : vector<8x512xf32>
    %271 = tpu.matmul %269, %7, %cst_56 {dimension_numbers = #tpu.dot_dimension_numbers<[1], [0], [0], [1], [0, 0, 1, 1], [], []>} : vector<8x128xf32>, vector<128x512xf32>, vector<8x512xf32> -> vector<8x512xf32>
    %272 = arith.addf %270, %271 : vector<8x512xf32>
    %cst_57 = arith.constant dense<0.000000e+00> : vector<8x512xf32>
    %273 = tpu.matmul %269, %8, %cst_57 {dimension_numbers = #tpu.dot_dimension_numbers<[1], [0], [0], [1], [0, 0, 1, 1], [], []>} : vector<8x128xf32>, vector<128x512xf32>, vector<8x512xf32> -> vector<8x512xf32>
    %cst_58 = arith.constant dense<0.000000e+00> : vector<8x512xf32>
    %274 = tpu.matmul %244, %9, %cst_58 {dimension_numbers = #tpu.dot_dimension_numbers<[1], [0], [0], [1], [0, 0, 1, 1], [], []>} : vector<8x128xf32>, vector<128x512xf32>, vector<8x512xf32> -> vector<8x512xf32>
    %275 = arith.addf %273, %274 : vector<8x512xf32>
    %276 = arith.addf %275, %12 : vector<8x512xf32>
    %277 = vector.extract_strided_slice %276 {offsets = [0, 0], sizes = [8, 128], strides = [1, 1]} : vector<8x512xf32> to vector<8x128xf32>
    %278 = arith.negf %277 : vector<8x128xf32>
    %279 = math.exp %278 : vector<8x128xf32>
    %cst_59 = arith.constant 1.000000e+00 : f32
    %280 = vector.broadcast %cst_59 : f32 to vector<8x128xf32>
    %281 = arith.addf %280, %279 : vector<8x128xf32>
    %282 = arith.divf %280, %281 : vector<8x128xf32>
    %283 = vector.extract_strided_slice %276 {offsets = [0, 128], sizes = [8, 128], strides = [1, 1]} : vector<8x512xf32> to vector<8x128xf32>
    %284 = arith.negf %283 : vector<8x128xf32>
    %285 = math.exp %284 : vector<8x128xf32>
    %cst_60 = arith.constant 1.000000e+00 : f32
    %286 = vector.broadcast %cst_60 : f32 to vector<8x128xf32>
    %287 = arith.addf %286, %285 : vector<8x128xf32>
    %288 = arith.divf %286, %287 : vector<8x128xf32>
    %289 = vector.extract_strided_slice %276 {offsets = [0, 256], sizes = [8, 128], strides = [1, 1]} : vector<8x512xf32> to vector<8x128xf32>
    %290 = math.tanh %289 : vector<8x128xf32>
    %291 = vector.extract_strided_slice %276 {offsets = [0, 384], sizes = [8, 128], strides = [1, 1]} : vector<8x512xf32> to vector<8x128xf32>
    %292 = arith.negf %291 : vector<8x128xf32>
    %293 = math.exp %292 : vector<8x128xf32>
    %cst_61 = arith.constant 1.000000e+00 : f32
    %294 = vector.broadcast %cst_61 : f32 to vector<8x128xf32>
    %295 = arith.addf %294, %293 : vector<8x128xf32>
    %296 = arith.divf %294, %295 : vector<8x128xf32>
    %297 = arith.mulf %288, %242 : vector<8x128xf32>
    %298 = arith.mulf %282, %290 : vector<8x128xf32>
    %299 = arith.addf %297, %298 : vector<8x128xf32>
    %300 = math.tanh %299 : vector<8x128xf32>
    %301 = arith.mulf %296, %300 : vector<8x128xf32>
    %302 = vector.extract_strided_slice %272 {offsets = [0, 0], sizes = [8, 128], strides = [1, 1]} : vector<8x512xf32> to vector<8x128xf32>
    %303 = arith.negf %302 : vector<8x128xf32>
    %304 = math.exp %303 : vector<8x128xf32>
    %cst_62 = arith.constant 1.000000e+00 : f32
    %305 = vector.broadcast %cst_62 : f32 to vector<8x128xf32>
    %306 = arith.addf %305, %304 : vector<8x128xf32>
    %307 = arith.divf %305, %306 : vector<8x128xf32>
    %308 = vector.extract_strided_slice %272 {offsets = [0, 128], sizes = [8, 128], strides = [1, 1]} : vector<8x512xf32> to vector<8x128xf32>
    %309 = arith.negf %308 : vector<8x128xf32>
    %310 = math.exp %309 : vector<8x128xf32>
    %cst_63 = arith.constant 1.000000e+00 : f32
    %311 = vector.broadcast %cst_63 : f32 to vector<8x128xf32>
    %312 = arith.addf %311, %310 : vector<8x128xf32>
    %313 = arith.divf %311, %312 : vector<8x128xf32>
    %314 = vector.extract_strided_slice %272 {offsets = [0, 256], sizes = [8, 128], strides = [1, 1]} : vector<8x512xf32> to vector<8x128xf32>
    %315 = math.tanh %314 : vector<8x128xf32>
    %316 = vector.extract_strided_slice %272 {offsets = [0, 384], sizes = [8, 128], strides = [1, 1]} : vector<8x512xf32> to vector<8x128xf32>
    %317 = arith.negf %316 : vector<8x128xf32>
    %318 = math.exp %317 : vector<8x128xf32>
    %cst_64 = arith.constant 1.000000e+00 : f32
    %319 = vector.broadcast %cst_64 : f32 to vector<8x128xf32>
    %320 = arith.addf %319, %318 : vector<8x128xf32>
    %321 = arith.divf %319, %320 : vector<8x128xf32>
    %322 = arith.mulf %313, %267 : vector<8x128xf32>
    %323 = arith.mulf %307, %315 : vector<8x128xf32>
    %324 = arith.addf %322, %323 : vector<8x128xf32>
    %325 = math.tanh %324 : vector<8x128xf32>
    %326 = arith.mulf %321, %325 : vector<8x128xf32>
    %327 = vector.extract_strided_slice %6 {offsets = [48, 0], sizes = [8, 512], strides = [1, 1]} : vector<64x512xf32> to vector<8x512xf32>
    %cst_65 = arith.constant dense<0.000000e+00> : vector<8x512xf32>
    %328 = tpu.matmul %326, %7, %cst_65 {dimension_numbers = #tpu.dot_dimension_numbers<[1], [0], [0], [1], [0, 0, 1, 1], [], []>} : vector<8x128xf32>, vector<128x512xf32>, vector<8x512xf32> -> vector<8x512xf32>
    %329 = arith.addf %327, %328 : vector<8x512xf32>
    %cst_66 = arith.constant dense<0.000000e+00> : vector<8x512xf32>
    %330 = tpu.matmul %326, %8, %cst_66 {dimension_numbers = #tpu.dot_dimension_numbers<[1], [0], [0], [1], [0, 0, 1, 1], [], []>} : vector<8x128xf32>, vector<128x512xf32>, vector<8x512xf32> -> vector<8x512xf32>
    %cst_67 = arith.constant dense<0.000000e+00> : vector<8x512xf32>
    %331 = tpu.matmul %301, %9, %cst_67 {dimension_numbers = #tpu.dot_dimension_numbers<[1], [0], [0], [1], [0, 0, 1, 1], [], []>} : vector<8x128xf32>, vector<128x512xf32>, vector<8x512xf32> -> vector<8x512xf32>
    %332 = arith.addf %330, %331 : vector<8x512xf32>
    %333 = arith.addf %332, %12 : vector<8x512xf32>
    %334 = vector.extract_strided_slice %333 {offsets = [0, 0], sizes = [8, 128], strides = [1, 1]} : vector<8x512xf32> to vector<8x128xf32>
    %335 = arith.negf %334 : vector<8x128xf32>
    %336 = math.exp %335 : vector<8x128xf32>
    %cst_68 = arith.constant 1.000000e+00 : f32
    %337 = vector.broadcast %cst_68 : f32 to vector<8x128xf32>
    %338 = arith.addf %337, %336 : vector<8x128xf32>
    %339 = arith.divf %337, %338 : vector<8x128xf32>
    %340 = vector.extract_strided_slice %333 {offsets = [0, 128], sizes = [8, 128], strides = [1, 1]} : vector<8x512xf32> to vector<8x128xf32>
    %341 = arith.negf %340 : vector<8x128xf32>
    %342 = math.exp %341 : vector<8x128xf32>
    %cst_69 = arith.constant 1.000000e+00 : f32
    %343 = vector.broadcast %cst_69 : f32 to vector<8x128xf32>
    %344 = arith.addf %343, %342 : vector<8x128xf32>
    %345 = arith.divf %343, %344 : vector<8x128xf32>
    %346 = vector.extract_strided_slice %333 {offsets = [0, 256], sizes = [8, 128], strides = [1, 1]} : vector<8x512xf32> to vector<8x128xf32>
    %347 = math.tanh %346 : vector<8x128xf32>
    %348 = vector.extract_strided_slice %333 {offsets = [0, 384], sizes = [8, 128], strides = [1, 1]} : vector<8x512xf32> to vector<8x128xf32>
    %349 = arith.negf %348 : vector<8x128xf32>
    %350 = math.exp %349 : vector<8x128xf32>
    %cst_70 = arith.constant 1.000000e+00 : f32
    %351 = vector.broadcast %cst_70 : f32 to vector<8x128xf32>
    %352 = arith.addf %351, %350 : vector<8x128xf32>
    %353 = arith.divf %351, %352 : vector<8x128xf32>
    %354 = arith.mulf %345, %299 : vector<8x128xf32>
    %355 = arith.mulf %339, %347 : vector<8x128xf32>
    %356 = arith.addf %354, %355 : vector<8x128xf32>
    %357 = math.tanh %356 : vector<8x128xf32>
    %358 = arith.mulf %353, %357 : vector<8x128xf32>
    %359 = vector.extract_strided_slice %329 {offsets = [0, 0], sizes = [8, 128], strides = [1, 1]} : vector<8x512xf32> to vector<8x128xf32>
    %360 = arith.negf %359 : vector<8x128xf32>
    %361 = math.exp %360 : vector<8x128xf32>
    %cst_71 = arith.constant 1.000000e+00 : f32
    %362 = vector.broadcast %cst_71 : f32 to vector<8x128xf32>
    %363 = arith.addf %362, %361 : vector<8x128xf32>
    %364 = arith.divf %362, %363 : vector<8x128xf32>
    %365 = vector.extract_strided_slice %329 {offsets = [0, 128], sizes = [8, 128], strides = [1, 1]} : vector<8x512xf32> to vector<8x128xf32>
    %366 = arith.negf %365 : vector<8x128xf32>
    %367 = math.exp %366 : vector<8x128xf32>
    %cst_72 = arith.constant 1.000000e+00 : f32
    %368 = vector.broadcast %cst_72 : f32 to vector<8x128xf32>
    %369 = arith.addf %368, %367 : vector<8x128xf32>
    %370 = arith.divf %368, %369 : vector<8x128xf32>
    %371 = vector.extract_strided_slice %329 {offsets = [0, 256], sizes = [8, 128], strides = [1, 1]} : vector<8x512xf32> to vector<8x128xf32>
    %372 = math.tanh %371 : vector<8x128xf32>
    %373 = vector.extract_strided_slice %329 {offsets = [0, 384], sizes = [8, 128], strides = [1, 1]} : vector<8x512xf32> to vector<8x128xf32>
    %374 = arith.negf %373 : vector<8x128xf32>
    %375 = math.exp %374 : vector<8x128xf32>
    %cst_73 = arith.constant 1.000000e+00 : f32
    %376 = vector.broadcast %cst_73 : f32 to vector<8x128xf32>
    %377 = arith.addf %376, %375 : vector<8x128xf32>
    %378 = arith.divf %376, %377 : vector<8x128xf32>
    %379 = arith.mulf %370, %324 : vector<8x128xf32>
    %380 = arith.mulf %364, %372 : vector<8x128xf32>
    %381 = arith.addf %379, %380 : vector<8x128xf32>
    %382 = math.tanh %381 : vector<8x128xf32>
    %383 = arith.mulf %378, %382 : vector<8x128xf32>
    %384 = vector.extract_strided_slice %6 {offsets = [56, 0], sizes = [8, 512], strides = [1, 1]} : vector<64x512xf32> to vector<8x512xf32>
    %cst_74 = arith.constant dense<0.000000e+00> : vector<8x512xf32>
    %385 = tpu.matmul %383, %7, %cst_74 {dimension_numbers = #tpu.dot_dimension_numbers<[1], [0], [0], [1], [0, 0, 1, 1], [], []>} : vector<8x128xf32>, vector<128x512xf32>, vector<8x512xf32> -> vector<8x512xf32>
    %386 = arith.addf %384, %385 : vector<8x512xf32>
    %cst_75 = arith.constant dense<0.000000e+00> : vector<8x512xf32>
    %387 = tpu.matmul %383, %8, %cst_75 {dimension_numbers = #tpu.dot_dimension_numbers<[1], [0], [0], [1], [0, 0, 1, 1], [], []>} : vector<8x128xf32>, vector<128x512xf32>, vector<8x512xf32> -> vector<8x512xf32>
    %cst_76 = arith.constant dense<0.000000e+00> : vector<8x512xf32>
    %388 = tpu.matmul %358, %9, %cst_76 {dimension_numbers = #tpu.dot_dimension_numbers<[1], [0], [0], [1], [0, 0, 1, 1], [], []>} : vector<8x128xf32>, vector<128x512xf32>, vector<8x512xf32> -> vector<8x512xf32>
    %389 = arith.addf %387, %388 : vector<8x512xf32>
    %390 = arith.addf %389, %12 : vector<8x512xf32>
    %391 = vector.extract_strided_slice %390 {offsets = [0, 0], sizes = [8, 128], strides = [1, 1]} : vector<8x512xf32> to vector<8x128xf32>
    %392 = arith.negf %391 : vector<8x128xf32>
    %393 = math.exp %392 : vector<8x128xf32>
    %cst_77 = arith.constant 1.000000e+00 : f32
    %394 = vector.broadcast %cst_77 : f32 to vector<8x128xf32>
    %395 = arith.addf %394, %393 : vector<8x128xf32>
    %396 = arith.divf %394, %395 : vector<8x128xf32>
    %397 = vector.extract_strided_slice %390 {offsets = [0, 128], sizes = [8, 128], strides = [1, 1]} : vector<8x512xf32> to vector<8x128xf32>
    %398 = arith.negf %397 : vector<8x128xf32>
    %399 = math.exp %398 : vector<8x128xf32>
    %cst_78 = arith.constant 1.000000e+00 : f32
    %400 = vector.broadcast %cst_78 : f32 to vector<8x128xf32>
    %401 = arith.addf %400, %399 : vector<8x128xf32>
    %402 = arith.divf %400, %401 : vector<8x128xf32>
    %403 = vector.extract_strided_slice %390 {offsets = [0, 256], sizes = [8, 128], strides = [1, 1]} : vector<8x512xf32> to vector<8x128xf32>
    %404 = math.tanh %403 : vector<8x128xf32>
    %405 = vector.extract_strided_slice %390 {offsets = [0, 384], sizes = [8, 128], strides = [1, 1]} : vector<8x512xf32> to vector<8x128xf32>
    %406 = arith.negf %405 : vector<8x128xf32>
    %407 = math.exp %406 : vector<8x128xf32>
    %cst_79 = arith.constant 1.000000e+00 : f32
    %408 = vector.broadcast %cst_79 : f32 to vector<8x128xf32>
    %409 = arith.addf %408, %407 : vector<8x128xf32>
    %410 = arith.divf %408, %409 : vector<8x128xf32>
    %411 = arith.mulf %402, %356 : vector<8x128xf32>
    %412 = arith.mulf %396, %404 : vector<8x128xf32>
    %413 = arith.addf %411, %412 : vector<8x128xf32>
    %414 = math.tanh %413 : vector<8x128xf32>
    %415 = arith.mulf %410, %414 : vector<8x128xf32>
    %416 = vector.extract_strided_slice %386 {offsets = [0, 0], sizes = [8, 128], strides = [1, 1]} : vector<8x512xf32> to vector<8x128xf32>
    %417 = arith.negf %416 : vector<8x128xf32>
    %418 = math.exp %417 : vector<8x128xf32>
    %cst_80 = arith.constant 1.000000e+00 : f32
    %419 = vector.broadcast %cst_80 : f32 to vector<8x128xf32>
    %420 = arith.addf %419, %418 : vector<8x128xf32>
    %421 = arith.divf %419, %420 : vector<8x128xf32>
    %422 = vector.extract_strided_slice %386 {offsets = [0, 128], sizes = [8, 128], strides = [1, 1]} : vector<8x512xf32> to vector<8x128xf32>
    %423 = arith.negf %422 : vector<8x128xf32>
    %424 = math.exp %423 : vector<8x128xf32>
    %cst_81 = arith.constant 1.000000e+00 : f32
    %425 = vector.broadcast %cst_81 : f32 to vector<8x128xf32>
    %426 = arith.addf %425, %424 : vector<8x128xf32>
    %427 = arith.divf %425, %426 : vector<8x128xf32>
    %428 = vector.extract_strided_slice %386 {offsets = [0, 256], sizes = [8, 128], strides = [1, 1]} : vector<8x512xf32> to vector<8x128xf32>
    %429 = math.tanh %428 : vector<8x128xf32>
    %430 = vector.extract_strided_slice %386 {offsets = [0, 384], sizes = [8, 128], strides = [1, 1]} : vector<8x512xf32> to vector<8x128xf32>
    %431 = arith.negf %430 : vector<8x128xf32>
    %432 = math.exp %431 : vector<8x128xf32>
    %cst_82 = arith.constant 1.000000e+00 : f32
    %433 = vector.broadcast %cst_82 : f32 to vector<8x128xf32>
    %434 = arith.addf %433, %432 : vector<8x128xf32>
    %435 = arith.divf %433, %434 : vector<8x128xf32>
    %436 = arith.mulf %427, %381 : vector<8x128xf32>
    %437 = arith.mulf %421, %429 : vector<8x128xf32>
    %438 = arith.addf %436, %437 : vector<8x128xf32>
    %439 = math.tanh %438 : vector<8x128xf32>
    %440 = arith.mulf %435, %439 : vector<8x128xf32>
    %cst_83 = arith.constant dense<0.000000e+00> : vector<8x512xf32>
    %441 = tpu.matmul %440, %8, %cst_83 {dimension_numbers = #tpu.dot_dimension_numbers<[1], [0], [0], [1], [0, 0, 1, 1], [], []>} : vector<8x128xf32>, vector<128x512xf32>, vector<8x512xf32> -> vector<8x512xf32>
    %cst_84 = arith.constant dense<0.000000e+00> : vector<8x512xf32>
    %442 = tpu.matmul %415, %9, %cst_84 {dimension_numbers = #tpu.dot_dimension_numbers<[1], [0], [0], [1], [0, 0, 1, 1], [], []>} : vector<8x128xf32>, vector<128x512xf32>, vector<8x512xf32> -> vector<8x512xf32>
    %443 = arith.addf %441, %442 : vector<8x512xf32>
    %444 = arith.addf %443, %12 : vector<8x512xf32>
    %445 = vector.extract_strided_slice %444 {offsets = [0, 0], sizes = [8, 128], strides = [1, 1]} : vector<8x512xf32> to vector<8x128xf32>
    %446 = arith.negf %445 : vector<8x128xf32>
    %447 = math.exp %446 : vector<8x128xf32>
    %cst_85 = arith.constant 1.000000e+00 : f32
    %448 = vector.broadcast %cst_85 : f32 to vector<8x128xf32>
    %449 = arith.addf %448, %447 : vector<8x128xf32>
    %450 = arith.divf %448, %449 : vector<8x128xf32>
    %451 = vector.extract_strided_slice %444 {offsets = [0, 128], sizes = [8, 128], strides = [1, 1]} : vector<8x512xf32> to vector<8x128xf32>
    %452 = arith.negf %451 : vector<8x128xf32>
    %453 = math.exp %452 : vector<8x128xf32>
    %cst_86 = arith.constant 1.000000e+00 : f32
    %454 = vector.broadcast %cst_86 : f32 to vector<8x128xf32>
    %455 = arith.addf %454, %453 : vector<8x128xf32>
    %456 = arith.divf %454, %455 : vector<8x128xf32>
    %457 = vector.extract_strided_slice %444 {offsets = [0, 256], sizes = [8, 128], strides = [1, 1]} : vector<8x512xf32> to vector<8x128xf32>
    %458 = math.tanh %457 : vector<8x128xf32>
    %459 = vector.extract_strided_slice %444 {offsets = [0, 384], sizes = [8, 128], strides = [1, 1]} : vector<8x512xf32> to vector<8x128xf32>
    %460 = arith.negf %459 : vector<8x128xf32>
    %461 = math.exp %460 : vector<8x128xf32>
    %cst_87 = arith.constant 1.000000e+00 : f32
    %462 = vector.broadcast %cst_87 : f32 to vector<8x128xf32>
    %463 = arith.addf %462, %461 : vector<8x128xf32>
    %464 = arith.divf %462, %463 : vector<8x128xf32>
    %465 = arith.mulf %456, %413 : vector<8x128xf32>
    %466 = arith.mulf %450, %458 : vector<8x128xf32>
    %467 = arith.addf %465, %466 : vector<8x128xf32>
    %468 = math.tanh %467 : vector<8x128xf32>
    %469 = arith.mulf %464, %468 : vector<8x128xf32>
    %c0_88 = arith.constant 0 : index
    %c0_89 = arith.constant 0 : index
    %470 = vector.load %arg8[%c0_88, %c0_89] : memref<128x128xf32, #tpu.memory_space<vmem>>, vector<128x128xf32>
    %cst_90 = arith.constant dense<0.000000e+00> : vector<8x128xf32>
    %471 = tpu.matmul %469, %470, %cst_90 {dimension_numbers = #tpu.dot_dimension_numbers<[1], [0], [0], [1], [0, 0, 1, 1], [], []>} : vector<8x128xf32>, vector<128x128xf32>, vector<8x128xf32> -> vector<8x128xf32>
    %c0_91 = arith.constant 0 : index
    %c0_92 = arith.constant 0 : index
    %472 = vector.load %arg9[%c0_91, %c0_92] : memref<1x128xf32, #tpu.memory_space<vmem>>, vector<1x128xf32>
    %473 = vector.broadcast %472 : vector<1x128xf32> to vector<8x128xf32>
    %474 = arith.addf %471, %473 : vector<8x128xf32>
    %c0_93 = arith.constant 0 : index
    %c0_94 = arith.constant 0 : index
    %c0_95 = arith.constant 0 : index
    %475 = vector.load %arg10[%c0_93, %c0_94, %c0_95] : memref<1x8x128xf32, #tpu.memory_space<vmem>>, vector<1x8x128xf32>
    %476 = vector.shape_cast %475 : vector<1x8x128xf32> to vector<8x128xf32>
    %477 = vector.shape_cast %474 : vector<8x128xf32> to vector<1x8x128xf32>
    tpu.vector_store %arg10[%c0_93, %c0_94, %c0_95], %477 {strides = array<i32>} : memref<1x8x128xf32, #tpu.memory_space<vmem>>, vector<1x8x128xf32>,
    return
  }
  func.func @transform_0(%arg0: i32) -> (i32, i32, i32) {
    %c0_i32 = arith.constant 0 : i32
    %c0_i32_0 = arith.constant 0 : i32
    %c0_i32_1 = arith.constant 0 : i32
    return %arg0, %c0_i32, %c0_i32_0 : i32, i32, i32
  }
  func.func @transform_1(%arg0: i32) -> (i32, i32) {
    %c0_i32 = arith.constant 0 : i32
    %c0_i32_0 = arith.constant 0 : i32
    %c0_i32_1 = arith.constant 0 : i32
    return %c0_i32, %c0_i32_0 : i32, i32
  }
  func.func @transform_2(%arg0: i32) -> (i32, i32) {
    %c0_i32 = arith.constant 0 : i32
    %c0_i32_0 = arith.constant 0 : i32
    %c0_i32_1 = arith.constant 0 : i32
    return %c0_i32, %c0_i32_0 : i32, i32
  }
  func.func @transform_3(%arg0: i32) -> (i32, i32) {
    %c0_i32 = arith.constant 0 : i32
    %c0_i32_0 = arith.constant 0 : i32
    %c0_i32_1 = arith.constant 0 : i32
    return %c0_i32, %c0_i32_0 : i32, i32
  }
  func.func @transform_4(%arg0: i32) -> (i32, i32) {
    %c0_i32 = arith.constant 0 : i32
    %c0_i32_0 = arith.constant 0 : i32
    %c0_i32_1 = arith.constant 0 : i32
    return %c0_i32, %c0_i32_0 : i32, i32
  }
  func.func @transform_5(%arg0: i32) -> (i32, i32) {
    %c0_i32 = arith.constant 0 : i32
    %c0_i32_0 = arith.constant 0 : i32
    %c0_i32_1 = arith.constant 0 : i32
    return %c0_i32, %c0_i32_0 : i32, i32
  }
  func.func @transform_6(%arg0: i32) -> (i32, i32) {
    %c0_i32 = arith.constant 0 : i32
    %c0_i32_0 = arith.constant 0 : i32
    %c0_i32_1 = arith.constant 0 : i32
    return %c0_i32, %c0_i32_0 : i32, i32
  }
  func.func @transform_7(%arg0: i32) -> (i32, i32) {
    %c0_i32 = arith.constant 0 : i32
    %c0_i32_0 = arith.constant 0 : i32
    %c0_i32_1 = arith.constant 0 : i32
    return %c0_i32, %c0_i32_0 : i32, i32
  }
  func.func @transform_8(%arg0: i32) -> (i32, i32) {
    %c0_i32 = arith.constant 0 : i32
    %c0_i32_0 = arith.constant 0 : i32
    %c0_i32_1 = arith.constant 0 : i32
    return %c0_i32, %c0_i32_0 : i32, i32
  }
  func.func @transform_9(%arg0: i32) -> (i32, i32, i32) {
    %c0_i32 = arith.constant 0 : i32
    %c0_i32_0 = arith.constant 0 : i32
    %c0_i32_1 = arith.constant 0 : i32
    return %arg0, %c0_i32, %c0_i32_0 : i32, i32, i32
  }
}

</mosaic_0001>

<bundles_post_ra>
// kernel: tpu_custom_call.1
= control target key start
LH: loop header
LB: loop body
LE: loop exit
PB: predicated region body
PF: predicated region fallthrough
CT: control target
= control target key end

     0   :  { %14 = vsyncpa [#allocation3], 0  ;;  %s8042_s0 = inlined_call_operand.vmem [shape: f32[1,64,32], index: 0, kind: input, shape index: {}]   ;;  %s8043_s1 = inlined_call_operand.hbm [shape: f32[32,512], index: 1, kind: input, shape index: {}]   ;;  %s8044_s2 = inlined_call_operand.vmem [shape: f32[1,512], index: 2, kind: input, shape index: {}]   ;;  %s8045_s3 = inlined_call_operand.hbm [shape: f32[128,512], index: 3, kind: input, shape index: {}]   ;;  %s8046_s4 = inlined_call_operand.hbm [shape: f32[128,512], index: 4, kind: input, shape index: {}]   ;;  %s8047_s5 = inlined_call_operand.hbm [shape: f32[128,512], index: 5, kind: input, shape index: {}]   ;;  %s8048_s6 = inlined_call_operand.vmem [shape: f32[1,512], index: 6, kind: input, shape index: {}]   ;;  %s8049_s7 = inlined_call_operand.hbm [shape: f32[128,128], index: 7, kind: input, shape index: {}]   ;;  %s8050_s8 = inlined_call_operand.vmem [shape: f32[1,128], index: 8, kind: input, shape index: {}]   ;;  %s8051_s9 = inlined_call_operand.hbm [shape: f32[1,8,128], index: 9, kind: output, shape index: {}]  }
   0x1   :  { %15 = vsyncpa [#allocation6], 0 }
   0x2   :  { %16 = vsyncpa [#allocation9], 0 }
   0x3   :  { %17 = vsyncpa [#allocation4], 0  ;;  %s39_s11 = sshll.u32 %s8045_s3, 4  ;;  %s4592_s12 = smov [#allocation5]   ;;  %s40_s11 = int_to_ptr.hbm [resolvable:$true] %s39_s11 }
   0x4   :  { %s41_s13 = sshll.u32 %s4592_s12, 4  ;;  %s65_s16 = sshll.u32 %s8047_s5, 4  ;;  %s42_s13 = int_to_ptr.vmem [resolvable:$true] %s41_s13  ;;  %s66_s16 = int_to_ptr.hbm [resolvable:$true] %s65_s16 }
   0x5   :  { %s4593_s17 = smov 512   ;;  %s4594_s18 = smov 32  }
   0x6   :  { %47 = dma.hbm_to_vmem [thread:$0]  %s40_s11, 8192, %s42_s13, [#allocation6], %s4593_s17, %s4593_s17, %s4594_s18  }
   0x7   :  { %s4595_s19 = smov [#allocation8]   ;;  %s24_s23 = sshll.u32 %s8043_s1, 4  ;;  %s25_s23 = int_to_ptr.hbm [resolvable:$true] %s24_s23 }
   0x8   :  { %s67_s20 = sshll.u32 %s4595_s19, 4  ;;  %s52_s25 = sshll.u32 %s8046_s4, 4  ;;  %s68_s20 = int_to_ptr.vmem [resolvable:$true] %s67_s20  ;;  %s53_s25 = int_to_ptr.hbm [resolvable:$true] %s52_s25 }
   0x9   :  { %73 = dma.hbm_to_vmem [thread:$0]  %s66_s16, 8192, %s68_s20, [#allocation9], %s4593_s17, %s4593_s17, %s4594_s18  }
   0xa   :  { %s4596_s26 = smov [#allocation2]   ;;  %s4597_s5 = smov [#allocation7]  }
   0xb   :  { %s26_s27 = sshll.u32 %s4596_s26, 4  ;;  %s54_s28 = sshll.u32 %s4597_s5, 4  ;;  %s27_s27 = int_to_ptr.vmem [resolvable:$true] %s26_s27  ;;  %s55_s28 = int_to_ptr.vmem [resolvable:$true] %s54_s28 }
   0xc   :  { %32 = dma.hbm_to_vmem [thread:$0]  %s25_s23, 2048, %s27_s27, [#allocation3], %s4593_s17, %s4593_s17, %s4594_s18  }
   0xd   :  { %s80_s10 = sshll.u32 %s8049_s7, 4  ;;  %s4598_s1 = smov [#allocation10]   ;;  %s81_s10 = int_to_ptr.hbm [resolvable:$true] %s80_s10 }
   0xe   :  { %60 = dma.hbm_to_vmem [thread:$0]  %s53_s25, 8192, %s55_s28, [#allocation6], %s4593_s17, %s4593_s17, %s4594_s18  }
   0xf   :  { %s82_s11 = sshll.u32 %s4598_s1, 4  ;;  %s4599_s12 = smov 128   ;;  %s83_s11 = int_to_ptr.vmem [resolvable:$true] %s82_s11 }
  0x10   :  { %s4600_s13 = smov 8  }
  0x11   :  { %88 = dma.hbm_to_vmem [thread:$0]  %s81_s10, 2048, %s83_s11, [#allocation9], %s4599_s12, %s4599_s12, %s4600_s13  }
  0x12   :  { %4584 = dma.done.wait [#allocation3], 2048  }
  0x13   :  { %4585 = vsyncadd [#allocation3], 4294965248 }
  0x14   :  { %4586 = dma.done.wait [#allocation6], 16384  }
  0x15   :  { %4587 = vsyncadd [#allocation6], 4294950912 }
  0x16   :  { %4588 = dma.done.wait [#allocation9], 10240  }
  0x17   :  { %4589 = vsyncadd [#allocation9], 4294957056  ;;  %v131_v0 = vld [vmem:[#allocation2 + $0x60] sm:$0xff]  ;;  %vm145_vm0 = vcmask 261120   ;;  %v4676_v5 = vld [vmem:[%s8042_s0 + $0x28] sm:$0xff]  ;;  %s4602_s29 = smov [#allocation11]  }
  0x18   :  { %v127_v1 = vld [vmem:[#allocation2 + $0x40] sm:$0xff]  ;;  %182 = vmatpush.msra.mxu0 %v131_v0  ;;  %3584 = vmatpush.msra.mxu1 %v131_v0  ;;  %v4681_v6 = vld [vmem:[%s8042_s0 + $0x38] sm:$0xff]  ;;  %v132_v7 = vld [vmem:[#allocation2 + $0x68] sm:$0xff]  ;;  %s3490_s30 = sshll.u32 %s4602_s29, 4  ;;  %s3492_s11 = sshll.u32 %s8051_s9, 4  ;;  %s3491_s30 = int_to_ptr.vmem [resolvable:$true] %s3490_s30  ;;  %s3493_s11 = int_to_ptr.hbm [resolvable:$true] %s3492_s11 }
  0x19   :  { %3586 = vmatpush.msra.mxu3 %v131_v0  ;;  %v123_v2 = vld [vmem:[#allocation2 + $0x20] sm:$0xff]  ;;  %3585 = vmatpush.msra.mxu2 %v131_v0  ;;  %v134_v8 = vld [vmem:[#allocation2 + $0x78] sm:$0xff]  ;;  %v128_v10 = vld [vmem:[#allocation2 + $0x48] sm:$0xff] }
  0x1a   :  { %183 = vmatpush.msra.mxu0 %v127_v1  ;;  %3587 = vmatpush.msra.mxu1 %v127_v1  ;;  %v119_v3 = vld [vmem:[#allocation2] sm:$0xff]  ;;  %v130_v11 = vld [vmem:[#allocation2 + $0x58] sm:$0xff]  ;;  %v4692_v12 = vld [vmem:[%s8042_s0 + $0x30] sm:$0xff] }
  0x1b   :  { %3589 = vmatpush.msra.mxu3 %v127_v1  ;;  %3588 = vmatpush.msra.mxu2 %v127_v1  ;;  %v4671_v4 = vld [vmem:[%s8042_s0] sm:$0xff]  ;;  %v124_v14 = vld [vmem:[#allocation2 + $0x28] sm:$0xff]  ;;  %v126_v15 = vld [vmem:[#allocation2 + $0x38] sm:$0xff] }
  0x1c   :  { %184 = vmatpush.msra.mxu0 %v123_v2  ;;  %3590 = vmatpush.msra.mxu1 %v123_v2  ;;  %v394_v9 = vld [vmem:[#allocation5 + $0x1e0] sm:$0xff]  ;;  %v133_v16 = vld [vmem:[#allocation2 + $0x70] sm:$0xff]  ;;  %v120_v18 = vld [vmem:[#allocation2 + $0x8] sm:$0xff] }
  0x1d   :  { %3592 = vmatpush.msra.mxu3 %v123_v2  ;;  %3591 = vmatpush.msra.mxu2 %v123_v2  ;;  %v390_v13 = vld [vmem:[#allocation5 + $0x1c0] sm:$0xff]  ;;  %v122_v19 = vld [vmem:[#allocation2 + $0x18] sm:$0xff]  ;;  %v129_v20 = vld [vmem:[#allocation2 + $0x50] sm:$0xff] }
  0x1e   :  { %185 = vmatpush.msra.mxu0 %v119_v3  ;;  %3593 = vmatpush.msra.mxu1 %v119_v3  ;;  %v386_v17 = vld [vmem:[#allocation5 + $0x1a0] sm:$0xff]  ;;  %v395_v21 = vld [vmem:[#allocation5 + $0x1e8] sm:$0xff]  ;;  %v4696_v22 = vld [vmem:[#allocation5 + $0x1f8] sm:$0xff] }
  0x1f   :  { %3595 = vmatpush.msra.mxu3 %v119_v3  ;;  %3504 = vmatmul.msk.f32.vlgmr.msra.gmra.mxu0 %vm145_vm0, %v4671_v4  ;;  %v382_v23 = vld [vmem:[#allocation5 + $0x180] sm:$0xff]  ;;  %v125_v24 = vld [vmem:[#allocation2 + $0x30] sm:$0xff]  ;;  %v4702_v25 = vld [vmem:[#allocation5 + $0x1c8] sm:$0xff] }
  0x20   :  { %3509 = vmatmul.msk.f32.vlgmr.msra.gmra.mxu1 %vm145_vm0, %v4676_v5  ;;  %3511 = vmatmul.msk.f32.vlgmr.msra.gmra.mxu3 %vm145_vm0, %v4681_v6  ;;  %v4704_v26 = vld [vmem:[#allocation5 + $0x1d8] sm:$0xff]  ;;  %v378_v27 = vld [vmem:[#allocation5 + $0x160] sm:$0xff]  ;;  %v121_v28 = vld [vmem:[#allocation2 + $0x10] sm:$0xff] }
  0x21   :  { %223 = vmatpush.msrb.mxu1 %v132_v7  ;;  %305 = vmatpush.msrb.mxu3 %v134_v8  ;;  %v4707_v29 = vld [vmem:[#allocation5 + $0x1a8] sm:$0xff]  ;;  %v4710_v30 = vld [vmem:[#allocation5 + $0x1b8] sm:$0xff]  ;;  %v4712_v31 = vld [vmem:[#allocation5 + $0x1f0] sm:$0xff] }
  0x22   :  { %3594 = vmatpush.msra.mxu2 %v119_v3  ;;  %599 = vmatpush.msrb.mxu0 %v394_v9  ;;  %v4715_v32 = vld [vmem:[#allocation5 + $0x188] sm:$0xff]  ;;  %v4723_v34 = vld [vmem:[#allocation5 + $0x1d0] sm:$0xff]  ;;  %v4726_v35 = vld [vmem:[#allocation5 + $0x198] sm:$0xff] }
  0x23   :  { %224 = vmatpush.msrb.mxu1 %v128_v10  ;;  %306 = vmatpush.msrb.mxu3 %v130_v11  ;;  %v112_v33 = vld [vmem:[%s8042_s0 + $0x8] sm:$0xff]  ;;  %v4732_v37 = vld [vmem:[#allocation5 + $0x1b0] sm:$0xff]  ;;  %v4736_v38 = vld [vmem:[#allocation5 + $0x178] sm:$0xff] }
  0x24   :  { %3510 = vmatmul.msk.f32.vlgmr.msra.gmra.mxu2 %vm145_vm0, %v4692_v12  ;;  %600 = vmatpush.msrb.mxu0 %v390_v13  ;;  %v4730_v36 = vld [vmem:[#allocation5 + $0x168] sm:$0xff]  ;;  %v4740_v39 = vld [vmem:[#allocation5 + $0x190] sm:$0xff]  ;;  %v4751_v41 = vld [vmem:[#allocation5 + $0x140] sm:$0xff] }
  0x25   :  { %225 = vmatpush.msrb.mxu1 %v124_v14  ;;  %307 = vmatpush.msrb.mxu3 %v126_v15  ;;  %v4746_v40 = vld [vmem:[#allocation5 + $0x170] sm:$0xff]  ;;  %v4753_v42 = vld [vmem:[#allocation5 + $0x148] sm:$0xff]  ;;  %v4759_v44 = vld [vmem:[#allocation5 + $0x158] sm:$0xff] }
  0x26   :  { %264 = vmatpush.msrb.mxu2 %v133_v16  ;;  %601 = vmatpush.msrb.mxu0 %v386_v17  ;;  %v4755_v43 = vld [vmem:[#allocation5 + $0x150] sm:$0xff]  ;;  %v4763_v45 = vld [vmem:[#allocation5 + $0x120] sm:$0xff]  ;;  %v4765_v46 = vld [vmem:[#allocation5 + $0x128] sm:$0xff] }
  0x27   :  { %226 = vmatpush.msrb.mxu1 %v120_v18  ;;  %308 = vmatpush.msrb.mxu3 %v122_v19  ;;  %v4767_v47 = vld [vmem:[#allocation5 + $0x130] sm:$0xff]  ;;  %v4771_v48 = vld [vmem:[#allocation5 + $0x138] sm:$0xff]  ;;  %v4780_v50 = vld [vmem:[#allocation5 + $0x100] sm:$0xff] }
  0x28   :  { %3512 = vmatmul.msk.f32.vlgmr.msrb.gmra.mxu1 %vm145_vm0, %v4671_v4  ;;  %3528 = vmatmul.msk.f32.vlgmr.msrb.gmra.mxu3 %vm145_vm0, %v4671_v4  ;;  %v4778_v49 = vld [vmem:[%s8042_s0 + $0x10] sm:$0xff]  ;;  %v4782_v51 = vld [vmem:[#allocation5 + $0x108] sm:$0xff]  ;;  %v4790_v53 = vld [vmem:[#allocation5 + $0x118] sm:$0xff] }
  0x29   :  { %265 = vmatpush.msrb.mxu2 %v129_v20  ;;  %619 = vmatpush.msra.mxu1 %v395_v21  ;;  %v4788_v52 = vld [vmem:[#allocation5 + $0x110] sm:$0xff]  ;;  %v4795_v54 = vld [vmem:[#allocation5 + $0xe0] sm:$0xff]  ;;  %v4797_v55 = vld [vmem:[#allocation5 + $0xe8] sm:$0xff] }
  0x2a   :  { %659 = vmatpush.msra.mxu3 %v4696_v22  ;;  %602 = vmatpush.msrb.mxu0 %v382_v23  ;;  %v4799_v56 = vld [vmem:[#allocation5 + $0xf0] sm:$0xff]  ;;  %v4803_v57 = vld [vmem:[#allocation5 + $0xf8] sm:$0xff]  ;;  %v4809_v58 = vld [vmem:[#allocation5 + $0xc0] sm:$0xff] }
  0x2b   :  { %266 = vmatpush.msrb.mxu2 %v125_v24  ;;  %620 = vmatpush.msra.mxu1 %v4702_v25  ;;  %v4811_v59 = vld [vmem:[#allocation5 + $0xc8] sm:$0xff]  ;;  %v4813_v60 = vld [vmem:[#allocation5 + $0xd0] sm:$0xff]  ;;  %v4817_v61 = vld [vmem:[#allocation5 + $0xd8] sm:$0xff] }
  0x2c   :  { %660 = vmatpush.msra.mxu3 %v4704_v26  ;;  %603 = vmatpush.msrb.mxu0 %v378_v27  ;;  %v4821_v62 = vld [vmem:[#allocation5 + $0xa0] sm:$0xff]  ;;  %v4823_v63 = vld [vmem:[#allocation5 + $0xa8] sm:$0xff]  ;;  %v4825_v0 = vld [vmem:[#allocation5 + $0xb0] sm:$0xff] }
  0x2d   :  { %267 = vmatpush.msrb.mxu2 %v121_v28  ;;  %621 = vmatpush.msra.mxu1 %v4707_v29  ;;  %v4829_v1 = vld [vmem:[#allocation5 + $0xb8] sm:$0xff]  ;;  %v4838_v3 = vld [vmem:[#allocation5 + $0x80] sm:$0xff]  ;;  %v4845_v7 = vld [vmem:[#allocation5 + $0x90] sm:$0xff] }
  0x2e   :  { %3520 = vmatmul.msk.f32.vlgmr.msrb.gmra.mxu2 %vm145_vm0, %v4671_v4  ;;  %661 = vmatpush.msra.mxu3 %v4710_v30  ;;  %v4836_v2 = vld [vmem:[%s8042_s0 + $0x18] sm:$0xff]  ;;  %v4840_v4 = vld [vmem:[#allocation5 + $0x88] sm:$0xff]  ;;  %8600 = vst [vmem:[#allocation16_spill] sm:$0xff] %v4845_v7  ;;  %v4853_v9 = vld [vmem:[#allocation5 + $0x60] sm:$0xff] }
  0x2f   :  { %639 = vmatpush.msra.mxu2 %v4712_v31  ;;  %622 = vmatpush.msra.mxu1 %v4715_v32  ;;  %v4847_v8 = vld [vmem:[#allocation5 + $0x98] sm:$0xff]  ;;  %8602 = vst [vmem:[#allocation18_spill] sm:$0xff] %v4853_v9  ;;  %v4855_v10 = vld [vmem:[#allocation5 + $0x68] sm:$0xff]  ;;  %v4859_v11 = vld [vmem:[#allocation5 + $0x70] sm:$0xff] }
  0x30   :  { %3513 = vmatmul.msk.f32.gmra.mxu1 %vm145_vm0, %v112_v33  ;;  %3529 = vmatmul.msk.f32.gmra.mxu3 %vm145_vm0, %v112_v33  ;;  %8601 = vst [vmem:[#allocation17_spill] sm:$0xff] %v4847_v8  ;;  %v4861_v13 = vld [vmem:[#allocation5 + $0x78] sm:$0xff]  ;;  %v4865_v14 = vld [vmem:[#allocation5 + $0x40] sm:$0xff]  ;;  %v4867_v15 = vld [vmem:[#allocation5 + $0x48] sm:$0xff] }
  0x31   :  { %640 = vmatpush.msra.mxu2 %v4723_v34  ;;  %662 = vmatpush.msra.mxu3 %v4726_v35  ;;  %8603 = vst [vmem:[#allocation19_spill] sm:$0xff] %v4855_v10  ;;  %v4871_v16 = vld [vmem:[#allocation5 + $0x50] sm:$0xff]  ;;  %v4873_v17 = vld [vmem:[#allocation5 + $0x58] sm:$0xff]  ;;  %v4877_v18 = vld [vmem:[#allocation5 + $0x20] sm:$0xff] }
  0x32   :  { %623 = vmatpush.msra.mxu1 %v4730_v36  ;;  %3505 = vmatmul.msk.f32.gmra.mxu0 %vm145_vm0, %v112_v33  ;;  %8604 = vst [vmem:[#allocation20_spill] sm:$0xff] %v4859_v11  ;;  %v4879_v19 = vld [vmem:[#allocation5 + $0x28] sm:$0xff]  ;;  %v4883_v20 = vld [vmem:[#allocation5 + $0x30] sm:$0xff]  ;;  %v4885_v21 = vld [vmem:[#allocation5 + $0x38] sm:$0xff] }
  0x33   :  { %641 = vmatpush.msra.mxu2 %v4732_v37  ;;  %663 = vmatpush.msra.mxu3 %v4736_v38  ;;  %8605 = vst [vmem:[#allocation21_spill] sm:$0xff] %v4861_v13  ;;  %v4892_v23 = vld [vmem:[%s8042_s0 + $0x20] sm:$0xff]  ;;  %v4900_v27 = vld [vmem:[#allocation5 + $0x8] sm:$0xff]  ;;  %v4902_v28 = vld [vmem:[#allocation5 + $0x10] sm:$0xff] }
  0x34   :  { %604 = vmatpush.msrb.mxu0 %v4751_v41  ;;  %624 = vmatpush.msra.mxu1 %v4753_v42  ;;  %8606 = vst [vmem:[#allocation22_spill] sm:$0xff] %v4865_v14  ;;  %v4896_v24 = vld [vmem:[#allocation5] sm:$0xff] }
  0x35   :  { %642 = vmatpush.msra.mxu2 %v4740_v39  ;;  %664 = vmatpush.msra.mxu3 %v4759_v44  ;;  %8607 = vst [vmem:[#allocation23_spill] sm:$0xff] %v4867_v15 }
  0x36   :  { %3521 = vmatmul.msk.f32.gmra.mxu2 %vm145_vm0, %v112_v33  ;;  %605 = vmatpush.msrb.mxu0 %v4763_v45  ;;  %8608 = vst [vmem:[#allocation24_spill] sm:$0xff] %v4871_v16  ;;  %v4908_v33 = vld [vmem:[#allocation5 + $0x18] sm:$0xff] }
  0x37   :  { %643 = vmatpush.msra.mxu2 %v4746_v40  ;;  %625 = vmatpush.msra.mxu1 %v4765_v46  ;;  %8609 = vst [vmem:[#allocation25_spill] sm:$0xff] %v4873_v17 }
  0x38   :  { %665 = vmatpush.msra.mxu3 %v4771_v48  ;;  %3514 = vmatmul.msk.f32.gmra.mxu1 %vm145_vm0, %v4778_v49  ;;  %8610 = vst [vmem:[#allocation26_spill] sm:$0xff] %v4877_v18 }
  0x39   :  { %644 = vmatpush.msra.mxu2 %v4755_v43  ;;  %3530 = vmatmul.msk.f32.gmra.mxu3 %vm145_vm0, %v4778_v49  ;;  %8611 = vst [vmem:[#allocation27_spill] sm:$0xff] %v4879_v19 }
  0x3a   :  { %606 = vmatpush.msrb.mxu0 %v4780_v50  ;;  %626 = vmatpush.msra.mxu1 %v4782_v51  ;;  %8612 = vst [vmem:[#allocation28_spill] sm:$0xff] %v4883_v20 }
  0x3b   :  { %645 = vmatpush.msra.mxu2 %v4767_v47  ;;  %666 = vmatpush.msra.mxu3 %v4790_v53  ;;  %8613 = vst [vmem:[#allocation29_spill] sm:$0xff] %v4885_v21 }
  0x3c   :  { %607 = vmatpush.msrb.mxu0 %v4795_v54  ;;  %627 = vmatpush.msra.mxu1 %v4797_v55  ;;  %8614 = vst [vmem:[#allocation30_spill] sm:$0xff] %v4896_v24 }
  0x3d   :  { %646 = vmatpush.msra.mxu2 %v4788_v52  ;;  %667 = vmatpush.msra.mxu3 %v4803_v57  ;;  %8615 = vst [vmem:[#allocation31_spill] sm:$0xff] %v4900_v27 }
  0x3e   :  { %3522 = vmatmul.msk.f32.gmra.mxu2 %vm145_vm0, %v4778_v49  ;;  %608 = vmatpush.msrb.mxu0 %v4809_v58  ;;  %8616 = vst [vmem:[#allocation32_spill] sm:$0xff] %v4902_v28 }
  0x3f   :  { %647 = vmatpush.msra.mxu2 %v4799_v56  ;;  %628 = vmatpush.msra.mxu1 %v4811_v59  ;;  %8617 = vst [vmem:[#allocation33_spill] sm:$0xff] %v4908_v33 }
  0x40   :  { %668 = vmatpush.msra.mxu3 %v4817_v61  ;;  %609 = vmatpush.msrb.mxu0 %v4821_v62 }
  0x41   :  { %648 = vmatpush.msra.mxu2 %v4813_v60  ;;  %629 = vmatpush.msra.mxu1 %v4823_v63 }
  0x42   :  { %669 = vmatpush.msra.mxu3 %v4829_v1  ;;  %3515 = vmatmul.msk.f32.gmra.mxu1 %vm145_vm0, %v4836_v2 }
  0x43   :  { %649 = vmatpush.msra.mxu2 %v4825_v0  ;;  %3531 = vmatmul.msk.f32.gmra.mxu3 %vm145_vm0, %v4836_v2 }
  0x44   :  { %610 = vmatpush.msrb.mxu0 %v4838_v3  ;;  %630 = vmatpush.msra.mxu1 %v4840_v4 }
  0x45   :  { %650 = vmatpush.msra.mxu2 %v4845_v7  ;;  %670 = vmatpush.msra.mxu3 %v4847_v8 }
  0x46   :  { %3523 = vmatmul.msk.f32.gmra.mxu2 %vm145_vm0, %v4836_v2  ;;  %611 = vmatpush.msrb.mxu0 %v4853_v9 }
  0x47   :  { %631 = vmatpush.msra.mxu1 %v4855_v10  ;;  %651 = vmatpush.msra.mxu2 %v4859_v11 }
  0x48   :  { %671 = vmatpush.msra.mxu3 %v4861_v13  ;;  %612 = vmatpush.msrb.mxu0 %v4865_v14  ;;  %v4938_v14 = vld [vmem:[#allocation8 + $0x1d8] sm:$0xff]  ;;  %v4959_v13 = vld [vmem:[#allocation8 + $0x188] sm:$0xff] }
  0x49   :  { %632 = vmatpush.msra.mxu1 %v4867_v15  ;;  %652 = vmatpush.msra.mxu2 %v4871_v16  ;;  %v4928_v16 = vld [vmem:[#allocation8 + $0x1c0] sm:$0xff]  ;;  %v4934_v15 = vld [vmem:[#allocation8 + $0x1d0] sm:$0xff]  ;;  %8625 = vst [vmem:[#allocation41_spill] sm:$0xff] %v4938_v14 }
  0x4a   :  { %672 = vmatpush.msra.mxu3 %v4873_v17  ;;  %613 = vmatpush.msrb.mxu0 %v4877_v18  ;;  %v4910_v18 = vld [vmem:[#allocation8 + $0x1e0] sm:$0xff]  ;;  %v4926_v17 = vld [vmem:[#allocation8 + $0x1f8] sm:$0xff]  ;;  %8622 = vst [vmem:[#allocation38_spill] sm:$0xff] %v4928_v16 }
  0x4b   :  { %633 = vmatpush.msra.mxu1 %v4879_v19  ;;  %653 = vmatpush.msra.mxu2 %v4883_v20  ;;  %8618 = vst [vmem:[#allocation34_spill] sm:$0xff] %v4910_v18  ;;  %v4917_v20 = vld [vmem:[#allocation8 + $0x1f0] sm:$0xff]  ;;  %v4922_v19 = vld [vmem:[%s8044_s2] sm:$0xf] }
  0x4c   :  { %673 = vmatpush.msra.mxu3 %v4885_v21  ;;  %3516 = vmatmul.msk.f32.gmra.mxu1 %vm145_vm0, %v4892_v23  ;;  %v4915_v21 = vld [vmem:[#allocation8 + $0x1e8] sm:$0xff]  ;;  %8620 = vst [vmem:[#allocation36_spill] sm:$0xff] %v4917_v20 }
  0x4d   :  { %3532 = vmatmul.msk.f32.gmra.mxu3 %vm145_vm0, %v4892_v23  ;;  %614 = vmatpush.msrb.mxu0 %v4896_v24  ;;  %8619 = vst [vmem:[#allocation35_spill] sm:$0xff] %v4915_v21  ;;  %v4932_v24 = vld [vmem:[#allocation8 + $0x1c8] sm:$0xff] }
  0x4e   :  { %3524 = vmatmul.msk.f32.gmra.mxu2 %vm145_vm0, %v4892_v23  ;;  %634 = vmatpush.msra.mxu1 %v4900_v27  ;;  %8621 = vst [vmem:[#allocation37_spill] sm:$0xff] %v4926_v17  ;;  %v4940_v27 = vld [vmem:[#allocation8 + $0x1a0] sm:$0xff] }
  0x4f   :  { %654 = vmatpush.msra.mxu2 %v4902_v28  ;;  %674 = vmatpush.msra.mxu3 %v4908_v33  ;;  %8623 = vst [vmem:[#allocation39_spill] sm:$0xff] %v4932_v24  ;;  %v4943_v28 = vperm.slane %v4922_v19, 0  ;;  %v4949_v33 = vld [vmem:[#allocation8 + $0x1b0] sm:$0xff] }
  0x50   :  { %683 = vmatpush.msra.mxu0 %v4910_v18  ;;  %8624 = vst [vmem:[#allocation40_spill] sm:$0xff] %v4934_v15  ;;  %703 = vmatpush.msrb.mxu1 %v4915_v21  ;;  %v4947_v18 = vld [vmem:[#allocation8 + $0x1a8] sm:$0xff]  ;;  %v4955_v21 = vld [vmem:[#allocation8 + $0x180] sm:$0xff] }
  0x51   :  { %723 = vmatpush.msrb.mxu2 %v4917_v20  ;;  %8626 = vst [vmem:[#allocation42_spill] sm:$0xff] %v4940_v27  ;;  %743 = vmatpush.msrb.mxu3 %v4926_v17  ;;  %v4953_v20 = vld [vmem:[#allocation8 + $0x1b8] sm:$0xff]  ;;  %v4961_v17 = vld [vmem:[#allocation8 + $0x190] sm:$0xff] }
  0x52   :  { %8627 = vst [vmem:[#allocation43_spill] sm:$0xff] %v4943_v28  ;;  %684 = vmatpush.msra.mxu0 %v4928_v16  ;;  %704 = vmatpush.msrb.mxu1 %v4932_v24  ;;  %v4965_v24 = vld [vmem:[#allocation8 + $0x198] sm:$0xff] }
  0x53   :  { %8628 = vst [vmem:[#allocation44_spill] sm:$0xff] %v4947_v18  ;;  %724 = vmatpush.msrb.mxu2 %v4934_v15  ;;  %744 = vmatpush.msrb.mxu3 %v4938_v14 }
  0x54   :  { %8629 = vst [vmem:[#allocation45_spill] sm:$0xff] %v4949_v33  ;;  %685 = vmatpush.msra.mxu0 %v4940_v27  ;;  %705 = vmatpush.msrb.mxu1 %v4947_v18  ;;  %v4974_v27 = vld [vmem:[#allocation8 + $0x160] sm:$0xff] }
  0x55   :  { %8630 = vst [vmem:[#allocation46_spill] sm:$0xff] %v4953_v20  ;;  %725 = vmatpush.msrb.mxu2 %v4949_v33  ;;  %745 = vmatpush.msrb.mxu3 %v4953_v20  ;;  %v4979_v33 = vld [vmem:[#allocation8 + $0x168] sm:$0xff]  ;;  %v5037_v20 = vperm.slane %v4922_v19, 3 }
  0x56   :  { %8631 = vst [vmem:[#allocation47_spill] sm:$0xff] %v4955_v21  ;;  %686 = vmatpush.msra.mxu0 %v4955_v21  ;;  %706 = vmatpush.msrb.mxu1 %v4959_v13 }
  0x57   :  { %8632 = vst [vmem:[#allocation48_spill] sm:$0xff] %v4959_v13  ;;  %726 = vmatpush.msrb.mxu2 %v4961_v17  ;;  %746 = vmatpush.msrb.mxu3 %v4965_v24  ;;  %v5005_v13 = vld [vmem:[#allocation8 + $0x120] sm:$0xff] }
  0x58   :  { %8633 = vst [vmem:[#allocation49_spill] sm:$0xff] %v4961_v17  ;;  %3506 = vmatmul.msk.f32.gmra.mxu0 %vm145_vm0, %v4778_v49  ;;  %3517 = vmatmul.msk.f32.gmra.mxu1 %vm145_vm0, %v4676_v5  ;;  %v4994_v49 = vld [vmem:[#allocation8 + $0x148] sm:$0xff]  ;;  %v5003_v17 = vld [vmem:[#allocation8 + $0x158] sm:$0xff] }
  0x59   :  { %8634 = vst [vmem:[#allocation50_spill] sm:$0xff] %v4965_v24  ;;  %3525 = vmatmul.msk.f32.gmra.mxu2 %vm145_vm0, %v4676_v5  ;;  %3533 = vmatmul.msk.f32.gmra.mxu3 %vm145_vm0, %v4676_v5  ;;  %v4999_v24 = vperm.slane %v4922_v19, 1  ;;  %v5011_v5 = vld [vmem:[#allocation8 + $0x128] sm:$0xff] }
  0x5a   :  { %8636 = vst [vmem:[#allocation52_spill] sm:$0xff] %v4974_v27  ;;  %687 = vmatpush.msra.mxu0 %v4974_v27  ;;  %707 = vmatpush.msrb.mxu1 %v4979_v33  ;;  %v5013_v27 = vld [vmem:[#allocation8 + $0x130] sm:$0xff] }
  0x5b   :  { %8637 = vst [vmem:[#allocation53_spill] sm:$0xff] %v4979_v33  ;;  %v5017_v33 = vld [vmem:[#allocation8 + $0x138] sm:$0xff] }
  0x5c   :  { %8641 = vst [vmem:[#allocation57_spill] sm:$0xff] %v4994_v49  ;;  %708 = vmatpush.msrb.mxu1 %v4994_v49 }
  0x5d   :  { %8643 = vst [vmem:[#allocation59_spill] sm:$0xff] %v4999_v24 }
  0x5e   :  { %8644 = vst [vmem:[#allocation60_spill] sm:$0xff] %v5003_v17  ;;  %709 = vmatpush.msrb.mxu1 %v5011_v5 }
  0x5f   :  { %8645 = vst [vmem:[#allocation61_spill] sm:$0xff] %v5005_v13 }
  0x60   :  { %8647 = vst [vmem:[#allocation63_spill] sm:$0xff] %v5011_v5  ;;  %3507 = vmatmul.msk.f32.gmra.mxu0 %vm145_vm0, %v4836_v2  ;;  %3518 = vmatmul.msk.f32.gmra.mxu1 %vm145_vm0, %v4692_v12 }
  0x61   :  { %8648 = vst [vmem:[#allocation64_spill] sm:$0xff] %v5013_v27  ;;  %3526 = vmatmul.msk.f32.gmra.mxu2 %vm145_vm0, %v4692_v12  ;;  %3534 = vmatmul.msk.f32.gmra.mxu3 %vm145_vm0, %v4692_v12  ;;  %v5077_v12 = vld [vmem:[#allocation8 + $0xa8] sm:$0xff] }
  0x62   :  { %8649 = vst [vmem:[#allocation65_spill] sm:$0xff] %v5017_v33 }
  0x63   :  { %8654 = vst [vmem:[#allocation70_spill] sm:$0xff] %v5037_v20 }
  0x64   :  { %8665 = vst [vmem:[#allocation81_spill] sm:$0xff] %v5077_v12 }
  0x68   :  { %3508 = vmatmul.msk.f32.gmra.mxu0 %vm145_vm0, %v4892_v23  ;;  %3519 = vmatmul.msk.f32.gmra.mxu1 %vm145_vm0, %v4681_v6 }
  0x69   :  { %3527 = vmatmul.msk.f32.gmra.mxu2 %vm145_vm0, %v4681_v6  ;;  %3535 = vmatmul.msk.f32.gmra.mxu3 %vm145_vm0, %v4681_v6  ;;  %v5146_v6 = vld [vmem:[#allocation8 + $0x28] sm:$0xff] }
  0x6a   :  { %8682 = vst [vmem:[#allocation98_spill] sm:$0xff] %v5146_v6 }
  0x9c   :  { %v187_v16 = vpop.f32.mrf.mxu0 }
  0x9d   :  { %v188_v15 = vadd.f32 %v187_v16, %v4943_v28  ;;  %v4968_v11 = vpop.f32.mrf.mxu1  ;;  %v4981_v16 = vld [vmem:[#allocation8 + $0x170] sm:$0xff]  ;;  %v4989_v28 = vld [vmem:[#allocation8 + $0x140] sm:$0xff] }
  0x9e   :  { %8635 = vst [vmem:[#allocation51_spill] sm:$0xff] %v4968_v11  ;;  %v4987_v11 = vld [vmem:[#allocation8 + $0x178] sm:$0xff]  ;;  %727 = vmatpush.msrb.mxu2 %v4981_v16  ;;  %688 = vmatpush.msra.mxu0 %v4989_v28 }
  0x9f   :  { %v3536_v14 = vmul.f32 -1.442695, %v188_v15  ;;  %8638 = vst [vmem:[#allocation54_spill] sm:$0xff] %v4981_v16  ;;  %v4996_v15 = vld [vmem:[#allocation8 + $0x150] sm:$0xff]  ;;  %747 = vmatpush.msrb.mxu3 %v4987_v11  ;;  %v5019_v16 = vld [vmem:[#allocation8 + $0x100] sm:$0xff] }
  0xa0   :  { %8639 = vst [vmem:[#allocation55_spill] sm:$0xff] %v4987_v11  ;;  %728 = vmatpush.msrb.mxu2 %v4996_v15  ;;  %689 = vmatpush.msra.mxu0 %v5005_v13 }
  0xa1   :  { %8640 = vst [vmem:[#allocation56_spill] sm:$0xff] %v4989_v28  ;;  %3608 = vpow2.f32 %v3536_v14  ;;  %748 = vmatpush.msrb.mxu3 %v5003_v17  ;;  %v5025_v28 = vld [vmem:[#allocation8 + $0x110] sm:$0xff] }
  0xa2   :  { %8642 = vst [vmem:[#allocation58_spill] sm:$0xff] %v4996_v15  ;;  %729 = vmatpush.msrb.mxu2 %v5013_v27  ;;  %v5030_v15 = vld [vmem:[#allocation8 + $0x118] sm:$0xff]  ;;  %690 = vmatpush.msra.mxu0 %v5019_v16 }
  0xa3   :  { %v5007_v14 = vpop.f32.mrf.mxu3  ;;  %8650 = vst [vmem:[#allocation66_spill] sm:$0xff] %v5019_v16  ;;  %749 = vmatpush.msrb.mxu3 %v5017_v33  ;;  %v5048_v16 = vld [vmem:[#allocation8 + $0xf0] sm:$0xff]  ;;  %v5071_v27 = vld [vmem:[#allocation8 + $0xd8] sm:$0xff] }
  0xa4   :  { %8646 = vst [vmem:[#allocation62_spill] sm:$0xff] %v5007_v14  ;;  %v5023_v14 = vld [vmem:[#allocation8 + $0x108] sm:$0xff]  ;;  %730 = vmatpush.msrb.mxu2 %v5025_v28 }
  0xa5   :  { %v228_v21 = vpop.f32.mrf.mxu1  ;;  %8651 = vst [vmem:[#allocation67_spill] sm:$0xff] %v5023_v14  ;;  %710 = vmatpush.msrb.mxu1 %v5023_v14  ;;  %750 = vmatpush.msrb.mxu3 %v5030_v15  ;;  %v5066_v14 = vld [vmem:[#allocation8 + $0xd0] sm:$0xff] }
  0xa6   :  { %8652 = vst [vmem:[#allocation68_spill] sm:$0xff] %v5025_v28  ;;  %v229_v11 = vadd.f32 %v228_v21, %v4999_v24  ;;  %v5041_v21 = vld [vmem:[#allocation8 + $0xe0] sm:$0xff]  ;;  %v5046_v24 = vld [vmem:[#allocation8 + $0xe8] sm:$0xff]  ;;  %731 = vmatpush.msrb.mxu2 %v5048_v16 }
  0xa7   :  { %8653 = vst [vmem:[#allocation69_spill] sm:$0xff] %v5030_v15  ;;  %v3609_v49 = vpop.eup %3608  ;;  %v5059_v15 = vpop.f32.mrf.mxu2  ;;  %691 = vmatpush.msra.mxu0 %v5041_v21  ;;  %v5064_v28 = vld [vmem:[#allocation8 + $0xc8] sm:$0xff]  ;;  %711 = vmatpush.msrb.mxu1 %v5046_v24 }
  0xa8   :  { %v5034_v17 = vadd.f32 1.0, %v3609_v49  ;;  %v3537_v13 = vmul.f32 -1.442695, %v229_v11  ;;  %8655 = vst [vmem:[#allocation71_spill] sm:$0xff] %v5041_v21  ;;  %v5055_v11 = vld [vmem:[#allocation8 + $0xf8] sm:$0xff]  ;;  %v5057_v49 = vld [vmem:[#allocation8 + $0xc0] sm:$0xff]  ;;  %732 = vmatpush.msrb.mxu2 %v5066_v14 }
  0xa9   :  { %8656 = vst [vmem:[#allocation72_spill] sm:$0xff] %v5046_v24  ;;  %751 = vmatpush.msrb.mxu3 %v5055_v11  ;;  %692 = vmatpush.msra.mxu0 %v5057_v49 }
  0xaa   :  { %8657 = vst [vmem:[#allocation73_spill] sm:$0xff] %v5048_v16  ;;  %3610 = vrcp.f32 %v5034_v17  ;;  %712 = vmatpush.msrb.mxu1 %v5064_v28  ;;  %vm545_vm1 = vweird.f32 %v5034_v17 }
  0xab   :  { %8658 = vst [vmem:[#allocation74_spill] sm:$0xff] %v5055_v11  ;;  %3612 = vpow2.f32 %v3537_v13  ;;  %v310_v2 = vpop.f32.mrf.mxu3  ;;  %v5073_v13 = vld [vmem:[#allocation8 + $0xa0] sm:$0xff]  ;;  %752 = vmatpush.msrb.mxu3 %v5071_v27  ;;  %v5089_v11 = vld [vmem:[#allocation8 + $0x88] sm:$0xff] }
  0xac   :  { %8659 = vst [vmem:[#allocation75_spill] sm:$0xff] %v5057_v49  ;;  %v311_v33 = vadd.f32 %v310_v2, %v5037_v20  ;;  %v5083_v2 = vld [vmem:[#allocation8 + $0xb8] sm:$0xff]  ;;  %v5085_v20 = vld [vmem:[#allocation8 + $0x80] sm:$0xff]  ;;  %693 = vmatpush.msra.mxu0 %v5073_v13  ;;  %v5091_v49 = vld [vmem:[#allocation8 + $0x90] sm:$0xff]  ;;  %713 = vmatpush.msrb.mxu1 %v5077_v12 }
  0xad   :  { %8660 = vst [vmem:[#allocation76_spill] sm:$0xff] %v5059_v15  ;;  %v5079_v15 = vld [vmem:[#allocation8 + $0xb0] sm:$0xff]  ;;  %753 = vmatpush.msrb.mxu3 %v5083_v2 }
  0xae   :  { %8661 = vst [vmem:[#allocation77_spill] sm:$0xff] %v5064_v28  ;;  %v3538_v21 = vmul.f32 -1.442695, %v311_v33  ;;  %733 = vmatpush.msrb.mxu2 %v5079_v15  ;;  %v5097_v33 = vld [vmem:[#allocation8 + $0x98] sm:$0xff]  ;;  %694 = vmatpush.msra.mxu0 %v5085_v20 }
  0xaf   :  { %8662 = vst [vmem:[#allocation78_spill] sm:$0xff] %v5066_v14  ;;  %714 = vmatpush.msrb.mxu1 %v5089_v11  ;;  %754 = vmatpush.msrb.mxu3 %v5097_v33 }
  0xb0   :  { %8663 = vst [vmem:[#allocation79_spill] sm:$0xff] %v5071_v27  ;;  %v5093_v16 = vpop.eup %3610  ;;  %3614 = vpow2.f32 %v3538_v21  ;;  %734 = vmatpush.msrb.mxu2 %v5091_v49  ;;  %v5107_v21 = vld [vmem:[#allocation8 + $0x60] sm:$0xff]  ;;  %v5114_v27 = vld [vmem:[#allocation8 + $0x70] sm:$0xff] }
  0xb1   :  { %8664 = vst [vmem:[#allocation80_spill] sm:$0xff] %v5073_v13  ;;  %v3613_v14 = vpop.eup %3612  ;;  %v541_v28 = vmul.f32 %v5093_v16, %v5034_v17  ;;  %v269_v23 = vpop.f32.mrf.mxu2  ;;  %695 = vmatpush.msra.mxu0 %v5107_v21  ;;  %vm546_vm2 = vweird.f32 %v5093_v16 }
  0xb2   :  { %8666 = vst [vmem:[#allocation82_spill] sm:$0xff] %v5079_v15  ;;  %v5103_v13 = vadd.f32 1.0, %v3613_v14  ;;  %v5112_v15 = vld [vmem:[#allocation8 + $0x68] sm:$0xff]  ;;  %v5118_v14 = vperm.slane %v4922_v19, 2  ;;  %v5133_v19 = vld [vmem:[#allocation8 + $0x50] sm:$0xff]  ;;  %735 = vmatpush.msrb.mxu2 %v5114_v27  ;;  %vm547_vm3 = vmor %vm545_vm1, %vm546_vm2 }
  0xb3   :  { %8667 = vst [vmem:[#allocation83_spill] sm:$0xff] %v5083_v2  ;;  %v542_v12 = vsub.f32 1.0, %v541_v28  ;;  %v5124_v28 = vld [vmem:[#allocation8 + $0x78] sm:$0xff]  ;;  %715 = vmatpush.msrb.mxu1 %v5112_v15  ;;  %v5139_v2 = vld [vmem:[#allocation8 + $0x20] sm:$0xff] }
  0xb4   :  { %8668 = vst [vmem:[#allocation84_spill] sm:$0xff] %v5085_v20  ;;  %3616 = vrcp.f32 %v5103_v13  ;;  %v5137_v20 = vld [vmem:[#allocation8 + $0x58] sm:$0xff]  ;;  %755 = vmatpush.msrb.mxu3 %v5124_v28  ;;  %736 = vmatpush.msrb.mxu2 %v5133_v19  ;;  %vm564_vm5 = vweird.f32 %v5103_v13 }
  0xb5   :  { %8669 = vst [vmem:[#allocation85_spill] sm:$0xff] %v5089_v11  ;;  %v543_v5 = vmul.f32 %v5093_v16, %v542_v12  ;;  %v5160_v12 = vld [vmem:[#allocation8 + $0x8] sm:$0xff] }
  0xb6   :  { %8670 = vst [vmem:[#allocation86_spill] sm:$0xff] %v5091_v49  ;;  %v5131_v49 = vld [vmem:[#allocation8 + $0x48] sm:$0xff]  ;;  %v3615_v11 = vpop.eup %3614  ;;  %756 = vmatpush.msrb.mxu3 %v5137_v20 }
  0xb7   :  { %8671 = vst [vmem:[#allocation87_spill] sm:$0xff] %v5097_v33  ;;  %v5126_v33 = vld [vmem:[#allocation8 + $0x40] sm:$0xff]  ;;  %v5141_v24 = vadd.f32 1.0, %v3615_v11  ;;  %716 = vmatpush.msrb.mxu1 %v5131_v49 }
  0xb8   :  { %8672 = vst [vmem:[#allocation88_spill] sm:$0xff] %v5107_v21  ;;  %696 = vmatpush.msra.mxu0 %v5126_v33  ;;  %v5148_v21 = vld [vmem:[#allocation8 + $0x30] sm:$0xff]  ;;  %v5155_v11 = vld [vmem:[#allocation8] sm:$0xff] }
  0xb9   :  { %8673 = vst [vmem:[#allocation89_spill] sm:$0xff] %v5112_v15  ;;  %v270_v15 = vadd.f32 %v269_v23, %v5118_v14  ;;  %3618 = vrcp.f32 %v5141_v24  ;;  %717 = vmatpush.msrb.mxu1 %v5146_v6  ;;  %737 = vmatpush.msrb.mxu2 %v5148_v21  ;;  %v5166_v23 = vld [vmem:[#allocation8 + $0x18] sm:$0xff]  ;;  %v549_v6 = vand.u32 2147483647, %v5034_v17  ;;  %vm584_vm10 = vweird.f32 %v5141_v24 }
  0xba   :  { %8674 = vst [vmem:[#allocation90_spill] sm:$0xff] %v5114_v27  ;;  %v5153_v27 = vld [vmem:[#allocation8 + $0x38] sm:$0xff]  ;;  %697 = vmatpush.msra.mxu0 %v5139_v2 }
  0xbb   :  { %8675 = vst [vmem:[#allocation91_spill] sm:$0xff] %v5118_v14  ;;  %757 = vmatpush.msrb.mxu3 %v5153_v27  ;;  %3620 = vtanh.f32 %v270_v15  ;;  %718 = vmatpush.msrb.mxu1 %v5160_v12  ;;  %vm550_vm6 = vcmp.eq.f32.partialorder %v549_v6, 8.507059e+37  ;;  %v5198_v6 = vld [vmem:[#allocation7 + $0x1f0] sm:$0xff] }
  0xbc   :  { %8676 = vst [vmem:[#allocation92_spill] sm:$0xff] %v5124_v28  ;;  %v3617_v28 = vpop.eup %3616  ;;  %698 = vmatpush.msra.mxu0 %v5155_v11 }
  0xbd   :  { %8677 = vst [vmem:[#allocation93_spill] sm:$0xff] %v5126_v33  ;;  %v5162_v33 = vld [vmem:[#allocation8 + $0x10] sm:$0xff]  ;;  %v560_v14 = vmul.f32 %v3617_v28, %v5103_v13  ;;  %758 = vmatpush.msrb.mxu3 %v5166_v23  ;;  %vm565_vm4 = vweird.f32 %v3617_v28 }
  0xbe   :  { %8678 = vst [vmem:[#allocation94_spill] sm:$0xff] %v5131_v49  ;;  %738 = vmatpush.msrb.mxu2 %v5162_v33  ;;  %vm566_vm7 = vmor %vm564_vm5, %vm565_vm4 }
  0xbf   :  { %8679 = vst [vmem:[#allocation95_spill] sm:$0xff] %v5133_v19  ;;  %v544_v19 = vadd.f32 %v5093_v16, %v543_v5  ;;  %v570_v5 = vand.u32 2147483648, %v5103_v13 }
  0xc0   :  { %8680 = vst [vmem:[#allocation96_spill] sm:$0xff] %v5137_v20  ;;  %v3619_v20 = vpop.eup %3618 }
  0xc1   :  { %8681 = vst [vmem:[#allocation97_spill] sm:$0xff] %v5139_v2  ;;  %v551_v2 = vand.u32 2147483648, %v5034_v17  ;;  %v580_v15 = vmul.f32 %v3619_v20, %v5141_v24  ;;  %v3621_v17 = vpop.eup %3620  ;;  %vm585_vm9 = vweird.f32 %v3619_v20 }
  0xc2   :  { %8683 = vst [vmem:[#allocation99_spill] sm:$0xff] %v5148_v21  ;;  %v561_v21 = vsub.f32 1.0, %v560_v14  ;;  %vm586_vm11 = vmor %vm584_vm10, %vm585_vm9 }
  0xc3   :  { %8684 = vst [vmem:[#allocation100_spill] sm:$0xff] %v5153_v27  ;;  %v548_v27 = vsel %vm547_vm3, %v5093_v16, %v544_v19 }
  0xc4   :  { %8685 = vst [vmem:[#allocation101_spill] sm:$0xff] %v5155_v11  ;;  %v562_v49 = vmul.f32 %v3617_v28, %v561_v21  ;;  %v568_v11 = vand.u32 2147483647, %v5103_v13 }
  0xc5   :  { %8686 = vst [vmem:[#allocation102_spill] sm:$0xff] %v5160_v12  ;;  %v552_v12 = vor.u32 1.1754944e-38, %v551_v2  ;;  %v590_v2 = vand.u32 2147483648, %v5141_v24 }
  0xc6   :  { %8687 = vst [vmem:[#allocation103_spill] sm:$0xff] %v5162_v33  ;;  %v563_v14 = vadd.f32 %v3617_v28, %v562_v49  ;;  %v571_v33 = vor.u32 1.1754944e-38, %v570_v5  ;;  %vm569_vm8 = vcmp.eq.f32.partialorder %v568_v11, 8.507059e+37  ;;  %v588_v49 = vand.u32 2147483647, %v5141_v24  ;;  %v5200_v11 = vld [vmem:[#allocation7 + $0x1f8] sm:$0xff] }
  0xc7   :  { %8688 = vst [vmem:[#allocation104_spill] sm:$0xff] %v5166_v23  ;;  %v581_v23 = vsub.f32 1.0, %v580_v15  ;;  %v553_v18 = vsel %vm550_vm6, %v552_v12, %v548_v27  ;;  %v591_v13 = vor.u32 1.1754944e-38, %v590_v2  ;;  %v5210_v24 = vld [vmem:[#allocation7 + $0x1d0] sm:$0xff]  ;;  %v5212_v12 = vld [vmem:[#allocation7 + $0x1d8] sm:$0xff]  ;;  %v5218_v5 = vld [vmem:[#allocation7 + $0x1a8] sm:$0xff] }
  0xc8   :  { %v567_v10 = vsel %vm566_vm7, %v3617_v28, %v563_v14  ;;  %v595_v19 = vmul.f32 %v3621_v17, %v553_v18  ;;  %vm589_vm12 = vcmp.eq.f32.partialorder %v588_v49, 8.507059e+37  ;;  %v5192_v18 = vld [vmem:[#allocation7 + $0x1e0] sm:$0xff]  ;;  %v5222_v15 = vld [vmem:[#allocation7 + $0x1b0] sm:$0xff]  ;;  %v5224_v14 = vld [vmem:[#allocation7 + $0x1b8] sm:$0xff] }
  0xc9   :  { %v582_v21 = vmul.f32 %v3619_v20, %v581_v23  ;;  %v572_v9 = vsel %vm569_vm8, %v571_v33, %v567_v10  ;;  %v5194_v33 = vld [vmem:[#allocation7 + $0x1e8] sm:$0xff]  ;;  %v5216_v23 = vld [vmem:[#allocation7 + $0x1a0] sm:$0xff]  ;;  %8689 = vst [vmem:[#allocation105_spill] sm:$0xff] %v5224_v14 }
  0xca   :  { %v594_v16 = vmul.f32 0.0, %v572_v9  ;;  %v5228_v17 = vld [vmem:[#allocation7 + $0x180] sm:$0xff]  ;;  %v5242_v49 = vld [vmem:[#allocation7 + $0x168] sm:$0xff] }
  0xcb   :  { %v583_v7 = vadd.f32 %v3619_v20, %v582_v21  ;;  %8690 = vst [vmem:[#allocation106_spill] sm:$0xff] %v5228_v17  ;;  %v5230_v21 = vld [vmem:[#allocation7 + $0x188] sm:$0xff]  ;;  %v5240_v2 = vld [vmem:[#allocation7 + $0x160] sm:$0xff] }
  0xcc   :  { %v5184_v8 = vadd.f32 %v595_v19, %v594_v16  ;;  %8691 = vst [vmem:[#allocation107_spill] sm:$0xff] %v5230_v21  ;;  %v5234_v16 = vld [vmem:[#allocation7 + $0x190] sm:$0xff]  ;;  %v5236_v19 = vld [vmem:[#allocation7 + $0x198] sm:$0xff] }
  0xcd   :  { %v587_v27 = vsel %vm586_vm11, %v3619_v20, %v583_v7  ;;  %v5204_v7 = vld [vmem:[#allocation7 + $0x1c0] sm:$0xff]  ;;  %v5206_v20 = vld [vmem:[#allocation7 + $0x1c8] sm:$0xff]  ;;  %8692 = vst [vmem:[#allocation108_spill] sm:$0xff] %v5234_v16 }
  0xce   :  { %3622 = vtanh.f32 %v5184_v8  ;;  %v592_v10 = vsel %vm589_vm12, %v591_v13, %v587_v27  ;;  %8693 = vst [vmem:[#allocation109_spill] sm:$0xff] %v5236_v19  ;;  %v5246_v27 = vld [vmem:[#allocation7 + $0x170] sm:$0xff]  ;;  %v5248_v13 = vld [vmem:[#allocation7 + $0x178] sm:$0xff] }
  0xcf   :  { %8694 = vst [vmem:[#allocation110_spill] sm:$0xff] %v5240_v2 }
  0xd0   :  { %8695 = vst [vmem:[#allocation111_spill] sm:$0xff] %v5242_v49 }
  0xd1   :  { %8696 = vst [vmem:[#allocation112_spill] sm:$0xff] %v5246_v27 }
  0xd2   :  { %8697 = vst [vmem:[#allocation113_spill] sm:$0xff] %v5248_v13 }
  0xd4   :  { %v3623_v28 = vpop.eup %3622 }
  0xd5   :  { %v5190_v9 = vmul.f32 %v3623_v28, %v592_v10  ;;  %v5252_v28 = vld [vmem:[#allocation7 + $0x140] sm:$0xff]  ;;  %v5254_v10 = vld [vmem:[#allocation7 + $0x148] sm:$0xff] }
  0xd6   :  { %8698 = vst [vmem:[#allocation114_spill] sm:$0xff] %v5252_v28 }
  0xd7   :  { %615 = vmatmul.f32.vlgmr.msrb.gmra.mxu0 %v5190_v9  ;;  %635 = vmatmul.f32.vlgmr.msra.gmra.mxu1 %v5190_v9  ;;  %8699 = vst [vmem:[#allocation115_spill] sm:$0xff] %v5254_v10 }
  0xd8   :  { %655 = vmatmul.f32.vlgmr.msra.gmra.mxu2 %v5190_v9  ;;  %675 = vmatmul.f32.vlgmr.msra.gmra.mxu3 %v5190_v9 }
  0xd9   :  { %763 = vmatpush.msrb.mxu0 %v5192_v18  ;;  %783 = vmatpush.msra.mxu1 %v5194_v33 }
  0xda   :  { %803 = vmatpush.msra.mxu2 %v5198_v6  ;;  %823 = vmatpush.msra.mxu3 %v5200_v11 }
  0xdb   :  { %764 = vmatpush.msrb.mxu0 %v5204_v7  ;;  %784 = vmatpush.msra.mxu1 %v5206_v20 }
  0xdc   :  { %804 = vmatpush.msra.mxu2 %v5210_v24  ;;  %824 = vmatpush.msra.mxu3 %v5212_v12 }
  0xdd   :  { %765 = vmatpush.msrb.mxu0 %v5216_v23  ;;  %785 = vmatpush.msra.mxu1 %v5218_v5 }
  0xde   :  { %805 = vmatpush.msra.mxu2 %v5222_v15  ;;  %825 = vmatpush.msra.mxu3 %v5224_v14  ;;  %v5258_v14 = vld [vmem:[#allocation7 + $0x150] sm:$0xff] }
  0xdf   :  { %766 = vmatpush.msrb.mxu0 %v5228_v17  ;;  %786 = vmatpush.msra.mxu1 %v5230_v21  ;;  %8700 = vst [vmem:[#allocation116_spill] sm:$0xff] %v5258_v14  ;;  %v5260_v17 = vld [vmem:[#allocation7 + $0x158] sm:$0xff]  ;;  %v5264_v21 = vld [vmem:[#allocation7 + $0x120] sm:$0xff] }
  0xe0   :  { %806 = vmatpush.msra.mxu2 %v5234_v16  ;;  %826 = vmatpush.msra.mxu3 %v5236_v19  ;;  %8701 = vst [vmem:[#allocation117_spill] sm:$0xff] %v5260_v17  ;;  %v5266_v16 = vld [vmem:[#allocation7 + $0x128] sm:$0xff]  ;;  %v5270_v19 = vld [vmem:[#allocation7 + $0x130] sm:$0xff] }
  0xe1   :  { %767 = vmatpush.msrb.mxu0 %v5240_v2  ;;  %787 = vmatpush.msra.mxu1 %v5242_v49  ;;  %8702 = vst [vmem:[#allocation118_spill] sm:$0xff] %v5264_v21  ;;  %v5272_v2 = vld [vmem:[#allocation7 + $0x138] sm:$0xff]  ;;  %v5276_v49 = vld [vmem:[#allocation7 + $0x100] sm:$0xff] }
  0xe2   :  { %807 = vmatpush.msra.mxu2 %v5246_v27  ;;  %827 = vmatpush.msra.mxu3 %v5248_v13  ;;  %8703 = vst [vmem:[#allocation119_spill] sm:$0xff] %v5266_v16  ;;  %v5278_v27 = vld [vmem:[#allocation7 + $0x108] sm:$0xff]  ;;  %v5282_v13 = vld [vmem:[#allocation7 + $0x110] sm:$0xff] }
  0xe3   :  { %768 = vmatpush.msrb.mxu0 %v5252_v28  ;;  %788 = vmatpush.msra.mxu1 %v5254_v10  ;;  %8704 = vst [vmem:[#allocation120_spill] sm:$0xff] %v5270_v19  ;;  %v5284_v28 = vld [vmem:[#allocation7 + $0x118] sm:$0xff]  ;;  %v5288_v10 = vld [vmem:[#allocation7 + $0xe0] sm:$0xff] }
  0xe4   :  { %8705 = vst [vmem:[#allocation121_spill] sm:$0xff] %v5272_v2  ;;  %808 = vmatpush.msra.mxu2 %v5258_v14  ;;  %828 = vmatpush.msra.mxu3 %v5260_v17  ;;  %v5290_v14 = vld [vmem:[#allocation7 + $0xe8] sm:$0xff]  ;;  %v5294_v17 = vld [vmem:[#allocation7 + $0xf0] sm:$0xff] }
  0xe5   :  { %8706 = vst [vmem:[#allocation122_spill] sm:$0xff] %v5276_v49  ;;  %769 = vmatpush.msrb.mxu0 %v5264_v21  ;;  %789 = vmatpush.msra.mxu1 %v5266_v16  ;;  %v5296_v21 = vld [vmem:[#allocation7 + $0xf8] sm:$0xff]  ;;  %v5300_v16 = vld [vmem:[#allocation7 + $0xc0] sm:$0xff] }
  0xe6   :  { %8707 = vst [vmem:[#allocation123_spill] sm:$0xff] %v5278_v27  ;;  %809 = vmatpush.msra.mxu2 %v5270_v19  ;;  %829 = vmatpush.msra.mxu3 %v5272_v2  ;;  %v5302_v19 = vld [vmem:[#allocation7 + $0xc8] sm:$0xff]  ;;  %v5306_v2 = vld [vmem:[#allocation7 + $0xd0] sm:$0xff] }
  0xe7   :  { %8708 = vst [vmem:[#allocation124_spill] sm:$0xff] %v5282_v13  ;;  %770 = vmatpush.msrb.mxu0 %v5276_v49  ;;  %790 = vmatpush.msra.mxu1 %v5278_v27  ;;  %v5308_v49 = vld [vmem:[#allocation7 + $0xd8] sm:$0xff]  ;;  %v5312_v27 = vld [vmem:[#allocation7 + $0xa0] sm:$0xff] }
  0xe8   :  { %8709 = vst [vmem:[#allocation125_spill] sm:$0xff] %v5284_v28  ;;  %810 = vmatpush.msra.mxu2 %v5282_v13  ;;  %830 = vmatpush.msra.mxu3 %v5284_v28  ;;  %v5314_v13 = vld [vmem:[#allocation7 + $0xa8] sm:$0xff]  ;;  %v5318_v28 = vld [vmem:[#allocation7 + $0xb0] sm:$0xff] }
  0xe9   :  { %8710 = vst [vmem:[#allocation126_spill] sm:$0xff] %v5288_v10  ;;  %771 = vmatpush.msrb.mxu0 %v5288_v10  ;;  %791 = vmatpush.msra.mxu1 %v5290_v14  ;;  %v5320_v10 = vld [vmem:[#allocation7 + $0xb8] sm:$0xff] }
  0xea   :  { %8711 = vst [vmem:[#allocation127_spill] sm:$0xff] %v5290_v14  ;;  %811 = vmatpush.msra.mxu2 %v5294_v17  ;;  %831 = vmatpush.msra.mxu3 %v5296_v21  ;;  %v5324_v14 = vld [vmem:[#allocation7 + $0x80] sm:$0xff] }
  0xeb   :  { %8712 = vst [vmem:[#allocation128_spill] sm:$0xff] %v5294_v17  ;;  %772 = vmatpush.msrb.mxu0 %v5300_v16  ;;  %792 = vmatpush.msra.mxu1 %v5302_v19  ;;  %v5326_v17 = vld [vmem:[#allocation7 + $0x88] sm:$0xff] }
  0xec   :  { %8713 = vst [vmem:[#allocation129_spill] sm:$0xff] %v5296_v21  ;;  %812 = vmatpush.msra.mxu2 %v5306_v2  ;;  %832 = vmatpush.msra.mxu3 %v5308_v49  ;;  %v5330_v21 = vld [vmem:[#allocation7 + $0x90] sm:$0xff] }
  0xed   :  { %8714 = vst [vmem:[#allocation130_spill] sm:$0xff] %v5300_v16  ;;  %773 = vmatpush.msrb.mxu0 %v5312_v27  ;;  %793 = vmatpush.msra.mxu1 %v5314_v13  ;;  %v5332_v16 = vld [vmem:[#allocation7 + $0x98] sm:$0xff] }
  0xee   :  { %8715 = vst [vmem:[#allocation131_spill] sm:$0xff] %v5302_v19  ;;  %813 = vmatpush.msra.mxu2 %v5318_v28  ;;  %833 = vmatpush.msra.mxu3 %v5320_v10  ;;  %v5362_v19 = vld [vmem:[#allocation7 + $0x28] sm:$0xff] }
  0xef   :  { %8716 = vst [vmem:[#allocation132_spill] sm:$0xff] %v5306_v2  ;;  %774 = vmatpush.msrb.mxu0 %v5324_v14  ;;  %794 = vmatpush.msra.mxu1 %v5326_v17  ;;  %v5344_v2 = vld [vmem:[#allocation7 + $0x70] sm:$0xff] }
  0xf0   :  { %8717 = vst [vmem:[#allocation133_spill] sm:$0xff] %v5308_v49  ;;  %814 = vmatpush.msra.mxu2 %v5330_v21  ;;  %834 = vmatpush.msra.mxu3 %v5332_v16  ;;  %v5340_v49 = vld [vmem:[#allocation7 + $0x60] sm:$0xff] }
  0xf1   :  { %8718 = vst [vmem:[#allocation134_spill] sm:$0xff] %v5312_v27  ;;  %v5342_v27 = vld [vmem:[#allocation7 + $0x68] sm:$0xff]  ;;  %775 = vmatpush.msrb.mxu0 %v5340_v49 }
  0xf2   :  { %8719 = vst [vmem:[#allocation135_spill] sm:$0xff] %v5314_v13  ;;  %v4601_v13 = vmov 0.0   ;;  %795 = vmatpush.msra.mxu1 %v5342_v27  ;;  %815 = vmatpush.msra.mxu2 %v5344_v2 }
  0xf3   :  { %8720 = vst [vmem:[#allocation136_spill] sm:$0xff] %v5318_v28  ;;  %699 = vmatmul.f32.vlgmr.msra.gmra.mxu0 %v4601_v13  ;;  %719 = vmatmul.f32.vlgmr.msrb.gmra.mxu1 %v4601_v13  ;;  %v5346_v28 = vld [vmem:[#allocation7 + $0x78] sm:$0xff] }
  0xf4   :  { %8721 = vst [vmem:[#allocation137_spill] sm:$0xff] %v5320_v10  ;;  %739 = vmatmul.f32.vlgmr.msrb.gmra.mxu2 %v4601_v13  ;;  %759 = vmatmul.f32.vlgmr.msrb.gmra.mxu3 %v4601_v13  ;;  %v5360_v10 = vld [vmem:[#allocation7 + $0x20] sm:$0xff]  ;;  %v5366_v13 = vld [vmem:[#allocation7 + $0x30] sm:$0xff] }
  0xf5   :  { %8722 = vst [vmem:[#allocation138_spill] sm:$0xff] %v5324_v14  ;;  %v5348_v14 = vld [vmem:[#allocation7 + $0x40] sm:$0xff]  ;;  %835 = vmatpush.msra.mxu3 %v5346_v28 }
  0xf6   :  { %8723 = vst [vmem:[#allocation139_spill] sm:$0xff] %v5326_v17  ;;  %v5350_v17 = vld [vmem:[#allocation7 + $0x48] sm:$0xff]  ;;  %776 = vmatpush.msrb.mxu0 %v5348_v14 }
  0xf7   :  { %8724 = vst [vmem:[#allocation140_spill] sm:$0xff] %v5330_v21  ;;  %v5356_v21 = vld [vmem:[#allocation7 + $0x58] sm:$0xff]  ;;  %796 = vmatpush.msra.mxu1 %v5350_v17 }
  0xf8   :  { %8725 = vst [vmem:[#allocation141_spill] sm:$0xff] %v5332_v16  ;;  %v5354_v16 = vld [vmem:[#allocation7 + $0x50] sm:$0xff]  ;;  %836 = vmatpush.msra.mxu3 %v5356_v21  ;;  %777 = vmatpush.msrb.mxu0 %v5360_v10 }
  0xf9   :  { %8726 = vst [vmem:[#allocation142_spill] sm:$0xff] %v5340_v49  ;;  %v5368_v49 = vld [vmem:[#allocation7 + $0x38] sm:$0xff]  ;;  %816 = vmatpush.msra.mxu2 %v5354_v16  ;;  %797 = vmatpush.msra.mxu1 %v5362_v19 }
  0xfa   :  { %8727 = vst [vmem:[#allocation143_spill] sm:$0xff] %v5342_v27  ;;  %v5372_v27 = vld [vmem:[#allocation7] sm:$0xff]  ;;  %837 = vmatpush.msra.mxu3 %v5368_v49 }
  0xfb   :  { %8728 = vst [vmem:[#allocation144_spill] sm:$0xff] %v5344_v2  ;;  %v5374_v2 = vld [vmem:[#allocation7 + $0x8] sm:$0xff]  ;;  %817 = vmatpush.msra.mxu2 %v5366_v13  ;;  %778 = vmatpush.msrb.mxu0 %v5372_v27 }
  0xfc   :  { %8729 = vst [vmem:[#allocation145_spill] sm:$0xff] %v5346_v28  ;;  %v5378_v28 = vld [vmem:[#allocation7 + $0x10] sm:$0xff]  ;;  %798 = vmatpush.msra.mxu1 %v5374_v2  ;;  %779 = vmatmul.f32.vlgmr.msrb.gmra.mxu0 %v5190_v9 }
  0xfd   :  { %8730 = vst [vmem:[#allocation146_spill] sm:$0xff] %v5348_v14  ;;  %v5380_v14 = vld [vmem:[#allocation7 + $0x18] sm:$0xff]  ;;  %818 = vmatpush.msra.mxu2 %v5378_v28  ;;  %799 = vmatmul.f32.vlgmr.msra.gmra.mxu1 %v5190_v9 }
  0xfe   :  { %8731 = vst [vmem:[#allocation147_spill] sm:$0xff] %v5362_v19  ;;  %838 = vmatpush.msra.mxu3 %v5380_v14  ;;  %819 = vmatmul.f32.vlgmr.msra.gmra.mxu2 %v5190_v9  ;;  %v5392_v19 = vld [vmem:[#allocation5 + $0x1e0] sm:$0xff] }
  0xff   :  { %8732 = vst [vmem:[#allocation148_spill] sm:$0xff] %v5368_v49  ;;  %839 = vmatmul.f32.vlgmr.msra.gmra.mxu3 %v5190_v9  ;;  %973 = vmatpush.msra.mxu0 %v5392_v19  ;;  %v5395_v49 = vld [vmem:[#allocation5 + $0x1e8] sm:$0xff]  ;;  %v5406_v9 = vld [vmem:[#allocation5 + $0x1a0] sm:$0xff] }
 0x100   :  { %8733 = vst [vmem:[#allocation149_spill] sm:$0xff] %v5380_v14  ;;  %993 = vmatpush.msrb.mxu1 %v5395_v49  ;;  %1013 = vmatpush.msrb.mxu2 %v4712_v31  ;;  %v5400_v14 = vld [vmem:[#allocation5 + $0x1c0] sm:$0xff]  ;;  %v5454_v31 = vpop.f32.mrf.mxu3 }
 0x101   :  { %1033 = vmatpush.msrb.mxu3 %v4696_v22  ;;  %974 = vmatpush.msra.mxu0 %v5400_v14  ;;  %v5412_v22 = vld [vmem:[#allocation5 + $0x180] sm:$0xff] }
 0x102   :  { %994 = vmatpush.msrb.mxu1 %v4702_v25  ;;  %1014 = vmatpush.msrb.mxu2 %v4723_v34  ;;  %v5418_v25 = vld [vmem:[#allocation5 + $0x160] sm:$0xff] }
 0x103   :  { %1034 = vmatpush.msrb.mxu3 %v4704_v26  ;;  %975 = vmatpush.msra.mxu0 %v5406_v9  ;;  %v5438_v26 = vpop.f32.mrf.mxu1  ;;  %v8737_v34 = vld [vmem:[#allocation19_spill] sm:$0xff] }
 0x104   :  { %995 = vmatpush.msrb.mxu1 %v4707_v29  ;;  %1015 = vmatpush.msrb.mxu2 %v4732_v37  ;;  %v8734_v29 = vld [vmem:[#allocation16_spill] sm:$0xff]  ;;  %v8740_v37 = vld [vmem:[#allocation22_spill] sm:$0xff] }
 0x105   :  { %1035 = vmatpush.msrb.mxu3 %v4710_v30  ;;  %976 = vmatpush.msra.mxu0 %v5412_v22  ;;  %v8735_v30 = vld [vmem:[#allocation17_spill] sm:$0xff] }
 0x106   :  { %996 = vmatpush.msrb.mxu1 %v4715_v32  ;;  %1016 = vmatpush.msrb.mxu2 %v4740_v39  ;;  %v8736_v32 = vld [vmem:[#allocation18_spill] sm:$0xff] }
 0x107   :  { %1036 = vmatpush.msrb.mxu3 %v4726_v35  ;;  %977 = vmatpush.msra.mxu0 %v5418_v25  ;;  %v8738_v35 = vld [vmem:[#allocation20_spill] sm:$0xff] }
 0x108   :  { %997 = vmatpush.msrb.mxu1 %v4730_v36  ;;  %1017 = vmatpush.msrb.mxu2 %v4746_v40  ;;  %v8739_v36 = vld [vmem:[#allocation21_spill] sm:$0xff]  ;;  %v8742_v40 = vld [vmem:[#allocation24_spill] sm:$0xff] }
 0x109   :  { %1037 = vmatpush.msrb.mxu3 %v4736_v38  ;;  %978 = vmatpush.msra.mxu0 %v4751_v41  ;;  %v8741_v38 = vld [vmem:[#allocation23_spill] sm:$0xff]  ;;  %v8743_v41 = vld [vmem:[#allocation25_spill] sm:$0xff] }
 0x10a   :  { %998 = vmatpush.msrb.mxu1 %v4753_v42  ;;  %1018 = vmatpush.msrb.mxu2 %v4755_v43  ;;  %v8744_v42 = vld [vmem:[#allocation26_spill] sm:$0xff]  ;;  %v8745_v43 = vld [vmem:[#allocation27_spill] sm:$0xff] }
 0x10b   :  { %1038 = vmatpush.msrb.mxu3 %v4759_v44  ;;  %979 = vmatpush.msra.mxu0 %v4763_v45  ;;  %v5462_v39 = vpop.f32.mrf.mxu1  ;;  %v8746_v44 = vld [vmem:[#allocation28_spill] sm:$0xff]  ;;  %v8747_v45 = vld [vmem:[#allocation29_spill] sm:$0xff] }
 0x10c   :  { %999 = vmatpush.msrb.mxu1 %v4765_v46  ;;  %1019 = vmatpush.msrb.mxu2 %v4767_v47  ;;  %v8748_v46 = vld [vmem:[#allocation30_spill] sm:$0xff]  ;;  %v8749_v47 = vld [vmem:[#allocation31_spill] sm:$0xff] }
 0x10d   :  { %1039 = vmatpush.msrb.mxu3 %v4771_v48  ;;  %980 = vmatpush.msra.mxu0 %v4780_v50  ;;  %v8750_v48 = vld [vmem:[#allocation32_spill] sm:$0xff]  ;;  %v8751_v50 = vld [vmem:[#allocation33_spill] sm:$0xff] }
 0x10e   :  { %1000 = vmatpush.msrb.mxu1 %v4782_v51  ;;  %1020 = vmatpush.msrb.mxu2 %v4788_v52  ;;  %v8752_v51 = vld [vmem:[#allocation34_spill] sm:$0xff]  ;;  %v8753_v52 = vld [vmem:[#allocation35_spill] sm:$0xff] }
 0x10f   :  { %1040 = vmatpush.msrb.mxu3 %v4790_v53  ;;  %981 = vmatpush.msra.mxu0 %v4795_v54  ;;  %v8754_v53 = vld [vmem:[#allocation36_spill] sm:$0xff]  ;;  %v8755_v54 = vld [vmem:[#allocation37_spill] sm:$0xff] }
 0x110   :  { %1001 = vmatpush.msrb.mxu1 %v4797_v55  ;;  %1021 = vmatpush.msrb.mxu2 %v4799_v56  ;;  %v5478_v55 = vpop.f32.mrf.mxu2  ;;  %v5480_v56 = vpop.f32.mrf.mxu3 }
 0x111   :  { %1041 = vmatpush.msrb.mxu3 %v4803_v57  ;;  %982 = vmatpush.msra.mxu0 %v4809_v58  ;;  %v8756_v57 = vld [vmem:[#allocation38_spill] sm:$0xff]  ;;  %v8757_v58 = vld [vmem:[#allocation39_spill] sm:$0xff] }
 0x112   :  { %1002 = vmatpush.msrb.mxu1 %v4811_v59  ;;  %1022 = vmatpush.msrb.mxu2 %v4813_v60  ;;  %v8758_v59 = vld [vmem:[#allocation40_spill] sm:$0xff]  ;;  %v8759_v60 = vld [vmem:[#allocation41_spill] sm:$0xff] }
 0x113   :  { %1042 = vmatpush.msrb.mxu3 %v4817_v61  ;;  %983 = vmatpush.msra.mxu0 %v4821_v62  ;;  %v8760_v61 = vld [vmem:[#allocation42_spill] sm:$0xff]  ;;  %v8761_v62 = vld [vmem:[#allocation44_spill] sm:$0xff] }
 0x114   :  { %1003 = vmatpush.msrb.mxu1 %v4823_v63  ;;  %1023 = vmatpush.msrb.mxu2 %v4825_v0  ;;  %v5488_v63 = vpop.f32.mrf.mxu1  ;;  %v8763_v0 = vld [vmem:[#allocation45_spill] sm:$0xff] }
 0x115   :  { %1043 = vmatpush.msrb.mxu3 %v4829_v1  ;;  %984 = vmatpush.msra.mxu0 %v4838_v3  ;;  %8762 = vst [vmem:[#allocation16_spill] sm:$0xff] %v5488_v63  ;;  %v8764_v1 = vld [vmem:[#allocation46_spill] sm:$0xff]  ;;  %v8765_v3 = vld [vmem:[#allocation47_spill] sm:$0xff] }
 0x116   :  { %1004 = vmatpush.msrb.mxu1 %v4840_v4  ;;  %1024 = vmatpush.msrb.mxu2 %v8734_v29  ;;  %v8766_v4 = vld [vmem:[#allocation48_spill] sm:$0xff]  ;;  %v8767_v29 = vld [vmem:[#allocation49_spill] sm:$0xff]  ;;  %v5866_v63 = vld [vmem:[#allocation5 + $0x58] sm:$0xff] }
 0x117   :  { %1044 = vmatpush.msrb.mxu3 %v8735_v30  ;;  %985 = vmatpush.msra.mxu0 %v8736_v32  ;;  %v8768_v30 = vld [vmem:[#allocation50_spill] sm:$0xff]  ;;  %v8769_v32 = vld [vmem:[#allocation52_spill] sm:$0xff] }
 0x118   :  { %1005 = vmatpush.msrb.mxu1 %v8737_v34  ;;  %1025 = vmatpush.msrb.mxu2 %v8738_v35  ;;  %v8770_v34 = vld [vmem:[#allocation53_spill] sm:$0xff]  ;;  %v8771_v35 = vld [vmem:[#allocation54_spill] sm:$0xff] }
 0x119   :  { %1045 = vmatpush.msrb.mxu3 %v8739_v36  ;;  %986 = vmatpush.msra.mxu0 %v8740_v37  ;;  %v8772_v36 = vld [vmem:[#allocation55_spill] sm:$0xff]  ;;  %v8773_v37 = vld [vmem:[#allocation56_spill] sm:$0xff] }
 0x11a   :  { %1006 = vmatpush.msrb.mxu1 %v8741_v38  ;;  %1026 = vmatpush.msrb.mxu2 %v8742_v40  ;;  %v8774_v38 = vld [vmem:[#allocation57_spill] sm:$0xff]  ;;  %v8775_v40 = vld [vmem:[#allocation58_spill] sm:$0xff]  ;;  %8902 = vst [vmem:[#allocation55_spill] sm:$0xff] %v5866_v63 }
 0x11b   :  { %1046 = vmatpush.msrb.mxu3 %v8743_v41  ;;  %987 = vmatpush.msra.mxu0 %v8744_v42  ;;  %v8776_v41 = vld [vmem:[#allocation60_spill] sm:$0xff]  ;;  %v5504_v42 = vpop.f32.mrf.mxu2 }
 0x11c   :  { %1007 = vmatpush.msrb.mxu1 %v8745_v43  ;;  %1027 = vmatpush.msrb.mxu2 %v8746_v44  ;;  %v5506_v43 = vpop.f32.mrf.mxu3  ;;  %v8778_v44 = vld [vmem:[#allocation61_spill] sm:$0xff] }
 0x11d   :  { %1047 = vmatpush.msrb.mxu3 %v8747_v45  ;;  %988 = vmatpush.msra.mxu0 %v8748_v46  ;;  %8777 = vst [vmem:[#allocation17_spill] sm:$0xff] %v5506_v43  ;;  %v8779_v45 = vld [vmem:[#allocation63_spill] sm:$0xff]  ;;  %v8780_v46 = vld [vmem:[#allocation64_spill] sm:$0xff] }
 0x11e   :  { %1008 = vmatpush.msrb.mxu1 %v8749_v47  ;;  %1028 = vmatpush.msrb.mxu2 %v8750_v48  ;;  %v8781_v47 = vld [vmem:[#allocation65_spill] sm:$0xff]  ;;  %v8782_v48 = vld [vmem:[#allocation66_spill] sm:$0xff]  ;;  %v5860_v43 = vld [vmem:[#allocation5 + $0x48] sm:$0xff] }
 0x11f   :  { %1048 = vmatpush.msrb.mxu3 %v8751_v50  ;;  %1057 = vmatpush.msrb.mxu0 %v8752_v51  ;;  %v8783_v50 = vld [vmem:[#allocation67_spill] sm:$0xff]  ;;  %v190_v51 = vpop.f32.mrf.mxu0  ;;  %8900 = vst [vmem:[#allocation53_spill] sm:$0xff] %v5860_v43 }
 0x120   :  { %1077 = vmatpush.msra.mxu1 %v8753_v52  ;;  %1097 = vmatpush.msra.mxu2 %v8754_v53  ;;  %v5514_v52 = vpop.f32.mrf.mxu1  ;;  %v8785_v53 = vld [vmem:[#allocation68_spill] sm:$0xff] }
 0x121   :  { %1117 = vmatpush.msra.mxu3 %v8755_v54  ;;  %1058 = vmatpush.msrb.mxu0 %v8756_v57  ;;  %8784 = vst [vmem:[#allocation18_spill] sm:$0xff] %v5514_v52  ;;  %v8786_v54 = vld [vmem:[#allocation69_spill] sm:$0xff]  ;;  %v8787_v57 = vld [vmem:[#allocation71_spill] sm:$0xff] }
 0x122   :  { %1078 = vmatpush.msra.mxu1 %v8757_v58  ;;  %1098 = vmatpush.msra.mxu2 %v8758_v59  ;;  %v8788_v58 = vld [vmem:[#allocation72_spill] sm:$0xff]  ;;  %v8789_v59 = vld [vmem:[#allocation73_spill] sm:$0xff] }
 0x123   :  { %1118 = vmatpush.msra.mxu3 %v8759_v60  ;;  %1059 = vmatpush.msrb.mxu0 %v8760_v61  ;;  %v8790_v60 = vld [vmem:[#allocation74_spill] sm:$0xff]  ;;  %v8791_v61 = vld [vmem:[#allocation75_spill] sm:$0xff] }
 0x124   :  { %1079 = vmatpush.msra.mxu1 %v8761_v62  ;;  %1099 = vmatpush.msra.mxu2 %v8763_v0  ;;  %v8792_v62 = vld [vmem:[#allocation77_spill] sm:$0xff]  ;;  %v8793_v0 = vld [vmem:[#allocation78_spill] sm:$0xff] }
 0x125   :  { %1119 = vmatpush.msra.mxu3 %v8764_v1  ;;  %1060 = vmatpush.msrb.mxu0 %v8765_v3  ;;  %v8794_v1 = vld [vmem:[#allocation79_spill] sm:$0xff]  ;;  %v8795_v3 = vld [vmem:[#allocation80_spill] sm:$0xff] }
 0x126   :  { %1080 = vmatpush.msra.mxu1 %v8766_v4  ;;  %1100 = vmatpush.msra.mxu2 %v8767_v29  ;;  %v8796_v4 = vld [vmem:[#allocation81_spill] sm:$0xff]  ;;  %v8797_v29 = vld [vmem:[#allocation82_spill] sm:$0xff] }
 0x127   :  { %1120 = vmatpush.msra.mxu3 %v8768_v30  ;;  %1061 = vmatpush.msrb.mxu0 %v8769_v32  ;;  %v8798_v30 = vld [vmem:[#allocation83_spill] sm:$0xff]  ;;  %v5530_v32 = vpop.f32.mrf.mxu2 }
 0x128   :  { %1081 = vmatpush.msra.mxu1 %v8770_v34  ;;  %1101 = vmatpush.msra.mxu2 %v8771_v35  ;;  %8799 = vst [vmem:[#allocation19_spill] sm:$0xff] %v5530_v32  ;;  %v5532_v34 = vpop.f32.mrf.mxu3  ;;  %v8801_v35 = vld [vmem:[#allocation84_spill] sm:$0xff] }
 0x129   :  { %1121 = vmatpush.msra.mxu3 %v8772_v36  ;;  %1062 = vmatpush.msrb.mxu0 %v8773_v37  ;;  %8800 = vst [vmem:[#allocation20_spill] sm:$0xff] %v5532_v34  ;;  %v8802_v36 = vld [vmem:[#allocation85_spill] sm:$0xff]  ;;  %v8803_v37 = vld [vmem:[#allocation86_spill] sm:$0xff] }
 0x12a   :  { %1082 = vmatpush.msra.mxu1 %v8774_v38  ;;  %1102 = vmatpush.msra.mxu2 %v8775_v40  ;;  %v8804_v38 = vld [vmem:[#allocation87_spill] sm:$0xff]  ;;  %v8805_v40 = vld [vmem:[#allocation88_spill] sm:$0xff] }
 0x12b   :  { %1122 = vmatpush.msra.mxu3 %v8776_v41  ;;  %1063 = vmatpush.msrb.mxu0 %v8778_v44  ;;  %v8806_v41 = vld [vmem:[#allocation89_spill] sm:$0xff]  ;;  %v5540_v44 = vpop.f32.mrf.mxu0 }
 0x12c   :  { %1083 = vmatpush.msra.mxu1 %v8779_v45  ;;  %1103 = vmatpush.msra.mxu2 %v8780_v46  ;;  %v5542_v45 = vpop.f32.mrf.mxu1  ;;  %v8808_v46 = vld [vmem:[#allocation90_spill] sm:$0xff] }
 0x12d   :  { %1123 = vmatpush.msra.mxu3 %v8781_v47  ;;  %1064 = vmatpush.msrb.mxu0 %v8782_v48  ;;  %8807 = vst [vmem:[#allocation21_spill] sm:$0xff] %v5542_v45  ;;  %v8809_v47 = vld [vmem:[#allocation92_spill] sm:$0xff]  ;;  %v8810_v48 = vld [vmem:[#allocation93_spill] sm:$0xff] }
 0x12e   :  { %1084 = vmatpush.msra.mxu1 %v8783_v50  ;;  %1104 = vmatpush.msra.mxu2 %v8785_v53  ;;  %v8811_v50 = vld [vmem:[#allocation94_spill] sm:$0xff]  ;;  %v8812_v53 = vld [vmem:[#allocation95_spill] sm:$0xff] }
 0x12f   :  { %1124 = vmatpush.msra.mxu3 %v8786_v54  ;;  %1065 = vmatpush.msrb.mxu0 %v8787_v57  ;;  %v8813_v54 = vld [vmem:[#allocation96_spill] sm:$0xff]  ;;  %v8814_v57 = vld [vmem:[#allocation97_spill] sm:$0xff] }
 0x130   :  { %1085 = vmatpush.msra.mxu1 %v8788_v58  ;;  %1105 = vmatpush.msra.mxu2 %v8789_v59  ;;  %v8815_v58 = vld [vmem:[#allocation98_spill] sm:$0xff]  ;;  %v8816_v59 = vld [vmem:[#allocation99_spill] sm:$0xff] }
 0x131   :  { %1125 = vmatpush.msra.mxu3 %v8790_v60  ;;  %1066 = vmatpush.msrb.mxu0 %v8791_v61  ;;  %v8817_v60 = vld [vmem:[#allocation100_spill] sm:$0xff]  ;;  %v8818_v61 = vld [vmem:[#allocation101_spill] sm:$0xff] }
 0x132   :  { %1086 = vmatpush.msra.mxu1 %v8792_v62  ;;  %1106 = vmatpush.msra.mxu2 %v8793_v0  ;;  %v8819_v62 = vld [vmem:[#allocation102_spill] sm:$0xff]  ;;  %v8820_v0 = vld [vmem:[#allocation103_spill] sm:$0xff] }
 0x133   :  { %1126 = vmatpush.msra.mxu3 %v8794_v1  ;;  %1067 = vmatpush.msrb.mxu0 %v8795_v3  ;;  %v8821_v1 = vld [vmem:[#allocation104_spill] sm:$0xff]  ;;  %v5558_v3 = vpop.f32.mrf.mxu2 }
 0x134   :  { %1087 = vmatpush.msra.mxu1 %v8796_v4  ;;  %1107 = vmatpush.msra.mxu2 %v8797_v29  ;;  %8822 = vst [vmem:[#allocation22_spill] sm:$0xff] %v5558_v3  ;;  %v5560_v4 = vpop.f32.mrf.mxu3  ;;  %v5562_v29 = vpop.f32.mrf.mxu0 }
 0x135   :  { %1127 = vmatpush.msra.mxu3 %v8798_v30  ;;  %1068 = vmatpush.msrb.mxu0 %v8801_v35  ;;  %8823 = vst [vmem:[#allocation23_spill] sm:$0xff] %v5560_v4  ;;  %v5564_v30 = vpop.f32.mrf.mxu1 }
 0x136   :  { %1088 = vmatpush.msra.mxu1 %v8802_v36  ;;  %1108 = vmatpush.msra.mxu2 %v8803_v37  ;;  %8824 = vst [vmem:[#allocation24_spill] sm:$0xff] %v5562_v29  ;;  %v5863_v29 = vld [vmem:[#allocation5 + $0x50] sm:$0xff] }
 0x137   :  { %1128 = vmatpush.msra.mxu3 %v8804_v38  ;;  %1069 = vmatpush.msrb.mxu0 %v8805_v40  ;;  %8825 = vst [vmem:[#allocation25_spill] sm:$0xff] %v5564_v30 }
 0x138   :  { %1089 = vmatpush.msra.mxu1 %v8806_v41  ;;  %1109 = vmatpush.msra.mxu2 %v8808_v46  ;;  %v8832_v46 = vld [vmem:[#allocation59_spill] sm:$0xff]  ;;  %8901 = vst [vmem:[#allocation54_spill] sm:$0xff] %v5863_v29 }
 0x139   :  { %1129 = vmatpush.msra.mxu3 %v8809_v47  ;;  %1070 = vmatpush.msrb.mxu0 %v8810_v48  ;;  %v232_v47 = vadd.f32 %v5438_v26, %v8832_v46  ;;  %v8833_v48 = vld [vmem:[#allocation43_spill] sm:$0xff] }
 0x13a   :  { %1090 = vmatpush.msra.mxu1 %v8811_v50  ;;  %1110 = vmatpush.msra.mxu2 %v8812_v53  ;;  %v191_v50 = vadd.f32 %v190_v51, %v8833_v48 }
 0x13b   :  { %1130 = vmatpush.msra.mxu3 %v8813_v54  ;;  %1071 = vmatpush.msrb.mxu0 %v8814_v57  ;;  %v5566_v35 = vpop.f32.mrf.mxu2 }
 0x13c   :  { %1091 = vmatpush.msra.mxu1 %v8815_v58  ;;  %1111 = vmatpush.msra.mxu2 %v8816_v59  ;;  %8826 = vst [vmem:[#allocation26_spill] sm:$0xff] %v5566_v35  ;;  %v5568_v36 = vpop.f32.mrf.mxu3  ;;  %v5570_v37 = vpop.f32.mrf.mxu0 }
 0x13d   :  { %1131 = vmatpush.msra.mxu3 %v8817_v60  ;;  %1072 = vmatpush.msrb.mxu0 %v8818_v61  ;;  %8827 = vst [vmem:[#allocation27_spill] sm:$0xff] %v5568_v36  ;;  %v5572_v38 = vpop.f32.mrf.mxu1  ;;  %v8834_v61 = vld [vmem:[#allocation70_spill] sm:$0xff] }
 0x13e   :  { %1092 = vmatpush.msra.mxu1 %v8819_v62  ;;  %1112 = vmatpush.msra.mxu2 %v8820_v0  ;;  %8828 = vst [vmem:[#allocation28_spill] sm:$0xff] %v5570_v37  ;;  %v314_v62 = vadd.f32 %v5454_v31, %v8834_v61 }
 0x13f   :  { %1132 = vmatpush.msra.mxu3 %v8821_v1  ;;  %8829 = vst [vmem:[#allocation29_spill] sm:$0xff] %v5572_v38 }
 0x143   :  { %v5574_v40 = vpop.f32.mrf.mxu2 }
 0x144   :  { %8830 = vst [vmem:[#allocation30_spill] sm:$0xff] %v5574_v40  ;;  %v5576_v41 = vpop.f32.mrf.mxu3 }
 0x145   :  { %8831 = vst [vmem:[#allocation31_spill] sm:$0xff] %v5576_v41 }
 0x14b   :  { %v5583_v0 = vpop.f32.mrf.mxu2 }
 0x14c   :  { %8835 = vst [vmem:[#allocation32_spill] sm:$0xff] %v5583_v0 }
 0x154   :  { %v616_v53 = vpop.f32.mrf.mxu0  ;;  %v636_v54 = vpop.f32.mrf.mxu1 }
 0x155   :  { %v679_v57 = vadd.f32 %v616_v53, %v191_v50  ;;  %v680_v58 = vadd.f32 %v636_v54, %v232_v47  ;;  %v8836_v53 = vld [vmem:[#allocation91_spill] sm:$0xff] }
 0x156   :  { %v273_v54 = vadd.f32 %v5478_v55, %v8836_v53 }
 0x157   :  { %v3542_v59 = vmul.f32 -1.442695, %v679_v57  ;;  %v3543_v60 = vmul.f32 -1.442695, %v680_v58 }
 0x159   :  { %3624 = vpow2.f32 %v3542_v59 }
 0x15a   :  { %3626 = vpow2.f32 %v3543_v60 }
 0x15b   :  { %v676_v1 = vpop.f32.mrf.mxu3  ;;  %v656_v47 = vpop.f32.mrf.mxu2 }
 0x15c   :  { %v682_v41 = vadd.f32 %v676_v1, %v314_v62  ;;  %v681_v58 = vadd.f32 %v656_v47, %v273_v54 }
 0x15e   :  { %v3544_v38 = vmul.f32 -1.442695, %v682_v41 }
 0x15f   :  { %v3625_v40 = vpop.eup %3624 }
 0x160   :  { %v3627_v26 = vpop.eup %3626  ;;  %v913_v36 = vadd.f32 1.0, %v3625_v40  ;;  %3628 = vpow2.f32 %v3544_v38 }
 0x161   :  { %v932_v51 = vadd.f32 1.0, %v3627_v26 }
 0x162   :  { %3630 = vrcp.f32 %v913_v36  ;;  %v925_v0 = vand.u32 2147483648, %v913_v36  ;;  %v923_v26 = vand.u32 2147483647, %v913_v36  ;;  %vm919_vm15 = vweird.f32 %v913_v36 }
 0x163   :  { %3632 = vrcp.f32 %v932_v51  ;;  %v944_v38 = vand.u32 2147483648, %v932_v51  ;;  %v942_v35 = vand.u32 2147483647, %v932_v51  ;;  %vm938_vm0 = vweird.f32 %v932_v51 }
 0x164   :  { %v926_v47 = vor.u32 1.1754944e-38, %v925_v0  ;;  %vm924_vm3 = vcmp.eq.f32.partialorder %v923_v26, 8.507059e+37 }
 0x165   :  { %vm943_vm4 = vcmp.eq.f32.partialorder %v942_v35, 8.507059e+37 }
 0x166   :  { %v3629_v50 = vpop.eup %3628 }
 0x167   :  { %v952_v57 = vadd.f32 1.0, %v3629_v50 }
 0x168   :  { %v3631_v31 = vpop.eup %3630 }
 0x169   :  { %v3633_v59 = vpop.eup %3632  ;;  %v915_v60 = vmul.f32 %v3631_v31, %v913_v36  ;;  %3634 = vrcp.f32 %v952_v57  ;;  %vm920_vm13 = vweird.f32 %v3631_v31  ;;  %v526_v36 = vld [vmem:[%s8048_s6] sm:$0xf]  ;;  %vm958_vm6 = vweird.f32 %v952_v57 }
 0x16a   :  { %v934_v62 = vmul.f32 %v3633_v59, %v932_v51  ;;  %3636 = vtanh.f32 %v681_v58  ;;  %vm939_vm14 = vweird.f32 %v3633_v59  ;;  %vm921_vm1 = vmor %vm919_vm15, %vm920_vm13 }
 0x16b   :  { %v916_v41 = vsub.f32 1.0, %v915_v60  ;;  %vm940_vm2 = vmor %vm938_vm0, %vm939_vm14 }
 0x16c   :  { %v935_v1 = vsub.f32 1.0, %v934_v62  ;;  %v945_v62 = vor.u32 1.1754944e-38, %v944_v38 }
 0x16d   :  { %v917_v40 = vmul.f32 %v3631_v31, %v916_v41 }
 0x16e   :  { %v936_v30 = vmul.f32 %v3633_v59, %v935_v1 }
 0x16f   :  { %v3635_v50 = vpop.eup %3634  ;;  %v918_v45 = vadd.f32 %v3631_v31, %v917_v40 }
 0x170   :  { %v700_v4 = vpop.f32.mrf.mxu0  ;;  %v720_v55 = vpop.f32.mrf.mxu1  ;;  %v937_v54 = vadd.f32 %v3633_v59, %v936_v30  ;;  %v954_v60 = vmul.f32 %v3635_v50, %v952_v57  ;;  %vm959_vm5 = vweird.f32 %v3635_v50 }
 0x171   :  { %v922_v58 = vsel %vm921_vm1, %v3631_v31, %v918_v45  ;;  %v3637_v41 = vpop.eup %3636  ;;  %v5593_v45 = vperm.slane %v526_v36, 0  ;;  %v5595_v31 = vperm.slane %v526_v36, 1  ;;  %vm960_vm7 = vmor %vm958_vm6, %vm959_vm5 }
 0x172   :  { %v927_v3 = vsel %vm924_vm3, %v926_v47, %v922_v58  ;;  %v941_v34 = vsel %vm940_vm2, %v3633_v59, %v937_v54  ;;  %v955_v1 = vsub.f32 1.0, %v954_v60 }
 0x173   :  { %v946_v37 = vsel %vm943_vm4, %v945_v62, %v941_v34  ;;  %v969_v52 = vmul.f32 %v3637_v41, %v927_v3  ;;  %8837 = vst [vmem:[#allocation33_spill] sm:$0xff] %v5593_v45  ;;  %v964_v34 = vand.u32 2147483648, %v952_v57  ;;  %v5600_v41 = vperm.slane %v526_v36, 3 }
 0x174   :  { %v968_v32 = vmul.f32 %v946_v37, %v5184_v8  ;;  %v956_v40 = vmul.f32 %v3635_v50, %v955_v1  ;;  %8838 = vst [vmem:[#allocation34_spill] sm:$0xff] %v5595_v31  ;;  %v962_v8 = vand.u32 2147483647, %v952_v57 }
 0x175   :  { %v965_v26 = vor.u32 1.1754944e-38, %v964_v34  ;;  %8839 = vst [vmem:[#allocation35_spill] sm:$0xff] %v5600_v41  ;;  %v8847_v34 = vld [vmem:[#allocation111_spill] sm:$0xff] }
 0x176   :  { %v5591_v0 = vadd.f32 %v969_v52, %v968_v32  ;;  %v957_v51 = vadd.f32 %v3635_v50, %v956_v40  ;;  %vm963_vm8 = vcmp.eq.f32.partialorder %v962_v8, 8.507059e+37 }
 0x177   :  { %v760_v30 = vpop.f32.mrf.mxu3  ;;  %v740_v47 = vpop.f32.mrf.mxu2 }
 0x178   :  { %3638 = vtanh.f32 %v5591_v0  ;;  %v961_v38 = vsel %vm960_vm7, %v3635_v50, %v957_v51 }
 0x179   :  { %v780_v3 = vpop.f32.mrf.mxu0  ;;  %v966_v58 = vsel %vm963_vm8, %v965_v26, %v961_v38 }
 0x17a   :  { %v800_v35 = vpop.f32.mrf.mxu1  ;;  %v781_v37 = vadd.f32 %v780_v3, %v700_v4  ;;  %v8848_v3 = vld [vmem:[#allocation112_spill] sm:$0xff] }
 0x17b   :  { %v801_v59 = vadd.f32 %v800_v35, %v720_v55  ;;  %v8849_v35 = vld [vmem:[#allocation113_spill] sm:$0xff] }
 0x17c   :  { %v843_v52 = vadd.f32 %v781_v37, %v5593_v45  ;;  %v8850_v37 = vld [vmem:[#allocation114_spill] sm:$0xff] }
 0x17d   :  { %v844_v32 = vadd.f32 %v801_v59, %v5595_v31 }
 0x17e   :  { %v3539_v54 = vmul.f32 -1.442695, %v843_v52  ;;  %v3639_v62 = vpop.eup %3638  ;;  %v8852_v52 = vld [vmem:[#allocation116_spill] sm:$0xff] }
 0x17f   :  { %v3540_v60 = vmul.f32 -1.442695, %v844_v32  ;;  %v5602_v1 = vmul.f32 %v3639_v62, %v966_v58  ;;  %v8853_v32 = vld [vmem:[#allocation117_spill] sm:$0xff]  ;;  %v8856_v58 = vld [vmem:[#allocation120_spill] sm:$0xff] }
 0x180   :  { %3640 = vpow2.f32 %v3539_v54  ;;  %v8854_v54 = vld [vmem:[#allocation118_spill] sm:$0xff] }
 0x181   :  { %3642 = vpow2.f32 %v3540_v60  ;;  %989 = vmatmul.f32.vlgmr.msra.gmra.mxu0 %v5602_v1  ;;  %1009 = vmatmul.f32.vlgmr.msrb.gmra.mxu1 %v5602_v1  ;;  %v8855_v60 = vld [vmem:[#allocation119_spill] sm:$0xff] }
 0x182   :  { %v840_v4 = vpop.f32.mrf.mxu3  ;;  %1029 = vmatmul.f32.vlgmr.msrb.gmra.mxu2 %v5602_v1  ;;  %1049 = vmatmul.f32.vlgmr.msrb.gmra.mxu3 %v5602_v1 }
 0x183   :  { %v841_v57 = vadd.f32 %v840_v4, %v760_v30  ;;  %1137 = vmatpush.msra.mxu0 %v5192_v18  ;;  %1157 = vmatpush.msrb.mxu1 %v5194_v33  ;;  %v820_v33 = vpop.f32.mrf.mxu2  ;;  %v8857_v4 = vld [vmem:[#allocation121_spill] sm:$0xff] }
 0x184   :  { %1177 = vmatpush.msrb.mxu2 %v5198_v6  ;;  %1197 = vmatpush.msrb.mxu3 %v5200_v11  ;;  %v8840_v6 = vld [vmem:[#allocation105_spill] sm:$0xff]  ;;  %v8841_v11 = vld [vmem:[#allocation106_spill] sm:$0xff] }
 0x185   :  { %v846_v55 = vadd.f32 %v841_v57, %v5600_v41  ;;  %1138 = vmatpush.msra.mxu0 %v5204_v7  ;;  %1158 = vmatpush.msrb.mxu1 %v5206_v20  ;;  %v8842_v7 = vld [vmem:[#allocation107_spill] sm:$0xff]  ;;  %v5629_v20 = vperm.slane %v526_v36, 2 }
 0x186   :  { %v3641_v40 = vpop.eup %3640  ;;  %1178 = vmatpush.msrb.mxu2 %v5210_v24  ;;  %1198 = vmatpush.msrb.mxu3 %v5212_v12  ;;  %v821_v24 = vadd.f32 %v820_v33, %v740_v47  ;;  %v8844_v12 = vld [vmem:[#allocation108_spill] sm:$0xff]  ;;  %v8851_v36 = vld [vmem:[#allocation115_spill] sm:$0xff] }
 0x187   :  { %v3541_v50 = vmul.f32 -1.442695, %v846_v55  ;;  %v3643_v30 = vpop.eup %3642  ;;  %v5615_v51 = vadd.f32 1.0, %v3641_v40  ;;  %1139 = vmatpush.msra.mxu0 %v5216_v23  ;;  %1159 = vmatpush.msrb.mxu1 %v5218_v5  ;;  %8843 = vst [vmem:[#allocation36_spill] sm:$0xff] %v5629_v20  ;;  %v8845_v23 = vld [vmem:[#allocation109_spill] sm:$0xff]  ;;  %v8846_v5 = vld [vmem:[#allocation110_spill] sm:$0xff] }
 0x188   :  { %v5619_v18 = vadd.f32 1.0, %v3643_v30  ;;  %1179 = vmatpush.msrb.mxu2 %v5222_v15  ;;  %1199 = vmatpush.msrb.mxu3 %v8840_v6  ;;  %v845_v38 = vadd.f32 %v821_v24, %v5629_v20  ;;  %v8858_v55 = vld [vmem:[#allocation122_spill] sm:$0xff]  ;;  %v8860_v33 = vld [vmem:[#allocation124_spill] sm:$0xff]  ;;  %v8861_v6 = vld [vmem:[#allocation125_spill] sm:$0xff] }
 0x189   :  { %3644 = vpow2.f32 %v3541_v50  ;;  %1140 = vmatpush.msra.mxu0 %v8841_v11  ;;  %1160 = vmatpush.msrb.mxu1 %v8842_v7  ;;  %v8859_v50 = vld [vmem:[#allocation123_spill] sm:$0xff]  ;;  %v862_v30 = vand.u32 2147483648, %v5615_v51  ;;  %v860_v24 = vand.u32 2147483647, %v5615_v51  ;;  %vm856_vm11 = vweird.f32 %v5615_v51 }
 0x18a   :  { %3646 = vrcp.f32 %v5615_v51  ;;  %1180 = vmatpush.msrb.mxu2 %v8844_v12  ;;  %1200 = vmatpush.msrb.mxu3 %v8845_v23  ;;  %v881_v11 = vand.u32 2147483648, %v5619_v18  ;;  %v8862_v12 = vld [vmem:[#allocation126_spill] sm:$0xff]  ;;  %v8863_v23 = vld [vmem:[#allocation127_spill] sm:$0xff]  ;;  %vm875_vm12 = vweird.f32 %v5619_v18 }
 0x18b   :  { %3648 = vrcp.f32 %v5619_v18  ;;  %1141 = vmatpush.msra.mxu0 %v8846_v5  ;;  %1161 = vmatpush.msrb.mxu1 %v8847_v34  ;;  %v879_v34 = vand.u32 2147483647, %v5619_v18  ;;  %vm861_vm14 = vcmp.eq.f32.partialorder %v860_v24, 8.507059e+37  ;;  %v8876_v24 = vld [vmem:[#allocation140_spill] sm:$0xff] }
 0x18c   :  { %1181 = vmatpush.msrb.mxu2 %v8848_v3  ;;  %1201 = vmatpush.msrb.mxu3 %v8849_v35  ;;  %v8865_v3 = vld [vmem:[#allocation129_spill] sm:$0xff] }
 0x18d   :  { %1142 = vmatpush.msra.mxu0 %v8850_v37  ;;  %1162 = vmatpush.msrb.mxu1 %v8851_v36  ;;  %v8866_v36 = vld [vmem:[#allocation130_spill] sm:$0xff]  ;;  %vm880_vm0 = vcmp.eq.f32.partialorder %v879_v34, 8.507059e+37 }
 0x18e   :  { %1182 = vmatpush.msrb.mxu2 %v8852_v52  ;;  %1202 = vmatpush.msrb.mxu3 %v8853_v32  ;;  %v863_v52 = vor.u32 1.1754944e-38, %v862_v30  ;;  %v8873_v30 = vld [vmem:[#allocation137_spill] sm:$0xff] }
 0x18f   :  { %v3645_v15 = vpop.eup %3644  ;;  %1143 = vmatpush.msra.mxu0 %v8854_v54  ;;  %1163 = vmatpush.msrb.mxu1 %v8855_v60  ;;  %v8868_v54 = vld [vmem:[#allocation132_spill] sm:$0xff]  ;;  %v8869_v60 = vld [vmem:[#allocation133_spill] sm:$0xff] }
 0x190   :  { %v5637_v8 = vadd.f32 1.0, %v3645_v15  ;;  %v3647_v59 = vpop.eup %3646  ;;  %1183 = vmatpush.msrb.mxu2 %v8856_v58  ;;  %1203 = vmatpush.msrb.mxu3 %v8857_v4  ;;  %v8864_v15 = vld [vmem:[#allocation128_spill] sm:$0xff]  ;;  %v8871_v4 = vld [vmem:[#allocation135_spill] sm:$0xff] }
 0x191   :  { %v3649_v26 = vpop.eup %3648  ;;  %v852_v47 = vmul.f32 %v3647_v59, %v5615_v51  ;;  %1144 = vmatpush.msra.mxu0 %v8858_v55  ;;  %1164 = vmatpush.msrb.mxu1 %v8859_v50  ;;  %vm857_vm9 = vweird.f32 %v3647_v59  ;;  %v8870_v51 = vld [vmem:[#allocation134_spill] sm:$0xff] }
 0x192   :  { %3650 = vrcp.f32 %v5637_v8  ;;  %v871_v62 = vmul.f32 %v3649_v26, %v5619_v18  ;;  %1184 = vmatpush.msrb.mxu2 %v8860_v33  ;;  %1204 = vmatpush.msrb.mxu3 %v8861_v6  ;;  %vm876_vm10 = vweird.f32 %v3649_v26  ;;  %vm858_vm13 = vmor %vm856_vm11, %vm857_vm9  ;;  %vm895_vm2 = vweird.f32 %v5637_v8 }
 0x193   :  { %v853_v57 = vsub.f32 1.0, %v852_v47  ;;  %3652 = vtanh.f32 %v845_v38  ;;  %1145 = vmatpush.msra.mxu0 %v8862_v12  ;;  %1165 = vmatpush.msrb.mxu1 %v8863_v23  ;;  %v8867_v38 = vld [vmem:[#allocation131_spill] sm:$0xff]  ;;  %vm877_vm15 = vmor %vm875_vm12, %vm876_vm10  ;;  %v8877_v12 = vld [vmem:[#allocation141_spill] sm:$0xff] }
 0x194   :  { %v872_v40 = vsub.f32 1.0, %v871_v62  ;;  %1185 = vmatpush.msrb.mxu2 %v8864_v15  ;;  %1205 = vmatpush.msrb.mxu3 %v8865_v3  ;;  %v882_v62 = vor.u32 1.1754944e-38, %v881_v11  ;;  %v8874_v11 = vld [vmem:[#allocation138_spill] sm:$0xff]  ;;  %v8880_v15 = vld [vmem:[#allocation144_spill] sm:$0xff]  ;;  %v8881_v3 = vld [vmem:[#allocation145_spill] sm:$0xff] }
 0x195   :  { %v854_v7 = vmul.f32 %v3647_v59, %v853_v57  ;;  %1146 = vmatpush.msra.mxu0 %v8866_v36  ;;  %1166 = vmatpush.msrb.mxu1 %v8867_v38  ;;  %v8882_v36 = vld [vmem:[#allocation146_spill] sm:$0xff]  ;;  %v901_v38 = vand.u32 2147483648, %v5637_v8 }
 0x196   :  { %v873_v5 = vmul.f32 %v3649_v26, %v872_v40  ;;  %1186 = vmatpush.msrb.mxu2 %v8868_v54  ;;  %1206 = vmatpush.msrb.mxu3 %v8869_v60  ;;  %v8872_v40 = vld [vmem:[#allocation136_spill] sm:$0xff]  ;;  %v5745_v60 = vld [vmem:[#allocation5 + $0x190] sm:$0xff] }
 0x197   :  { %v855_v37 = vadd.f32 %v3647_v59, %v854_v7  ;;  %1147 = vmatpush.msra.mxu0 %v8870_v51  ;;  %1167 = vmatpush.msrb.mxu1 %v8871_v4  ;;  %v5761_v51 = vld [vmem:[#allocation5 + $0x140] sm:$0xff]  ;;  %v5764_v4 = vld [vmem:[#allocation5 + $0x148] sm:$0xff] }
 0x198   :  { %v5663_v35 = vpop.eup %3650  ;;  %v874_v32 = vadd.f32 %v3649_v26, %v873_v5  ;;  %1187 = vmatpush.msrb.mxu2 %v8872_v40  ;;  %1207 = vmatpush.msrb.mxu3 %v8873_v30  ;;  %v8879_v5 = vld [vmem:[#allocation143_spill] sm:$0xff]  ;;  %v5782_v40 = vld [vmem:[#allocation5 + $0x138] sm:$0xff] }
 0x199   :  { %v891_v47 = vmul.f32 %v5663_v35, %v5637_v8  ;;  %v859_v58 = vsel %vm858_vm13, %v3647_v59, %v855_v37  ;;  %v3653_v18 = vpop.eup %3652  ;;  %1148 = vmatpush.msra.mxu0 %v8874_v11  ;;  %v8875_v59 = vld [vmem:[#allocation139_spill] sm:$0xff]  ;;  %vm896_vm1 = vweird.f32 %v5663_v35  ;;  %v5794_v11 = vld [vmem:[#allocation5 + $0x118] sm:$0xff] }
 0x19a   :  { %v864_v57 = vsel %vm861_vm14, %v863_v52, %v859_v58  ;;  %v878_v55 = vsel %vm877_vm15, %v3649_v26, %v874_v32  ;;  %1168 = vmatpush.msrb.mxu1 %v8875_v59  ;;  %1188 = vmatpush.msrb.mxu2 %v8876_v24  ;;  %v8878_v26 = vld [vmem:[#allocation142_spill] sm:$0xff]  ;;  %v899_v52 = vand.u32 2147483647, %v5637_v8  ;;  %v8883_v32 = vld [vmem:[#allocation147_spill] sm:$0xff]  ;;  %vm897_vm3 = vmor %vm895_vm2, %vm896_vm1 }
 0x19b   :  { %v892_v50 = vsub.f32 1.0, %v891_v47  ;;  %v883_v33 = vsel %vm880_vm0, %v882_v62, %v878_v55  ;;  %v906_v6 = vmul.f32 %v3653_v18, %v864_v57  ;;  %1208 = vmatpush.msrb.mxu3 %v8877_v12  ;;  %1149 = vmatpush.msra.mxu0 %v8878_v26  ;;  %v5748_v62 = vld [vmem:[#allocation5 + $0x198] sm:$0xff]  ;;  %v5752_v58 = vld [vmem:[#allocation5 + $0x168] sm:$0xff]  ;;  %v5773_v57 = vld [vmem:[#allocation5 + $0x120] sm:$0xff] }
 0x19c   :  { %v905_v7 = vmul.f32 0.0, %v883_v33  ;;  %1169 = vmatpush.msrb.mxu1 %v8879_v5  ;;  %1189 = vmatpush.msrb.mxu2 %v8880_v15  ;;  %vm900_vm4 = vcmp.eq.f32.partialorder %v899_v52, 8.507059e+37  ;;  %v5770_v18 = vld [vmem:[#allocation5 + $0x158] sm:$0xff]  ;;  %v5776_v55 = vld [vmem:[#allocation5 + $0x128] sm:$0xff]  ;;  %v5785_v30 = vld [vmem:[#allocation5 + $0x100] sm:$0xff] }
 0x19d   :  { %v893_v23 = vmul.f32 %v5663_v35, %v892_v50  ;;  %1209 = vmatpush.msrb.mxu3 %v8881_v3  ;;  %1150 = vmatpush.msra.mxu0 %v8882_v36  ;;  %v5779_v50 = vld [vmem:[#allocation5 + $0x130] sm:$0xff]  ;;  %v5788_v33 = vld [vmem:[#allocation5 + $0x108] sm:$0xff]  ;;  %v5797_v59 = vld [vmem:[#allocation5 + $0xe0] sm:$0xff] }
 0x19e   :  { %v5686_v34 = vadd.f32 %v906_v6, %v905_v7  ;;  %1170 = vmatpush.msrb.mxu1 %v5350_v17  ;;  %1190 = vmatpush.msrb.mxu2 %v5354_v16  ;;  %v8884_v17 = vld [vmem:[#allocation148_spill] sm:$0xff]  ;;  %v8885_v16 = vld [vmem:[#allocation149_spill] sm:$0xff]  ;;  %v5806_v12 = vld [vmem:[#allocation5 + $0xf8] sm:$0xff] }
 0x19f   :  { %v894_v37 = vadd.f32 %v5663_v35, %v893_v23  ;;  %1210 = vmatpush.msrb.mxu3 %v5356_v21  ;;  %1151 = vmatpush.msra.mxu0 %v5360_v10  ;;  %v902_v21 = vor.u32 1.1754944e-38, %v901_v38  ;;  %v5791_v6 = vld [vmem:[#allocation5 + $0x110] sm:$0xff]  ;;  %v5800_v7 = vld [vmem:[#allocation5 + $0xe8] sm:$0xff]  ;;  %v5809_v23 = vld [vmem:[#allocation5 + $0xc0] sm:$0xff] }
 0x1a0   :  { %3654 = vtanh.f32 %v5686_v34  ;;  %1171 = vmatpush.msrb.mxu1 %v8883_v32  ;;  %1191 = vmatpush.msrb.mxu2 %v5366_v13  ;;  %v5721_v13 = vld [vmem:[#allocation5 + $0x1d0] sm:$0xff]  ;;  %v5812_v26 = vld [vmem:[#allocation5 + $0xc8] sm:$0xff]  ;;  %v5818_v15 = vld [vmem:[#allocation5 + $0xd8] sm:$0xff] }
 0x1a1   :  { %1211 = vmatpush.msrb.mxu3 %v8884_v17  ;;  %v898_v47 = vsel %vm897_vm3, %v5663_v35, %v894_v37  ;;  %1152 = vmatpush.msra.mxu0 %v5372_v27  ;;  %v5711_v27 = vld [vmem:[#allocation5 + $0x1f0] sm:$0xff]  ;;  %8886 = vst [vmem:[#allocation37_spill] sm:$0xff] %v5818_v15  ;;  %v5821_v3 = vld [vmem:[#allocation5 + $0xa0] sm:$0xff]  ;;  %v5824_v37 = vld [vmem:[#allocation5 + $0xa8] sm:$0xff] }
 0x1a2   :  { %1172 = vmatpush.msrb.mxu1 %v5374_v2  ;;  %1192 = vmatpush.msrb.mxu2 %v5378_v28  ;;  %v903_v8 = vsel %vm900_vm4, %v902_v21, %v898_v47  ;;  %v5714_v2 = vld [vmem:[#allocation5 + $0x1f8] sm:$0xff]  ;;  %v5718_v28 = vld [vmem:[#allocation5 + $0x1c8] sm:$0xff]  ;;  %v5731_v35 = vld [vmem:[#allocation5 + $0x1b0] sm:$0xff]  ;;  %8887 = vst [vmem:[#allocation38_spill] sm:$0xff] %v5821_v3 }
 0x1a3   :  { %1212 = vmatpush.msrb.mxu3 %v8885_v16  ;;  %v5803_v24 = vld [vmem:[#allocation5 + $0xf0] sm:$0xff]  ;;  %8888 = vst [vmem:[#allocation39_spill] sm:$0xff] %v5824_v37  ;;  %v5830_v38 = vld [vmem:[#allocation5 + $0xb8] sm:$0xff]  ;;  %v5833_v52 = vld [vmem:[#allocation5 + $0x80] sm:$0xff] }
 0x1a4   :  { %v5815_v5 = vld [vmem:[#allocation5 + $0xd0] sm:$0xff]  ;;  %8890 = vst [vmem:[#allocation41_spill] sm:$0xff] %v5830_v38  ;;  %v5836_v32 = vld [vmem:[#allocation5 + $0x88] sm:$0xff]  ;;  %v5842_v47 = vld [vmem:[#allocation5 + $0x98] sm:$0xff] }
 0x1a5   :  { %v5827_v36 = vld [vmem:[#allocation5 + $0xb0] sm:$0xff]  ;;  %8891 = vst [vmem:[#allocation42_spill] sm:$0xff] %v5833_v52  ;;  %v5845_v21 = vld [vmem:[#allocation5 + $0x60] sm:$0xff]  ;;  %v5848_v16 = vld [vmem:[#allocation5 + $0x68] sm:$0xff] }
 0x1a6   :  { %v3655_v10 = vpop.eup %3654  ;;  %8889 = vst [vmem:[#allocation40_spill] sm:$0xff] %v5827_v36  ;;  %v5839_v17 = vld [vmem:[#allocation5 + $0x90] sm:$0xff] }
 0x1a7   :  { %v909_v54 = vmul.f32 %v3655_v10, %v903_v8  ;;  %8892 = vst [vmem:[#allocation44_spill] sm:$0xff] %v5836_v32  ;;  %v5851_v10 = vld [vmem:[#allocation5 + $0x70] sm:$0xff]  ;;  %v5854_v8 = vld [vmem:[#allocation5 + $0x78] sm:$0xff] }
 0x1a8   :  { %8893 = vst [vmem:[#allocation45_spill] sm:$0xff] %v5839_v17 }
 0x1a9   :  { %1073 = vmatmul.f32.vlgmr.msrb.gmra.mxu0 %v909_v54  ;;  %1093 = vmatmul.f32.vlgmr.msra.gmra.mxu1 %v909_v54  ;;  %8894 = vst [vmem:[#allocation46_spill] sm:$0xff] %v5842_v47 }
 0x1aa   :  { %1113 = vmatmul.f32.vlgmr.msra.gmra.mxu2 %v909_v54  ;;  %1133 = vmatmul.f32.vlgmr.msra.gmra.mxu3 %v909_v54  ;;  %8895 = vst [vmem:[#allocation47_spill] sm:$0xff] %v5845_v21  ;;  %v5857_v54 = vld [vmem:[#allocation5 + $0x40] sm:$0xff] }
 0x1ab   :  { %1347 = vmatpush.msrb.mxu0 %v5392_v19  ;;  %1367 = vmatpush.msra.mxu1 %v5395_v49  ;;  %v5724_v19 = vld [vmem:[#allocation5 + $0x1d8] sm:$0xff]  ;;  %v5728_v49 = vld [vmem:[#allocation5 + $0x1a8] sm:$0xff]  ;;  %8896 = vst [vmem:[#allocation48_spill] sm:$0xff] %v5848_v16 }
 0x1ac   :  { %1387 = vmatpush.msra.mxu2 %v5711_v27  ;;  %1407 = vmatpush.msra.mxu3 %v5714_v2  ;;  %8897 = vst [vmem:[#allocation49_spill] sm:$0xff] %v5851_v10 }
 0x1ad   :  { %1348 = vmatpush.msrb.mxu0 %v5400_v14  ;;  %1368 = vmatpush.msra.mxu1 %v5718_v28  ;;  %v5734_v14 = vld [vmem:[#allocation5 + $0x1b8] sm:$0xff]  ;;  %8898 = vst [vmem:[#allocation50_spill] sm:$0xff] %v5854_v8 }
 0x1ae   :  { %1388 = vmatpush.msra.mxu2 %v5721_v13  ;;  %1408 = vmatpush.msra.mxu3 %v5724_v19  ;;  %8899 = vst [vmem:[#allocation52_spill] sm:$0xff] %v5857_v54 }
 0x1af   :  { %1349 = vmatpush.msrb.mxu0 %v5406_v9  ;;  %1369 = vmatpush.msra.mxu1 %v5728_v49  ;;  %v5742_v9 = vld [vmem:[#allocation5 + $0x188] sm:$0xff] }
 0x1b0   :  { %1389 = vmatpush.msra.mxu2 %v5731_v35  ;;  %1409 = vmatpush.msra.mxu3 %v5734_v14 }
 0x1b1   :  { %1153 = vmatmul.f32.vlgmr.msra.gmra.mxu0 %v5602_v1  ;;  %1173 = vmatmul.f32.vlgmr.msrb.gmra.mxu1 %v5602_v1 }
 0x1b2   :  { %1193 = vmatmul.f32.vlgmr.msrb.gmra.mxu2 %v5602_v1  ;;  %1213 = vmatmul.f32.vlgmr.msrb.gmra.mxu3 %v5602_v1  ;;  %v5755_v1 = vld [vmem:[#allocation5 + $0x170] sm:$0xff] }
 0x1b3   :  { %1350 = vmatpush.msrb.mxu0 %v5412_v22  ;;  %1370 = vmatpush.msra.mxu1 %v5742_v9  ;;  %v5758_v22 = vld [vmem:[#allocation5 + $0x178] sm:$0xff] }
 0x1b4   :  { %1390 = vmatpush.msra.mxu2 %v5745_v60  ;;  %1410 = vmatpush.msra.mxu3 %v5748_v62 }
 0x1b5   :  { %1351 = vmatpush.msrb.mxu0 %v5418_v25  ;;  %1371 = vmatpush.msra.mxu1 %v5752_v58  ;;  %v5767_v25 = vld [vmem:[#allocation5 + $0x150] sm:$0xff] }
 0x1b6   :  { %1391 = vmatpush.msra.mxu2 %v5755_v1  ;;  %1411 = vmatpush.msra.mxu3 %v5758_v22 }
 0x1b7   :  { %1352 = vmatpush.msrb.mxu0 %v5761_v51  ;;  %1372 = vmatpush.msra.mxu1 %v5764_v4 }
 0x1b8   :  { %1392 = vmatpush.msra.mxu2 %v5767_v25  ;;  %1412 = vmatpush.msra.mxu3 %v5770_v18 }
 0x1b9   :  { %1353 = vmatpush.msrb.mxu0 %v5773_v57  ;;  %1373 = vmatpush.msra.mxu1 %v5776_v55 }
 0x1ba   :  { %1393 = vmatpush.msra.mxu2 %v5779_v50  ;;  %1413 = vmatpush.msra.mxu3 %v5782_v40 }
 0x1bb   :  { %1354 = vmatpush.msrb.mxu0 %v5785_v30  ;;  %1374 = vmatpush.msra.mxu1 %v5788_v33 }
 0x1bc   :  { %1394 = vmatpush.msra.mxu2 %v5791_v6  ;;  %1414 = vmatpush.msra.mxu3 %v5794_v11 }
 0x1bd   :  { %1355 = vmatpush.msrb.mxu0 %v5797_v59  ;;  %1375 = vmatpush.msra.mxu1 %v5800_v7 }
 0x1be   :  { %1395 = vmatpush.msra.mxu2 %v5803_v24  ;;  %1415 = vmatpush.msra.mxu3 %v5806_v12 }
 0x1bf   :  { %1356 = vmatpush.msrb.mxu0 %v5809_v23  ;;  %1376 = vmatpush.msra.mxu1 %v5812_v26 }
 0x1c0   :  { %1396 = vmatpush.msra.mxu2 %v5815_v5  ;;  %1416 = vmatpush.msra.mxu3 %v5818_v15 }
 0x1c1   :  { %1357 = vmatpush.msrb.mxu0 %v5821_v3  ;;  %1377 = vmatpush.msra.mxu1 %v5824_v37 }
 0x1c2   :  { %1397 = vmatpush.msra.mxu2 %v5827_v36  ;;  %1417 = vmatpush.msra.mxu3 %v5830_v38 }
 0x1c3   :  { %1358 = vmatpush.msrb.mxu0 %v5833_v52  ;;  %1378 = vmatpush.msra.mxu1 %v5836_v32 }
 0x1c4   :  { %1398 = vmatpush.msra.mxu2 %v5839_v17  ;;  %1418 = vmatpush.msra.mxu3 %v5842_v47 }
 0x1c5   :  { %1359 = vmatpush.msrb.mxu0 %v5845_v21  ;;  %1379 = vmatpush.msra.mxu1 %v5848_v16 }
 0x1c6   :  { %1399 = vmatpush.msra.mxu2 %v5851_v10  ;;  %1419 = vmatpush.msra.mxu3 %v5854_v8  ;;  %v5869_v10 = vld [vmem:[#allocation5 + $0x20] sm:$0xff]  ;;  %v5872_v8 = vld [vmem:[#allocation5 + $0x28] sm:$0xff] }
 0x1c7   :  { %1360 = vmatpush.msrb.mxu0 %v5857_v54  ;;  %1380 = vmatpush.msra.mxu1 %v5860_v43  ;;  %8903 = vst [vmem:[#allocation56_spill] sm:$0xff] %v5869_v10  ;;  %v5875_v54 = vld [vmem:[#allocation5 + $0x30] sm:$0xff]  ;;  %v5878_v43 = vld [vmem:[#allocation5 + $0x38] sm:$0xff] }
 0x1c8   :  { %1400 = vmatpush.msra.mxu2 %v5863_v29  ;;  %1420 = vmatpush.msra.mxu3 %v5866_v63  ;;  %8904 = vst [vmem:[#allocation57_spill] sm:$0xff] %v5872_v8  ;;  %v5881_v29 = vld [vmem:[#allocation5] sm:$0xff]  ;;  %v5884_v63 = vld [vmem:[#allocation5 + $0x8] sm:$0xff] }
 0x1c9   :  { %1361 = vmatpush.msrb.mxu0 %v5869_v10  ;;  %1381 = vmatpush.msra.mxu1 %v5872_v8  ;;  %8905 = vst [vmem:[#allocation58_spill] sm:$0xff] %v5875_v54  ;;  %v5887_v10 = vld [vmem:[#allocation5 + $0x10] sm:$0xff]  ;;  %v5890_v8 = vld [vmem:[#allocation5 + $0x18] sm:$0xff] }
 0x1ca   :  { %1401 = vmatpush.msra.mxu2 %v5875_v54  ;;  %8906 = vst [vmem:[#allocation60_spill] sm:$0xff] %v5878_v43  ;;  %1421 = vmatpush.msra.mxu3 %v5878_v43  ;;  %v5893_v54 = vld [vmem:[#allocation8 + $0x1e0] sm:$0xff]  ;;  %v5896_v43 = vld [vmem:[#allocation8 + $0x1e8] sm:$0xff] }
 0x1cb   :  { %8907 = vst [vmem:[#allocation61_spill] sm:$0xff] %v5881_v29  ;;  %1362 = vmatpush.msrb.mxu0 %v5881_v29  ;;  %1382 = vmatpush.msra.mxu1 %v5884_v63  ;;  %v5899_v29 = vld [vmem:[#allocation8 + $0x1f0] sm:$0xff] }
 0x1cc   :  { %8908 = vst [vmem:[#allocation63_spill] sm:$0xff] %v5884_v63  ;;  %1402 = vmatpush.msra.mxu2 %v5887_v10  ;;  %1422 = vmatpush.msra.mxu3 %v5890_v8  ;;  %v5902_v63 = vld [vmem:[#allocation8 + $0x1f8] sm:$0xff] }
 0x1cd   :  { %8909 = vst [vmem:[#allocation64_spill] sm:$0xff] %v5887_v10  ;;  %1431 = vmatpush.msra.mxu0 %v5893_v54  ;;  %1451 = vmatpush.msrb.mxu1 %v5896_v43  ;;  %v5905_v10 = vld [vmem:[#allocation8 + $0x1c0] sm:$0xff] }
 0x1ce   :  { %8910 = vst [vmem:[#allocation65_spill] sm:$0xff] %v5890_v8  ;;  %1471 = vmatpush.msrb.mxu2 %v5899_v29  ;;  %1491 = vmatpush.msrb.mxu3 %v5902_v63  ;;  %v5908_v8 = vld [vmem:[#allocation8 + $0x1c8] sm:$0xff] }
 0x1cf   :  { %8911 = vst [vmem:[#allocation66_spill] sm:$0xff] %v5893_v54  ;;  %1432 = vmatpush.msra.mxu0 %v5905_v10  ;;  %1452 = vmatpush.msrb.mxu1 %v5908_v8  ;;  %v5911_v54 = vld [vmem:[#allocation8 + $0x1d0] sm:$0xff] }
 0x1d0   :  { %8912 = vst [vmem:[#allocation67_spill] sm:$0xff] %v5896_v43  ;;  %1472 = vmatpush.msrb.mxu2 %v5911_v54  ;;  %v5914_v43 = vld [vmem:[#allocation8 + $0x1d8] sm:$0xff] }
 0x1d1   :  { %8913 = vst [vmem:[#allocation68_spill] sm:$0xff] %v5899_v29  ;;  %1492 = vmatpush.msrb.mxu3 %v5914_v43  ;;  %v5917_v29 = vld [vmem:[#allocation8 + $0x1a0] sm:$0xff] }
 0x1d2   :  { %8914 = vst [vmem:[#allocation69_spill] sm:$0xff] %v5902_v63  ;;  %1433 = vmatpush.msra.mxu0 %v5917_v29  ;;  %v5920_v63 = vld [vmem:[#allocation8 + $0x1a8] sm:$0xff] }
 0x1d3   :  { %8915 = vst [vmem:[#allocation71_spill] sm:$0xff] %v5905_v10  ;;  %1453 = vmatpush.msrb.mxu1 %v5920_v63  ;;  %v5923_v10 = vld [vmem:[#allocation8 + $0x1b0] sm:$0xff] }
 0x1d4   :  { %8916 = vst [vmem:[#allocation72_spill] sm:$0xff] %v5908_v8  ;;  %1473 = vmatpush.msrb.mxu2 %v5923_v10  ;;  %v5926_v8 = vld [vmem:[#allocation8 + $0x1b8] sm:$0xff] }
 0x1d5   :  { %8917 = vst [vmem:[#allocation73_spill] sm:$0xff] %v5911_v54  ;;  %1493 = vmatpush.msrb.mxu3 %v5926_v8  ;;  %v5929_v54 = vld [vmem:[#allocation8 + $0x180] sm:$0xff] }
 0x1d6   :  { %8918 = vst [vmem:[#allocation74_spill] sm:$0xff] %v5914_v43  ;;  %1434 = vmatpush.msra.mxu0 %v5929_v54  ;;  %v5932_v43 = vld [vmem:[#allocation8 + $0x188] sm:$0xff] }
 0x1d7   :  { %8919 = vst [vmem:[#allocation75_spill] sm:$0xff] %v5917_v29  ;;  %1454 = vmatpush.msrb.mxu1 %v5932_v43  ;;  %v5935_v29 = vld [vmem:[#allocation8 + $0x190] sm:$0xff] }
 0x1d8   :  { %8920 = vst [vmem:[#allocation77_spill] sm:$0xff] %v5920_v63  ;;  %1474 = vmatpush.msrb.mxu2 %v5935_v29  ;;  %v5938_v63 = vld [vmem:[#allocation8 + $0x198] sm:$0xff] }
 0x1d9   :  { %8921 = vst [vmem:[#allocation78_spill] sm:$0xff] %v5923_v10  ;;  %1494 = vmatpush.msrb.mxu3 %v5938_v63  ;;  %v5941_v10 = vld [vmem:[#allocation8 + $0x160] sm:$0xff] }
 0x1da   :  { %8922 = vst [vmem:[#allocation79_spill] sm:$0xff] %v5926_v8  ;;  %1435 = vmatpush.msra.mxu0 %v5941_v10  ;;  %v5944_v8 = vld [vmem:[#allocation8 + $0x168] sm:$0xff] }
 0x1db   :  { %8923 = vst [vmem:[#allocation80_spill] sm:$0xff] %v5929_v54  ;;  %1455 = vmatpush.msrb.mxu1 %v5944_v8  ;;  %v5947_v54 = vld [vmem:[#allocation8 + $0x170] sm:$0xff] }
 0x1dc   :  { %8924 = vst [vmem:[#allocation81_spill] sm:$0xff] %v5932_v43  ;;  %1475 = vmatpush.msrb.mxu2 %v5947_v54  ;;  %v5950_v43 = vld [vmem:[#allocation8 + $0x178] sm:$0xff] }
 0x1dd   :  { %8925 = vst [vmem:[#allocation82_spill] sm:$0xff] %v5935_v29  ;;  %1495 = vmatpush.msrb.mxu3 %v5950_v43  ;;  %v5953_v29 = vld [vmem:[#allocation8 + $0x140] sm:$0xff] }
 0x1de   :  { %8926 = vst [vmem:[#allocation83_spill] sm:$0xff] %v5938_v63  ;;  %1436 = vmatpush.msra.mxu0 %v5953_v29  ;;  %v5956_v63 = vld [vmem:[#allocation8 + $0x148] sm:$0xff] }
 0x1df   :  { %8927 = vst [vmem:[#allocation84_spill] sm:$0xff] %v5941_v10  ;;  %1456 = vmatpush.msrb.mxu1 %v5956_v63  ;;  %v5959_v10 = vld [vmem:[#allocation8 + $0x150] sm:$0xff] }
 0x1e0   :  { %8928 = vst [vmem:[#allocation85_spill] sm:$0xff] %v5944_v8  ;;  %1476 = vmatpush.msrb.mxu2 %v5959_v10  ;;  %v5962_v8 = vld [vmem:[#allocation8 + $0x158] sm:$0xff] }
 0x1e1   :  { %8929 = vst [vmem:[#allocation86_spill] sm:$0xff] %v5947_v54  ;;  %1496 = vmatpush.msrb.mxu3 %v5962_v8  ;;  %v5965_v54 = vld [vmem:[#allocation8 + $0x120] sm:$0xff] }
 0x1e2   :  { %8930 = vst [vmem:[#allocation87_spill] sm:$0xff] %v5950_v43  ;;  %1437 = vmatpush.msra.mxu0 %v5965_v54  ;;  %v5968_v43 = vld [vmem:[#allocation8 + $0x128] sm:$0xff] }
 0x1e3   :  { %8931 = vst [vmem:[#allocation88_spill] sm:$0xff] %v5953_v29  ;;  %1457 = vmatpush.msrb.mxu1 %v5968_v43  ;;  %v5971_v29 = vld [vmem:[#allocation8 + $0x130] sm:$0xff] }
 0x1e4   :  { %8932 = vst [vmem:[#allocation89_spill] sm:$0xff] %v5956_v63  ;;  %1477 = vmatpush.msrb.mxu2 %v5971_v29  ;;  %v5974_v63 = vld [vmem:[#allocation8 + $0x138] sm:$0xff] }
 0x1e5   :  { %8933 = vst [vmem:[#allocation90_spill] sm:$0xff] %v5959_v10  ;;  %1497 = vmatpush.msrb.mxu3 %v5974_v63  ;;  %v5977_v10 = vld [vmem:[#allocation8 + $0x100] sm:$0xff] }
 0x1e6   :  { %8934 = vst [vmem:[#allocation92_spill] sm:$0xff] %v5962_v8  ;;  %1438 = vmatpush.msra.mxu0 %v5977_v10  ;;  %v5980_v8 = vld [vmem:[#allocation8 + $0x108] sm:$0xff] }
 0x1e7   :  { %8935 = vst [vmem:[#allocation93_spill] sm:$0xff] %v5965_v54  ;;  %1458 = vmatpush.msrb.mxu1 %v5980_v8  ;;  %v5983_v54 = vld [vmem:[#allocation8 + $0x110] sm:$0xff] }
 0x1e8   :  { %8936 = vst [vmem:[#allocation94_spill] sm:$0xff] %v5968_v43  ;;  %1478 = vmatpush.msrb.mxu2 %v5983_v54  ;;  %v5986_v43 = vld [vmem:[#allocation8 + $0x118] sm:$0xff] }
 0x1e9   :  { %8937 = vst [vmem:[#allocation95_spill] sm:$0xff] %v5971_v29  ;;  %1498 = vmatpush.msrb.mxu3 %v5986_v43  ;;  %v5989_v29 = vld [vmem:[#allocation8 + $0xe0] sm:$0xff] }
 0x1ea   :  { %8938 = vst [vmem:[#allocation96_spill] sm:$0xff] %v5974_v63  ;;  %1439 = vmatpush.msra.mxu0 %v5989_v29  ;;  %v5992_v63 = vld [vmem:[#allocation8 + $0xe8] sm:$0xff] }
 0x1eb   :  { %8939 = vst [vmem:[#allocation97_spill] sm:$0xff] %v5977_v10  ;;  %1459 = vmatpush.msrb.mxu1 %v5992_v63  ;;  %v5995_v10 = vld [vmem:[#allocation8 + $0xf0] sm:$0xff] }
 0x1ec   :  { %8940 = vst [vmem:[#allocation98_spill] sm:$0xff] %v5980_v8  ;;  %1479 = vmatpush.msrb.mxu2 %v5995_v10  ;;  %v5998_v8 = vld [vmem:[#allocation8 + $0xf8] sm:$0xff] }
 0x1ed   :  { %8941 = vst [vmem:[#allocation99_spill] sm:$0xff] %v5983_v54  ;;  %1499 = vmatpush.msrb.mxu3 %v5998_v8  ;;  %v6001_v54 = vld [vmem:[#allocation8 + $0xc0] sm:$0xff] }
 0x1ee   :  { %8942 = vst [vmem:[#allocation100_spill] sm:$0xff] %v5986_v43  ;;  %1440 = vmatpush.msra.mxu0 %v6001_v54  ;;  %v6004_v43 = vld [vmem:[#allocation8 + $0xc8] sm:$0xff] }
 0x1ef   :  { %8943 = vst [vmem:[#allocation101_spill] sm:$0xff] %v5989_v29  ;;  %1460 = vmatpush.msrb.mxu1 %v6004_v43  ;;  %v6007_v29 = vld [vmem:[#allocation8 + $0xd0] sm:$0xff] }
 0x1f0   :  { %8944 = vst [vmem:[#allocation102_spill] sm:$0xff] %v5992_v63  ;;  %1480 = vmatpush.msrb.mxu2 %v6007_v29  ;;  %v6010_v63 = vld [vmem:[#allocation8 + $0xd8] sm:$0xff] }
 0x1f1   :  { %8945 = vst [vmem:[#allocation103_spill] sm:$0xff] %v5995_v10  ;;  %1500 = vmatpush.msrb.mxu3 %v6010_v63  ;;  %v6013_v10 = vld [vmem:[#allocation8 + $0xa0] sm:$0xff] }
 0x1f2   :  { %8946 = vst [vmem:[#allocation104_spill] sm:$0xff] %v5998_v8  ;;  %1441 = vmatpush.msra.mxu0 %v6013_v10  ;;  %v6016_v8 = vld [vmem:[#allocation8 + $0xa8] sm:$0xff] }
 0x1f3   :  { %8947 = vst [vmem:[#allocation105_spill] sm:$0xff] %v6001_v54  ;;  %1461 = vmatpush.msrb.mxu1 %v6016_v8  ;;  %v6019_v54 = vld [vmem:[#allocation8 + $0xb0] sm:$0xff] }
 0x1f4   :  { %8948 = vst [vmem:[#allocation106_spill] sm:$0xff] %v6004_v43  ;;  %1481 = vmatpush.msrb.mxu2 %v6019_v54  ;;  %v6022_v43 = vld [vmem:[#allocation8 + $0xb8] sm:$0xff] }
 0x1f5   :  { %8949 = vst [vmem:[#allocation107_spill] sm:$0xff] %v6007_v29  ;;  %1501 = vmatpush.msrb.mxu3 %v6022_v43  ;;  %v6025_v29 = vld [vmem:[#allocation8 + $0x80] sm:$0xff] }
 0x1f6   :  { %8950 = vst [vmem:[#allocation108_spill] sm:$0xff] %v6010_v63  ;;  %1442 = vmatpush.msra.mxu0 %v6025_v29  ;;  %v6028_v63 = vld [vmem:[#allocation8 + $0x88] sm:$0xff] }
 0x1f7   :  { %8951 = vst [vmem:[#allocation109_spill] sm:$0xff] %v6013_v10  ;;  %1462 = vmatpush.msrb.mxu1 %v6028_v63  ;;  %v6031_v10 = vld [vmem:[#allocation8 + $0x90] sm:$0xff] }
 0x1f8   :  { %8952 = vst [vmem:[#allocation110_spill] sm:$0xff] %v6016_v8  ;;  %1482 = vmatpush.msrb.mxu2 %v6031_v10  ;;  %v6034_v8 = vld [vmem:[#allocation8 + $0x98] sm:$0xff] }
 0x1f9   :  { %8953 = vst [vmem:[#allocation111_spill] sm:$0xff] %v6019_v54  ;;  %1502 = vmatpush.msrb.mxu3 %v6034_v8  ;;  %v6037_v54 = vld [vmem:[#allocation8 + $0x60] sm:$0xff] }
 0x1fa   :  { %8954 = vst [vmem:[#allocation112_spill] sm:$0xff] %v6022_v43  ;;  %1443 = vmatpush.msra.mxu0 %v6037_v54  ;;  %v6040_v43 = vld [vmem:[#allocation8 + $0x68] sm:$0xff] }
 0x1fb   :  { %8955 = vst [vmem:[#allocation113_spill] sm:$0xff] %v6025_v29  ;;  %1463 = vmatpush.msrb.mxu1 %v6040_v43  ;;  %v6043_v29 = vld [vmem:[#allocation8 + $0x70] sm:$0xff] }
 0x1fc   :  { %8956 = vst [vmem:[#allocation114_spill] sm:$0xff] %v6028_v63  ;;  %1483 = vmatpush.msrb.mxu2 %v6043_v29  ;;  %v6046_v63 = vld [vmem:[#allocation8 + $0x78] sm:$0xff] }
 0x1fd   :  { %8957 = vst [vmem:[#allocation115_spill] sm:$0xff] %v6031_v10  ;;  %1503 = vmatpush.msrb.mxu3 %v6046_v63  ;;  %v6049_v10 = vld [vmem:[#allocation8 + $0x40] sm:$0xff] }
 0x1fe   :  { %8958 = vst [vmem:[#allocation116_spill] sm:$0xff] %v6034_v8  ;;  %1444 = vmatpush.msra.mxu0 %v6049_v10  ;;  %v6052_v8 = vld [vmem:[#allocation8 + $0x48] sm:$0xff]  ;;  %v990_v16 = vpop.f32.mrf.mxu0 }
 0x1ff   :  { %8959 = vst [vmem:[#allocation117_spill] sm:$0xff] %v6037_v54  ;;  %1464 = vmatpush.msrb.mxu1 %v6052_v8  ;;  %v6055_v54 = vld [vmem:[#allocation8 + $0x50] sm:$0xff] }
 0x200   :  { %8960 = vst [vmem:[#allocation118_spill] sm:$0xff] %v6040_v43  ;;  %1484 = vmatpush.msrb.mxu2 %v6055_v54  ;;  %v6058_v43 = vld [vmem:[#allocation8 + $0x58] sm:$0xff] }
 0x201   :  { %8961 = vst [vmem:[#allocation119_spill] sm:$0xff] %v6043_v29  ;;  %1504 = vmatpush.msrb.mxu3 %v6058_v43  ;;  %v6061_v29 = vld [vmem:[#allocation8 + $0x20] sm:$0xff] }
 0x202   :  { %8962 = vst [vmem:[#allocation120_spill] sm:$0xff] %v6046_v63  ;;  %1445 = vmatpush.msra.mxu0 %v6061_v29  ;;  %v6064_v63 = vld [vmem:[#allocation8 + $0x28] sm:$0xff] }
 0x203   :  { %8963 = vst [vmem:[#allocation121_spill] sm:$0xff] %v6049_v10  ;;  %1465 = vmatpush.msrb.mxu1 %v6064_v63  ;;  %v6067_v10 = vld [vmem:[#allocation8 + $0x30] sm:$0xff] }
 0x204   :  { %8964 = vst [vmem:[#allocation122_spill] sm:$0xff] %v6052_v8  ;;  %1485 = vmatpush.msrb.mxu2 %v6067_v10  ;;  %v6070_v8 = vld [vmem:[#allocation8 + $0x38] sm:$0xff] }
 0x205   :  { %8965 = vst [vmem:[#allocation123_spill] sm:$0xff] %v6055_v54  ;;  %1505 = vmatpush.msrb.mxu3 %v6070_v8  ;;  %v6073_v54 = vld [vmem:[#allocation8] sm:$0xff]  ;;  %v1050_v32 = vpop.f32.mrf.mxu3 }
 0x206   :  { %8966 = vst [vmem:[#allocation124_spill] sm:$0xff] %v6058_v43  ;;  %1446 = vmatpush.msra.mxu0 %v6073_v54  ;;  %v6076_v43 = vld [vmem:[#allocation8 + $0x8] sm:$0xff] }
 0x207   :  { %8967 = vst [vmem:[#allocation125_spill] sm:$0xff] %v6061_v29  ;;  %1466 = vmatpush.msrb.mxu1 %v6076_v43  ;;  %v6079_v29 = vld [vmem:[#allocation8 + $0x10] sm:$0xff] }
 0x208   :  { %8968 = vst [vmem:[#allocation126_spill] sm:$0xff] %v6064_v63  ;;  %1486 = vmatpush.msrb.mxu2 %v6079_v29  ;;  %v6082_v63 = vld [vmem:[#allocation8 + $0x18] sm:$0xff] }
 0x209   :  { %8969 = vst [vmem:[#allocation127_spill] sm:$0xff] %v6067_v10  ;;  %1506 = vmatpush.msrb.mxu3 %v6082_v63  ;;  %v235_v10 = vadd.f32 %v5462_v39, %v8832_v46 }
 0x20a   :  { %8970 = vst [vmem:[#allocation128_spill] sm:$0xff] %v6070_v8  ;;  %v194_v8 = vadd.f32 %v5540_v44, %v8833_v48  ;;  %v1030_v44 = vpop.f32.mrf.mxu2 }
 0x20b   :  { %8971 = vst [vmem:[#allocation129_spill] sm:$0xff] %v6073_v54  ;;  %v1010_v54 = vpop.f32.mrf.mxu1 }
 0x20c   :  { %8972 = vst [vmem:[#allocation130_spill] sm:$0xff] %v6076_v43  ;;  %v1053_v21 = vadd.f32 %v990_v16, %v194_v8  ;;  %v1054_v47 = vadd.f32 %v1010_v54, %v235_v10 }
 0x20d   :  { %8973 = vst [vmem:[#allocation131_spill] sm:$0xff] %v6079_v29  ;;  %v317_v29 = vadd.f32 %v5480_v56, %v8834_v61 }
 0x20e   :  { %8974 = vst [vmem:[#allocation132_spill] sm:$0xff] %v6082_v63  ;;  %v3548_v17 = vmul.f32 -1.442695, %v1053_v21  ;;  %v3549_v43 = vmul.f32 -1.442695, %v1054_v47  ;;  %v276_v47 = vadd.f32 %v5504_v42, %v8836_v53 }
 0x20f   :  { %v1056_v52 = vadd.f32 %v1050_v32, %v317_v29 }
 0x210   :  { %3656 = vpow2.f32 %v3548_v17  ;;  %v1055_v10 = vadd.f32 %v1030_v44, %v276_v47 }
 0x211   :  { %3658 = vpow2.f32 %v3549_v43  ;;  %v3550_v63 = vmul.f32 -1.442695, %v1056_v52 }
 0x213   :  { %3660 = vpow2.f32 %v3550_v63 }
 0x216   :  { %v3657_v38 = vpop.eup %3656 }
 0x217   :  { %v3659_v36 = vpop.eup %3658  ;;  %v1287_v39 = vadd.f32 1.0, %v3657_v38 }
 0x218   :  { %v1306_v46 = vadd.f32 1.0, %v3659_v36 }
 0x219   :  { %3662 = vrcp.f32 %v1287_v39  ;;  %v3661_v16 = vpop.eup %3660  ;;  %v1299_v8 = vand.u32 2147483648, %v1287_v39  ;;  %v1297_v38 = vand.u32 2147483647, %v1287_v39  ;;  %vm1293_vm7 = vweird.f32 %v1287_v39 }
 0x21a   :  { %3664 = vrcp.f32 %v1306_v46  ;;  %v1326_v17 = vadd.f32 1.0, %v3661_v16  ;;  %v1318_v63 = vand.u32 2147483648, %v1306_v46  ;;  %v1316_v61 = vand.u32 2147483647, %v1306_v46 }
 0x21b   :  { %vm1312_vm8 = vweird.f32 %v1306_v46  ;;  %v1300_v44 = vor.u32 1.1754944e-38, %v1299_v8  ;;  %vm1298_vm11 = vcmp.eq.f32.partialorder %v1297_v38, 8.507059e+37 }
 0x21c   :  { %3666 = vrcp.f32 %v1326_v17  ;;  %vm1317_vm12 = vcmp.eq.f32.partialorder %v1316_v61, 8.507059e+37  ;;  %v1338_v8 = vand.u32 2147483648, %v1326_v17  ;;  %vm1332_vm14 = vweird.f32 %v1326_v17 }
 0x21d   :  { %3668 = vtanh.f32 %v1055_v10 }
 0x21e   :  { %v1339_v61 = vor.u32 1.1754944e-38, %v1338_v8 }
 0x21f   :  { %v3663_v21 = vpop.eup %3662 }
 0x220   :  { %v3665_v56 = vpop.eup %3664  ;;  %v1289_v43 = vmul.f32 %v3663_v21, %v1287_v39  ;;  %vm1294_vm5 = vweird.f32 %v3663_v21 }
 0x221   :  { %v1308_v29 = vmul.f32 %v3665_v56, %v1306_v46  ;;  %vm1313_vm6 = vweird.f32 %v3665_v56  ;;  %vm1295_vm9 = vmor %vm1293_vm7, %vm1294_vm5 }
 0x222   :  { %v1290_v52 = vsub.f32 1.0, %v1289_v43  ;;  %v3667_v48 = vpop.eup %3666  ;;  %vm1314_vm10 = vmor %vm1312_vm8, %vm1313_vm6  ;;  %v1319_v43 = vor.u32 1.1754944e-38, %v1318_v63 }
 0x223   :  { %v1309_v32 = vsub.f32 1.0, %v1308_v29  ;;  %v1328_v47 = vmul.f32 %v3667_v48, %v1326_v17  ;;  %v3669_v10 = vpop.eup %3668  ;;  %vm1333_vm13 = vweird.f32 %v3667_v48 }
 0x224   :  { %v1291_v36 = vmul.f32 %v3663_v21, %v1290_v52  ;;  %vm1334_vm15 = vmor %vm1332_vm14, %vm1333_vm13 }
 0x225   :  { %v1310_v54 = vmul.f32 %v3665_v56, %v1309_v32  ;;  %v1329_v37 = vsub.f32 1.0, %v1328_v47  ;;  %v6112_v47 = vld [vmem:[#allocation7 + $0x1f8] sm:$0xff] }
 0x226   :  { %v1292_v42 = vadd.f32 %v3663_v21, %v1291_v36  ;;  %v1074_v63 = vpop.f32.mrf.mxu0  ;;  %v1094_v38 = vpop.f32.mrf.mxu1 }
 0x227   :  { %v1311_v16 = vadd.f32 %v3665_v56, %v1310_v54  ;;  %v1330_v36 = vmul.f32 %v3667_v48, %v1329_v37 }
 0x228   :  { %v1296_v29 = vsel %vm1295_vm9, %v3663_v21, %v1292_v42  ;;  %v1336_v21 = vand.u32 2147483647, %v1326_v17 }
 0x229   :  { %v1301_v53 = vsel %vm1298_vm11, %v1300_v44, %v1296_v29  ;;  %v1315_v52 = vsel %vm1314_vm10, %v3665_v56, %v1311_v16  ;;  %v1331_v46 = vadd.f32 %v3667_v48, %v1330_v36  ;;  %v6106_v44 = vld [vmem:[#allocation7 + $0x1e8] sm:$0xff]  ;;  %v6109_v16 = vld [vmem:[#allocation7 + $0x1f0] sm:$0xff]  ;;  %v6126_v36 = vld [vmem:[#allocation7 + $0x1d8] sm:$0xff] }
 0x22a   :  { %v1320_v32 = vsel %vm1317_vm12, %v1319_v43, %v1315_v52  ;;  %v1343_v3 = vmul.f32 %v3669_v10, %v1301_v53  ;;  %vm1337_vm0 = vcmp.eq.f32.partialorder %v1336_v21, 8.507059e+37  ;;  %v6117_v10 = vld [vmem:[#allocation7 + $0x1c0] sm:$0xff]  ;;  %v6120_v52 = vld [vmem:[#allocation7 + $0x1c8] sm:$0xff]  ;;  %8975 = vst [vmem:[#allocation133_spill] sm:$0xff] %v6126_v36 }
 0x22b   :  { %v1342_v15 = vmul.f32 %v1320_v32, %v5591_v0  ;;  %v1335_v56 = vsel %vm1334_vm15, %v3667_v48, %v1331_v46  ;;  %v6103_v48 = vld [vmem:[#allocation7 + $0x1e0] sm:$0xff]  ;;  %v6123_v32 = vld [vmem:[#allocation7 + $0x1d0] sm:$0xff] }
 0x22c   :  { %v1340_v53 = vsel %vm1337_vm0, %v1339_v61, %v1335_v56  ;;  %v6137_v56 = vld [vmem:[#allocation7 + $0x1b0] sm:$0xff]  ;;  %v6140_v61 = vld [vmem:[#allocation7 + $0x1b8] sm:$0xff] }
 0x22d   :  { %v6094_v39 = vadd.f32 %v1343_v3, %v1342_v15  ;;  %v1134_v0 = vpop.f32.mrf.mxu3  ;;  %v6129_v46 = vpop.f32.mrf.mxu2  ;;  %8978 = vst [vmem:[#allocation136_spill] sm:$0xff] %v6137_v56 }
 0x22e   :  { %v1154_v15 = vpop.f32.mrf.mxu0  ;;  %v1174_v3 = vpop.f32.mrf.mxu1  ;;  %8979 = vst [vmem:[#allocation137_spill] sm:$0xff] %v6140_v61 }
 0x22f   :  { %3670 = vtanh.f32 %v6094_v39  ;;  %v1155_v37 = vadd.f32 %v1154_v15, %v1074_v63  ;;  %v1175_v17 = vadd.f32 %v1174_v3, %v1094_v38  ;;  %v6131_v63 = vld [vmem:[#allocation7 + $0x1a0] sm:$0xff]  ;;  %v6134_v38 = vld [vmem:[#allocation7 + $0x1a8] sm:$0xff] }
 0x230   :  { %8976 = vst [vmem:[#allocation134_spill] sm:$0xff] %v6131_v63  ;;  %v6146_v15 = vld [vmem:[#allocation7 + $0x188] sm:$0xff] }
 0x231   :  { %v1217_v43 = vadd.f32 %v1155_v37, %v5593_v45  ;;  %v1218_v29 = vadd.f32 %v1175_v17, %v5595_v31  ;;  %8977 = vst [vmem:[#allocation135_spill] sm:$0xff] %v6134_v38  ;;  %v6149_v37 = vld [vmem:[#allocation7 + $0x190] sm:$0xff]  ;;  %v6152_v17 = vld [vmem:[#allocation7 + $0x198] sm:$0xff]  ;;  %v6171_v31 = vld [vmem:[#allocation7 + $0x148] sm:$0xff] }
 0x232   :  { %8981 = vst [vmem:[#allocation139_spill] sm:$0xff] %v6146_v15 }
 0x233   :  { %v3545_v8 = vmul.f32 -1.442695, %v1217_v43  ;;  %v3546_v21 = vmul.f32 -1.442695, %v1218_v29  ;;  %8982 = vst [vmem:[#allocation140_spill] sm:$0xff] %v6149_v37  ;;  %v6155_v43 = vld [vmem:[#allocation7 + $0x160] sm:$0xff] }
 0x234   :  { %8983 = vst [vmem:[#allocation141_spill] sm:$0xff] %v6152_v17  ;;  %v6158_v29 = vld [vmem:[#allocation7 + $0x168] sm:$0xff] }
 0x235   :  { %v3671_v54 = vpop.eup %3670  ;;  %3672 = vpow2.f32 %v3545_v8  ;;  %8984 = vst [vmem:[#allocation142_spill] sm:$0xff] %v6155_v43 }
 0x236   :  { %v6097_v42 = vmul.f32 %v3671_v54, %v1340_v53  ;;  %v1214_v54 = vpop.f32.mrf.mxu3  ;;  %v6143_v53 = vld [vmem:[#allocation7 + $0x180] sm:$0xff]  ;;  %3674 = vpow2.f32 %v3546_v21  ;;  %8985 = vst [vmem:[#allocation143_spill] sm:$0xff] %v6158_v29  ;;  %v6162_v21 = vld [vmem:[#allocation7 + $0x170] sm:$0xff] }
 0x237   :  { %8980 = vst [vmem:[#allocation138_spill] sm:$0xff] %v6143_v53  ;;  %v1215_v3 = vadd.f32 %v1214_v54, %v1134_v0  ;;  %v6165_v0 = vld [vmem:[#allocation7 + $0x178] sm:$0xff]  ;;  %v6168_v54 = vld [vmem:[#allocation7 + $0x140] sm:$0xff] }
 0x238   :  { %1363 = vmatmul.f32.vlgmr.msrb.gmra.mxu0 %v6097_v42  ;;  %1383 = vmatmul.f32.vlgmr.msra.gmra.mxu1 %v6097_v42  ;;  %8986 = vst [vmem:[#allocation144_spill] sm:$0xff] %v6162_v21 }
 0x239   :  { %1403 = vmatmul.f32.vlgmr.msra.gmra.mxu2 %v6097_v42  ;;  %1423 = vmatmul.f32.vlgmr.msra.gmra.mxu3 %v6097_v42  ;;  %v1220_v8 = vadd.f32 %v1215_v3, %v5600_v41  ;;  %8987 = vst [vmem:[#allocation145_spill] sm:$0xff] %v6165_v0  ;;  %v6177_v3 = vld [vmem:[#allocation7 + $0x158] sm:$0xff] }
 0x23a   :  { %1511 = vmatpush.msrb.mxu0 %v6103_v48  ;;  %1531 = vmatpush.msra.mxu1 %v6106_v44  ;;  %8988 = vst [vmem:[#allocation146_spill] sm:$0xff] %v6168_v54 }
 0x23b   :  { %1551 = vmatpush.msra.mxu2 %v6109_v16  ;;  %1571 = vmatpush.msra.mxu3 %v6112_v47  ;;  %8989 = vst [vmem:[#allocation147_spill] sm:$0xff] %v6171_v31  ;;  %v3547_v45 = vmul.f32 -1.442695, %v1220_v8  ;;  %v3673_v41 = vpop.eup %3672  ;;  %v6188_v8 = vld [vmem:[#allocation7 + $0x130] sm:$0xff] }
 0x23c   :  { %1512 = vmatpush.msrb.mxu0 %v6117_v10  ;;  %1532 = vmatpush.msra.mxu1 %v6120_v52  ;;  %8991 = vst [vmem:[#allocation149_spill] sm:$0xff] %v6177_v3 }
 0x23d   :  { %1552 = vmatpush.msra.mxu2 %v6123_v32  ;;  %1572 = vmatpush.msra.mxu3 %v6126_v36  ;;  %3676 = vpow2.f32 %v3547_v45  ;;  %8994 = vst [vmem:[#allocation152_spill] sm:$0xff] %v6188_v8  ;;  %v6203_v45 = vld [vmem:[#allocation7 + $0x110] sm:$0xff] }
 0x23e   :  { %1513 = vmatpush.msrb.mxu0 %v6131_v63  ;;  %1533 = vmatpush.msra.mxu1 %v6134_v38  ;;  %8998 = vst [vmem:[#allocation156_spill] sm:$0xff] %v6203_v45  ;;  %v6344_v36 = vld [vmem:[#allocation7 + $0x10] sm:$0xff] }
 0x23f   :  { %1553 = vmatpush.msra.mxu2 %v6137_v56  ;;  %1573 = vmatpush.msra.mxu3 %v6140_v61  ;;  %v6320_v56 = vld [vmem:[#allocation7 + $0x30] sm:$0xff] }
 0x240   :  { %1514 = vmatpush.msrb.mxu0 %v6143_v53  ;;  %1534 = vmatpush.msra.mxu1 %v6146_v15  ;;  %v6278_v53 = vld [vmem:[#allocation7 + $0x70] sm:$0xff]  ;;  %9028 = vst [vmem:[#allocation184_spill] sm:$0xff] %v6320_v56 }
 0x241   :  { %1554 = vmatpush.msra.mxu2 %v6149_v37  ;;  %1574 = vmatpush.msra.mxu3 %v6152_v17  ;;  %v6246_v17 = vld [vmem:[#allocation7 + $0xb0] sm:$0xff]  ;;  %v6271_v37 = vld [vmem:[#allocation7 + $0x60] sm:$0xff]  ;;  %9018 = vst [vmem:[#allocation176_spill] sm:$0xff] %v6278_v53 }
 0x242   :  { %1515 = vmatpush.msrb.mxu0 %v6155_v43  ;;  %1535 = vmatpush.msra.mxu1 %v6158_v29  ;;  %v6174_v29 = vld [vmem:[#allocation7 + $0x150] sm:$0xff]  ;;  %v1194_v43 = vpop.f32.mrf.mxu2  ;;  %9010 = vst [vmem:[#allocation168_spill] sm:$0xff] %v6246_v17 }
 0x243   :  { %1555 = vmatpush.msra.mxu2 %v6162_v21  ;;  %1575 = vmatpush.msra.mxu3 %v6165_v0  ;;  %8990 = vst [vmem:[#allocation148_spill] sm:$0xff] %v6174_v29  ;;  %v6180_v21 = vld [vmem:[#allocation7 + $0x120] sm:$0xff]  ;;  %v6183_v0 = vld [vmem:[#allocation7 + $0x128] sm:$0xff] }
 0x244   :  { %1516 = vmatpush.msrb.mxu0 %v6168_v54  ;;  %1536 = vmatpush.msra.mxu1 %v6171_v31  ;;  %8992 = vst [vmem:[#allocation150_spill] sm:$0xff] %v6180_v21  ;;  %v3675_v54 = vpop.eup %3674  ;;  %v6186_v31 = vadd.f32 1.0, %v3673_v41  ;;  %v6206_v41 = vld [vmem:[#allocation7 + $0x118] sm:$0xff] }
 0x245   :  { %1556 = vmatpush.msra.mxu2 %v6174_v29  ;;  %1576 = vmatpush.msra.mxu3 %v6177_v3  ;;  %8993 = vst [vmem:[#allocation151_spill] sm:$0xff] %v6183_v0  ;;  %v6191_v29 = vld [vmem:[#allocation7 + $0x138] sm:$0xff]  ;;  %v6194_v3 = vadd.f32 1.0, %v3675_v54  ;;  %v6210_v54 = vld [vmem:[#allocation7 + $0xe0] sm:$0xff] }
 0x246   :  { %1517 = vmatpush.msrb.mxu0 %v6180_v21  ;;  %1537 = vmatpush.msra.mxu1 %v6183_v0  ;;  %8995 = vst [vmem:[#allocation153_spill] sm:$0xff] %v6191_v29  ;;  %v6196_v21 = vld [vmem:[#allocation7 + $0x100] sm:$0xff]  ;;  %v6199_v0 = vld [vmem:[#allocation7 + $0x108] sm:$0xff]  ;;  %3678 = vrcp.f32 %v6186_v31  ;;  %v1236_v15 = vand.u32 2147483648, %v6186_v31  ;;  %vm1230_vm3 = vweird.f32 %v6186_v31 }
 0x247   :  { %1557 = vmatpush.msra.mxu2 %v6188_v8  ;;  %1577 = vmatpush.msra.mxu3 %v6191_v29  ;;  %8996 = vst [vmem:[#allocation154_spill] sm:$0xff] %v6196_v21  ;;  %3680 = vrcp.f32 %v6194_v3  ;;  %v6217_v29 = vld [vmem:[#allocation7 + $0xf0] sm:$0xff]  ;;  %v6226_v8 = vld [vmem:[#allocation7 + $0xc8] sm:$0xff]  ;;  %vm1249_vm4 = vweird.f32 %v6194_v3 }
 0x248   :  { %1518 = vmatpush.msrb.mxu0 %v6196_v21  ;;  %8997 = vst [vmem:[#allocation155_spill] sm:$0xff] %v6199_v0  ;;  %1538 = vmatpush.msra.mxu1 %v6199_v0  ;;  %v6213_v21 = vld [vmem:[#allocation7 + $0xe8] sm:$0xff]  ;;  %v1195_v0 = vadd.f32 %v1194_v43, %v6129_v46  ;;  %v6232_v46 = vld [vmem:[#allocation7 + $0xd8] sm:$0xff] }
 0x249   :  { %1558 = vmatpush.msra.mxu2 %v6203_v45  ;;  %8999 = vst [vmem:[#allocation157_spill] sm:$0xff] %v6206_v41  ;;  %1578 = vmatpush.msra.mxu3 %v6206_v41  ;;  %v6220_v45 = vld [vmem:[#allocation7 + $0xf8] sm:$0xff]  ;;  %v6223_v41 = vld [vmem:[#allocation7 + $0xc0] sm:$0xff] }
 0x24a   :  { %9000 = vst [vmem:[#allocation158_spill] sm:$0xff] %v6210_v54  ;;  %1519 = vmatpush.msrb.mxu0 %v6210_v54  ;;  %1539 = vmatpush.msra.mxu1 %v6213_v21  ;;  %v3677_v54 = vpop.eup %3676 }
 0x24b   :  { %9001 = vst [vmem:[#allocation159_spill] sm:$0xff] %v6213_v21  ;;  %1559 = vmatpush.msra.mxu2 %v6217_v29  ;;  %1579 = vmatpush.msra.mxu3 %v6220_v45  ;;  %v6229_v21 = vld [vmem:[#allocation7 + $0xd0] sm:$0xff]  ;;  %v6235_v43 = vadd.f32 1.0, %v3677_v54 }
 0x24c   :  { %9002 = vst [vmem:[#allocation160_spill] sm:$0xff] %v6217_v29  ;;  %1520 = vmatpush.msrb.mxu0 %v6223_v41  ;;  %1540 = vmatpush.msra.mxu1 %v6226_v8  ;;  %v1219_v29 = vadd.f32 %v1195_v0, %v5629_v20  ;;  %v6260_v0 = vld [vmem:[#allocation7 + $0x88] sm:$0xff] }
 0x24d   :  { %9003 = vst [vmem:[#allocation161_spill] sm:$0xff] %v6220_v45  ;;  %1560 = vmatpush.msra.mxu2 %v6229_v21  ;;  %1580 = vmatpush.msra.mxu3 %v6232_v46  ;;  %v6237_v45 = vld [vmem:[#allocation7 + $0xa0] sm:$0xff]  ;;  %3682 = vrcp.f32 %v6235_v43  ;;  %vm1269_vm10 = vweird.f32 %v6235_v43 }
 0x24e   :  { %9004 = vst [vmem:[#allocation162_spill] sm:$0xff] %v6223_v41  ;;  %1521 = vmatpush.msrb.mxu0 %v6237_v45  ;;  %v6240_v41 = vld [vmem:[#allocation7 + $0xa8] sm:$0xff]  ;;  %3684 = vtanh.f32 %v1219_v29 }
 0x24f   :  { %9005 = vst [vmem:[#allocation163_spill] sm:$0xff] %v6226_v8  ;;  %1541 = vmatpush.msra.mxu1 %v6240_v41  ;;  %v6243_v8 = vpop.eup %3678  ;;  %1561 = vmatpush.msra.mxu2 %v6246_v17  ;;  %v6265_v17 = vld [vmem:[#allocation7 + $0x90] sm:$0xff]  ;;  %v6291_v29 = vld [vmem:[#allocation7 + $0x48] sm:$0xff] }
 0x250   :  { %9006 = vst [vmem:[#allocation164_spill] sm:$0xff] %v6229_v21  ;;  %v6249_v21 = vld [vmem:[#allocation7 + $0xb8] sm:$0xff]  ;;  %v6252_v54 = vpop.eup %3680  ;;  %vm1231_vm1 = vweird.f32 %v6243_v8 }
 0x251   :  { %9007 = vst [vmem:[#allocation165_spill] sm:$0xff] %v6232_v46  ;;  %1581 = vmatpush.msra.mxu3 %v6249_v21  ;;  %1542 = vmatpush.msra.mxu1 %v6260_v0  ;;  %v1245_v20 = vmul.f32 %v6252_v54, %v6194_v3  ;;  %vm1250_vm2 = vweird.f32 %v6252_v54  ;;  %vm6314_vm5 = vmor %vm1230_vm3, %vm1231_vm1 }
 0x252   :  { %9008 = vst [vmem:[#allocation166_spill] sm:$0xff] %v6237_v45  ;;  %v1226_v45 = vmul.f32 %v6243_v8, %v6186_v31  ;;  %1562 = vmatpush.msra.mxu2 %v6265_v17  ;;  %vm6328_vm6 = vmor %vm1249_vm4, %vm1250_vm2 }
 0x253   :  { %9009 = vst [vmem:[#allocation167_spill] sm:$0xff] %v6240_v41  ;;  %v6257_v41 = vld [vmem:[#allocation7 + $0x80] sm:$0xff]  ;;  %v3683_v61 = vpop.eup %3682 }
 0x254   :  { %9011 = vst [vmem:[#allocation169_spill] sm:$0xff] %v6249_v21  ;;  %1522 = vmatpush.msrb.mxu0 %v6257_v41  ;;  %v6268_v21 = vld [vmem:[#allocation7 + $0x98] sm:$0xff]  ;;  %v1227_v46 = vsub.f32 1.0, %v1226_v45  ;;  %1563 = vmatpush.msra.mxu2 %v6278_v53  ;;  %v1255_v45 = vand.u32 2147483648, %v6194_v3  ;;  %vm1270_vm9 = vweird.f32 %v3683_v61 }
 0x255   :  { %9012 = vst [vmem:[#allocation170_spill] sm:$0xff] %v6257_v41  ;;  %1582 = vmatpush.msra.mxu3 %v6268_v21  ;;  %v6274_v41 = vld [vmem:[#allocation7 + $0x68] sm:$0xff]  ;;  %vm1271_vm11 = vmor %vm1269_vm10, %vm1270_vm9 }
 0x256   :  { %9013 = vst [vmem:[#allocation171_spill] sm:$0xff] %v6260_v0  ;;  %1523 = vmatpush.msrb.mxu0 %v6271_v37  ;;  %1543 = vmatpush.msra.mxu1 %v6274_v41  ;;  %v1246_v0 = vsub.f32 1.0, %v1245_v20  ;;  %v6288_v20 = vld [vmem:[#allocation7 + $0x40] sm:$0xff] }
 0x257   :  { %9014 = vst [vmem:[#allocation172_spill] sm:$0xff] %v6265_v17  ;;  %v6281_v17 = vld [vmem:[#allocation7 + $0x78] sm:$0xff] }
 0x258   :  { %9015 = vst [vmem:[#allocation173_spill] sm:$0xff] %v6268_v21  ;;  %1583 = vmatpush.msra.mxu3 %v6281_v17  ;;  %1524 = vmatpush.msrb.mxu0 %v6288_v20  ;;  %v1247_v53 = vmul.f32 %v6252_v54, %v1246_v0  ;;  %v6297_v21 = vld [vmem:[#allocation7 + $0x50] sm:$0xff]  ;;  %v6308_v0 = vld [vmem:[#allocation7 + $0x28] sm:$0xff] }
 0x259   :  { %9016 = vst [vmem:[#allocation174_spill] sm:$0xff] %v6271_v37  ;;  %v1228_v37 = vmul.f32 %v6243_v8, %v1227_v46  ;;  %1544 = vmatpush.msra.mxu1 %v6291_v29  ;;  %1564 = vmatpush.msra.mxu2 %v6297_v21  ;;  %v6300_v46 = vld [vmem:[#allocation7 + $0x58] sm:$0xff] }
 0x25a   :  { %9017 = vst [vmem:[#allocation175_spill] sm:$0xff] %v6274_v41  ;;  %v1234_v41 = vand.u32 2147483647, %v6186_v31  ;;  %1584 = vmatpush.msra.mxu3 %v6300_v46  ;;  %v1265_v31 = vmul.f32 %v3683_v61, %v6235_v43 }
 0x25b   :  { %9019 = vst [vmem:[#allocation177_spill] sm:$0xff] %v6281_v17  ;;  %v1253_v17 = vand.u32 2147483647, %v6194_v3  ;;  %1545 = vmatpush.msra.mxu1 %v6308_v0  ;;  %1565 = vmatpush.msra.mxu2 %v6320_v56  ;;  %v6338_v56 = vld [vmem:[#allocation7 + $0x8] sm:$0xff]  ;;  %v9066_v3 = vld [vmem:[#allocation75_spill] sm:$0xff] }
 0x25c   :  { %9020 = vst [vmem:[#allocation178_spill] sm:$0xff] %v6288_v20  ;;  %v1229_v20 = vadd.f32 %v6243_v8, %v1228_v37  ;;  %v1248_v37 = vadd.f32 %v6252_v54, %v1247_v53  ;;  %vm1235_vm7 = vcmp.eq.f32.partialorder %v1234_v41, 8.507059e+37 }
 0x25d   :  { %9021 = vst [vmem:[#allocation179_spill] sm:$0xff] %v6291_v29  ;;  %v6305_v29 = vld [vmem:[#allocation7 + $0x20] sm:$0xff]  ;;  %1546 = vmatpush.msra.mxu1 %v6338_v56  ;;  %vm1254_vm8 = vcmp.eq.f32.partialorder %v1253_v17, 8.507059e+37  ;;  %1566 = vmatpush.msra.mxu2 %v6344_v36  ;;  %v1275_v17 = vand.u32 2147483648, %v6235_v43 }
 0x25e   :  { %9022 = vst [vmem:[#allocation180_spill] sm:$0xff] %v6297_v21  ;;  %1525 = vmatpush.msrb.mxu0 %v6305_v29  ;;  %v1233_v53 = vsel %vm6314_vm5, %v6243_v8, %v1229_v20  ;;  %v1252_v63 = vsel %vm6328_vm6, %v6252_v54, %v1248_v37  ;;  %v6347_v21 = vld [vmem:[#allocation7 + $0x18] sm:$0xff]  ;;  %v1273_v54 = vand.u32 2147483647, %v6235_v43  ;;  %v6371_v43 = vld [vmem:[#allocation5 + $0x1a0] sm:$0xff] }
 0x25f   :  { %9023 = vst [vmem:[#allocation181_spill] sm:$0xff] %v6300_v46  ;;  %v1237_v46 = vor.u32 1.1754944e-38, %v1236_v15  ;;  %v6335_v15 = vld [vmem:[#allocation7] sm:$0xff] }
 0x260   :  { %9024 = vst [vmem:[#allocation182_spill] sm:$0xff] %v6305_v29  ;;  %v6323_v29 = vld [vmem:[#allocation7 + $0x38] sm:$0xff]  ;;  %1526 = vmatpush.msrb.mxu0 %v6335_v15  ;;  %vm1274_vm12 = vcmp.eq.f32.partialorder %v1273_v54, 8.507059e+37  ;;  %v9073_v54 = vld [vmem:[#allocation83_spill] sm:$0xff] }
 0x261   :  { %9025 = vst [vmem:[#allocation183_spill] sm:$0xff] %v6308_v0  ;;  %1585 = vmatpush.msra.mxu3 %v6323_v29  ;;  %v1256_v0 = vor.u32 1.1754944e-38, %v1255_v45  ;;  %v1238_v38 = vsel %vm1235_vm7, %v1237_v46, %v1233_v53  ;;  %v1266_v45 = vsub.f32 1.0, %v1265_v31  ;;  %v1276_v31 = vor.u32 1.1754944e-38, %v1275_v17  ;;  %v9072_v17 = vld [vmem:[#allocation82_spill] sm:$0xff] }
 0x262   :  { %9029 = vst [vmem:[#allocation185_spill] sm:$0xff] %v6323_v29  ;;  %v3685_v29 = vpop.eup %3684 }
 0x263   :  { %9032 = vst [vmem:[#allocation186_spill] sm:$0xff] %v6338_v56  ;;  %1586 = vmatpush.msra.mxu3 %v6347_v21  ;;  %v1257_v8 = vsel %vm1254_vm8, %v1256_v0, %v1252_v63  ;;  %v1280_v41 = vmul.f32 %v3685_v29, %v1238_v38  ;;  %v1267_v56 = vmul.f32 %v3683_v61, %v1266_v45  ;;  %v6360_v29 = vld [vmem:[#allocation5 + $0x1e8] sm:$0xff]  ;;  %v9065_v0 = vld [vmem:[#allocation74_spill] sm:$0xff]  ;;  %v9067_v45 = vld [vmem:[#allocation77_spill] sm:$0xff] }
 0x264   :  { %v1279_v20 = vmul.f32 %v1257_v8, %v5686_v34  ;;  %v9068_v8 = vld [vmem:[#allocation78_spill] sm:$0xff] }
 0x265   :  { %v1268_v53 = vadd.f32 %v3683_v61, %v1267_v56  ;;  %v6357_v56 = vld [vmem:[#allocation5 + $0x1e0] sm:$0xff] }
 0x266   :  { %v6351_v46 = vadd.f32 %v1280_v41, %v1279_v20  ;;  %v9069_v41 = vld [vmem:[#allocation79_spill] sm:$0xff]  ;;  %v9070_v20 = vld [vmem:[#allocation80_spill] sm:$0xff] }
 0x267   :  { %v1272_v37 = vsel %vm1271_vm11, %v3683_v61, %v1268_v53  ;;  %v6365_v61 = vld [vmem:[#allocation5 + $0x1c0] sm:$0xff]  ;;  %v9071_v53 = vld [vmem:[#allocation81_spill] sm:$0xff] }
 0x268   :  { %3686 = vtanh.f32 %v6351_v46  ;;  %v1277_v38 = vsel %vm1274_vm12, %v1276_v31, %v1272_v37  ;;  %v9074_v37 = vld [vmem:[#allocation84_spill] sm:$0xff]  ;;  %v9075_v31 = vld [vmem:[#allocation85_spill] sm:$0xff] }
 0x26e   :  { %v3687_v63 = vpop.eup %3686 }
 0x26f   :  { %v1283_v34 = vmul.f32 %v3687_v63, %v1277_v38  ;;  %v9076_v63 = vld [vmem:[#allocation86_spill] sm:$0xff]  ;;  %v9077_v38 = vld [vmem:[#allocation87_spill] sm:$0xff] }
 0x271   :  { %1447 = vmatmul.f32.vlgmr.msra.gmra.mxu0 %v1283_v34  ;;  %1467 = vmatmul.f32.vlgmr.msrb.gmra.mxu1 %v1283_v34 }
 0x272   :  { %1487 = vmatmul.f32.vlgmr.msrb.gmra.mxu2 %v1283_v34  ;;  %1507 = vmatmul.f32.vlgmr.msrb.gmra.mxu3 %v1283_v34  ;;  %v9078_v34 = vld [vmem:[#allocation88_spill] sm:$0xff] }
 0x273   :  { %1721 = vmatpush.msra.mxu0 %v6357_v56  ;;  %1741 = vmatpush.msrb.mxu1 %v6360_v29 }
 0x274   :  { %1761 = vmatpush.msrb.mxu2 %v5711_v27  ;;  %1781 = vmatpush.msrb.mxu3 %v5714_v2  ;;  %v6381_v27 = vld [vmem:[#allocation5 + $0x180] sm:$0xff] }
 0x275   :  { %1722 = vmatpush.msra.mxu0 %v6365_v61  ;;  %1742 = vmatpush.msrb.mxu1 %v5718_v28  ;;  %v6387_v2 = vld [vmem:[#allocation5 + $0x160] sm:$0xff]  ;;  %v9033_v28 = vld [vmem:[#allocation37_spill] sm:$0xff] }
 0x276   :  { %1762 = vmatpush.msrb.mxu2 %v5721_v13  ;;  %1782 = vmatpush.msrb.mxu3 %v5724_v19  ;;  %v9034_v13 = vld [vmem:[#allocation38_spill] sm:$0xff]  ;;  %v9035_v19 = vld [vmem:[#allocation39_spill] sm:$0xff] }
 0x277   :  { %1723 = vmatpush.msra.mxu0 %v6371_v43  ;;  %1743 = vmatpush.msrb.mxu1 %v5728_v49  ;;  %v9036_v49 = vld [vmem:[#allocation40_spill] sm:$0xff] }
 0x278   :  { %1763 = vmatpush.msrb.mxu2 %v5731_v35  ;;  %1783 = vmatpush.msrb.mxu3 %v5734_v14  ;;  %v9037_v35 = vld [vmem:[#allocation41_spill] sm:$0xff]  ;;  %v9038_v14 = vld [vmem:[#allocation42_spill] sm:$0xff] }
 0x279   :  { %1527 = vmatmul.f32.vlgmr.msrb.gmra.mxu0 %v6097_v42  ;;  %1547 = vmatmul.f32.vlgmr.msra.gmra.mxu1 %v6097_v42 }
 0x27a   :  { %1567 = vmatmul.f32.vlgmr.msra.gmra.mxu2 %v6097_v42  ;;  %1587 = vmatmul.f32.vlgmr.msra.gmra.mxu3 %v6097_v42  ;;  %v9064_v42 = vld [vmem:[#allocation73_spill] sm:$0xff] }
 0x27b   :  { %1724 = vmatpush.msra.mxu0 %v6381_v27  ;;  %1744 = vmatpush.msrb.mxu1 %v5742_v9  ;;  %v9039_v9 = vld [vmem:[#allocation44_spill] sm:$0xff] }
 0x27c   :  { %1764 = vmatpush.msrb.mxu2 %v5745_v60  ;;  %1784 = vmatpush.msrb.mxu3 %v5748_v62  ;;  %v9040_v60 = vld [vmem:[#allocation45_spill] sm:$0xff]  ;;  %v9041_v62 = vld [vmem:[#allocation46_spill] sm:$0xff] }
 0x27d   :  { %1725 = vmatpush.msra.mxu0 %v6387_v2  ;;  %1745 = vmatpush.msrb.mxu1 %v5752_v58  ;;  %v9042_v58 = vld [vmem:[#allocation47_spill] sm:$0xff] }
 0x27e   :  { %1765 = vmatpush.msrb.mxu2 %v5755_v1  ;;  %1785 = vmatpush.msrb.mxu3 %v5758_v22  ;;  %v9043_v1 = vld [vmem:[#allocation48_spill] sm:$0xff]  ;;  %v9044_v22 = vld [vmem:[#allocation49_spill] sm:$0xff] }
 0x27f   :  { %1726 = vmatpush.msra.mxu0 %v5761_v51  ;;  %1746 = vmatpush.msrb.mxu1 %v5764_v4  ;;  %v9045_v51 = vld [vmem:[#allocation50_spill] sm:$0xff]  ;;  %v9046_v4 = vld [vmem:[#allocation52_spill] sm:$0xff] }
 0x280   :  { %1766 = vmatpush.msrb.mxu2 %v5767_v25  ;;  %1786 = vmatpush.msrb.mxu3 %v5770_v18  ;;  %v9047_v25 = vld [vmem:[#allocation53_spill] sm:$0xff]  ;;  %v9048_v18 = vld [vmem:[#allocation54_spill] sm:$0xff] }
 0x281   :  { %1727 = vmatpush.msra.mxu0 %v5773_v57  ;;  %1747 = vmatpush.msrb.mxu1 %v5776_v55  ;;  %v9049_v57 = vld [vmem:[#allocation55_spill] sm:$0xff]  ;;  %v9050_v55 = vld [vmem:[#allocation56_spill] sm:$0xff] }
 0x282   :  { %1767 = vmatpush.msrb.mxu2 %v5779_v50  ;;  %1787 = vmatpush.msrb.mxu3 %v5782_v40  ;;  %v9051_v50 = vld [vmem:[#allocation57_spill] sm:$0xff]  ;;  %v9052_v40 = vld [vmem:[#allocation58_spill] sm:$0xff] }
 0x283   :  { %1728 = vmatpush.msra.mxu0 %v5785_v30  ;;  %1748 = vmatpush.msrb.mxu1 %v5788_v33  ;;  %v9053_v30 = vld [vmem:[#allocation60_spill] sm:$0xff]  ;;  %v9054_v33 = vld [vmem:[#allocation61_spill] sm:$0xff] }
 0x284   :  { %1768 = vmatpush.msrb.mxu2 %v5791_v6  ;;  %1788 = vmatpush.msrb.mxu3 %v5794_v11  ;;  %v9055_v6 = vld [vmem:[#allocation63_spill] sm:$0xff]  ;;  %v9056_v11 = vld [vmem:[#allocation64_spill] sm:$0xff] }
 0x285   :  { %1729 = vmatpush.msra.mxu0 %v5797_v59  ;;  %1749 = vmatpush.msrb.mxu1 %v5800_v7  ;;  %v9057_v59 = vld [vmem:[#allocation65_spill] sm:$0xff]  ;;  %v9058_v7 = vld [vmem:[#allocation66_spill] sm:$0xff] }
 0x286   :  { %1769 = vmatpush.msrb.mxu2 %v5803_v24  ;;  %1789 = vmatpush.msrb.mxu3 %v5806_v12  ;;  %v9059_v24 = vld [vmem:[#allocation67_spill] sm:$0xff]  ;;  %v9060_v12 = vld [vmem:[#allocation68_spill] sm:$0xff] }
 0x287   :  { %1730 = vmatpush.msra.mxu0 %v5809_v23  ;;  %1750 = vmatpush.msrb.mxu1 %v5812_v26  ;;  %v9061_v23 = vld [vmem:[#allocation69_spill] sm:$0xff]  ;;  %v9062_v26 = vld [vmem:[#allocation71_spill] sm:$0xff] }
 0x288   :  { %1770 = vmatpush.msrb.mxu2 %v5815_v5  ;;  %1790 = vmatpush.msrb.mxu3 %v9033_v28  ;;  %v9063_v5 = vld [vmem:[#allocation72_spill] sm:$0xff]  ;;  %v9079_v28 = vld [vmem:[#allocation89_spill] sm:$0xff] }
 0x289   :  { %1731 = vmatpush.msra.mxu0 %v9034_v13  ;;  %1751 = vmatpush.msrb.mxu1 %v9035_v19  ;;  %v9080_v13 = vld [vmem:[#allocation90_spill] sm:$0xff]  ;;  %v9081_v19 = vld [vmem:[#allocation92_spill] sm:$0xff] }
 0x28a   :  { %1771 = vmatpush.msrb.mxu2 %v9036_v49  ;;  %1791 = vmatpush.msrb.mxu3 %v9037_v35  ;;  %v9082_v49 = vld [vmem:[#allocation93_spill] sm:$0xff]  ;;  %v9083_v35 = vld [vmem:[#allocation94_spill] sm:$0xff] }
 0x28b   :  { %1732 = vmatpush.msra.mxu0 %v9038_v14  ;;  %1752 = vmatpush.msrb.mxu1 %v9039_v9  ;;  %v9084_v14 = vld [vmem:[#allocation95_spill] sm:$0xff]  ;;  %v9085_v9 = vld [vmem:[#allocation96_spill] sm:$0xff] }
 0x28c   :  { %1772 = vmatpush.msrb.mxu2 %v9040_v60  ;;  %1792 = vmatpush.msrb.mxu3 %v9041_v62  ;;  %v9086_v60 = vld [vmem:[#allocation97_spill] sm:$0xff]  ;;  %v9087_v62 = vld [vmem:[#allocation98_spill] sm:$0xff] }
 0x28d   :  { %1733 = vmatpush.msra.mxu0 %v9042_v58  ;;  %1753 = vmatpush.msrb.mxu1 %v9043_v1  ;;  %v9088_v58 = vld [vmem:[#allocation99_spill] sm:$0xff]  ;;  %v9089_v1 = vld [vmem:[#allocation100_spill] sm:$0xff] }
 0x28e   :  { %1773 = vmatpush.msrb.mxu2 %v9044_v22  ;;  %1793 = vmatpush.msrb.mxu3 %v9045_v51  ;;  %v9090_v22 = vld [vmem:[#allocation101_spill] sm:$0xff]  ;;  %v9091_v51 = vld [vmem:[#allocation102_spill] sm:$0xff] }
 0x28f   :  { %1734 = vmatpush.msra.mxu0 %v9046_v4  ;;  %1754 = vmatpush.msrb.mxu1 %v9047_v25  ;;  %v9092_v4 = vld [vmem:[#allocation103_spill] sm:$0xff]  ;;  %v9093_v25 = vld [vmem:[#allocation104_spill] sm:$0xff] }
 0x290   :  { %1774 = vmatpush.msrb.mxu2 %v9048_v18  ;;  %1794 = vmatpush.msrb.mxu3 %v9049_v57  ;;  %v9094_v18 = vld [vmem:[#allocation105_spill] sm:$0xff]  ;;  %v9095_v57 = vld [vmem:[#allocation106_spill] sm:$0xff] }
 0x291   :  { %1735 = vmatpush.msra.mxu0 %v9050_v55  ;;  %1755 = vmatpush.msrb.mxu1 %v9051_v50  ;;  %v9096_v55 = vld [vmem:[#allocation107_spill] sm:$0xff]  ;;  %v9097_v50 = vld [vmem:[#allocation108_spill] sm:$0xff] }
 0x292   :  { %1775 = vmatpush.msrb.mxu2 %v9052_v40  ;;  %1795 = vmatpush.msrb.mxu3 %v9053_v30  ;;  %v9098_v40 = vld [vmem:[#allocation109_spill] sm:$0xff]  ;;  %v9099_v30 = vld [vmem:[#allocation110_spill] sm:$0xff] }
 0x293   :  { %1736 = vmatpush.msra.mxu0 %v9054_v33  ;;  %1756 = vmatpush.msrb.mxu1 %v9055_v6  ;;  %v9100_v33 = vld [vmem:[#allocation111_spill] sm:$0xff]  ;;  %v9101_v6 = vld [vmem:[#allocation112_spill] sm:$0xff] }
 0x294   :  { %1776 = vmatpush.msrb.mxu2 %v9056_v11  ;;  %1796 = vmatpush.msrb.mxu3 %v9057_v59  ;;  %v9102_v11 = vld [vmem:[#allocation113_spill] sm:$0xff]  ;;  %v9103_v59 = vld [vmem:[#allocation114_spill] sm:$0xff] }
 0x295   :  { %1805 = vmatpush.msrb.mxu0 %v9058_v7  ;;  %1825 = vmatpush.msra.mxu1 %v9059_v24  ;;  %v9104_v7 = vld [vmem:[#allocation115_spill] sm:$0xff]  ;;  %v9105_v24 = vld [vmem:[#allocation116_spill] sm:$0xff] }
 0x296   :  { %1845 = vmatpush.msra.mxu2 %v9060_v12  ;;  %1865 = vmatpush.msra.mxu3 %v9061_v23  ;;  %v9106_v12 = vld [vmem:[#allocation117_spill] sm:$0xff]  ;;  %v9107_v23 = vld [vmem:[#allocation118_spill] sm:$0xff] }
 0x297   :  { %1806 = vmatpush.msrb.mxu0 %v9062_v26  ;;  %1826 = vmatpush.msra.mxu1 %v9063_v5  ;;  %v9108_v26 = vld [vmem:[#allocation119_spill] sm:$0xff]  ;;  %v9109_v5 = vld [vmem:[#allocation120_spill] sm:$0xff] }
 0x298   :  { %1846 = vmatpush.msra.mxu2 %v9064_v42  ;;  %1866 = vmatpush.msra.mxu3 %v9065_v0  ;;  %v9110_v42 = vld [vmem:[#allocation121_spill] sm:$0xff]  ;;  %v9111_v0 = vld [vmem:[#allocation122_spill] sm:$0xff] }
 0x299   :  { %1807 = vmatpush.msrb.mxu0 %v9066_v3  ;;  %1827 = vmatpush.msra.mxu1 %v9067_v45  ;;  %v9112_v3 = vld [vmem:[#allocation123_spill] sm:$0xff]  ;;  %v9113_v45 = vld [vmem:[#allocation124_spill] sm:$0xff] }
 0x29a   :  { %1847 = vmatpush.msra.mxu2 %v9068_v8  ;;  %1867 = vmatpush.msra.mxu3 %v9069_v41  ;;  %v9114_v8 = vld [vmem:[#allocation125_spill] sm:$0xff]  ;;  %v9115_v41 = vld [vmem:[#allocation126_spill] sm:$0xff] }
 0x29b   :  { %1808 = vmatpush.msrb.mxu0 %v9070_v20  ;;  %1828 = vmatpush.msra.mxu1 %v9071_v53  ;;  %v9116_v20 = vld [vmem:[#allocation127_spill] sm:$0xff]  ;;  %v9117_v53 = vld [vmem:[#allocation128_spill] sm:$0xff] }
 0x29c   :  { %1848 = vmatpush.msra.mxu2 %v9072_v17  ;;  %1868 = vmatpush.msra.mxu3 %v9073_v54  ;;  %v9118_v17 = vld [vmem:[#allocation129_spill] sm:$0xff]  ;;  %v9119_v54 = vld [vmem:[#allocation130_spill] sm:$0xff] }
 0x29d   :  { %1809 = vmatpush.msrb.mxu0 %v9074_v37  ;;  %1829 = vmatpush.msra.mxu1 %v9075_v31  ;;  %v9120_v37 = vld [vmem:[#allocation131_spill] sm:$0xff]  ;;  %v9121_v31 = vld [vmem:[#allocation132_spill] sm:$0xff] }
 0x29e   :  { %1849 = vmatpush.msra.mxu2 %v9076_v63  ;;  %1869 = vmatpush.msra.mxu3 %v9077_v38  ;;  %v9122_v63 = vld [vmem:[#allocation59_spill] sm:$0xff]  ;;  %v9123_v38 = vld [vmem:[#allocation16_spill] sm:$0xff] }
 0x29f   :  { %1810 = vmatpush.msrb.mxu0 %v9078_v34  ;;  %1830 = vmatpush.msra.mxu1 %v9079_v28  ;;  %v238_v34 = vadd.f32 %v9123_v38, %v9122_v63  ;;  %v9124_v28 = vld [vmem:[#allocation43_spill] sm:$0xff] }
 0x2a0   :  { %1850 = vmatpush.msra.mxu2 %v9080_v13  ;;  %1870 = vmatpush.msra.mxu3 %v9081_v19  ;;  %v9125_v13 = vld [vmem:[#allocation24_spill] sm:$0xff] }
 0x2a1   :  { %1811 = vmatpush.msrb.mxu0 %v9082_v49  ;;  %1831 = vmatpush.msra.mxu1 %v9083_v35  ;;  %v197_v19 = vadd.f32 %v9125_v13, %v9124_v28 }
 0x2a2   :  { %1851 = vmatpush.msra.mxu2 %v9084_v14  ;;  %1871 = vmatpush.msra.mxu3 %v9085_v9 }
 0x2a3   :  { %1812 = vmatpush.msrb.mxu0 %v9086_v60  ;;  %1832 = vmatpush.msra.mxu1 %v9087_v62 }
 0x2a4   :  { %1852 = vmatpush.msra.mxu2 %v9088_v58  ;;  %1872 = vmatpush.msra.mxu3 %v9089_v1  ;;  %v9126_v58 = vld [vmem:[#allocation70_spill] sm:$0xff]  ;;  %v9127_v1 = vld [vmem:[#allocation17_spill] sm:$0xff] }
 0x2a5   :  { %1813 = vmatpush.msrb.mxu0 %v9090_v22  ;;  %1833 = vmatpush.msra.mxu1 %v9091_v51  ;;  %v320_v22 = vadd.f32 %v9127_v1, %v9126_v58 }
 0x2a6   :  { %1853 = vmatpush.msra.mxu2 %v9092_v4  ;;  %1873 = vmatpush.msra.mxu3 %v9093_v25 }
 0x2a7   :  { %1814 = vmatpush.msrb.mxu0 %v9094_v18  ;;  %1834 = vmatpush.msra.mxu1 %v9095_v57 }
 0x2a8   :  { %1854 = vmatpush.msra.mxu2 %v9096_v55  ;;  %1874 = vmatpush.msra.mxu3 %v9097_v50 }
 0x2a9   :  { %1815 = vmatpush.msrb.mxu0 %v9098_v40  ;;  %1835 = vmatpush.msra.mxu1 %v9099_v30 }
 0x2aa   :  { %1855 = vmatpush.msra.mxu2 %v9100_v33  ;;  %1875 = vmatpush.msra.mxu3 %v9101_v6  ;;  %v9128_v33 = vld [vmem:[#allocation91_spill] sm:$0xff] }
 0x2ab   :  { %1816 = vmatpush.msrb.mxu0 %v9102_v11  ;;  %1836 = vmatpush.msra.mxu1 %v9103_v59  ;;  %v9129_v6 = vld [vmem:[#allocation19_spill] sm:$0xff] }
 0x2ac   :  { %1856 = vmatpush.msra.mxu2 %v9104_v7  ;;  %1876 = vmatpush.msra.mxu3 %v9105_v24  ;;  %v279_v11 = vadd.f32 %v9129_v6, %v9128_v33  ;;  %v9131_v6 = vld [vmem:[#allocation134_spill] sm:$0xff] }
 0x2ad   :  { %1817 = vmatpush.msrb.mxu0 %v9106_v12  ;;  %1837 = vmatpush.msra.mxu1 %v9107_v23 }
 0x2ae   :  { %1857 = vmatpush.msra.mxu2 %v9108_v26  ;;  %1877 = vmatpush.msra.mxu3 %v9109_v5 }
 0x2af   :  { %1818 = vmatpush.msrb.mxu0 %v9110_v42  ;;  %1838 = vmatpush.msra.mxu1 %v9111_v0 }
 0x2b0   :  { %1858 = vmatpush.msra.mxu2 %v9112_v3  ;;  %1878 = vmatpush.msra.mxu3 %v9113_v45 }
 0x2b1   :  { %1819 = vmatpush.msrb.mxu0 %v9114_v8  ;;  %1839 = vmatpush.msra.mxu1 %v9115_v41 }
 0x2b2   :  { %1859 = vmatpush.msra.mxu2 %v9116_v20  ;;  %1879 = vmatpush.msra.mxu3 %v9117_v53 }
 0x2b3   :  { %1820 = vmatpush.msrb.mxu0 %v9118_v17  ;;  %1840 = vmatpush.msra.mxu1 %v9119_v54 }
 0x2b4   :  { %1860 = vmatpush.msra.mxu2 %v9120_v37  ;;  %1880 = vmatpush.msra.mxu3 %v9121_v31 }
 0x2b5   :  { %v1364_v49 = vpop.f32.mrf.mxu0  ;;  %v1384_v35 = vpop.f32.mrf.mxu1 }
 0x2b6   :  { %v1427_v14 = vadd.f32 %v1364_v49, %v197_v19  ;;  %v1428_v9 = vadd.f32 %v1384_v35, %v238_v34 }
 0x2b8   :  { %v3554_v60 = vmul.f32 -1.442695, %v1427_v14  ;;  %v3555_v62 = vmul.f32 -1.442695, %v1428_v9 }
 0x2ba   :  { %3688 = vpow2.f32 %v3554_v60 }
 0x2bb   :  { %3690 = vpow2.f32 %v3555_v62 }
 0x2bc   :  { %v1424_v51 = vpop.f32.mrf.mxu3  ;;  %v1404_v40 = vpop.f32.mrf.mxu2 }
 0x2bd   :  { %v1430_v4 = vadd.f32 %v1424_v51, %v320_v22  ;;  %v1429_v24 = vadd.f32 %v1404_v40, %v279_v11  ;;  %v9132_v11 = vld [vmem:[#allocation135_spill] sm:$0xff] }
 0x2bf   :  { %v3556_v25 = vmul.f32 -1.442695, %v1430_v4 }
 0x2c0   :  { %v3689_v18 = vpop.eup %3688 }
 0x2c1   :  { %v3691_v57 = vpop.eup %3690  ;;  %v1661_v55 = vadd.f32 1.0, %v3689_v18  ;;  %3692 = vpow2.f32 %v3556_v25 }
 0x2c2   :  { %v1680_v50 = vadd.f32 1.0, %v3691_v57 }
 0x2c3   :  { %3694 = vrcp.f32 %v1661_v55  ;;  %v1673_v0 = vand.u32 2147483648, %v1661_v55  ;;  %v1671_v8 = vand.u32 2147483647, %v1661_v55  ;;  %vm1667_vm15 = vweird.f32 %v1661_v55 }
 0x2c4   :  { %3696 = vrcp.f32 %v1680_v50  ;;  %v1692_v3 = vand.u32 2147483648, %v1680_v50  ;;  %v1690_v20 = vand.u32 2147483647, %v1680_v50  ;;  %vm1686_vm0 = vweird.f32 %v1680_v50 }
 0x2c5   :  { %v1674_v54 = vor.u32 1.1754944e-38, %v1673_v0  ;;  %vm1672_vm3 = vcmp.eq.f32.partialorder %v1671_v8, 8.507059e+37  ;;  %v9143_v0 = vld [vmem:[#allocation146_spill] sm:$0xff]  ;;  %v9146_v8 = vld [vmem:[#allocation149_spill] sm:$0xff] }
 0x2c6   :  { %v1693_v38 = vor.u32 1.1754944e-38, %v1692_v3  ;;  %vm1691_vm4 = vcmp.eq.f32.partialorder %v1690_v20, 8.507059e+37  ;;  %v9144_v3 = vld [vmem:[#allocation147_spill] sm:$0xff] }
 0x2c7   :  { %v3693_v30 = vpop.eup %3692 }
 0x2c8   :  { %v1700_v59 = vadd.f32 1.0, %v3693_v30  ;;  %v9130_v30 = vld [vmem:[#allocation133_spill] sm:$0xff] }
 0x2c9   :  { %v3695_v7 = vpop.eup %3694 }
 0x2ca   :  { %v3697_v12 = vpop.eup %3696  ;;  %v1663_v23 = vmul.f32 %v3695_v7, %v1661_v55  ;;  %3698 = vrcp.f32 %v1700_v59  ;;  %vm1668_vm13 = vweird.f32 %v3695_v7  ;;  %v1712_v51 = vand.u32 2147483648, %v1700_v59 }
 0x2cb   :  { %v1682_v26 = vmul.f32 %v3697_v12, %v1680_v50  ;;  %3700 = vtanh.f32 %v1429_v24  ;;  %vm1687_vm14 = vweird.f32 %v3697_v12  ;;  %vm1669_vm1 = vmor %vm1667_vm15, %vm1668_vm13  ;;  %vm1706_vm6 = vweird.f32 %v1700_v59 }
 0x2cc   :  { %v1664_v5 = vsub.f32 1.0, %v1663_v23  ;;  %vm1688_vm2 = vmor %vm1686_vm0, %vm1687_vm14  ;;  %v1710_v4 = vand.u32 2147483647, %v1700_v59  ;;  %v1713_v18 = vor.u32 1.1754944e-38, %v1712_v51  ;;  %v9141_v23 = vld [vmem:[#allocation144_spill] sm:$0xff] }
 0x2cd   :  { %v1683_v42 = vsub.f32 1.0, %v1682_v26  ;;  %v9142_v26 = vld [vmem:[#allocation145_spill] sm:$0xff] }
 0x2ce   :  { %v1665_v45 = vmul.f32 %v3695_v7, %v1664_v5  ;;  %vm1711_vm8 = vcmp.eq.f32.partialorder %v1710_v4, 8.507059e+37  ;;  %v9159_v4 = vld [vmem:[#allocation160_spill] sm:$0xff] }
 0x2cf   :  { %v1684_v41 = vmul.f32 %v3697_v12, %v1683_v42 }
 0x2d0   :  { %v3699_v53 = vpop.eup %3698  ;;  %v1666_v17 = vadd.f32 %v3695_v7, %v1665_v45  ;;  %v9145_v45 = vld [vmem:[#allocation148_spill] sm:$0xff] }
 0x2d1   :  { %v1685_v37 = vadd.f32 %v3697_v12, %v1684_v41  ;;  %v1702_v31 = vmul.f32 %v3699_v53, %v1700_v59  ;;  %v3701_v13 = vpop.eup %3700  ;;  %vm1707_vm5 = vweird.f32 %v3699_v53  ;;  %v9135_v59 = vld [vmem:[#allocation138_spill] sm:$0xff]  ;;  %v9147_v41 = vld [vmem:[#allocation33_spill] sm:$0xff] }
 0x2d2   :  { %v1670_v34 = vsel %vm1669_vm1, %v3695_v7, %v1666_v17  ;;  %vm1708_vm7 = vmor %vm1706_vm6, %vm1707_vm5  ;;  %v9140_v7 = vld [vmem:[#allocation143_spill] sm:$0xff] }
 0x2d3   :  { %v1675_v19 = vsel %vm1672_vm3, %v1674_v54, %v1670_v34  ;;  %v1689_v49 = vsel %vm1688_vm2, %v3697_v12, %v1685_v37  ;;  %v1703_v35 = vsub.f32 1.0, %v1702_v31  ;;  %v9149_v54 = vld [vmem:[#allocation150_spill] sm:$0xff]  ;;  %v9150_v37 = vld [vmem:[#allocation151_spill] sm:$0xff]  ;;  %v9151_v31 = vld [vmem:[#allocation152_spill] sm:$0xff] }
 0x2d4   :  { %v1694_v14 = vsel %vm1691_vm4, %v1693_v38, %v1689_v49  ;;  %v1717_v9 = vmul.f32 %v3701_v13, %v1675_v19  ;;  %v9152_v38 = vld [vmem:[#allocation153_spill] sm:$0xff]  ;;  %v9153_v49 = vld [vmem:[#allocation154_spill] sm:$0xff] }
 0x2d5   :  { %v1716_v60 = vmul.f32 %v1694_v14, %v6094_v39  ;;  %v1704_v62 = vmul.f32 %v3699_v53, %v1703_v35  ;;  %v9154_v35 = vld [vmem:[#allocation155_spill] sm:$0xff]  ;;  %v9155_v14 = vld [vmem:[#allocation156_spill] sm:$0xff] }
 0x2d7   :  { %v6510_v1 = vadd.f32 %v1717_v9, %v1716_v60  ;;  %v1705_v22 = vadd.f32 %v3699_v53, %v1704_v62  ;;  %v9156_v9 = vld [vmem:[#allocation157_spill] sm:$0xff]  ;;  %v9157_v62 = vld [vmem:[#allocation158_spill] sm:$0xff] }
 0x2d9   :  { %3702 = vtanh.f32 %v6510_v1  ;;  %v1709_v25 = vsel %vm1708_vm7, %v3699_v53, %v1705_v22  ;;  %v9148_v53 = vld [vmem:[#allocation34_spill] sm:$0xff]  ;;  %v9158_v22 = vld [vmem:[#allocation159_spill] sm:$0xff] }
 0x2da   :  { %v1714_v55 = vsel %vm1711_vm8, %v1713_v18, %v1709_v25  ;;  %v9160_v25 = vld [vmem:[#allocation161_spill] sm:$0xff]  ;;  %v9161_v18 = vld [vmem:[#allocation162_spill] sm:$0xff] }
 0x2df   :  { %v3703_v57 = vpop.eup %3702 }
 0x2e0   :  { %v6513_v50 = vmul.f32 %v3703_v57, %v1714_v55  ;;  %v9162_v57 = vld [vmem:[#allocation163_spill] sm:$0xff] }
 0x2e1   :  { %v9163_v55 = vld [vmem:[#allocation35_spill] sm:$0xff] }
 0x2e2   :  { %1737 = vmatmul.f32.vlgmr.msra.gmra.mxu0 %v6513_v50  ;;  %1757 = vmatmul.f32.vlgmr.msrb.gmra.mxu1 %v6513_v50 }
 0x2e3   :  { %1777 = vmatmul.f32.vlgmr.msrb.gmra.mxu2 %v6513_v50  ;;  %1797 = vmatmul.f32.vlgmr.msrb.gmra.mxu3 %v6513_v50 }
 0x2e4   :  { %1885 = vmatpush.msra.mxu0 %v6103_v48  ;;  %1905 = vmatpush.msrb.mxu1 %v6106_v44  ;;  %v9133_v48 = vld [vmem:[#allocation136_spill] sm:$0xff]  ;;  %v9134_v44 = vld [vmem:[#allocation137_spill] sm:$0xff] }
 0x2e5   :  { %1925 = vmatpush.msrb.mxu2 %v6109_v16  ;;  %1945 = vmatpush.msrb.mxu3 %v6112_v47  ;;  %v9136_v16 = vld [vmem:[#allocation139_spill] sm:$0xff]  ;;  %v9137_v47 = vld [vmem:[#allocation140_spill] sm:$0xff] }
 0x2e6   :  { %1886 = vmatpush.msra.mxu0 %v6117_v10  ;;  %1906 = vmatpush.msrb.mxu1 %v6120_v52  ;;  %v9138_v10 = vld [vmem:[#allocation141_spill] sm:$0xff] }
 0x2e7   :  { %1926 = vmatpush.msrb.mxu2 %v6123_v32  ;;  %1946 = vmatpush.msrb.mxu3 %v9130_v30  ;;  %v9139_v32 = vld [vmem:[#allocation142_spill] sm:$0xff]  ;;  %v9165_v30 = vld [vmem:[#allocation165_spill] sm:$0xff] }
 0x2e8   :  { %1887 = vmatpush.msra.mxu0 %v9131_v6  ;;  %1907 = vmatpush.msrb.mxu1 %v9132_v11  ;;  %v9166_v6 = vld [vmem:[#allocation166_spill] sm:$0xff]  ;;  %v9167_v11 = vld [vmem:[#allocation167_spill] sm:$0xff] }
 0x2e9   :  { %1927 = vmatpush.msrb.mxu2 %v9133_v48  ;;  %1947 = vmatpush.msrb.mxu3 %v9134_v44  ;;  %v9168_v44 = vld [vmem:[#allocation168_spill] sm:$0xff] }
 0x2ea   :  { %1888 = vmatpush.msra.mxu0 %v9135_v59  ;;  %1908 = vmatpush.msrb.mxu1 %v9136_v16  ;;  %v9169_v59 = vld [vmem:[#allocation169_spill] sm:$0xff] }
 0x2eb   :  { %1928 = vmatpush.msrb.mxu2 %v9137_v47  ;;  %1948 = vmatpush.msrb.mxu3 %v9138_v10  ;;  %v9170_v47 = vld [vmem:[#allocation170_spill] sm:$0xff]  ;;  %v9171_v10 = vld [vmem:[#allocation171_spill] sm:$0xff] }
 0x2ec   :  { %1889 = vmatpush.msra.mxu0 %v9139_v32  ;;  %1909 = vmatpush.msrb.mxu1 %v9140_v7  ;;  %v9172_v7 = vld [vmem:[#allocation172_spill] sm:$0xff] }
 0x2ed   :  { %1929 = vmatpush.msrb.mxu2 %v9141_v23  ;;  %1949 = vmatpush.msrb.mxu3 %v9142_v26  ;;  %v9174_v26 = vld [vmem:[#allocation174_spill] sm:$0xff] }
 0x2ee   :  { %v1448_v39 = vpop.f32.mrf.mxu0  ;;  %v1468_v40 = vpop.f32.mrf.mxu1  ;;  %1890 = vmatpush.msra.mxu0 %v9143_v0  ;;  %1910 = vmatpush.msrb.mxu1 %v9144_v3  ;;  %v9177_v0 = vld [vmem:[#allocation177_spill] sm:$0xff]  ;;  %v9178_v3 = vld [vmem:[#allocation178_spill] sm:$0xff] }
 0x2ef   :  { %1930 = vmatpush.msrb.mxu2 %v9145_v45  ;;  %1950 = vmatpush.msrb.mxu3 %v9146_v8  ;;  %v9179_v45 = vld [vmem:[#allocation179_spill] sm:$0xff] }
 0x2f0   :  { %1891 = vmatpush.msra.mxu0 %v9149_v54  ;;  %1911 = vmatpush.msrb.mxu1 %v9150_v37  ;;  %v9182_v54 = vld [vmem:[#allocation182_spill] sm:$0xff]  ;;  %v9183_v37 = vld [vmem:[#allocation183_spill] sm:$0xff] }
 0x2f1   :  { %1931 = vmatpush.msrb.mxu2 %v9151_v31  ;;  %1951 = vmatpush.msrb.mxu3 %v9152_v38  ;;  %v9184_v38 = vld [vmem:[#allocation184_spill] sm:$0xff] }
 0x2f2   :  { %1892 = vmatpush.msra.mxu0 %v9153_v49  ;;  %1912 = vmatpush.msrb.mxu1 %v9154_v35  ;;  %v9186_v49 = vld [vmem:[#allocation186_spill] sm:$0xff] }
 0x2f3   :  { %1932 = vmatpush.msrb.mxu2 %v9155_v14  ;;  %1952 = vmatpush.msrb.mxu3 %v9156_v9 }
 0x2f4   :  { %1893 = vmatpush.msra.mxu0 %v9157_v62  ;;  %1913 = vmatpush.msrb.mxu1 %v9158_v22 }
 0x2f5   :  { %v1508_v52 = vpop.f32.mrf.mxu3  ;;  %v1488_v34 = vpop.f32.mrf.mxu2  ;;  %1933 = vmatpush.msrb.mxu2 %v9159_v4  ;;  %1953 = vmatpush.msrb.mxu3 %v9160_v25 }
 0x2f6   :  { %v1528_v24 = vpop.f32.mrf.mxu0  ;;  %v1548_v12 = vpop.f32.mrf.mxu1  ;;  %1894 = vmatpush.msra.mxu0 %v9161_v18  ;;  %1914 = vmatpush.msrb.mxu1 %v9162_v57 }
 0x2f7   :  { %v1529_v5 = vadd.f32 %v1528_v24, %v1448_v39  ;;  %v1549_v42 = vadd.f32 %v1548_v12, %v1468_v40  ;;  %v9164_v40 = vld [vmem:[#allocation164_spill] sm:$0xff]  ;;  %1954 = vmatpush.msrb.mxu3 %v9165_v30  ;;  %v9173_v24 = vld [vmem:[#allocation173_spill] sm:$0xff] }
 0x2f8   :  { %1934 = vmatpush.msrb.mxu2 %v9164_v40  ;;  %1895 = vmatpush.msra.mxu0 %v9166_v6 }
 0x2f9   :  { %v1591_v20 = vadd.f32 %v1529_v5, %v9147_v41  ;;  %v1592_v17 = vadd.f32 %v1549_v42, %v9148_v53  ;;  %1915 = vmatpush.msrb.mxu1 %v9167_v11  ;;  %1955 = vmatpush.msrb.mxu3 %v9169_v59  ;;  %v9175_v5 = vld [vmem:[#allocation175_spill] sm:$0xff]  ;;  %v9176_v42 = vld [vmem:[#allocation176_spill] sm:$0xff] }
 0x2fa   :  { %1935 = vmatpush.msrb.mxu2 %v9168_v44  ;;  %1896 = vmatpush.msra.mxu0 %v9170_v47 }
 0x2fb   :  { %v3551_v13 = vmul.f32 -1.442695, %v1591_v20  ;;  %v3552_v19 = vmul.f32 -1.442695, %v1592_v17  ;;  %1916 = vmatpush.msrb.mxu1 %v9171_v10  ;;  %1956 = vmatpush.msrb.mxu3 %v9173_v24  ;;  %v9180_v20 = vld [vmem:[#allocation180_spill] sm:$0xff]  ;;  %v9181_v17 = vld [vmem:[#allocation181_spill] sm:$0xff] }
 0x2fc   :  { %1936 = vmatpush.msrb.mxu2 %v9172_v7  ;;  %1897 = vmatpush.msra.mxu0 %v9174_v26 }
 0x2fd   :  { %3704 = vpow2.f32 %v3551_v13  ;;  %v1588_v60 = vpop.f32.mrf.mxu3  ;;  %v1568_v23 = vpop.f32.mrf.mxu2  ;;  %1917 = vmatpush.msrb.mxu1 %v9175_v5  ;;  %1957 = vmatpush.msrb.mxu3 %v9177_v0  ;;  %v9185_v13 = vld [vmem:[#allocation185_spill] sm:$0xff] }
 0x2fe   :  { %3706 = vpow2.f32 %v3552_v19  ;;  %v1589_v51 = vadd.f32 %v1588_v60, %v1508_v52  ;;  %1937 = vmatpush.msrb.mxu2 %v9176_v42  ;;  %1898 = vmatpush.msra.mxu0 %v9178_v3  ;;  %v1569_v8 = vadd.f32 %v1568_v23, %v1488_v34  ;;  %v9187_v34 = vld [vmem:[#allocation36_spill] sm:$0xff] }
 0x2ff   :  { %1918 = vmatpush.msrb.mxu1 %v9179_v45  ;;  %1958 = vmatpush.msrb.mxu3 %v9181_v17  ;;  %v6603_v17 = vld [vmem:[#allocation5 + $0x1d0] sm:$0xff] }
 0x300   :  { %v1594_v39 = vadd.f32 %v1589_v51, %v9163_v55  ;;  %1938 = vmatpush.msrb.mxu2 %v9180_v20  ;;  %1899 = vmatpush.msra.mxu0 %v9182_v54  ;;  %v1593_v14 = vadd.f32 %v1569_v8, %v9187_v34  ;;  %v6596_v8 = vld [vmem:[#allocation5 + $0x1f8] sm:$0xff]  ;;  %v6600_v20 = vld [vmem:[#allocation5 + $0x1c8] sm:$0xff]  ;;  %v6613_v54 = vld [vmem:[#allocation5 + $0x1b0] sm:$0xff] }
 0x301   :  { %1919 = vmatpush.msrb.mxu1 %v9183_v37  ;;  %1959 = vmatpush.msrb.mxu3 %v9185_v13  ;;  %v6627_v37 = vld [vmem:[#allocation5 + $0x190] sm:$0xff]  ;;  %v6643_v13 = vld [vmem:[#allocation5 + $0x140] sm:$0xff] }
 0x302   :  { %v3553_v48 = vmul.f32 -1.442695, %v1594_v39  ;;  %1939 = vmatpush.msrb.mxu2 %v9184_v38  ;;  %1900 = vmatpush.msra.mxu0 %v6335_v15  ;;  %v6634_v38 = vld [vmem:[#allocation5 + $0x168] sm:$0xff] }
 0x303   :  { %v3705_v16 = vpop.eup %3704  ;;  %1920 = vmatpush.msrb.mxu1 %v9186_v49  ;;  %1960 = vmatpush.msrb.mxu3 %v6347_v21  ;;  %v6652_v49 = vld [vmem:[#allocation5 + $0x158] sm:$0xff] }
 0x304   :  { %v3707_v52 = vpop.eup %3706  ;;  %v1598_v32 = vadd.f32 1.0, %v3705_v16  ;;  %3708 = vpow2.f32 %v3553_v48  ;;  %1940 = vmatpush.msrb.mxu2 %v6344_v36 }
 0x305   :  { %v1617_v12 = vadd.f32 1.0, %v3707_v52 }
 0x306   :  { %3710 = vrcp.f32 %v1598_v32  ;;  %v1610_v4 = vand.u32 2147483648, %v1598_v32  ;;  %v1608_v15 = vand.u32 2147483647, %v1598_v32  ;;  %vm1604_vm11 = vweird.f32 %v1598_v32 }
 0x307   :  { %3712 = vrcp.f32 %v1617_v12  ;;  %v1629_v25 = vand.u32 2147483648, %v1617_v12  ;;  %v1627_v39 = vand.u32 2147483647, %v1617_v12  ;;  %vm1623_vm12 = vweird.f32 %v1617_v12 }
 0x308   :  { %v1611_v36 = vor.u32 1.1754944e-38, %v1610_v4  ;;  %vm1609_vm15 = vcmp.eq.f32.partialorder %v1608_v15, 8.507059e+37  ;;  %v6676_v4 = vld [vmem:[#allocation5 + $0x118] sm:$0xff]  ;;  %v6685_v15 = vld [vmem:[#allocation5 + $0xf0] sm:$0xff] }
 0x309   :  { %v1630_v11 = vor.u32 1.1754944e-38, %v1629_v25  ;;  %vm1628_vm0 = vcmp.eq.f32.partialorder %v1627_v39, 8.507059e+37  ;;  %v6679_v25 = vld [vmem:[#allocation5 + $0xe0] sm:$0xff] }
 0x30a   :  { %v3709_v31 = vpop.eup %3708  ;;  %v6691_v39 = vld [vmem:[#allocation5 + $0xc0] sm:$0xff] }
 0x30b   :  { %v1637_v19 = vadd.f32 1.0, %v3709_v31  ;;  %v6630_v31 = vld [vmem:[#allocation5 + $0x198] sm:$0xff] }
 0x30c   :  { %v3711_v35 = vpop.eup %3710 }
 0x30d   :  { %v3713_v9 = vpop.eup %3712  ;;  %v1600_v60 = vmul.f32 %v3711_v35, %v1598_v32  ;;  %3714 = vrcp.f32 %v1637_v19  ;;  %vm1605_vm9 = vweird.f32 %v3711_v35  ;;  %v1649_v23 = vand.u32 2147483648, %v1637_v19 }
 0x30e   :  { %v1619_v62 = vmul.f32 %v3713_v9, %v1617_v12  ;;  %3716 = vtanh.f32 %v1593_v14  ;;  %vm1624_vm10 = vweird.f32 %v3713_v9  ;;  %vm1606_vm13 = vmor %vm1604_vm11, %vm1605_vm9  ;;  %vm1643_vm2 = vweird.f32 %v1637_v19  ;;  %v6658_v14 = vld [vmem:[#allocation5 + $0x128] sm:$0xff] }
 0x30f   :  { %v1601_v22 = vsub.f32 1.0, %v1600_v60  ;;  %vm1625_vm14 = vmor %vm1623_vm12, %vm1624_vm10  ;;  %v1647_v26 = vand.u32 2147483647, %v1637_v19  ;;  %v1650_v42 = vor.u32 1.1754944e-38, %v1649_v23  ;;  %v6664_v60 = vld [vmem:[#allocation5 + $0x138] sm:$0xff]  ;;  %v6742_v23 = vld [vmem:[#allocation5 + $0x48] sm:$0xff] }
 0x310   :  { %v1620_v51 = vsub.f32 1.0, %v1619_v62  ;;  %v6667_v62 = vld [vmem:[#allocation5 + $0x100] sm:$0xff]  ;;  %9202 = vst [vmem:[#allocation53_spill] sm:$0xff] %v6742_v23 }
 0x311   :  { %v1602_v18 = vmul.f32 %v3711_v35, %v1601_v22  ;;  %vm1648_vm4 = vcmp.eq.f32.partialorder %v1647_v26, 8.507059e+37  ;;  %v6670_v22 = vld [vmem:[#allocation5 + $0x108] sm:$0xff]  ;;  %v6745_v26 = vld [vmem:[#allocation5 + $0x50] sm:$0xff] }
 0x312   :  { %v1621_v57 = vmul.f32 %v3713_v9, %v1620_v51  ;;  %v6673_v51 = vld [vmem:[#allocation5 + $0x110] sm:$0xff]  ;;  %9203 = vst [vmem:[#allocation54_spill] sm:$0xff] %v6745_v26 }
 0x313   :  { %v3715_v40 = vpop.eup %3714  ;;  %v1603_v30 = vadd.f32 %v3711_v35, %v1602_v18  ;;  %v6682_v18 = vld [vmem:[#allocation5 + $0xe8] sm:$0xff] }
 0x314   :  { %v1622_v21 = vadd.f32 %v3713_v9, %v1621_v57  ;;  %v1639_v6 = vmul.f32 %v3715_v40, %v1637_v19  ;;  %v3717_v44 = vpop.eup %3716  ;;  %vm1644_vm1 = vweird.f32 %v3715_v40  ;;  %v6646_v19 = vld [vmem:[#allocation5 + $0x148] sm:$0xff]  ;;  %v6688_v57 = vld [vmem:[#allocation5 + $0xf8] sm:$0xff] }
 0x315   :  { %v1607_v48 = vsel %vm1606_vm13, %v3711_v35, %v1603_v30  ;;  %vm1645_vm3 = vmor %vm1643_vm2, %vm1644_vm1  ;;  %v6655_v35 = vld [vmem:[#allocation5 + $0x120] sm:$0xff]  ;;  %v6697_v30 = vld [vmem:[#allocation5 + $0xd0] sm:$0xff] }
 0x316   :  { %v1612_v59 = vsel %vm1609_vm15, %v1611_v36, %v1607_v48  ;;  %v1626_v16 = vsel %vm1625_vm14, %v3713_v9, %v1622_v21  ;;  %v1640_v47 = vsub.f32 1.0, %v1639_v6  ;;  %v6661_v9 = vld [vmem:[#allocation5 + $0x130] sm:$0xff]  ;;  %v6700_v36 = vld [vmem:[#allocation5 + $0xd8] sm:$0xff]  ;;  %v6703_v21 = vld [vmem:[#allocation5 + $0xa0] sm:$0xff] }
 0x317   :  { %v1631_v10 = vsel %vm1628_vm0, %v1630_v11, %v1626_v16  ;;  %v1654_v52 = vmul.f32 %v3717_v44, %v1612_v59  ;;  %9188 = vst [vmem:[#allocation37_spill] sm:$0xff] %v6700_v36  ;;  %v6706_v6 = vld [vmem:[#allocation5 + $0xa8] sm:$0xff]  ;;  %v6709_v11 = vld [vmem:[#allocation5 + $0xb0] sm:$0xff]  ;;  %v6712_v48 = vld [vmem:[#allocation5 + $0xb8] sm:$0xff] }
 0x318   :  { %v1653_v7 = vmul.f32 %v1631_v10, %v6351_v46  ;;  %v1641_v24 = vmul.f32 %v3715_v40, %v1640_v47  ;;  %v6593_v46 = vld [vmem:[#allocation5 + $0x1f0] sm:$0xff]  ;;  %9189 = vst [vmem:[#allocation38_spill] sm:$0xff] %v6703_v21  ;;  %v6715_v44 = vld [vmem:[#allocation5 + $0x80] sm:$0xff]  ;;  %v6718_v59 = vld [vmem:[#allocation5 + $0x88] sm:$0xff] }
 0x319   :  { %9190 = vst [vmem:[#allocation39_spill] sm:$0xff] %v6706_v6  ;;  %v6721_v16 = vld [vmem:[#allocation5 + $0x90] sm:$0xff]  ;;  %v6724_v47 = vld [vmem:[#allocation5 + $0x98] sm:$0xff]  ;;  %v6727_v10 = vld [vmem:[#allocation5 + $0x60] sm:$0xff] }
 0x31a   :  { %v6588_v32 = vadd.f32 %v1654_v52, %v1653_v7  ;;  %v1642_v12 = vadd.f32 %v3715_v40, %v1641_v24  ;;  %9191 = vst [vmem:[#allocation40_spill] sm:$0xff] %v6709_v11  ;;  %v6730_v52 = vld [vmem:[#allocation5 + $0x68] sm:$0xff]  ;;  %v6733_v7 = vld [vmem:[#allocation5 + $0x70] sm:$0xff]  ;;  %v6736_v24 = vld [vmem:[#allocation5 + $0x78] sm:$0xff] }
 0x31b   :  { %9192 = vst [vmem:[#allocation41_spill] sm:$0xff] %v6712_v48 }
 0x31c   :  { %3718 = vtanh.f32 %v6588_v32  ;;  %v1646_v5 = vsel %vm1645_vm3, %v3715_v40, %v1642_v12  ;;  %v6694_v40 = vld [vmem:[#allocation5 + $0xc8] sm:$0xff]  ;;  %9193 = vst [vmem:[#allocation42_spill] sm:$0xff] %v6715_v44  ;;  %v6739_v12 = vld [vmem:[#allocation5 + $0x40] sm:$0xff] }
 0x31d   :  { %v1651_v3 = vsel %vm1648_vm4, %v1650_v42, %v1646_v5  ;;  %9194 = vst [vmem:[#allocation44_spill] sm:$0xff] %v6718_v59  ;;  %v6748_v5 = vld [vmem:[#allocation5 + $0x58] sm:$0xff]  ;;  %v6751_v42 = vld [vmem:[#allocation5 + $0x20] sm:$0xff] }
 0x31e   :  { %9195 = vst [vmem:[#allocation45_spill] sm:$0xff] %v6721_v16 }
 0x31f   :  { %9196 = vst [vmem:[#allocation46_spill] sm:$0xff] %v6724_v47 }
 0x320   :  { %9197 = vst [vmem:[#allocation47_spill] sm:$0xff] %v6727_v10 }
 0x321   :  { %9198 = vst [vmem:[#allocation48_spill] sm:$0xff] %v6730_v52 }
 0x322   :  { %v3719_v0 = vpop.eup %3718  ;;  %9199 = vst [vmem:[#allocation49_spill] sm:$0xff] %v6733_v7 }
 0x323   :  { %v1657_v45 = vmul.f32 %v3719_v0, %v1651_v3  ;;  %9200 = vst [vmem:[#allocation50_spill] sm:$0xff] %v6736_v24  ;;  %v6754_v0 = vld [vmem:[#allocation5 + $0x28] sm:$0xff]  ;;  %v6757_v3 = vld [vmem:[#allocation5 + $0x30] sm:$0xff] }
 0x324   :  { %9201 = vst [vmem:[#allocation52_spill] sm:$0xff] %v6739_v12 }
 0x325   :  { %1821 = vmatmul.f32.vlgmr.msrb.gmra.mxu0 %v1657_v45  ;;  %1841 = vmatmul.f32.vlgmr.msra.gmra.mxu1 %v1657_v45  ;;  %9204 = vst [vmem:[#allocation55_spill] sm:$0xff] %v6748_v5 }
 0x326   :  { %1861 = vmatmul.f32.vlgmr.msra.gmra.mxu2 %v1657_v45  ;;  %1881 = vmatmul.f32.vlgmr.msra.gmra.mxu3 %v1657_v45  ;;  %9205 = vst [vmem:[#allocation56_spill] sm:$0xff] %v6751_v42  ;;  %v6760_v45 = vld [vmem:[#allocation5 + $0x38] sm:$0xff] }
 0x327   :  { %2095 = vmatpush.msrb.mxu0 %v6357_v56  ;;  %2115 = vmatpush.msra.mxu1 %v6360_v29  ;;  %v6606_v56 = vld [vmem:[#allocation5 + $0x1d8] sm:$0xff]  ;;  %v6610_v29 = vld [vmem:[#allocation5 + $0x1a8] sm:$0xff]  ;;  %9206 = vst [vmem:[#allocation57_spill] sm:$0xff] %v6754_v0 }
 0x328   :  { %2135 = vmatpush.msra.mxu2 %v6593_v46  ;;  %2155 = vmatpush.msra.mxu3 %v6596_v8  ;;  %9207 = vst [vmem:[#allocation58_spill] sm:$0xff] %v6757_v3 }
 0x329   :  { %2096 = vmatpush.msrb.mxu0 %v6365_v61  ;;  %2116 = vmatpush.msra.mxu1 %v6600_v20  ;;  %v6616_v61 = vld [vmem:[#allocation5 + $0x1b8] sm:$0xff]  ;;  %9208 = vst [vmem:[#allocation60_spill] sm:$0xff] %v6760_v45 }
 0x32a   :  { %2136 = vmatpush.msra.mxu2 %v6603_v17  ;;  %2156 = vmatpush.msra.mxu3 %v6606_v56 }
 0x32b   :  { %2097 = vmatpush.msrb.mxu0 %v6371_v43  ;;  %2117 = vmatpush.msra.mxu1 %v6610_v29  ;;  %v6624_v43 = vld [vmem:[#allocation5 + $0x188] sm:$0xff] }
 0x32c   :  { %2137 = vmatpush.msra.mxu2 %v6613_v54  ;;  %2157 = vmatpush.msra.mxu3 %v6616_v61 }
 0x32d   :  { %1901 = vmatmul.f32.vlgmr.msra.gmra.mxu0 %v6513_v50  ;;  %1921 = vmatmul.f32.vlgmr.msrb.gmra.mxu1 %v6513_v50 }
 0x32e   :  { %1941 = vmatmul.f32.vlgmr.msrb.gmra.mxu2 %v6513_v50  ;;  %1961 = vmatmul.f32.vlgmr.msrb.gmra.mxu3 %v6513_v50  ;;  %v6637_v50 = vld [vmem:[#allocation5 + $0x170] sm:$0xff] }
 0x32f   :  { %2098 = vmatpush.msrb.mxu0 %v6381_v27  ;;  %2118 = vmatpush.msra.mxu1 %v6624_v43  ;;  %v6640_v27 = vld [vmem:[#allocation5 + $0x178] sm:$0xff] }
 0x330   :  { %2138 = vmatpush.msra.mxu2 %v6627_v37  ;;  %2158 = vmatpush.msra.mxu3 %v6630_v31 }
 0x331   :  { %2099 = vmatpush.msrb.mxu0 %v6387_v2  ;;  %2119 = vmatpush.msra.mxu1 %v6634_v38  ;;  %v6649_v2 = vld [vmem:[#allocation5 + $0x150] sm:$0xff] }
 0x332   :  { %2139 = vmatpush.msra.mxu2 %v6637_v50  ;;  %2159 = vmatpush.msra.mxu3 %v6640_v27 }
 0x333   :  { %2100 = vmatpush.msrb.mxu0 %v6643_v13  ;;  %2120 = vmatpush.msra.mxu1 %v6646_v19 }
 0x334   :  { %2140 = vmatpush.msra.mxu2 %v6649_v2  ;;  %2160 = vmatpush.msra.mxu3 %v6652_v49 }
 0x335   :  { %2101 = vmatpush.msrb.mxu0 %v6655_v35  ;;  %2121 = vmatpush.msra.mxu1 %v6658_v14 }
 0x336   :  { %2141 = vmatpush.msra.mxu2 %v6661_v9  ;;  %2161 = vmatpush.msra.mxu3 %v6664_v60 }
 0x337   :  { %2102 = vmatpush.msrb.mxu0 %v6667_v62  ;;  %2122 = vmatpush.msra.mxu1 %v6670_v22 }
 0x338   :  { %2142 = vmatpush.msra.mxu2 %v6673_v51  ;;  %2162 = vmatpush.msra.mxu3 %v6676_v4 }
 0x339   :  { %2103 = vmatpush.msrb.mxu0 %v6679_v25  ;;  %2123 = vmatpush.msra.mxu1 %v6682_v18 }
 0x33a   :  { %2143 = vmatpush.msra.mxu2 %v6685_v15  ;;  %2163 = vmatpush.msra.mxu3 %v6688_v57 }
 0x33b   :  { %2104 = vmatpush.msrb.mxu0 %v6691_v39  ;;  %2124 = vmatpush.msra.mxu1 %v6694_v40 }
 0x33c   :  { %2144 = vmatpush.msra.mxu2 %v6697_v30  ;;  %2164 = vmatpush.msra.mxu3 %v6700_v36 }
 0x33d   :  { %2105 = vmatpush.msrb.mxu0 %v6703_v21  ;;  %2125 = vmatpush.msra.mxu1 %v6706_v6 }
 0x33e   :  { %2145 = vmatpush.msra.mxu2 %v6709_v11  ;;  %2165 = vmatpush.msra.mxu3 %v6712_v48 }
 0x33f   :  { %2106 = vmatpush.msrb.mxu0 %v6715_v44  ;;  %2126 = vmatpush.msra.mxu1 %v6718_v59 }
 0x340   :  { %2146 = vmatpush.msra.mxu2 %v6721_v16  ;;  %2166 = vmatpush.msra.mxu3 %v6724_v47 }
 0x341   :  { %2107 = vmatpush.msrb.mxu0 %v6727_v10  ;;  %2127 = vmatpush.msra.mxu1 %v6730_v52 }
 0x342   :  { %2147 = vmatpush.msra.mxu2 %v6733_v7  ;;  %2167 = vmatpush.msra.mxu3 %v6736_v24  ;;  %v6959_v24 = vld [vmem:[#allocation8] sm:$0xff]  ;;  %v6965_v7 = vld [vmem:[#allocation8 + $0x10] sm:$0xff] }
 0x343   :  { %2108 = vmatpush.msrb.mxu0 %v6739_v12  ;;  %2128 = vmatpush.msra.mxu1 %v6742_v23  ;;  %9275 = vst [vmem:[#allocation129_spill] sm:$0xff] %v6959_v24 }
 0x344   :  { %2148 = vmatpush.msra.mxu2 %v6745_v26  ;;  %2168 = vmatpush.msra.mxu3 %v6748_v5  ;;  %v6763_v26 = vld [vmem:[#allocation5] sm:$0xff]  ;;  %v6766_v5 = vld [vmem:[#allocation5 + $0x8] sm:$0xff]  ;;  %9277 = vst [vmem:[#allocation131_spill] sm:$0xff] %v6965_v7 }
 0x345   :  { %2109 = vmatpush.msrb.mxu0 %v6751_v42  ;;  %2129 = vmatpush.msra.mxu1 %v6754_v0  ;;  %9209 = vst [vmem:[#allocation61_spill] sm:$0xff] %v6763_v26  ;;  %v6769_v42 = vld [vmem:[#allocation5 + $0x10] sm:$0xff]  ;;  %v6772_v0 = vld [vmem:[#allocation5 + $0x18] sm:$0xff] }
 0x346   :  { %2149 = vmatpush.msra.mxu2 %v6757_v3  ;;  %2169 = vmatpush.msra.mxu3 %v6760_v45  ;;  %9210 = vst [vmem:[#allocation63_spill] sm:$0xff] %v6766_v5  ;;  %v6775_v3 = vld [vmem:[#allocation8 + $0x1e0] sm:$0xff]  ;;  %v6778_v45 = vld [vmem:[#allocation8 + $0x1e8] sm:$0xff] }
 0x347   :  { %2110 = vmatpush.msrb.mxu0 %v6763_v26  ;;  %2130 = vmatpush.msra.mxu1 %v6766_v5  ;;  %9211 = vst [vmem:[#allocation64_spill] sm:$0xff] %v6769_v42  ;;  %v6781_v26 = vld [vmem:[#allocation8 + $0x1f0] sm:$0xff]  ;;  %v6784_v5 = vld [vmem:[#allocation8 + $0x1f8] sm:$0xff] }
 0x348   :  { %2150 = vmatpush.msra.mxu2 %v6769_v42  ;;  %9212 = vst [vmem:[#allocation65_spill] sm:$0xff] %v6772_v0  ;;  %2170 = vmatpush.msra.mxu3 %v6772_v0  ;;  %v6787_v42 = vld [vmem:[#allocation8 + $0x1c0] sm:$0xff]  ;;  %v6790_v0 = vld [vmem:[#allocation8 + $0x1c8] sm:$0xff] }
 0x349   :  { %9213 = vst [vmem:[#allocation66_spill] sm:$0xff] %v6775_v3  ;;  %2179 = vmatpush.msra.mxu0 %v6775_v3  ;;  %2199 = vmatpush.msrb.mxu1 %v6778_v45  ;;  %v6793_v3 = vld [vmem:[#allocation8 + $0x1d0] sm:$0xff] }
 0x34a   :  { %9214 = vst [vmem:[#allocation67_spill] sm:$0xff] %v6778_v45  ;;  %2219 = vmatpush.msrb.mxu2 %v6781_v26  ;;  %2239 = vmatpush.msrb.mxu3 %v6784_v5  ;;  %v6796_v45 = vld [vmem:[#allocation8 + $0x1d8] sm:$0xff] }
 0x34b   :  { %9215 = vst [vmem:[#allocation68_spill] sm:$0xff] %v6781_v26  ;;  %2180 = vmatpush.msra.mxu0 %v6787_v42  ;;  %2200 = vmatpush.msrb.mxu1 %v6790_v0  ;;  %v6799_v26 = vld [vmem:[#allocation8 + $0x1a0] sm:$0xff] }
 0x34c   :  { %9216 = vst [vmem:[#allocation69_spill] sm:$0xff] %v6784_v5  ;;  %2220 = vmatpush.msrb.mxu2 %v6793_v3  ;;  %2240 = vmatpush.msrb.mxu3 %v6796_v45  ;;  %v6802_v5 = vld [vmem:[#allocation8 + $0x1a8] sm:$0xff] }
 0x34d   :  { %9217 = vst [vmem:[#allocation71_spill] sm:$0xff] %v6787_v42  ;;  %2181 = vmatpush.msra.mxu0 %v6799_v26  ;;  %2201 = vmatpush.msrb.mxu1 %v6802_v5  ;;  %v6805_v42 = vld [vmem:[#allocation8 + $0x1b0] sm:$0xff] }
 0x34e   :  { %9218 = vst [vmem:[#allocation72_spill] sm:$0xff] %v6790_v0  ;;  %2221 = vmatpush.msrb.mxu2 %v6805_v42  ;;  %v6808_v0 = vld [vmem:[#allocation8 + $0x1b8] sm:$0xff] }
 0x34f   :  { %9219 = vst [vmem:[#allocation73_spill] sm:$0xff] %v6793_v3  ;;  %2241 = vmatpush.msrb.mxu3 %v6808_v0  ;;  %v6811_v3 = vld [vmem:[#allocation8 + $0x180] sm:$0xff] }
 0x350   :  { %9220 = vst [vmem:[#allocation74_spill] sm:$0xff] %v6796_v45  ;;  %2182 = vmatpush.msra.mxu0 %v6811_v3  ;;  %v6814_v45 = vld [vmem:[#allocation8 + $0x188] sm:$0xff] }
 0x351   :  { %9221 = vst [vmem:[#allocation75_spill] sm:$0xff] %v6799_v26  ;;  %2202 = vmatpush.msrb.mxu1 %v6814_v45  ;;  %v6817_v26 = vld [vmem:[#allocation8 + $0x190] sm:$0xff] }
 0x352   :  { %9222 = vst [vmem:[#allocation77_spill] sm:$0xff] %v6802_v5  ;;  %2222 = vmatpush.msrb.mxu2 %v6817_v26  ;;  %v6820_v5 = vld [vmem:[#allocation8 + $0x198] sm:$0xff] }
 0x353   :  { %9223 = vst [vmem:[#allocation78_spill] sm:$0xff] %v6805_v42  ;;  %2242 = vmatpush.msrb.mxu3 %v6820_v5  ;;  %v6823_v42 = vld [vmem:[#allocation8 + $0x160] sm:$0xff] }
 0x354   :  { %9224 = vst [vmem:[#allocation79_spill] sm:$0xff] %v6808_v0  ;;  %2183 = vmatpush.msra.mxu0 %v6823_v42  ;;  %v6826_v0 = vld [vmem:[#allocation8 + $0x168] sm:$0xff] }
 0x355   :  { %9225 = vst [vmem:[#allocation80_spill] sm:$0xff] %v6811_v3  ;;  %2203 = vmatpush.msrb.mxu1 %v6826_v0  ;;  %v6829_v3 = vld [vmem:[#allocation8 + $0x170] sm:$0xff] }
 0x356   :  { %9226 = vst [vmem:[#allocation81_spill] sm:$0xff] %v6814_v45  ;;  %2223 = vmatpush.msrb.mxu2 %v6829_v3  ;;  %v6832_v45 = vld [vmem:[#allocation8 + $0x178] sm:$0xff] }
 0x357   :  { %9227 = vst [vmem:[#allocation82_spill] sm:$0xff] %v6817_v26  ;;  %2243 = vmatpush.msrb.mxu3 %v6832_v45  ;;  %v6835_v26 = vld [vmem:[#allocation8 + $0x140] sm:$0xff] }
 0x358   :  { %9228 = vst [vmem:[#allocation83_spill] sm:$0xff] %v6820_v5  ;;  %2184 = vmatpush.msra.mxu0 %v6835_v26  ;;  %v6838_v5 = vld [vmem:[#allocation8 + $0x148] sm:$0xff] }
 0x359   :  { %9229 = vst [vmem:[#allocation84_spill] sm:$0xff] %v6823_v42  ;;  %2204 = vmatpush.msrb.mxu1 %v6838_v5  ;;  %v6841_v42 = vld [vmem:[#allocation8 + $0x150] sm:$0xff] }
 0x35a   :  { %9230 = vst [vmem:[#allocation85_spill] sm:$0xff] %v6826_v0  ;;  %2224 = vmatpush.msrb.mxu2 %v6841_v42  ;;  %v6844_v0 = vld [vmem:[#allocation8 + $0x158] sm:$0xff] }
 0x35b   :  { %9231 = vst [vmem:[#allocation86_spill] sm:$0xff] %v6829_v3  ;;  %2244 = vmatpush.msrb.mxu3 %v6844_v0  ;;  %v6847_v3 = vld [vmem:[#allocation8 + $0x120] sm:$0xff] }
 0x35c   :  { %9232 = vst [vmem:[#allocation87_spill] sm:$0xff] %v6832_v45  ;;  %2185 = vmatpush.msra.mxu0 %v6847_v3  ;;  %v6850_v45 = vld [vmem:[#allocation8 + $0x128] sm:$0xff] }
 0x35d   :  { %9233 = vst [vmem:[#allocation88_spill] sm:$0xff] %v6835_v26  ;;  %2205 = vmatpush.msrb.mxu1 %v6850_v45  ;;  %v6853_v26 = vld [vmem:[#allocation8 + $0x130] sm:$0xff] }
 0x35e   :  { %9234 = vst [vmem:[#allocation89_spill] sm:$0xff] %v6838_v5  ;;  %2225 = vmatpush.msrb.mxu2 %v6853_v26  ;;  %v6856_v5 = vld [vmem:[#allocation8 + $0x138] sm:$0xff] }
 0x35f   :  { %9235 = vst [vmem:[#allocation90_spill] sm:$0xff] %v6841_v42  ;;  %2245 = vmatpush.msrb.mxu3 %v6856_v5  ;;  %v6859_v42 = vld [vmem:[#allocation8 + $0x100] sm:$0xff] }
 0x360   :  { %9236 = vst [vmem:[#allocation92_spill] sm:$0xff] %v6844_v0  ;;  %2186 = vmatpush.msra.mxu0 %v6859_v42  ;;  %v6862_v0 = vld [vmem:[#allocation8 + $0x108] sm:$0xff] }
 0x361   :  { %9237 = vst [vmem:[#allocation93_spill] sm:$0xff] %v6847_v3  ;;  %2206 = vmatpush.msrb.mxu1 %v6862_v0  ;;  %v6865_v3 = vld [vmem:[#allocation8 + $0x110] sm:$0xff] }
 0x362   :  { %9238 = vst [vmem:[#allocation94_spill] sm:$0xff] %v6850_v45  ;;  %2226 = vmatpush.msrb.mxu2 %v6865_v3  ;;  %v6868_v45 = vld [vmem:[#allocation8 + $0x118] sm:$0xff] }
 0x363   :  { %9239 = vst [vmem:[#allocation95_spill] sm:$0xff] %v6853_v26  ;;  %2246 = vmatpush.msrb.mxu3 %v6868_v45  ;;  %v6871_v26 = vld [vmem:[#allocation8 + $0xe0] sm:$0xff] }
 0x364   :  { %9240 = vst [vmem:[#allocation96_spill] sm:$0xff] %v6856_v5  ;;  %2187 = vmatpush.msra.mxu0 %v6871_v26  ;;  %v6874_v5 = vld [vmem:[#allocation8 + $0xe8] sm:$0xff] }
 0x365   :  { %9241 = vst [vmem:[#allocation97_spill] sm:$0xff] %v6859_v42  ;;  %2207 = vmatpush.msrb.mxu1 %v6874_v5  ;;  %v6877_v42 = vld [vmem:[#allocation8 + $0xf0] sm:$0xff] }
 0x366   :  { %9242 = vst [vmem:[#allocation98_spill] sm:$0xff] %v6862_v0  ;;  %2227 = vmatpush.msrb.mxu2 %v6877_v42  ;;  %v6880_v0 = vld [vmem:[#allocation8 + $0xf8] sm:$0xff] }
 0x367   :  { %9243 = vst [vmem:[#allocation99_spill] sm:$0xff] %v6865_v3  ;;  %2247 = vmatpush.msrb.mxu3 %v6880_v0  ;;  %v6883_v3 = vld [vmem:[#allocation8 + $0xc0] sm:$0xff] }
 0x368   :  { %9244 = vst [vmem:[#allocation100_spill] sm:$0xff] %v6868_v45  ;;  %2188 = vmatpush.msra.mxu0 %v6883_v3  ;;  %v6886_v45 = vld [vmem:[#allocation8 + $0xc8] sm:$0xff] }
 0x369   :  { %9245 = vst [vmem:[#allocation101_spill] sm:$0xff] %v6871_v26  ;;  %2208 = vmatpush.msrb.mxu1 %v6886_v45  ;;  %v6889_v26 = vld [vmem:[#allocation8 + $0xd0] sm:$0xff] }
 0x36a   :  { %9246 = vst [vmem:[#allocation102_spill] sm:$0xff] %v6874_v5  ;;  %2228 = vmatpush.msrb.mxu2 %v6889_v26  ;;  %v6892_v5 = vld [vmem:[#allocation8 + $0xd8] sm:$0xff] }
 0x36b   :  { %9247 = vst [vmem:[#allocation103_spill] sm:$0xff] %v6877_v42  ;;  %2248 = vmatpush.msrb.mxu3 %v6892_v5  ;;  %v6895_v42 = vld [vmem:[#allocation8 + $0xa0] sm:$0xff] }
 0x36c   :  { %9248 = vst [vmem:[#allocation104_spill] sm:$0xff] %v6880_v0  ;;  %2189 = vmatpush.msra.mxu0 %v6895_v42  ;;  %v6898_v0 = vld [vmem:[#allocation8 + $0xa8] sm:$0xff] }
 0x36d   :  { %9249 = vst [vmem:[#allocation105_spill] sm:$0xff] %v6883_v3  ;;  %2209 = vmatpush.msrb.mxu1 %v6898_v0  ;;  %v6901_v3 = vld [vmem:[#allocation8 + $0xb0] sm:$0xff] }
 0x36e   :  { %9250 = vst [vmem:[#allocation106_spill] sm:$0xff] %v6886_v45  ;;  %2229 = vmatpush.msrb.mxu2 %v6901_v3  ;;  %v6904_v45 = vld [vmem:[#allocation8 + $0xb8] sm:$0xff] }
 0x36f   :  { %9251 = vst [vmem:[#allocation107_spill] sm:$0xff] %v6889_v26  ;;  %2249 = vmatpush.msrb.mxu3 %v6904_v45  ;;  %v6907_v26 = vld [vmem:[#allocation8 + $0x80] sm:$0xff] }
 0x370   :  { %9252 = vst [vmem:[#allocation108_spill] sm:$0xff] %v6892_v5  ;;  %2190 = vmatpush.msra.mxu0 %v6907_v26  ;;  %v6910_v5 = vld [vmem:[#allocation8 + $0x88] sm:$0xff] }
 0x371   :  { %9253 = vst [vmem:[#allocation109_spill] sm:$0xff] %v6895_v42  ;;  %2210 = vmatpush.msrb.mxu1 %v6910_v5  ;;  %v6913_v42 = vld [vmem:[#allocation8 + $0x90] sm:$0xff] }
 0x372   :  { %9254 = vst [vmem:[#allocation110_spill] sm:$0xff] %v6898_v0  ;;  %2230 = vmatpush.msrb.mxu2 %v6913_v42  ;;  %v6916_v0 = vld [vmem:[#allocation8 + $0x98] sm:$0xff] }
 0x373   :  { %9255 = vst [vmem:[#allocation111_spill] sm:$0xff] %v6901_v3  ;;  %2250 = vmatpush.msrb.mxu3 %v6916_v0  ;;  %v6919_v3 = vld [vmem:[#allocation8 + $0x60] sm:$0xff] }
 0x374   :  { %9256 = vst [vmem:[#allocation112_spill] sm:$0xff] %v6904_v45  ;;  %2191 = vmatpush.msra.mxu0 %v6919_v3  ;;  %v6922_v45 = vld [vmem:[#allocation8 + $0x68] sm:$0xff] }
 0x375   :  { %9257 = vst [vmem:[#allocation113_spill] sm:$0xff] %v6907_v26  ;;  %2211 = vmatpush.msrb.mxu1 %v6922_v45  ;;  %v6925_v26 = vld [vmem:[#allocation8 + $0x70] sm:$0xff] }
 0x376   :  { %9258 = vst [vmem:[#allocation114_spill] sm:$0xff] %v6910_v5  ;;  %2231 = vmatpush.msrb.mxu2 %v6925_v26  ;;  %v6928_v5 = vld [vmem:[#allocation8 + $0x78] sm:$0xff] }
 0x377   :  { %9259 = vst [vmem:[#allocation115_spill] sm:$0xff] %v6913_v42  ;;  %2251 = vmatpush.msrb.mxu3 %v6928_v5  ;;  %v6931_v42 = vld [vmem:[#allocation8 + $0x40] sm:$0xff] }
 0x378   :  { %9260 = vst [vmem:[#allocation116_spill] sm:$0xff] %v6916_v0  ;;  %2192 = vmatpush.msra.mxu0 %v6931_v42  ;;  %v6934_v0 = vld [vmem:[#allocation8 + $0x48] sm:$0xff] }
 0x379   :  { %9261 = vst [vmem:[#allocation117_spill] sm:$0xff] %v6919_v3  ;;  %2212 = vmatpush.msrb.mxu1 %v6934_v0  ;;  %v6937_v3 = vld [vmem:[#allocation8 + $0x50] sm:$0xff] }
 0x37a   :  { %9262 = vst [vmem:[#allocation118_spill] sm:$0xff] %v6922_v45  ;;  %2232 = vmatpush.msrb.mxu2 %v6937_v3  ;;  %v6940_v45 = vld [vmem:[#allocation8 + $0x58] sm:$0xff] }
 0x37b   :  { %9263 = vst [vmem:[#allocation119_spill] sm:$0xff] %v6925_v26  ;;  %2252 = vmatpush.msrb.mxu3 %v6940_v45  ;;  %v6943_v26 = vld [vmem:[#allocation8 + $0x20] sm:$0xff] }
 0x37c   :  { %9264 = vst [vmem:[#allocation120_spill] sm:$0xff] %v6928_v5  ;;  %2193 = vmatpush.msra.mxu0 %v6943_v26  ;;  %v6946_v5 = vld [vmem:[#allocation8 + $0x28] sm:$0xff] }
 0x37d   :  { %9265 = vst [vmem:[#allocation121_spill] sm:$0xff] %v6931_v42  ;;  %2213 = vmatpush.msrb.mxu1 %v6946_v5  ;;  %v6949_v42 = vld [vmem:[#allocation8 + $0x30] sm:$0xff] }
 0x37e   :  { %9266 = vst [vmem:[#allocation122_spill] sm:$0xff] %v6934_v0  ;;  %2233 = vmatpush.msrb.mxu2 %v6949_v42  ;;  %v6952_v0 = vld [vmem:[#allocation8 + $0x38] sm:$0xff]  ;;  %2194 = vmatpush.msra.mxu0 %v6959_v24  ;;  %v9279_v24 = vld [vmem:[#allocation20_spill] sm:$0xff] }
 0x37f   :  { %9267 = vst [vmem:[#allocation123_spill] sm:$0xff] %v6937_v3  ;;  %2253 = vmatpush.msrb.mxu3 %v6952_v0  ;;  %v9273_v3 = vld [vmem:[#allocation18_spill] sm:$0xff]  ;;  %v323_v52 = vadd.f32 %v9279_v24, %v9126_v58 }
 0x380   :  { %9268 = vst [vmem:[#allocation124_spill] sm:$0xff] %v6940_v45  ;;  %v241_v23 = vadd.f32 %v9273_v3, %v9122_v63  ;;  %v9274_v45 = vld [vmem:[#allocation28_spill] sm:$0xff]  ;;  %2234 = vmatpush.msrb.mxu2 %v6965_v7 }
 0x381   :  { %9269 = vst [vmem:[#allocation125_spill] sm:$0xff] %v6943_v26  ;;  %v200_v12 = vadd.f32 %v9274_v45, %v9124_v28  ;;  %v6962_v26 = vld [vmem:[#allocation8 + $0x8] sm:$0xff] }
 0x382   :  { %9270 = vst [vmem:[#allocation126_spill] sm:$0xff] %v6946_v5  ;;  %2214 = vmatpush.msrb.mxu1 %v6962_v26  ;;  %v1738_v5 = vpop.f32.mrf.mxu0 }
 0x383   :  { %9271 = vst [vmem:[#allocation127_spill] sm:$0xff] %v6949_v42  ;;  %v1758_v42 = vpop.f32.mrf.mxu1  ;;  %v1801_v3 = vadd.f32 %v1738_v5, %v200_v12 }
 0x384   :  { %9272 = vst [vmem:[#allocation128_spill] sm:$0xff] %v6952_v0  ;;  %v6968_v0 = vld [vmem:[#allocation8 + $0x18] sm:$0xff]  ;;  %v1802_v45 = vadd.f32 %v1758_v42, %v241_v23 }
 0x385   :  { %9276 = vst [vmem:[#allocation130_spill] sm:$0xff] %v6962_v26  ;;  %2254 = vmatpush.msrb.mxu3 %v6968_v0  ;;  %v3560_v63 = vmul.f32 -1.442695, %v1801_v3  ;;  %v1798_v26 = vpop.f32.mrf.mxu3  ;;  %v9280_v23 = vld [vmem:[#allocation22_spill] sm:$0xff] }
 0x386   :  { %9278 = vst [vmem:[#allocation132_spill] sm:$0xff] %v6968_v0  ;;  %v3561_v28 = vmul.f32 -1.442695, %v1802_v45  ;;  %v1804_v10 = vadd.f32 %v1798_v26, %v323_v52  ;;  %v1778_v0 = vpop.f32.mrf.mxu2  ;;  %v282_v5 = vadd.f32 %v9280_v23, %v9128_v33 }
 0x387   :  { %3720 = vpow2.f32 %v3560_v63 }
 0x388   :  { %3722 = vpow2.f32 %v3561_v28  ;;  %v3562_v47 = vmul.f32 -1.442695, %v1804_v10  ;;  %v1803_v3 = vadd.f32 %v1778_v0, %v282_v5 }
 0x38a   :  { %3724 = vpow2.f32 %v3562_v47 }
 0x38d   :  { %v3721_v16 = vpop.eup %3720 }
 0x38e   :  { %v3723_v59 = vpop.eup %3722  ;;  %v2035_v44 = vadd.f32 1.0, %v3721_v16 }
 0x38f   :  { %v2054_v7 = vadd.f32 1.0, %v3723_v59 }
 0x390   :  { %3726 = vrcp.f32 %v2035_v44  ;;  %v3725_v12 = vpop.eup %3724  ;;  %v2047_v45 = vand.u32 2147483648, %v2035_v44  ;;  %v2045_v47 = vand.u32 2147483647, %v2035_v44  ;;  %vm2041_vm7 = vweird.f32 %v2035_v44 }
 0x391   :  { %3728 = vrcp.f32 %v2054_v7  ;;  %v2074_v63 = vadd.f32 1.0, %v3725_v12  ;;  %v2066_v16 = vand.u32 2147483648, %v2054_v7  ;;  %v2064_v48 = vand.u32 2147483647, %v2054_v7 }
 0x392   :  { %vm2060_vm8 = vweird.f32 %v2054_v7  ;;  %v2048_v0 = vor.u32 1.1754944e-38, %v2047_v45  ;;  %vm2046_vm11 = vcmp.eq.f32.partialorder %v2045_v47, 8.507059e+37 }
 0x393   :  { %3730 = vrcp.f32 %v2074_v63  ;;  %vm2065_vm12 = vcmp.eq.f32.partialorder %v2064_v48, 8.507059e+37  ;;  %vm2080_vm14 = vweird.f32 %v2074_v63 }
 0x394   :  { %3732 = vtanh.f32 %v1803_v3 }
 0x396   :  { %v3727_v42 = vpop.eup %3726 }
 0x397   :  { %v3729_v24 = vpop.eup %3728  ;;  %v2037_v28 = vmul.f32 %v3727_v42, %v2035_v44  ;;  %vm2042_vm5 = vweird.f32 %v3727_v42 }
 0x398   :  { %v2056_v52 = vmul.f32 %v3729_v24, %v2054_v7  ;;  %vm2061_vm6 = vweird.f32 %v3729_v24  ;;  %vm2043_vm9 = vmor %vm2041_vm7, %vm2042_vm5 }
 0x399   :  { %v2038_v10 = vsub.f32 1.0, %v2037_v28  ;;  %v3731_v11 = vpop.eup %3730  ;;  %vm2062_vm10 = vmor %vm2060_vm8, %vm2061_vm6  ;;  %v2067_v28 = vor.u32 1.1754944e-38, %v2066_v16 }
 0x39a   :  { %v2057_v26 = vsub.f32 1.0, %v2056_v52  ;;  %v2076_v5 = vmul.f32 %v3731_v11, %v2074_v63  ;;  %v3733_v3 = vpop.eup %3732  ;;  %vm2081_vm13 = vweird.f32 %v3731_v11 }
 0x39b   :  { %v2039_v59 = vmul.f32 %v3727_v42, %v2038_v10  ;;  %vm2082_vm15 = vmor %vm2080_vm14, %vm2081_vm13 }
 0x39c   :  { %v2058_v58 = vmul.f32 %v3729_v24, %v2057_v26  ;;  %v2077_v6 = vsub.f32 1.0, %v2076_v5  ;;  %v7015_v5 = vld [vmem:[#allocation7 + $0x1b0] sm:$0xff] }
 0x39d   :  { %v2040_v23 = vadd.f32 %v3727_v42, %v2039_v59  ;;  %9288 = vst [vmem:[#allocation136_spill] sm:$0xff] %v7015_v5 }
 0x39e   :  { %v2059_v12 = vadd.f32 %v3729_v24, %v2058_v58  ;;  %v2078_v59 = vmul.f32 %v3731_v11, %v2077_v6  ;;  %v2086_v58 = vand.u32 2147483648, %v2074_v63  ;;  %v6997_v6 = vld [vmem:[#allocation7 + $0x1c0] sm:$0xff] }
 0x39f   :  { %v2044_v52 = vsel %vm2043_vm9, %v3727_v42, %v2040_v23  ;;  %v2084_v42 = vand.u32 2147483647, %v2074_v63  ;;  %9282 = vst [vmem:[#allocation24_spill] sm:$0xff] %v6997_v6  ;;  %v7003_v63 = vld [vmem:[#allocation7 + $0x1d0] sm:$0xff]  ;;  %v7006_v23 = vld [vmem:[#allocation7 + $0x1d8] sm:$0xff] }
 0x3a0   :  { %v2049_v33 = vsel %vm2046_vm11, %v2048_v0, %v2044_v52  ;;  %v2063_v10 = vsel %vm2062_vm10, %v3729_v24, %v2059_v12  ;;  %v2079_v7 = vadd.f32 %v3731_v11, %v2078_v59  ;;  %v2087_v16 = vor.u32 1.1754944e-38, %v2086_v58  ;;  %9284 = vst [vmem:[#allocation19_spill] sm:$0xff] %v7003_v63  ;;  %v7009_v0 = vld [vmem:[#allocation7 + $0x1a0] sm:$0xff]  ;;  %v7012_v12 = vld [vmem:[#allocation7 + $0x1a8] sm:$0xff]  ;;  %v7039_v58 = vld [vmem:[#allocation7 + $0x170] sm:$0xff] }
 0x3a1   :  { %v2068_v26 = vsel %vm2065_vm12, %v2067_v28, %v2063_v10  ;;  %v2091_v21 = vmul.f32 %v3733_v3, %v2049_v33  ;;  %vm2085_vm0 = vcmp.eq.f32.partialorder %v2084_v42, 8.507059e+37  ;;  %v6985_v33 = vld [vmem:[#allocation7 + $0x1e0] sm:$0xff]  ;;  %9285 = vst [vmem:[#allocation133_spill] sm:$0xff] %v7006_v23  ;;  %v7018_v28 = vld [vmem:[#allocation7 + $0x1b8] sm:$0xff]  ;;  %v7024_v3 = vld [vmem:[#allocation7 + $0x188] sm:$0xff] }
 0x3a2   :  { %v2090_v36 = vmul.f32 %v2068_v26, %v6510_v1  ;;  %v2083_v45 = vsel %vm2082_vm15, %v3731_v11, %v2079_v7  ;;  %v6988_v1 = vld [vmem:[#allocation7 + $0x1e8] sm:$0xff]  ;;  %9286 = vst [vmem:[#allocation134_spill] sm:$0xff] %v7009_v0  ;;  %v7021_v52 = vld [vmem:[#allocation7 + $0x180] sm:$0xff]  ;;  %v7027_v10 = vld [vmem:[#allocation7 + $0x190] sm:$0xff] }
 0x3a3   :  { %v2088_v24 = vsel %vm2085_vm0, %v2087_v16, %v2083_v45  ;;  %v7000_v11 = vld [vmem:[#allocation7 + $0x1c8] sm:$0xff]  ;;  %9287 = vst [vmem:[#allocation135_spill] sm:$0xff] %v7012_v12  ;;  %v7030_v26 = vld [vmem:[#allocation7 + $0x198] sm:$0xff]  ;;  %v7033_v59 = vld [vmem:[#allocation7 + $0x160] sm:$0xff] }
 0x3a4   :  { %v6976_v44 = vadd.f32 %v2091_v21, %v2090_v36  ;;  %v6991_v36 = vld [vmem:[#allocation7 + $0x1f0] sm:$0xff]  ;;  %v6994_v21 = vld [vmem:[#allocation7 + $0x1f8] sm:$0xff]  ;;  %9283 = vst [vmem:[#allocation17_spill] sm:$0xff] %v7000_v11  ;;  %v7036_v7 = vld [vmem:[#allocation7 + $0x168] sm:$0xff] }
 0x3a5   :  { %9281 = vst [vmem:[#allocation16_spill] sm:$0xff] %v6994_v21  ;;  %v7042_v42 = vld [vmem:[#allocation7 + $0x178] sm:$0xff]  ;;  %v7045_v45 = vld [vmem:[#allocation7 + $0x140] sm:$0xff]  ;;  %v7048_v16 = vld [vmem:[#allocation7 + $0x148] sm:$0xff] }
 0x3a6   :  { %3734 = vtanh.f32 %v6976_v44  ;;  %9289 = vst [vmem:[#allocation137_spill] sm:$0xff] %v7018_v28 }
 0x3a7   :  { %9290 = vst [vmem:[#allocation138_spill] sm:$0xff] %v7021_v52 }
 0x3a8   :  { %9291 = vst [vmem:[#allocation139_spill] sm:$0xff] %v7024_v3 }
 0x3a9   :  { %9292 = vst [vmem:[#allocation140_spill] sm:$0xff] %v7027_v10 }
 0x3aa   :  { %9293 = vst [vmem:[#allocation141_spill] sm:$0xff] %v7030_v26 }
 0x3ab   :  { %9294 = vst [vmem:[#allocation142_spill] sm:$0xff] %v7033_v59 }
 0x3ac   :  { %v3735_v48 = vpop.eup %3734  ;;  %9295 = vst [vmem:[#allocation143_spill] sm:$0xff] %v7036_v7 }
 0x3ad   :  { %v6979_v47 = vmul.f32 %v3735_v48, %v2088_v24  ;;  %9296 = vst [vmem:[#allocation144_spill] sm:$0xff] %v7039_v58  ;;  %v1822_v48 = vpop.f32.mrf.mxu0  ;;  %v1842_v24 = vpop.f32.mrf.mxu1 }
 0x3ae   :  { %9297 = vst [vmem:[#allocation145_spill] sm:$0xff] %v7042_v42 }
 0x3af   :  { %2111 = vmatmul.f32.vlgmr.msrb.gmra.mxu0 %v6979_v47  ;;  %2131 = vmatmul.f32.vlgmr.msra.gmra.mxu1 %v6979_v47  ;;  %9298 = vst [vmem:[#allocation146_spill] sm:$0xff] %v7045_v45 }
 0x3b0   :  { %2151 = vmatmul.f32.vlgmr.msra.gmra.mxu2 %v6979_v47  ;;  %2171 = vmatmul.f32.vlgmr.msra.gmra.mxu3 %v6979_v47  ;;  %9299 = vst [vmem:[#allocation147_spill] sm:$0xff] %v7048_v16 }
 0x3b1   :  { %2259 = vmatpush.msrb.mxu0 %v6985_v33  ;;  %2279 = vmatpush.msra.mxu1 %v6988_v1 }
 0x3b2   :  { %2299 = vmatpush.msra.mxu2 %v6991_v36  ;;  %2319 = vmatpush.msra.mxu3 %v6994_v21 }
 0x3b3   :  { %2260 = vmatpush.msrb.mxu0 %v6997_v6  ;;  %2280 = vmatpush.msra.mxu1 %v7000_v11 }
 0x3b4   :  { %2300 = vmatpush.msra.mxu2 %v7003_v63  ;;  %2320 = vmatpush.msra.mxu3 %v7006_v23 }
 0x3b5   :  { %2261 = vmatpush.msrb.mxu0 %v7009_v0  ;;  %2281 = vmatpush.msra.mxu1 %v7012_v12 }
 0x3b6   :  { %2301 = vmatpush.msra.mxu2 %v7015_v5  ;;  %2321 = vmatpush.msra.mxu3 %v7018_v28  ;;  %v7114_v28 = vld [vmem:[#allocation7 + $0xb8] sm:$0xff] }
 0x3b7   :  { %2262 = vmatpush.msrb.mxu0 %v7021_v52  ;;  %2282 = vmatpush.msra.mxu1 %v7024_v3  ;;  %v7105_v52 = vld [vmem:[#allocation7 + $0xa0] sm:$0xff]  ;;  %9321 = vst [vmem:[#allocation169_spill] sm:$0xff] %v7114_v28 }
 0x3b8   :  { %2302 = vmatpush.msra.mxu2 %v7027_v10  ;;  %2322 = vmatpush.msra.mxu3 %v7030_v26  ;;  %v7093_v26 = vld [vmem:[#allocation7 + $0xc0] sm:$0xff]  ;;  %v1922_v10 = vpop.f32.mrf.mxu1  ;;  %9318 = vst [vmem:[#allocation166_spill] sm:$0xff] %v7105_v52 }
 0x3b9   :  { %2263 = vmatpush.msrb.mxu0 %v7033_v59  ;;  %2283 = vmatpush.msra.mxu1 %v7036_v7  ;;  %v7051_v59 = vld [vmem:[#allocation7 + $0x150] sm:$0xff]  ;;  %v7054_v7 = vld [vmem:[#allocation7 + $0x158] sm:$0xff]  ;;  %9314 = vst [vmem:[#allocation162_spill] sm:$0xff] %v7093_v26  ;;  %v1923_v3 = vadd.f32 %v1922_v10, %v1842_v24 }
 0x3ba   :  { %2303 = vmatpush.msra.mxu2 %v7039_v58  ;;  %2323 = vmatpush.msra.mxu3 %v7042_v42  ;;  %9300 = vst [vmem:[#allocation148_spill] sm:$0xff] %v7051_v59  ;;  %v7057_v58 = vld [vmem:[#allocation7 + $0x120] sm:$0xff]  ;;  %v7060_v42 = vld [vmem:[#allocation7 + $0x128] sm:$0xff]  ;;  %v7125_v24 = vld [vmem:[#allocation7 + $0x90] sm:$0xff] }
 0x3bb   :  { %2264 = vmatpush.msrb.mxu0 %v7045_v45  ;;  %2284 = vmatpush.msra.mxu1 %v7048_v16  ;;  %9301 = vst [vmem:[#allocation149_spill] sm:$0xff] %v7054_v7  ;;  %v7063_v45 = vld [vmem:[#allocation7 + $0x130] sm:$0xff]  ;;  %v7066_v16 = vld [vmem:[#allocation7 + $0x138] sm:$0xff]  ;;  %v1966_v10 = vadd.f32 %v1923_v3, %v9148_v53  ;;  %v7131_v3 = vld [vmem:[#allocation7 + $0x60] sm:$0xff] }
 0x3bc   :  { %2304 = vmatpush.msra.mxu2 %v7051_v59  ;;  %2324 = vmatpush.msra.mxu3 %v7054_v7  ;;  %9302 = vst [vmem:[#allocation150_spill] sm:$0xff] %v7057_v58  ;;  %v7069_v59 = vld [vmem:[#allocation7 + $0x100] sm:$0xff]  ;;  %v7072_v7 = vld [vmem:[#allocation7 + $0x108] sm:$0xff] }
 0x3bd   :  { %2265 = vmatpush.msrb.mxu0 %v7057_v58  ;;  %9303 = vst [vmem:[#allocation151_spill] sm:$0xff] %v7060_v42  ;;  %2285 = vmatpush.msra.mxu1 %v7060_v42  ;;  %v7075_v58 = vld [vmem:[#allocation7 + $0x110] sm:$0xff]  ;;  %v7078_v42 = vld [vmem:[#allocation7 + $0x118] sm:$0xff]  ;;  %v7134_v53 = vld [vmem:[#allocation7 + $0x68] sm:$0xff] }
 0x3be   :  { %9304 = vst [vmem:[#allocation152_spill] sm:$0xff] %v7063_v45  ;;  %2305 = vmatpush.msra.mxu2 %v7063_v45  ;;  %2325 = vmatpush.msra.mxu3 %v7066_v16  ;;  %v7081_v45 = vld [vmem:[#allocation7 + $0xe0] sm:$0xff] }
 0x3bf   :  { %9305 = vst [vmem:[#allocation153_spill] sm:$0xff] %v7066_v16  ;;  %2266 = vmatpush.msrb.mxu0 %v7069_v59  ;;  %2286 = vmatpush.msra.mxu1 %v7072_v7  ;;  %v7084_v16 = vld [vmem:[#allocation7 + $0xe8] sm:$0xff] }
 0x3c0   :  { %9306 = vst [vmem:[#allocation154_spill] sm:$0xff] %v7069_v59  ;;  %2306 = vmatpush.msra.mxu2 %v7075_v58  ;;  %2326 = vmatpush.msra.mxu3 %v7078_v42  ;;  %v7087_v59 = vld [vmem:[#allocation7 + $0xf0] sm:$0xff] }
 0x3c1   :  { %9307 = vst [vmem:[#allocation155_spill] sm:$0xff] %v7072_v7  ;;  %2267 = vmatpush.msrb.mxu0 %v7081_v45  ;;  %2287 = vmatpush.msra.mxu1 %v7084_v16  ;;  %v7090_v7 = vld [vmem:[#allocation7 + $0xf8] sm:$0xff] }
 0x3c2   :  { %9308 = vst [vmem:[#allocation156_spill] sm:$0xff] %v7075_v58  ;;  %2307 = vmatpush.msra.mxu2 %v7087_v59  ;;  %2327 = vmatpush.msra.mxu3 %v7090_v7  ;;  %v1882_v58 = vpop.f32.mrf.mxu3 }
 0x3c3   :  { %9309 = vst [vmem:[#allocation157_spill] sm:$0xff] %v7078_v42  ;;  %2268 = vmatpush.msrb.mxu0 %v7093_v26  ;;  %v7096_v42 = vld [vmem:[#allocation7 + $0xc8] sm:$0xff] }
 0x3c4   :  { %9310 = vst [vmem:[#allocation158_spill] sm:$0xff] %v7081_v45  ;;  %2288 = vmatpush.msra.mxu1 %v7096_v42  ;;  %v1902_v45 = vpop.f32.mrf.mxu0  ;;  %v7108_v26 = vld [vmem:[#allocation7 + $0xa8] sm:$0xff] }
 0x3c5   :  { %9311 = vst [vmem:[#allocation159_spill] sm:$0xff] %v7084_v16  ;;  %v7099_v16 = vld [vmem:[#allocation7 + $0xd0] sm:$0xff]  ;;  %2269 = vmatpush.msrb.mxu0 %v7105_v52 }
 0x3c6   :  { %9312 = vst [vmem:[#allocation160_spill] sm:$0xff] %v7087_v59  ;;  %2308 = vmatpush.msra.mxu2 %v7099_v16  ;;  %v7102_v59 = vld [vmem:[#allocation7 + $0xd8] sm:$0xff]  ;;  %2289 = vmatpush.msra.mxu1 %v7108_v26 }
 0x3c7   :  { %9313 = vst [vmem:[#allocation161_spill] sm:$0xff] %v7090_v7  ;;  %2328 = vmatpush.msra.mxu3 %v7102_v59  ;;  %v1903_v7 = vadd.f32 %v1902_v45, %v1822_v48  ;;  %v7119_v45 = vld [vmem:[#allocation7 + $0x80] sm:$0xff]  ;;  %v7122_v48 = vld [vmem:[#allocation7 + $0x88] sm:$0xff] }
 0x3c8   :  { %9315 = vst [vmem:[#allocation163_spill] sm:$0xff] %v7096_v42  ;;  %v7111_v42 = vld [vmem:[#allocation7 + $0xb0] sm:$0xff]  ;;  %2270 = vmatpush.msrb.mxu0 %v7119_v45  ;;  %2290 = vmatpush.msra.mxu1 %v7122_v48 }
 0x3c9   :  { %9316 = vst [vmem:[#allocation164_spill] sm:$0xff] %v7099_v16  ;;  %2309 = vmatpush.msra.mxu2 %v7111_v42  ;;  %2329 = vmatpush.msra.mxu3 %v7114_v28  ;;  %v1862_v28 = vpop.f32.mrf.mxu2 }
 0x3ca   :  { %9317 = vst [vmem:[#allocation165_spill] sm:$0xff] %v7102_v59  ;;  %v1965_v59 = vadd.f32 %v1903_v7, %v9147_v41  ;;  %v3558_v41 = vmul.f32 -1.442695, %v1966_v10  ;;  %2271 = vmatpush.msrb.mxu0 %v7131_v3  ;;  %2291 = vmatpush.msra.mxu1 %v7134_v53  ;;  %v7146_v10 = vld [vmem:[#allocation7 + $0x48] sm:$0xff] }
 0x3cb   :  { %9319 = vst [vmem:[#allocation167_spill] sm:$0xff] %v7108_v26  ;;  %2310 = vmatpush.msra.mxu2 %v7125_v24 }
 0x3cc   :  { %9320 = vst [vmem:[#allocation168_spill] sm:$0xff] %v7111_v42  ;;  %v7128_v42 = vld [vmem:[#allocation7 + $0x98] sm:$0xff]  ;;  %v3557_v7 = vmul.f32 -1.442695, %v1965_v59  ;;  %v7143_v59 = vld [vmem:[#allocation7 + $0x40] sm:$0xff]  ;;  %2292 = vmatpush.msra.mxu1 %v7146_v10 }
 0x3cd   :  { %9322 = vst [vmem:[#allocation170_spill] sm:$0xff] %v7119_v45  ;;  %2330 = vmatpush.msra.mxu3 %v7128_v42  ;;  %2272 = vmatpush.msrb.mxu0 %v7143_v59 }
 0x3ce   :  { %9323 = vst [vmem:[#allocation171_spill] sm:$0xff] %v7122_v48  ;;  %v7137_v48 = vld [vmem:[#allocation7 + $0x70] sm:$0xff]  ;;  %3736 = vpow2.f32 %v3557_v7  ;;  %v7155_v7 = vld [vmem:[#allocation7 + $0x20] sm:$0xff] }
 0x3cf   :  { %9324 = vst [vmem:[#allocation172_spill] sm:$0xff] %v7125_v24  ;;  %2311 = vmatpush.msra.mxu2 %v7137_v48  ;;  %v7140_v24 = vld [vmem:[#allocation7 + $0x78] sm:$0xff]  ;;  %3738 = vpow2.f32 %v3558_v41  ;;  %2273 = vmatpush.msrb.mxu0 %v7155_v7  ;;  %v7162_v41 = vld [vmem:[#allocation7 + $0x30] sm:$0xff] }
 0x3d0   :  { %9325 = vst [vmem:[#allocation173_spill] sm:$0xff] %v7128_v42  ;;  %2331 = vmatpush.msra.mxu3 %v7140_v24  ;;  %v1962_v42 = vpop.f32.mrf.mxu3 }
 0x3d1   :  { %9326 = vst [vmem:[#allocation174_spill] sm:$0xff] %v7131_v3  ;;  %v7149_v3 = vld [vmem:[#allocation7 + $0x50] sm:$0xff] }
 0x3d2   :  { %9327 = vst [vmem:[#allocation175_spill] sm:$0xff] %v7134_v53  ;;  %v1963_v53 = vadd.f32 %v1962_v42, %v1882_v58  ;;  %2312 = vmatpush.msra.mxu2 %v7149_v3  ;;  %v7165_v58 = vld [vmem:[#allocation7 + $0x38] sm:$0xff]  ;;  %v7168_v42 = vld [vmem:[#allocation7] sm:$0xff] }
 0x3d3   :  { %9328 = vst [vmem:[#allocation176_spill] sm:$0xff] %v7137_v48  ;;  %v7152_v48 = vld [vmem:[#allocation7 + $0x58] sm:$0xff]  ;;  %2274 = vmatpush.msrb.mxu0 %v7168_v42 }
 0x3d4   :  { %9329 = vst [vmem:[#allocation177_spill] sm:$0xff] %v7140_v24  ;;  %2332 = vmatpush.msra.mxu3 %v7152_v48  ;;  %v7158_v24 = vld [vmem:[#allocation7 + $0x28] sm:$0xff]  ;;  %2313 = vmatpush.msra.mxu2 %v7162_v41 }
 0x3d5   :  { %9330 = vst [vmem:[#allocation178_spill] sm:$0xff] %v7143_v59  ;;  %2293 = vmatpush.msra.mxu1 %v7158_v24  ;;  %v1942_v59 = vpop.f32.mrf.mxu2 }
 0x3d6   :  { %9331 = vst [vmem:[#allocation179_spill] sm:$0xff] %v7146_v10  ;;  %v1968_v10 = vadd.f32 %v1963_v53, %v9163_v55  ;;  %2333 = vmatpush.msra.mxu3 %v7165_v58  ;;  %v7177_v53 = vld [vmem:[#allocation7 + $0x18] sm:$0xff]  ;;  %v3737_v55 = vpop.eup %3736 }
 0x3d7   :  { %9332 = vst [vmem:[#allocation180_spill] sm:$0xff] %v7149_v3 }
 0x3d8   :  { %9333 = vst [vmem:[#allocation181_spill] sm:$0xff] %v7152_v48  ;;  %v7171_v48 = vld [vmem:[#allocation7 + $0x8] sm:$0xff]  ;;  %2334 = vmatpush.msra.mxu3 %v7177_v53 }
 0x3d9   :  { %9334 = vst [vmem:[#allocation182_spill] sm:$0xff] %v7155_v7  ;;  %2294 = vmatpush.msra.mxu1 %v7171_v48  ;;  %v3559_v7 = vmul.f32 -1.442695, %v1968_v10 }
 0x3da   :  { %9335 = vst [vmem:[#allocation183_spill] sm:$0xff] %v7158_v24  ;;  %v7174_v24 = vld [vmem:[#allocation7 + $0x10] sm:$0xff] }
 0x3db   :  { %9336 = vst [vmem:[#allocation184_spill] sm:$0xff] %v7162_v41  ;;  %2314 = vmatpush.msra.mxu2 %v7174_v24  ;;  %v3739_v41 = vpop.eup %3738  ;;  %3740 = vpow2.f32 %v3559_v7 }
 0x3dc   :  { %9337 = vst [vmem:[#allocation185_spill] sm:$0xff] %v7165_v58  ;;  %v1972_v58 = vadd.f32 1.0, %v3737_v55  ;;  %v1991_v3 = vadd.f32 1.0, %v3739_v41 }
 0x3dd   :  { %9338 = vst [vmem:[#allocation186_spill] sm:$0xff] %v7168_v42  ;;  %v1943_v42 = vadd.f32 %v1942_v59, %v1862_v28 }
 0x3de   :  { %9339 = vst [vmem:[#allocation18_spill] sm:$0xff] %v7171_v48  ;;  %3742 = vrcp.f32 %v1972_v58  ;;  %v1984_v12 = vand.u32 2147483648, %v1972_v58  ;;  %v2003_v55 = vand.u32 2147483648, %v1991_v3  ;;  %v1982_v41 = vand.u32 2147483647, %v1972_v58 }
 0x3df   :  { %9340 = vst [vmem:[#allocation28_spill] sm:$0xff] %v7174_v24  ;;  %3744 = vrcp.f32 %v1991_v3  ;;  %v1967_v26 = vadd.f32 %v1943_v42, %v9187_v34  ;;  %v2001_v28 = vand.u32 2147483647, %v1991_v3  ;;  %vm1978_vm3 = vweird.f32 %v1972_v58 }
 0x3e0   :  { %9341 = vst [vmem:[#allocation20_spill] sm:$0xff] %v7177_v53  ;;  %vm1997_vm4 = vweird.f32 %v1991_v3  ;;  %v1985_v42 = vor.u32 1.1754944e-38, %v1984_v12  ;;  %vm1983_vm7 = vcmp.eq.f32.partialorder %v1982_v41, 8.507059e+37  ;;  %v9376_v41 = vld [vmem:[#allocation77_spill] sm:$0xff] }
 0x3e1   :  { %v3741_v45 = vpop.eup %3740  ;;  %vm2002_vm8 = vcmp.eq.f32.partialorder %v2001_v28, 8.507059e+37  ;;  %v9377_v28 = vld [vmem:[#allocation78_spill] sm:$0xff] }
 0x3e2   :  { %v2011_v48 = vadd.f32 1.0, %v3741_v45 }
 0x3e4   :  { %v3743_v10 = vpop.eup %3742  ;;  %3746 = vrcp.f32 %v2011_v48  ;;  %vm2017_vm10 = vweird.f32 %v2011_v48  ;;  %v2021_v12 = vand.u32 2147483647, %v2011_v48 }
 0x3e5   :  { %v3745_v52 = vpop.eup %3744  ;;  %v1974_v24 = vmul.f32 %v3743_v10, %v1972_v58  ;;  %3748 = vtanh.f32 %v1967_v26  ;;  %vm1979_vm1 = vweird.f32 %v3743_v10 }
 0x3e6   :  { %v1993_v16 = vmul.f32 %v3745_v52, %v1991_v3  ;;  %vm1998_vm2 = vweird.f32 %v3745_v52  ;;  %vm1980_vm5 = vmor %vm1978_vm3, %vm1979_vm1  ;;  %vm2022_vm12 = vcmp.eq.f32.partialorder %v2021_v12, 8.507059e+37  ;;  %v9389_v12 = vld [vmem:[#allocation90_spill] sm:$0xff] }
 0x3e7   :  { %v1975_v5 = vsub.f32 1.0, %v1974_v24  ;;  %vm1999_vm6 = vmor %vm1997_vm4, %vm1998_vm2  ;;  %v2004_v24 = vor.u32 1.1754944e-38, %v2003_v55 }
 0x3e8   :  { %v1994_v53 = vsub.f32 1.0, %v1993_v16 }
 0x3e9   :  { %v1976_v7 = vmul.f32 %v3743_v10, %v1975_v5 }
 0x3ea   :  { %v1995_v0 = vmul.f32 %v3745_v52, %v1994_v53  ;;  %v3747_v59 = vpop.eup %3746 }
 0x3eb   :  { %v1977_v45 = vadd.f32 %v3743_v10, %v1976_v7  ;;  %v2013_v23 = vmul.f32 %v3747_v59, %v2011_v48  ;;  %v3749_v26 = vpop.eup %3748  ;;  %vm2018_vm9 = vweird.f32 %v3747_v59 }
 0x3ec   :  { %v1996_v34 = vadd.f32 %v3745_v52, %v1995_v0  ;;  %v2023_v0 = vand.u32 2147483648, %v2011_v48  ;;  %vm2019_vm11 = vmor %vm2017_vm10, %vm2018_vm9  ;;  %v9375_v48 = vld [vmem:[#allocation75_spill] sm:$0xff] }
 0x3ed   :  { %v1981_v16 = vsel %vm1980_vm5, %v3743_v10, %v1977_v45  ;;  %v2014_v11 = vsub.f32 1.0, %v2013_v23  ;;  %v9379_v45 = vld [vmem:[#allocation80_spill] sm:$0xff] }
 0x3ee   :  { %v1986_v63 = vsel %vm1983_vm7, %v1985_v42, %v1981_v16  ;;  %v2000_v5 = vsel %vm1999_vm6, %v3745_v52, %v1996_v34  ;;  %v2024_v55 = vor.u32 1.1754944e-38, %v2023_v0  ;;  %v9380_v42 = vld [vmem:[#allocation81_spill] sm:$0xff]  ;;  %v9382_v16 = vld [vmem:[#allocation83_spill] sm:$0xff] }
 0x3ef   :  { %v2005_v53 = vsel %vm2002_vm8, %v2004_v24, %v2000_v5  ;;  %v2028_v6 = vmul.f32 %v3749_v26, %v1986_v63  ;;  %v2015_v7 = vmul.f32 %v3747_v59, %v2014_v11  ;;  %v7199_v11 = vld [vmem:[#allocation5 + $0x1a0] sm:$0xff]  ;;  %v9374_v63 = vld [vmem:[#allocation74_spill] sm:$0xff]  ;;  %v9383_v26 = vld [vmem:[#allocation84_spill] sm:$0xff] }
 0x3f0   :  { %v2027_v21 = vmul.f32 %v2005_v53, %v6588_v32  ;;  %v7185_v32 = vld [vmem:[#allocation5 + $0x1e0] sm:$0xff]  ;;  %v9381_v24 = vld [vmem:[#allocation82_spill] sm:$0xff]  ;;  %v9384_v5 = vld [vmem:[#allocation85_spill] sm:$0xff] }
 0x3f1   :  { %v2016_v3 = vadd.f32 %v3747_v59, %v2015_v7  ;;  %v9385_v53 = vld [vmem:[#allocation86_spill] sm:$0xff]  ;;  %v9386_v7 = vld [vmem:[#allocation87_spill] sm:$0xff]  ;;  %v9388_v0 = vld [vmem:[#allocation89_spill] sm:$0xff] }
 0x3f2   :  { %v7182_v58 = vadd.f32 %v2028_v6, %v2027_v21  ;;  %v7188_v21 = vld [vmem:[#allocation5 + $0x1e8] sm:$0xff]  ;;  %v7193_v6 = vld [vmem:[#allocation5 + $0x1c0] sm:$0xff] }
 0x3f3   :  { %v2020_v10 = vsel %vm2019_vm11, %v3747_v59, %v2016_v3  ;;  %v9378_v59 = vld [vmem:[#allocation79_spill] sm:$0xff]  ;;  %v9387_v3 = vld [vmem:[#allocation88_spill] sm:$0xff] }
 0x3f4   :  { %3750 = vtanh.f32 %v7182_v58  ;;  %v2025_v23 = vsel %vm2022_vm12, %v2024_v55, %v2020_v10  ;;  %v9390_v10 = vld [vmem:[#allocation92_spill] sm:$0xff]  ;;  %v9391_v55 = vld [vmem:[#allocation93_spill] sm:$0xff] }
 0x3fa   :  { %v3751_v34 = vpop.eup %3750 }
 0x3fb   :  { %v2031_v52 = vmul.f32 %v3751_v34, %v2025_v23  ;;  %v9392_v34 = vld [vmem:[#allocation94_spill] sm:$0xff]  ;;  %v9393_v23 = vld [vmem:[#allocation95_spill] sm:$0xff] }
 0x3fd   :  { %2195 = vmatmul.f32.vlgmr.msra.gmra.mxu0 %v2031_v52  ;;  %2215 = vmatmul.f32.vlgmr.msrb.gmra.mxu1 %v2031_v52 }
 0x3fe   :  { %2235 = vmatmul.f32.vlgmr.msrb.gmra.mxu2 %v2031_v52  ;;  %2255 = vmatmul.f32.vlgmr.msrb.gmra.mxu3 %v2031_v52  ;;  %v9394_v52 = vld [vmem:[#allocation96_spill] sm:$0xff] }
 0x3ff   :  { %2469 = vmatpush.msra.mxu0 %v7185_v32  ;;  %2489 = vmatpush.msrb.mxu1 %v7188_v21 }
 0x400   :  { %2509 = vmatpush.msrb.mxu2 %v6593_v46  ;;  %2529 = vmatpush.msrb.mxu3 %v6596_v8  ;;  %v7209_v46 = vld [vmem:[#allocation5 + $0x180] sm:$0xff] }
 0x401   :  { %2470 = vmatpush.msra.mxu0 %v7193_v6  ;;  %2490 = vmatpush.msrb.mxu1 %v6600_v20  ;;  %v7215_v8 = vld [vmem:[#allocation5 + $0x160] sm:$0xff]  ;;  %v9342_v20 = vld [vmem:[#allocation37_spill] sm:$0xff] }
 0x402   :  { %2510 = vmatpush.msrb.mxu2 %v6603_v17  ;;  %2530 = vmatpush.msrb.mxu3 %v6606_v56  ;;  %v9343_v17 = vld [vmem:[#allocation38_spill] sm:$0xff]  ;;  %v9344_v56 = vld [vmem:[#allocation39_spill] sm:$0xff] }
 0x403   :  { %2471 = vmatpush.msra.mxu0 %v7199_v11  ;;  %2491 = vmatpush.msrb.mxu1 %v6610_v29  ;;  %v9345_v29 = vld [vmem:[#allocation40_spill] sm:$0xff] }
 0x404   :  { %2511 = vmatpush.msrb.mxu2 %v6613_v54  ;;  %2531 = vmatpush.msrb.mxu3 %v6616_v61  ;;  %v9346_v54 = vld [vmem:[#allocation41_spill] sm:$0xff]  ;;  %v9347_v61 = vld [vmem:[#allocation42_spill] sm:$0xff] }
 0x405   :  { %2275 = vmatmul.f32.vlgmr.msrb.gmra.mxu0 %v6979_v47  ;;  %2295 = vmatmul.f32.vlgmr.msra.gmra.mxu1 %v6979_v47 }
 0x406   :  { %2315 = vmatmul.f32.vlgmr.msra.gmra.mxu2 %v6979_v47  ;;  %2335 = vmatmul.f32.vlgmr.msra.gmra.mxu3 %v6979_v47  ;;  %v9373_v47 = vld [vmem:[#allocation73_spill] sm:$0xff] }
 0x407   :  { %2472 = vmatpush.msra.mxu0 %v7209_v46  ;;  %2492 = vmatpush.msrb.mxu1 %v6624_v43  ;;  %v9348_v43 = vld [vmem:[#allocation44_spill] sm:$0xff] }
 0x408   :  { %2512 = vmatpush.msrb.mxu2 %v6627_v37  ;;  %2532 = vmatpush.msrb.mxu3 %v6630_v31  ;;  %v9349_v37 = vld [vmem:[#allocation45_spill] sm:$0xff]  ;;  %v9350_v31 = vld [vmem:[#allocation46_spill] sm:$0xff] }
 0x409   :  { %2473 = vmatpush.msra.mxu0 %v7215_v8  ;;  %2493 = vmatpush.msrb.mxu1 %v6634_v38  ;;  %v9351_v38 = vld [vmem:[#allocation47_spill] sm:$0xff] }
 0x40a   :  { %2513 = vmatpush.msrb.mxu2 %v6637_v50  ;;  %2533 = vmatpush.msrb.mxu3 %v6640_v27  ;;  %v9352_v50 = vld [vmem:[#allocation48_spill] sm:$0xff]  ;;  %v9353_v27 = vld [vmem:[#allocation49_spill] sm:$0xff] }
 0x40b   :  { %2474 = vmatpush.msra.mxu0 %v6643_v13  ;;  %2494 = vmatpush.msrb.mxu1 %v6646_v19  ;;  %v9354_v13 = vld [vmem:[#allocation50_spill] sm:$0xff]  ;;  %v9355_v19 = vld [vmem:[#allocation52_spill] sm:$0xff] }
 0x40c   :  { %2514 = vmatpush.msrb.mxu2 %v6649_v2  ;;  %2534 = vmatpush.msrb.mxu3 %v6652_v49  ;;  %v9356_v2 = vld [vmem:[#allocation53_spill] sm:$0xff]  ;;  %v9357_v49 = vld [vmem:[#allocation54_spill] sm:$0xff] }
 0x40d   :  { %2475 = vmatpush.msra.mxu0 %v6655_v35  ;;  %2495 = vmatpush.msrb.mxu1 %v6658_v14  ;;  %v9358_v35 = vld [vmem:[#allocation55_spill] sm:$0xff]  ;;  %v9359_v14 = vld [vmem:[#allocation56_spill] sm:$0xff] }
 0x40e   :  { %2515 = vmatpush.msrb.mxu2 %v6661_v9  ;;  %2535 = vmatpush.msrb.mxu3 %v6664_v60  ;;  %v9360_v9 = vld [vmem:[#allocation57_spill] sm:$0xff]  ;;  %v9361_v60 = vld [vmem:[#allocation58_spill] sm:$0xff] }
 0x40f   :  { %2476 = vmatpush.msra.mxu0 %v6667_v62  ;;  %2496 = vmatpush.msrb.mxu1 %v6670_v22  ;;  %v9362_v62 = vld [vmem:[#allocation60_spill] sm:$0xff]  ;;  %v9363_v22 = vld [vmem:[#allocation61_spill] sm:$0xff] }
 0x410   :  { %2516 = vmatpush.msrb.mxu2 %v6673_v51  ;;  %2536 = vmatpush.msrb.mxu3 %v6676_v4  ;;  %v9364_v51 = vld [vmem:[#allocation63_spill] sm:$0xff]  ;;  %v9365_v4 = vld [vmem:[#allocation64_spill] sm:$0xff] }
 0x411   :  { %2477 = vmatpush.msra.mxu0 %v6679_v25  ;;  %2497 = vmatpush.msrb.mxu1 %v6682_v18  ;;  %v9366_v25 = vld [vmem:[#allocation65_spill] sm:$0xff]  ;;  %v9367_v18 = vld [vmem:[#allocation66_spill] sm:$0xff] }
 0x412   :  { %2517 = vmatpush.msrb.mxu2 %v6685_v15  ;;  %2537 = vmatpush.msrb.mxu3 %v6688_v57  ;;  %v9368_v15 = vld [vmem:[#allocation67_spill] sm:$0xff]  ;;  %v9369_v57 = vld [vmem:[#allocation68_spill] sm:$0xff] }
 0x413   :  { %2478 = vmatpush.msra.mxu0 %v6691_v39  ;;  %2498 = vmatpush.msrb.mxu1 %v6694_v40  ;;  %v9370_v39 = vld [vmem:[#allocation69_spill] sm:$0xff]  ;;  %v9371_v40 = vld [vmem:[#allocation71_spill] sm:$0xff] }
 0x414   :  { %2518 = vmatpush.msrb.mxu2 %v6697_v30  ;;  %2538 = vmatpush.msrb.mxu3 %v9342_v20  ;;  %v9372_v30 = vld [vmem:[#allocation72_spill] sm:$0xff]  ;;  %v9395_v20 = vld [vmem:[#allocation97_spill] sm:$0xff] }
 0x415   :  { %2479 = vmatpush.msra.mxu0 %v9343_v17  ;;  %2499 = vmatpush.msrb.mxu1 %v9344_v56  ;;  %v9396_v17 = vld [vmem:[#allocation98_spill] sm:$0xff]  ;;  %v9397_v56 = vld [vmem:[#allocation99_spill] sm:$0xff] }
 0x416   :  { %2519 = vmatpush.msrb.mxu2 %v9345_v29  ;;  %2539 = vmatpush.msrb.mxu3 %v9346_v54  ;;  %v9398_v29 = vld [vmem:[#allocation100_spill] sm:$0xff]  ;;  %v9399_v54 = vld [vmem:[#allocation101_spill] sm:$0xff] }
 0x417   :  { %2480 = vmatpush.msra.mxu0 %v9347_v61  ;;  %2500 = vmatpush.msrb.mxu1 %v9348_v43  ;;  %v9400_v61 = vld [vmem:[#allocation102_spill] sm:$0xff]  ;;  %v9401_v43 = vld [vmem:[#allocation103_spill] sm:$0xff] }
 0x418   :  { %2520 = vmatpush.msrb.mxu2 %v9349_v37  ;;  %2540 = vmatpush.msrb.mxu3 %v9350_v31  ;;  %v9402_v37 = vld [vmem:[#allocation104_spill] sm:$0xff]  ;;  %v9403_v31 = vld [vmem:[#allocation105_spill] sm:$0xff] }
 0x419   :  { %2481 = vmatpush.msra.mxu0 %v9351_v38  ;;  %2501 = vmatpush.msrb.mxu1 %v9352_v50  ;;  %v9404_v38 = vld [vmem:[#allocation106_spill] sm:$0xff]  ;;  %v9405_v50 = vld [vmem:[#allocation107_spill] sm:$0xff] }
 0x41a   :  { %2521 = vmatpush.msrb.mxu2 %v9353_v27  ;;  %2541 = vmatpush.msrb.mxu3 %v9354_v13  ;;  %v9406_v27 = vld [vmem:[#allocation108_spill] sm:$0xff]  ;;  %v9407_v13 = vld [vmem:[#allocation43_spill] sm:$0xff] }
 0x41b   :  { %2482 = vmatpush.msra.mxu0 %v9355_v19  ;;  %2502 = vmatpush.msrb.mxu1 %v9356_v2  ;;  %v9408_v19 = vld [vmem:[#allocation51_spill] sm:$0xff] }
 0x41c   :  { %2522 = vmatpush.msrb.mxu2 %v9357_v49  ;;  %2542 = vmatpush.msrb.mxu3 %v9358_v35  ;;  %v203_v2 = vadd.f32 %v9408_v19, %v9407_v13  ;;  %v9409_v49 = vld [vmem:[#allocation59_spill] sm:$0xff]  ;;  %v9410_v35 = vld [vmem:[#allocation21_spill] sm:$0xff] }
 0x41d   :  { %2483 = vmatpush.msra.mxu0 %v9359_v14  ;;  %2503 = vmatpush.msrb.mxu1 %v9360_v9  ;;  %v244_v14 = vadd.f32 %v9410_v35, %v9409_v49  ;;  %v9411_v9 = vld [vmem:[#allocation109_spill] sm:$0xff] }
 0x41e   :  { %2523 = vmatpush.msrb.mxu2 %v9361_v60  ;;  %2543 = vmatpush.msrb.mxu3 %v9362_v62  ;;  %v9412_v60 = vld [vmem:[#allocation110_spill] sm:$0xff] }
 0x41f   :  { %2484 = vmatpush.msra.mxu0 %v9363_v22  ;;  %2504 = vmatpush.msrb.mxu1 %v9364_v51  ;;  %v9413_v51 = vld [vmem:[#allocation111_spill] sm:$0xff] }
 0x420   :  { %2524 = vmatpush.msrb.mxu2 %v9365_v4  ;;  %2544 = vmatpush.msrb.mxu3 %v9366_v25  ;;  %v9414_v4 = vld [vmem:[#allocation112_spill] sm:$0xff] }
 0x421   :  { %2553 = vmatpush.msrb.mxu0 %v9367_v18  ;;  %2573 = vmatpush.msra.mxu1 %v9368_v15  ;;  %v9415_v15 = vld [vmem:[#allocation113_spill] sm:$0xff] }
 0x422   :  { %2593 = vmatpush.msra.mxu2 %v9369_v57  ;;  %2613 = vmatpush.msra.mxu3 %v9370_v39  ;;  %v9416_v57 = vld [vmem:[#allocation114_spill] sm:$0xff]  ;;  %v9417_v39 = vld [vmem:[#allocation115_spill] sm:$0xff] }
 0x423   :  { %2554 = vmatpush.msrb.mxu0 %v9371_v40  ;;  %2574 = vmatpush.msra.mxu1 %v9372_v30  ;;  %v9418_v40 = vld [vmem:[#allocation116_spill] sm:$0xff] }
 0x424   :  { %2594 = vmatpush.msra.mxu2 %v9373_v47  ;;  %2614 = vmatpush.msra.mxu3 %v9374_v63  ;;  %v9419_v63 = vld [vmem:[#allocation117_spill] sm:$0xff] }
 0x425   :  { %2555 = vmatpush.msrb.mxu0 %v9375_v48  ;;  %2575 = vmatpush.msra.mxu1 %v9376_v41  ;;  %v9420_v48 = vld [vmem:[#allocation118_spill] sm:$0xff]  ;;  %v9421_v41 = vld [vmem:[#allocation119_spill] sm:$0xff] }
 0x426   :  { %2595 = vmatpush.msra.mxu2 %v9377_v28  ;;  %2615 = vmatpush.msra.mxu3 %v9378_v59  ;;  %v9422_v28 = vld [vmem:[#allocation120_spill] sm:$0xff]  ;;  %v9423_v59 = vld [vmem:[#allocation121_spill] sm:$0xff] }
 0x427   :  { %2556 = vmatpush.msrb.mxu0 %v9379_v45  ;;  %2576 = vmatpush.msra.mxu1 %v9380_v42  ;;  %v9424_v45 = vld [vmem:[#allocation122_spill] sm:$0xff] }
 0x428   :  { %2596 = vmatpush.msra.mxu2 %v9381_v24  ;;  %2616 = vmatpush.msra.mxu3 %v9382_v16  ;;  %v9425_v42 = vld [vmem:[#allocation70_spill] sm:$0xff]  ;;  %v9426_v24 = vld [vmem:[#allocation23_spill] sm:$0xff] }
 0x429   :  { %2557 = vmatpush.msrb.mxu0 %v9383_v26  ;;  %2577 = vmatpush.msra.mxu1 %v9384_v5  ;;  %v326_v16 = vadd.f32 %v9426_v24, %v9425_v42  ;;  %v9427_v26 = vld [vmem:[#allocation123_spill] sm:$0xff]  ;;  %v9428_v5 = vld [vmem:[#allocation124_spill] sm:$0xff] }
 0x42a   :  { %2597 = vmatpush.msra.mxu2 %v9385_v53  ;;  %2617 = vmatpush.msra.mxu3 %v9386_v7  ;;  %v9429_v7 = vld [vmem:[#allocation125_spill] sm:$0xff] }
 0x42b   :  { %2558 = vmatpush.msrb.mxu0 %v9387_v3  ;;  %2578 = vmatpush.msra.mxu1 %v9388_v0  ;;  %v9430_v3 = vld [vmem:[#allocation126_spill] sm:$0xff] }
 0x42c   :  { %2598 = vmatpush.msra.mxu2 %v9389_v12  ;;  %2618 = vmatpush.msra.mxu3 %v9390_v10  ;;  %v2112_v62 = vpop.f32.mrf.mxu0  ;;  %v2132_v22 = vpop.f32.mrf.mxu1  ;;  %v9431_v12 = vld [vmem:[#allocation127_spill] sm:$0xff]  ;;  %v9432_v10 = vld [vmem:[#allocation128_spill] sm:$0xff] }
 0x42d   :  { %2559 = vmatpush.msrb.mxu0 %v9391_v55  ;;  %2579 = vmatpush.msra.mxu1 %v9392_v34  ;;  %v2175_v25 = vadd.f32 %v2112_v62, %v203_v2  ;;  %v2176_v18 = vadd.f32 %v2132_v22, %v244_v14  ;;  %v9433_v55 = vld [vmem:[#allocation129_spill] sm:$0xff]  ;;  %v9434_v34 = vld [vmem:[#allocation130_spill] sm:$0xff] }
 0x42e   :  { %2599 = vmatpush.msra.mxu2 %v9393_v23  ;;  %2619 = vmatpush.msra.mxu3 %v9394_v52  ;;  %v9435_v52 = vld [vmem:[#allocation131_spill] sm:$0xff] }
 0x42f   :  { %2560 = vmatpush.msrb.mxu0 %v9395_v20  ;;  %2580 = vmatpush.msra.mxu1 %v9396_v17  ;;  %v3566_v30 = vmul.f32 -1.442695, %v2175_v25  ;;  %v3567_v47 = vmul.f32 -1.442695, %v2176_v18  ;;  %v9436_v20 = vld [vmem:[#allocation132_spill] sm:$0xff] }
 0x430   :  { %2600 = vmatpush.msra.mxu2 %v9397_v56  ;;  %2620 = vmatpush.msra.mxu3 %v9398_v29 }
 0x431   :  { %2561 = vmatpush.msrb.mxu0 %v9399_v54  ;;  %2581 = vmatpush.msra.mxu1 %v9400_v61  ;;  %3752 = vpow2.f32 %v3566_v30 }
 0x432   :  { %2601 = vmatpush.msra.mxu2 %v9401_v43  ;;  %2621 = vmatpush.msra.mxu3 %v9402_v37  ;;  %3754 = vpow2.f32 %v3567_v47  ;;  %v9437_v37 = vld [vmem:[#allocation91_spill] sm:$0xff] }
 0x433   :  { %2562 = vmatpush.msrb.mxu0 %v9403_v31  ;;  %2582 = vmatpush.msra.mxu1 %v9404_v38  ;;  %v2172_v53 = vpop.f32.mrf.mxu3  ;;  %v2152_v61 = vpop.f32.mrf.mxu2  ;;  %v9438_v31 = vld [vmem:[#allocation26_spill] sm:$0xff] }
 0x434   :  { %2602 = vmatpush.msra.mxu2 %v9405_v50  ;;  %2622 = vmatpush.msra.mxu3 %v9406_v27  ;;  %v2178_v0 = vadd.f32 %v2172_v53, %v326_v16  ;;  %v285_v38 = vadd.f32 %v9438_v31, %v9437_v37  ;;  %v9452_v31 = vld [vmem:[#allocation142_spill] sm:$0xff] }
 0x435   :  { %2563 = vmatpush.msrb.mxu0 %v9411_v9  ;;  %2583 = vmatpush.msra.mxu1 %v9412_v60 }
 0x436   :  { %2603 = vmatpush.msra.mxu2 %v9413_v51  ;;  %2623 = vmatpush.msra.mxu3 %v9414_v4  ;;  %v3568_v23 = vmul.f32 -1.442695, %v2178_v0  ;;  %v2177_v19 = vadd.f32 %v2152_v61, %v285_v38  ;;  %v9450_v61 = vld [vmem:[#allocation140_spill] sm:$0xff]  ;;  %v9453_v38 = vld [vmem:[#allocation143_spill] sm:$0xff] }
 0x437   :  { %2564 = vmatpush.msrb.mxu0 %v9415_v15  ;;  %2584 = vmatpush.msra.mxu1 %v9416_v57  ;;  %v3753_v17 = vpop.eup %3752 }
 0x438   :  { %2604 = vmatpush.msra.mxu2 %v9417_v39  ;;  %2624 = vmatpush.msra.mxu3 %v9418_v40  ;;  %v3755_v56 = vpop.eup %3754  ;;  %v2409_v29 = vadd.f32 1.0, %v3753_v17  ;;  %3756 = vpow2.f32 %v3568_v23  ;;  %v9440_v23 = vld [vmem:[#allocation24_spill] sm:$0xff]  ;;  %v9443_v17 = vld [vmem:[#allocation133_spill] sm:$0xff] }
 0x439   :  { %2565 = vmatpush.msrb.mxu0 %v9419_v63  ;;  %2585 = vmatpush.msra.mxu1 %v9420_v48  ;;  %v2428_v54 = vadd.f32 1.0, %v3755_v56  ;;  %v9444_v56 = vld [vmem:[#allocation134_spill] sm:$0xff] }
 0x43a   :  { %2605 = vmatpush.msra.mxu2 %v9421_v41  ;;  %2625 = vmatpush.msra.mxu3 %v9422_v28  ;;  %3758 = vrcp.f32 %v2409_v29  ;;  %v2421_v62 = vand.u32 2147483648, %v2409_v29  ;;  %v2419_v4 = vand.u32 2147483647, %v2409_v29  ;;  %vm2415_vm15 = vweird.f32 %v2409_v29 }
 0x43b   :  { %2566 = vmatpush.msrb.mxu0 %v9423_v59  ;;  %2586 = vmatpush.msra.mxu1 %v9424_v45  ;;  %3760 = vrcp.f32 %v2428_v54  ;;  %v2440_v22 = vand.u32 2147483648, %v2428_v54  ;;  %v2438_v18 = vand.u32 2147483647, %v2428_v54  ;;  %vm2434_vm0 = vweird.f32 %v2428_v54 }
 0x43c   :  { %2606 = vmatpush.msra.mxu2 %v9427_v26  ;;  %2626 = vmatpush.msra.mxu3 %v9428_v5  ;;  %v2422_v39 = vor.u32 1.1754944e-38, %v2421_v62  ;;  %vm2420_vm3 = vcmp.eq.f32.partialorder %v2419_v4, 8.507059e+37  ;;  %v9462_v62 = vld [vmem:[#allocation152_spill] sm:$0xff]  ;;  %v9465_v4 = vld [vmem:[#allocation155_spill] sm:$0xff] }
 0x43d   :  { %2567 = vmatpush.msrb.mxu0 %v9429_v7  ;;  %2587 = vmatpush.msra.mxu1 %v9430_v3  ;;  %v2441_v47 = vor.u32 1.1754944e-38, %v2440_v22  ;;  %vm2439_vm4 = vcmp.eq.f32.partialorder %v2438_v18, 8.507059e+37  ;;  %v9463_v22 = vld [vmem:[#allocation153_spill] sm:$0xff] }
 0x43e   :  { %2607 = vmatpush.msra.mxu2 %v9431_v12  ;;  %2627 = vmatpush.msra.mxu3 %v9432_v10  ;;  %v3757_v43 = vpop.eup %3756  ;;  %v9467_v18 = vld [vmem:[#allocation157_spill] sm:$0xff] }
 0x43f   :  { %2568 = vmatpush.msrb.mxu0 %v9433_v55  ;;  %2588 = vmatpush.msra.mxu1 %v9434_v34  ;;  %v2448_v50 = vadd.f32 1.0, %v3757_v43  ;;  %v9451_v43 = vld [vmem:[#allocation141_spill] sm:$0xff] }
 0x440   :  { %2608 = vmatpush.msra.mxu2 %v9435_v52  ;;  %2628 = vmatpush.msra.mxu3 %v9436_v20  ;;  %v3759_v27 = vpop.eup %3758  ;;  %v9441_v52 = vld [vmem:[#allocation17_spill] sm:$0xff]  ;;  %v9442_v20 = vld [vmem:[#allocation19_spill] sm:$0xff] }
 0x441   :  { %v3761_v2 = vpop.eup %3760  ;;  %v2411_v35 = vmul.f32 %v3759_v27, %v2409_v29  ;;  %3762 = vrcp.f32 %v2448_v50  ;;  %vm2416_vm13 = vweird.f32 %v3759_v27  ;;  %v2460_v7 = vand.u32 2147483648, %v2448_v50  ;;  %v9445_v29 = vld [vmem:[#allocation135_spill] sm:$0xff] }
 0x442   :  { %v2430_v14 = vmul.f32 %v3761_v2, %v2428_v54  ;;  %3764 = vtanh.f32 %v2177_v19  ;;  %vm2435_vm14 = vweird.f32 %v3761_v2  ;;  %vm2417_vm1 = vmor %vm2415_vm15, %vm2416_vm13  ;;  %vm2454_vm6 = vweird.f32 %v2448_v50  ;;  %v9446_v54 = vld [vmem:[#allocation136_spill] sm:$0xff]  ;;  %v9456_v19 = vld [vmem:[#allocation146_spill] sm:$0xff] }
 0x443   :  { %v2412_v9 = vsub.f32 1.0, %v2411_v35  ;;  %vm2436_vm2 = vmor %vm2434_vm0, %vm2435_vm14  ;;  %v2458_v3 = vand.u32 2147483647, %v2448_v50  ;;  %v2461_v12 = vor.u32 1.1754944e-38, %v2460_v7  ;;  %v9458_v35 = vld [vmem:[#allocation148_spill] sm:$0xff] }
 0x444   :  { %v2431_v60 = vsub.f32 1.0, %v2430_v14  ;;  %v9459_v14 = vld [vmem:[#allocation149_spill] sm:$0xff]  ;;  %v9482_v7 = vld [vmem:[#allocation172_spill] sm:$0xff] }
 0x445   :  { %v2413_v51 = vmul.f32 %v3759_v27, %v2412_v9  ;;  %vm2459_vm8 = vcmp.eq.f32.partialorder %v2458_v3, 8.507059e+37  ;;  %v9460_v9 = vld [vmem:[#allocation150_spill] sm:$0xff]  ;;  %v9483_v3 = vld [vmem:[#allocation173_spill] sm:$0xff] }
 0x446   :  { %v2432_v25 = vmul.f32 %v3761_v2, %v2431_v60  ;;  %v9461_v60 = vld [vmem:[#allocation151_spill] sm:$0xff] }
 0x447   :  { %v3763_v15 = vpop.eup %3762  ;;  %v2414_v57 = vadd.f32 %v3759_v27, %v2413_v51  ;;  %v9464_v51 = vld [vmem:[#allocation154_spill] sm:$0xff] }
 0x448   :  { %v2433_v40 = vadd.f32 %v3761_v2, %v2432_v25  ;;  %v2450_v30 = vmul.f32 %v3763_v15, %v2448_v50  ;;  %v3765_v48 = vpop.eup %3764  ;;  %vm2455_vm5 = vweird.f32 %v3763_v15  ;;  %v9454_v50 = vld [vmem:[#allocation144_spill] sm:$0xff] }
 0x449   :  { %v2418_v63 = vsel %vm2417_vm1, %v3759_v27, %v2414_v57  ;;  %vm2456_vm7 = vmor %vm2454_vm6, %vm2455_vm5  ;;  %v9455_v27 = vld [vmem:[#allocation145_spill] sm:$0xff]  ;;  %v9466_v25 = vld [vmem:[#allocation156_spill] sm:$0xff] }
 0x44a   :  { %v2423_v41 = vsel %vm2420_vm3, %v2422_v39, %v2418_v63  ;;  %v2437_v28 = vsel %vm2436_vm2, %v3761_v2, %v2433_v40  ;;  %v2451_v59 = vsub.f32 1.0, %v2450_v30  ;;  %v9457_v2 = vld [vmem:[#allocation147_spill] sm:$0xff]  ;;  %v9470_v39 = vld [vmem:[#allocation160_spill] sm:$0xff]  ;;  %v9471_v40 = vld [vmem:[#allocation161_spill] sm:$0xff] }
 0x44b   :  { %v2442_v45 = vsel %vm2439_vm4, %v2441_v47, %v2437_v28  ;;  %v2465_v24 = vmul.f32 %v3765_v48, %v2423_v41  ;;  %v9469_v57 = vld [vmem:[#allocation159_spill] sm:$0xff]  ;;  %v9472_v30 = vld [vmem:[#allocation162_spill] sm:$0xff]  ;;  %v9474_v63 = vld [vmem:[#allocation164_spill] sm:$0xff] }
 0x44c   :  { %v2464_v16 = vmul.f32 %v2442_v45, %v6976_v44  ;;  %v2452_v26 = vmul.f32 %v3763_v15, %v2451_v59  ;;  %v9439_v44 = vld [vmem:[#allocation16_spill] sm:$0xff]  ;;  %v9473_v47 = vld [vmem:[#allocation163_spill] sm:$0xff]  ;;  %v9475_v48 = vld [vmem:[#allocation165_spill] sm:$0xff] }
 0x44d   :  { %v9476_v41 = vld [vmem:[#allocation166_spill] sm:$0xff]  ;;  %v9477_v28 = vld [vmem:[#allocation167_spill] sm:$0xff] }
 0x44e   :  { %v7338_v5 = vadd.f32 %v2465_v24, %v2464_v16  ;;  %v2453_v53 = vadd.f32 %v3763_v15, %v2452_v26  ;;  %v9478_v24 = vld [vmem:[#allocation168_spill] sm:$0xff]  ;;  %v9479_v16 = vld [vmem:[#allocation169_spill] sm:$0xff]  ;;  %v9480_v26 = vld [vmem:[#allocation170_spill] sm:$0xff] }
 0x450   :  { %3766 = vtanh.f32 %v7338_v5  ;;  %v2457_v0 = vsel %vm2456_vm7, %v3763_v15, %v2453_v53  ;;  %v9468_v15 = vld [vmem:[#allocation158_spill] sm:$0xff]  ;;  %v9481_v53 = vld [vmem:[#allocation171_spill] sm:$0xff] }
 0x451   :  { %v2462_v55 = vsel %vm2459_vm8, %v2461_v12, %v2457_v0  ;;  %v9484_v0 = vld [vmem:[#allocation174_spill] sm:$0xff]  ;;  %v9485_v12 = vld [vmem:[#allocation175_spill] sm:$0xff] }
 0x456   :  { %v3767_v10 = vpop.eup %3766 }
 0x457   :  { %v7341_v34 = vmul.f32 %v3767_v10, %v2462_v55  ;;  %v9486_v10 = vld [vmem:[#allocation176_spill] sm:$0xff]  ;;  %v9487_v55 = vld [vmem:[#allocation177_spill] sm:$0xff] }
 0x459   :  { %2485 = vmatmul.f32.vlgmr.msra.gmra.mxu0 %v7341_v34  ;;  %2505 = vmatmul.f32.vlgmr.msrb.gmra.mxu1 %v7341_v34 }
 0x45a   :  { %2525 = vmatmul.f32.vlgmr.msrb.gmra.mxu2 %v7341_v34  ;;  %2545 = vmatmul.f32.vlgmr.msrb.gmra.mxu3 %v7341_v34 }
 0x45b   :  { %2633 = vmatpush.msra.mxu0 %v6985_v33  ;;  %2653 = vmatpush.msrb.mxu1 %v6988_v1  ;;  %v9447_v33 = vld [vmem:[#allocation137_spill] sm:$0xff]  ;;  %v9448_v1 = vld [vmem:[#allocation138_spill] sm:$0xff] }
 0x45c   :  { %2673 = vmatpush.msrb.mxu2 %v6991_v36  ;;  %2693 = vmatpush.msrb.mxu3 %v9439_v44  ;;  %v9449_v36 = vld [vmem:[#allocation139_spill] sm:$0xff]  ;;  %v9488_v44 = vld [vmem:[#allocation178_spill] sm:$0xff] }
 0x45d   :  { %2634 = vmatpush.msra.mxu0 %v9440_v23  ;;  %2654 = vmatpush.msrb.mxu1 %v9441_v52  ;;  %v9489_v23 = vld [vmem:[#allocation179_spill] sm:$0xff]  ;;  %v9490_v52 = vld [vmem:[#allocation180_spill] sm:$0xff] }
 0x45e   :  { %2674 = vmatpush.msrb.mxu2 %v9442_v20  ;;  %2694 = vmatpush.msrb.mxu3 %v9443_v17  ;;  %v9491_v20 = vld [vmem:[#allocation181_spill] sm:$0xff] }
 0x45f   :  { %2635 = vmatpush.msra.mxu0 %v9444_v56  ;;  %2655 = vmatpush.msrb.mxu1 %v9445_v29  ;;  %v9492_v56 = vld [vmem:[#allocation182_spill] sm:$0xff]  ;;  %v9493_v29 = vld [vmem:[#allocation183_spill] sm:$0xff] }
 0x460   :  { %2675 = vmatpush.msrb.mxu2 %v9446_v54  ;;  %2695 = vmatpush.msrb.mxu3 %v9447_v33 }
 0x461   :  { %2636 = vmatpush.msra.mxu0 %v9448_v1  ;;  %2656 = vmatpush.msrb.mxu1 %v9449_v36  ;;  %v9494_v1 = vld [vmem:[#allocation184_spill] sm:$0xff]  ;;  %v9495_v36 = vld [vmem:[#allocation185_spill] sm:$0xff] }
 0x462   :  { %2676 = vmatpush.msrb.mxu2 %v9450_v61  ;;  %2696 = vmatpush.msrb.mxu3 %v9451_v43 }
 0x463   :  { %2637 = vmatpush.msra.mxu0 %v9452_v31  ;;  %2657 = vmatpush.msrb.mxu1 %v9453_v38  ;;  %v9496_v31 = vld [vmem:[#allocation186_spill] sm:$0xff] }
 0x464   :  { %2677 = vmatpush.msrb.mxu2 %v9454_v50  ;;  %2697 = vmatpush.msrb.mxu3 %v9455_v27  ;;  %v9497_v38 = vld [vmem:[#allocation18_spill] sm:$0xff]  ;;  %v9498_v50 = vld [vmem:[#allocation28_spill] sm:$0xff] }
 0x465   :  { %2638 = vmatpush.msra.mxu0 %v9456_v19  ;;  %2658 = vmatpush.msrb.mxu1 %v9457_v2  ;;  %v9499_v27 = vld [vmem:[#allocation20_spill] sm:$0xff]  ;;  %v9500_v19 = vld [vmem:[#allocation33_spill] sm:$0xff] }
 0x466   :  { %2678 = vmatpush.msrb.mxu2 %v9458_v35  ;;  %2698 = vmatpush.msrb.mxu3 %v9459_v14  ;;  %v9501_v35 = vld [vmem:[#allocation34_spill] sm:$0xff] }
 0x467   :  { %2639 = vmatpush.msra.mxu0 %v9460_v9  ;;  %2659 = vmatpush.msrb.mxu1 %v9461_v60 }
 0x468   :  { %2679 = vmatpush.msrb.mxu2 %v9462_v62  ;;  %2699 = vmatpush.msrb.mxu3 %v9463_v22 }
 0x469   :  { %2640 = vmatpush.msra.mxu0 %v9464_v51  ;;  %2660 = vmatpush.msrb.mxu1 %v9465_v4  ;;  %v9502_v4 = vld [vmem:[#allocation35_spill] sm:$0xff] }
 0x46a   :  { %2680 = vmatpush.msrb.mxu2 %v9466_v25  ;;  %2700 = vmatpush.msrb.mxu3 %v9467_v18 }
 0x46b   :  { %2641 = vmatpush.msra.mxu0 %v9468_v15  ;;  %2661 = vmatpush.msrb.mxu1 %v9469_v57 }
 0x46c   :  { %2681 = vmatpush.msrb.mxu2 %v9470_v39  ;;  %2701 = vmatpush.msrb.mxu3 %v9471_v40 }
 0x46d   :  { %2642 = vmatpush.msra.mxu0 %v9472_v30  ;;  %2662 = vmatpush.msrb.mxu1 %v9473_v47 }
 0x46e   :  { %2682 = vmatpush.msrb.mxu2 %v9474_v63  ;;  %2702 = vmatpush.msrb.mxu3 %v9475_v48 }
 0x46f   :  { %2643 = vmatpush.msra.mxu0 %v9476_v41  ;;  %2663 = vmatpush.msrb.mxu1 %v9477_v28  ;;  %v9503_v28 = vld [vmem:[#allocation36_spill] sm:$0xff] }
 0x470   :  { %2683 = vmatpush.msrb.mxu2 %v9478_v24  ;;  %2703 = vmatpush.msrb.mxu3 %v9479_v16 }
 0x471   :  { %2644 = vmatpush.msra.mxu0 %v9480_v26  ;;  %2664 = vmatpush.msrb.mxu1 %v9481_v53 }
 0x472   :  { %2684 = vmatpush.msrb.mxu2 %v9482_v7  ;;  %2704 = vmatpush.msrb.mxu3 %v9483_v3 }
 0x473   :  { %2645 = vmatpush.msra.mxu0 %v9484_v0  ;;  %2665 = vmatpush.msrb.mxu1 %v9485_v12 }
 0x474   :  { %2685 = vmatpush.msrb.mxu2 %v9486_v10  ;;  %2705 = vmatpush.msrb.mxu3 %v9487_v55 }
 0x475   :  { %2646 = vmatpush.msra.mxu0 %v9488_v44  ;;  %2666 = vmatpush.msrb.mxu1 %v9489_v23 }
 0x476   :  { %2686 = vmatpush.msrb.mxu2 %v9490_v52  ;;  %2706 = vmatpush.msrb.mxu3 %v9491_v20 }
 0x477   :  { %2647 = vmatpush.msra.mxu0 %v9492_v56  ;;  %2667 = vmatpush.msrb.mxu1 %v9493_v29 }
 0x478   :  { %2687 = vmatpush.msrb.mxu2 %v9494_v1  ;;  %2707 = vmatpush.msrb.mxu3 %v9495_v36 }
 0x479   :  { %2648 = vmatpush.msra.mxu0 %v9496_v31  ;;  %2668 = vmatpush.msrb.mxu1 %v9497_v38 }
 0x47a   :  { %v2196_v59 = vpop.f32.mrf.mxu0  ;;  %v2216_v45 = vpop.f32.mrf.mxu1  ;;  %2688 = vmatpush.msrb.mxu2 %v9498_v50  ;;  %2708 = vmatpush.msrb.mxu3 %v9499_v27 }
 0x481   :  { %v2256_v17 = vpop.f32.mrf.mxu3  ;;  %v2236_v9 = vpop.f32.mrf.mxu2 }
 0x482   :  { %v2276_v54 = vpop.f32.mrf.mxu0  ;;  %v2296_v33 = vpop.f32.mrf.mxu1 }
 0x483   :  { %v2277_v61 = vadd.f32 %v2276_v54, %v2196_v59  ;;  %v2297_v43 = vadd.f32 %v2296_v33, %v2216_v45 }
 0x485   :  { %v2339_v2 = vadd.f32 %v2277_v61, %v9500_v19  ;;  %v2340_v14 = vadd.f32 %v2297_v43, %v9501_v35 }
 0x487   :  { %v3563_v60 = vmul.f32 -1.442695, %v2339_v2  ;;  %v3564_v62 = vmul.f32 -1.442695, %v2340_v14 }
 0x489   :  { %3768 = vpow2.f32 %v3563_v60  ;;  %v2336_v22 = vpop.f32.mrf.mxu3  ;;  %v2316_v30 = vpop.f32.mrf.mxu2 }
 0x48a   :  { %3770 = vpow2.f32 %v3564_v62  ;;  %v2337_v51 = vadd.f32 %v2336_v22, %v2256_v17  ;;  %v2317_v47 = vadd.f32 %v2316_v30, %v2236_v9  ;;  %v4265_v30 = vld [vmem:[#allocation5 + $0x168] sm:$0xff] }
 0x48c   :  { %v2342_v25 = vadd.f32 %v2337_v51, %v9502_v4  ;;  %v2341_v59 = vadd.f32 %v2317_v47, %v9503_v28  ;;  %v4266_v47 = vld [vmem:[#allocation5 + $0x170] sm:$0xff] }
 0x48e   :  { %v3565_v18 = vmul.f32 -1.442695, %v2342_v25  ;;  %v4255_v25 = vld [vmem:[#allocation5 + $0x1f8] sm:$0xff] }
 0x48f   :  { %v3769_v15 = vpop.eup %3768 }
 0x490   :  { %v3771_v57 = vpop.eup %3770  ;;  %v2346_v39 = vadd.f32 1.0, %v3769_v15  ;;  %3772 = vpow2.f32 %v3565_v18  ;;  %v4256_v18 = vld [vmem:[#allocation5 + $0x1c8] sm:$0xff]  ;;  %v4257_v15 = vld [vmem:[#allocation5 + $0x1d0] sm:$0xff] }
 0x491   :  { %v2365_v40 = vadd.f32 1.0, %v3771_v57  ;;  %v4258_v57 = vld [vmem:[#allocation5 + $0x1d8] sm:$0xff] }
 0x492   :  { %3774 = vrcp.f32 %v2346_v39  ;;  %v2358_v7 = vand.u32 2147483648, %v2346_v39  ;;  %v2356_v12 = vand.u32 2147483647, %v2346_v39  ;;  %vm2352_vm11 = vweird.f32 %v2346_v39 }
 0x493   :  { %3776 = vrcp.f32 %v2365_v40  ;;  %v2377_v3 = vand.u32 2147483648, %v2365_v40  ;;  %v2375_v55 = vand.u32 2147483647, %v2365_v40  ;;  %vm2371_vm12 = vweird.f32 %v2365_v40 }
 0x494   :  { %v2359_v52 = vor.u32 1.1754944e-38, %v2358_v7  ;;  %vm2357_vm15 = vcmp.eq.f32.partialorder %v2356_v12, 8.507059e+37  ;;  %v4279_v7 = vld [vmem:[#allocation5 + $0x118] sm:$0xff]  ;;  %v4282_v12 = vld [vmem:[#allocation5 + $0xf0] sm:$0xff] }
 0x495   :  { %v2378_v56 = vor.u32 1.1754944e-38, %v2377_v3  ;;  %vm2376_vm0 = vcmp.eq.f32.partialorder %v2375_v55, 8.507059e+37  ;;  %v4280_v3 = vld [vmem:[#allocation5 + $0xe0] sm:$0xff] }
 0x496   :  { %v3773_v63 = vpop.eup %3772  ;;  %v4284_v55 = vld [vmem:[#allocation5 + $0xc0] sm:$0xff] }
 0x497   :  { %v2385_v48 = vadd.f32 1.0, %v3773_v63  ;;  %v4267_v63 = vld [vmem:[#allocation5 + $0x178] sm:$0xff] }
 0x498   :  { %v3775_v41 = vpop.eup %3774 }
 0x499   :  { %v3777_v45 = vpop.eup %3776  ;;  %v2348_v24 = vmul.f32 %v3775_v41, %v2346_v39  ;;  %3778 = vrcp.f32 %v2385_v48  ;;  %vm2353_vm9 = vweird.f32 %v3775_v41  ;;  %v2397_v2 = vand.u32 2147483648, %v2385_v48  ;;  %v4259_v39 = vld [vmem:[#allocation5 + $0x1a8] sm:$0xff] }
 0x49a   :  { %v2367_v16 = vmul.f32 %v3777_v45, %v2365_v40  ;;  %3780 = vtanh.f32 %v2341_v59  ;;  %vm2372_vm10 = vweird.f32 %v3777_v45  ;;  %vm2354_vm13 = vmor %vm2352_vm11, %vm2353_vm9  ;;  %vm2391_vm2 = vweird.f32 %v2385_v48  ;;  %v4260_v40 = vld [vmem:[#allocation5 + $0x1b0] sm:$0xff]  ;;  %v4272_v59 = vld [vmem:[#allocation5 + $0x120] sm:$0xff] }
 0x49b   :  { %v2349_v26 = vsub.f32 1.0, %v2348_v24  ;;  %vm2373_vm14 = vmor %vm2371_vm12, %vm2372_vm10  ;;  %v2395_v14 = vand.u32 2147483647, %v2385_v48  ;;  %v2398_v60 = vor.u32 1.1754944e-38, %v2397_v2  ;;  %v4274_v24 = vld [vmem:[#allocation5 + $0x130] sm:$0xff]  ;;  %v4301_v2 = vld [vmem:[#allocation5 + $0x48] sm:$0xff] }
 0x49c   :  { %v2368_v53 = vsub.f32 1.0, %v2367_v16  ;;  %v4276_v16 = vld [vmem:[#allocation5 + $0x100] sm:$0xff] }
 0x49d   :  { %v2350_v0 = vmul.f32 %v3775_v41, %v2349_v26  ;;  %vm2396_vm4 = vcmp.eq.f32.partialorder %v2395_v14, 8.507059e+37  ;;  %v4277_v26 = vld [vmem:[#allocation5 + $0x108] sm:$0xff]  ;;  %v4302_v14 = vld [vmem:[#allocation5 + $0x50] sm:$0xff] }
 0x49e   :  { %v2369_v10 = vmul.f32 %v3777_v45, %v2368_v53  ;;  %v4278_v53 = vld [vmem:[#allocation5 + $0x110] sm:$0xff] }
 0x49f   :  { %v3779_v44 = vpop.eup %3778  ;;  %v2351_v23 = vadd.f32 %v3775_v41, %v2350_v0  ;;  %v4281_v0 = vld [vmem:[#allocation5 + $0xe8] sm:$0xff] }
 0x4a0   :  { %v2370_v20 = vadd.f32 %v3777_v45, %v2369_v10  ;;  %v2387_v17 = vmul.f32 %v3779_v44, %v2385_v48  ;;  %v3781_v54 = vpop.eup %3780  ;;  %vm2392_vm1 = vweird.f32 %v3779_v44  ;;  %v4268_v48 = vld [vmem:[#allocation5 + $0x140] sm:$0xff]  ;;  %v4283_v10 = vld [vmem:[#allocation5 + $0xf8] sm:$0xff] }
 0x4a1   :  { %v2355_v29 = vsel %vm2354_vm13, %v3775_v41, %v2351_v23  ;;  %vm2393_vm3 = vmor %vm2391_vm2, %vm2392_vm1  ;;  %v4269_v41 = vld [vmem:[#allocation5 + $0x148] sm:$0xff]  ;;  %v4286_v23 = vld [vmem:[#allocation5 + $0xd0] sm:$0xff] }
 0x4a2   :  { %v2360_v33 = vsel %vm2357_vm15, %v2359_v52, %v2355_v29  ;;  %v2374_v1 = vsel %vm2373_vm14, %v3777_v45, %v2370_v20  ;;  %v2388_v36 = vsub.f32 1.0, %v2387_v17  ;;  %v4273_v45 = vld [vmem:[#allocation5 + $0x128] sm:$0xff]  ;;  %v4287_v52 = vld [vmem:[#allocation5 + $0xd8] sm:$0xff]  ;;  %v4288_v20 = vld [vmem:[#allocation5 + $0xa0] sm:$0xff] }
 0x4a3   :  { %v2379_v61 = vsel %vm2376_vm0, %v2378_v56, %v2374_v1  ;;  %v2402_v43 = vmul.f32 %v3781_v54, %v2360_v33  ;;  %v4289_v17 = vld [vmem:[#allocation5 + $0xa8] sm:$0xff]  ;;  %v4290_v56 = vld [vmem:[#allocation5 + $0xb0] sm:$0xff]  ;;  %v4291_v29 = vld [vmem:[#allocation5 + $0xb8] sm:$0xff] }
 0x4a4   :  { %v2401_v31 = vmul.f32 %v2379_v61, %v7182_v58  ;;  %v2389_v38 = vmul.f32 %v3779_v44, %v2388_v36  ;;  %v4254_v58 = vld [vmem:[#allocation5 + $0x1f0] sm:$0xff]  ;;  %v4292_v54 = vld [vmem:[#allocation5 + $0x80] sm:$0xff]  ;;  %v4293_v33 = vld [vmem:[#allocation5 + $0x88] sm:$0xff] }
 0x4a5   :  { %v4294_v1 = vld [vmem:[#allocation5 + $0x90] sm:$0xff]  ;;  %v4295_v36 = vld [vmem:[#allocation5 + $0x98] sm:$0xff]  ;;  %v4296_v61 = vld [vmem:[#allocation5 + $0x60] sm:$0xff] }
 0x4a6   :  { %v7416_v50 = vadd.f32 %v2402_v43, %v2401_v31  ;;  %v2390_v27 = vadd.f32 %v3779_v44, %v2389_v38  ;;  %v4297_v43 = vld [vmem:[#allocation5 + $0x68] sm:$0xff]  ;;  %v4298_v31 = vld [vmem:[#allocation5 + $0x70] sm:$0xff]  ;;  %v4299_v38 = vld [vmem:[#allocation5 + $0x78] sm:$0xff] }
 0x4a8   :  { %3782 = vtanh.f32 %v7416_v50  ;;  %v2394_v9 = vsel %vm2393_vm3, %v3779_v44, %v2390_v27  ;;  %v4285_v44 = vld [vmem:[#allocation5 + $0xc8] sm:$0xff]  ;;  %v4300_v27 = vld [vmem:[#allocation5 + $0x40] sm:$0xff] }
 0x4a9   :  { %v2399_v22 = vsel %vm2396_vm4, %v2398_v60, %v2394_v9  ;;  %v4303_v9 = vld [vmem:[#allocation5 + $0x58] sm:$0xff]  ;;  %v4304_v60 = vld [vmem:[#allocation5 + $0x20] sm:$0xff] }
 0x4ae   :  { %v3783_v62 = vpop.eup %3782 }
 0x4af   :  { %v2405_v51 = vmul.f32 %v3783_v62, %v2399_v22  ;;  %v4305_v62 = vld [vmem:[#allocation5 + $0x28] sm:$0xff]  ;;  %v4306_v22 = vld [vmem:[#allocation5 + $0x30] sm:$0xff] }
 0x4b1   :  { %2569 = vmatmul.f32.vlgmr.msrb.gmra.mxu0 %v2405_v51  ;;  %2589 = vmatmul.f32.vlgmr.msra.gmra.mxu1 %v2405_v51 }
 0x4b2   :  { %2609 = vmatmul.f32.vlgmr.msra.gmra.mxu2 %v2405_v51  ;;  %2629 = vmatmul.f32.vlgmr.msra.gmra.mxu3 %v2405_v51  ;;  %v4307_v51 = vld [vmem:[#allocation5 + $0x38] sm:$0xff] }
 0x4b3   :  { %2843 = vmatpush.msrb.mxu0 %v7185_v32  ;;  %2863 = vmatpush.msra.mxu1 %v7188_v21  ;;  %v4261_v32 = vld [vmem:[#allocation5 + $0x1b8] sm:$0xff]  ;;  %v4262_v21 = vld [vmem:[#allocation5 + $0x188] sm:$0xff] }
 0x4b4   :  { %2883 = vmatpush.msra.mxu2 %v4254_v58  ;;  %2903 = vmatpush.msra.mxu3 %v4255_v25  ;;  %v4308_v58 = vld [vmem:[#allocation5] sm:$0xff]  ;;  %v4309_v25 = vld [vmem:[#allocation5 + $0x8] sm:$0xff] }
 0x4b5   :  { %2844 = vmatpush.msrb.mxu0 %v7193_v6  ;;  %2864 = vmatpush.msra.mxu1 %v4256_v18  ;;  %v4263_v6 = vld [vmem:[#allocation5 + $0x190] sm:$0xff] }
 0x4b6   :  { %2884 = vmatpush.msra.mxu2 %v4257_v15  ;;  %2904 = vmatpush.msra.mxu3 %v4258_v57  ;;  %v4310_v18 = vld [vmem:[#allocation5 + $0x10] sm:$0xff]  ;;  %v4311_v15 = vld [vmem:[#allocation5 + $0x18] sm:$0xff]  ;;  %v7429_v57 = vld [vmem:[#allocation8 + $0x1e0] sm:$0xff] }
 0x4b7   :  { %2845 = vmatpush.msrb.mxu0 %v7199_v11  ;;  %2865 = vmatpush.msra.mxu1 %v4259_v39  ;;  %v4264_v11 = vld [vmem:[#allocation5 + $0x198] sm:$0xff]  ;;  %v7432_v39 = vld [vmem:[#allocation8 + $0x1e8] sm:$0xff] }
 0x4b8   :  { %2885 = vmatpush.msra.mxu2 %v4260_v40  ;;  %2905 = vmatpush.msra.mxu3 %v4261_v32  ;;  %v7435_v40 = vld [vmem:[#allocation8 + $0x1f0] sm:$0xff]  ;;  %v7438_v32 = vld [vmem:[#allocation8 + $0x1f8] sm:$0xff] }
 0x4b9   :  { %2649 = vmatmul.f32.vlgmr.msra.gmra.mxu0 %v7341_v34  ;;  %2669 = vmatmul.f32.vlgmr.msrb.gmra.mxu1 %v7341_v34 }
 0x4ba   :  { %2689 = vmatmul.f32.vlgmr.msrb.gmra.mxu2 %v7341_v34  ;;  %2709 = vmatmul.f32.vlgmr.msrb.gmra.mxu3 %v7341_v34  ;;  %v4270_v34 = vld [vmem:[#allocation5 + $0x150] sm:$0xff] }
 0x4bb   :  { %2846 = vmatpush.msrb.mxu0 %v7209_v46  ;;  %2866 = vmatpush.msra.mxu1 %v4262_v21  ;;  %v4271_v46 = vld [vmem:[#allocation5 + $0x158] sm:$0xff]  ;;  %v7441_v21 = vld [vmem:[#allocation8 + $0x1c0] sm:$0xff] }
 0x4bc   :  { %2886 = vmatpush.msra.mxu2 %v4263_v6  ;;  %2906 = vmatpush.msra.mxu3 %v4264_v11  ;;  %v7444_v6 = vld [vmem:[#allocation8 + $0x1c8] sm:$0xff]  ;;  %v7447_v11 = vld [vmem:[#allocation8 + $0x1d0] sm:$0xff] }
 0x4bd   :  { %2847 = vmatpush.msrb.mxu0 %v7215_v8  ;;  %2867 = vmatpush.msra.mxu1 %v4265_v30  ;;  %v4275_v8 = vld [vmem:[#allocation5 + $0x138] sm:$0xff] }
 0x4be   :  { %2887 = vmatpush.msra.mxu2 %v4266_v47  ;;  %2907 = vmatpush.msra.mxu3 %v4267_v63  ;;  %v7450_v30 = vld [vmem:[#allocation8 + $0x1d8] sm:$0xff]  ;;  %v7453_v47 = vld [vmem:[#allocation8 + $0x1a0] sm:$0xff]  ;;  %v7456_v63 = vld [vmem:[#allocation8 + $0x1a8] sm:$0xff] }
 0x4bf   :  { %2848 = vmatpush.msrb.mxu0 %v4268_v48  ;;  %2868 = vmatpush.msra.mxu1 %v4269_v41  ;;  %v7459_v48 = vld [vmem:[#allocation8 + $0x1b0] sm:$0xff]  ;;  %v7462_v41 = vld [vmem:[#allocation8 + $0x1b8] sm:$0xff] }
 0x4c0   :  { %2888 = vmatpush.msra.mxu2 %v4270_v34  ;;  %2908 = vmatpush.msra.mxu3 %v4271_v46  ;;  %v7465_v34 = vld [vmem:[#allocation8 + $0x180] sm:$0xff]  ;;  %v7468_v46 = vld [vmem:[#allocation8 + $0x188] sm:$0xff] }
 0x4c1   :  { %2849 = vmatpush.msrb.mxu0 %v4272_v59  ;;  %2869 = vmatpush.msra.mxu1 %v4273_v45  ;;  %v7471_v59 = vld [vmem:[#allocation8 + $0x190] sm:$0xff]  ;;  %v7474_v45 = vld [vmem:[#allocation8 + $0x198] sm:$0xff] }
 0x4c2   :  { %2889 = vmatpush.msra.mxu2 %v4274_v24  ;;  %2909 = vmatpush.msra.mxu3 %v4275_v8  ;;  %v7477_v24 = vld [vmem:[#allocation8 + $0x160] sm:$0xff]  ;;  %v7480_v8 = vld [vmem:[#allocation8 + $0x168] sm:$0xff] }
 0x4c3   :  { %2850 = vmatpush.msrb.mxu0 %v4276_v16  ;;  %2870 = vmatpush.msra.mxu1 %v4277_v26  ;;  %v7483_v16 = vld [vmem:[#allocation8 + $0x170] sm:$0xff]  ;;  %v7486_v26 = vld [vmem:[#allocation8 + $0x178] sm:$0xff] }
 0x4c4   :  { %2890 = vmatpush.msra.mxu2 %v4278_v53  ;;  %2910 = vmatpush.msra.mxu3 %v4279_v7  ;;  %v9504_v53 = vld [vmem:[#allocation76_spill] sm:$0xff] }
 0x4c5   :  { %2851 = vmatpush.msrb.mxu0 %v4280_v3  ;;  %2871 = vmatpush.msra.mxu1 %v4281_v0  ;;  %v206_v7 = vadd.f32 %v9504_v53, %v9407_v13  ;;  %v9505_v3 = vld [vmem:[#allocation25_spill] sm:$0xff]  ;;  %v7555_v53 = vld [vmem:[#allocation8 + $0xa0] sm:$0xff] }
 0x4c6   :  { %2891 = vmatpush.msra.mxu2 %v4282_v12  ;;  %2911 = vmatpush.msra.mxu3 %v4283_v10  ;;  %v247_v0 = vadd.f32 %v9505_v3, %v9409_v49  ;;  %v7493_v12 = vld [vmem:[#allocation8 + $0x140] sm:$0xff]  ;;  %v7496_v10 = vld [vmem:[#allocation8 + $0x148] sm:$0xff]  ;;  %9514 = vst [vmem:[#allocation44_spill] sm:$0xff] %v7555_v53  ;;  %v7603_v13 = vld [vmem:[#allocation8 + $0x50] sm:$0xff] }
 0x4c7   :  { %2852 = vmatpush.msrb.mxu0 %v4284_v55  ;;  %2872 = vmatpush.msra.mxu1 %v4285_v44  ;;  %v7600_v49 = vld [vmem:[#allocation8 + $0x48] sm:$0xff]  ;;  %9528 = vst [vmem:[#allocation60_spill] sm:$0xff] %v7603_v13 }
 0x4c8   :  { %2892 = vmatpush.msra.mxu2 %v4286_v23  ;;  %2912 = vmatpush.msra.mxu3 %v4287_v52  ;;  %v7499_v23 = vld [vmem:[#allocation8 + $0x150] sm:$0xff]  ;;  %v7502_v52 = vld [vmem:[#allocation8 + $0x158] sm:$0xff]  ;;  %9527 = vst [vmem:[#allocation58_spill] sm:$0xff] %v7600_v49 }
 0x4c9   :  { %2853 = vmatpush.msrb.mxu0 %v4288_v20  ;;  %2873 = vmatpush.msra.mxu1 %v4289_v17 }
 0x4ca   :  { %2893 = vmatpush.msra.mxu2 %v4290_v56  ;;  %2913 = vmatpush.msra.mxu3 %v4291_v29  ;;  %v7505_v56 = vld [vmem:[#allocation8 + $0x120] sm:$0xff]  ;;  %v7508_v29 = vld [vmem:[#allocation8 + $0x128] sm:$0xff] }
 0x4cb   :  { %2854 = vmatpush.msrb.mxu0 %v4292_v54  ;;  %2874 = vmatpush.msra.mxu1 %v4293_v33  ;;  %v7511_v54 = vld [vmem:[#allocation8 + $0x130] sm:$0xff]  ;;  %v7514_v33 = vld [vmem:[#allocation8 + $0x138] sm:$0xff] }
 0x4cc   :  { %2894 = vmatpush.msra.mxu2 %v4294_v1  ;;  %2914 = vmatpush.msra.mxu3 %v4295_v36 }
 0x4cd   :  { %2855 = vmatpush.msrb.mxu0 %v4296_v61  ;;  %2875 = vmatpush.msra.mxu1 %v4297_v43  ;;  %v7517_v61 = vld [vmem:[#allocation8 + $0x100] sm:$0xff]  ;;  %v7520_v43 = vld [vmem:[#allocation8 + $0x108] sm:$0xff] }
 0x4ce   :  { %2895 = vmatpush.msra.mxu2 %v4298_v31  ;;  %2915 = vmatpush.msra.mxu3 %v4299_v38  ;;  %v7523_v31 = vld [vmem:[#allocation8 + $0x110] sm:$0xff]  ;;  %v7526_v38 = vld [vmem:[#allocation8 + $0x118] sm:$0xff] }
 0x4cf   :  { %2856 = vmatpush.msrb.mxu0 %v4300_v27  ;;  %2876 = vmatpush.msra.mxu1 %v4301_v2  ;;  %v7529_v27 = vld [vmem:[#allocation8 + $0xe0] sm:$0xff]  ;;  %v7532_v2 = vld [vmem:[#allocation8 + $0xe8] sm:$0xff] }
 0x4d0   :  { %2896 = vmatpush.msra.mxu2 %v4302_v14  ;;  %2916 = vmatpush.msra.mxu3 %v4303_v9  ;;  %9506 = vst [vmem:[#allocation22_spill] sm:$0xff] %v7532_v2  ;;  %v9507_v14 = vld [vmem:[#allocation27_spill] sm:$0xff] }
 0x4d1   :  { %2857 = vmatpush.msrb.mxu0 %v4304_v60  ;;  %2877 = vmatpush.msra.mxu1 %v4305_v62  ;;  %v329_v9 = vadd.f32 %v9507_v14, %v9425_v42  ;;  %v7537_v60 = vld [vmem:[#allocation8 + $0xf0] sm:$0xff]  ;;  %v7540_v62 = vld [vmem:[#allocation8 + $0xf8] sm:$0xff]  ;;  %v7586_v42 = vld [vmem:[#allocation8 + $0x68] sm:$0xff] }
 0x4d2   :  { %2897 = vmatpush.msra.mxu2 %v4306_v22  ;;  %2917 = vmatpush.msra.mxu3 %v4307_v51  ;;  %9508 = vst [vmem:[#allocation37_spill] sm:$0xff] %v7537_v60  ;;  %v7543_v51 = vld [vmem:[#allocation8 + $0xc0] sm:$0xff]  ;;  %v7575_v14 = vld [vmem:[#allocation8 + $0x90] sm:$0xff] }
 0x4d3   :  { %2858 = vmatpush.msrb.mxu0 %v4308_v58  ;;  %2878 = vmatpush.msra.mxu1 %v4309_v25  ;;  %9509 = vst [vmem:[#allocation38_spill] sm:$0xff] %v7540_v62  ;;  %v7546_v58 = vld [vmem:[#allocation8 + $0xc8] sm:$0xff] }
 0x4d4   :  { %2898 = vmatpush.msra.mxu2 %v4310_v18  ;;  %2918 = vmatpush.msra.mxu3 %v4311_v15  ;;  %9510 = vst [vmem:[#allocation39_spill] sm:$0xff] %v7543_v51  ;;  %v7549_v18 = vld [vmem:[#allocation8 + $0xd0] sm:$0xff]  ;;  %v7552_v15 = vld [vmem:[#allocation8 + $0xd8] sm:$0xff] }
 0x4d5   :  { %2927 = vmatpush.msra.mxu0 %v7429_v57  ;;  %2947 = vmatpush.msrb.mxu1 %v7432_v39  ;;  %9511 = vst [vmem:[#allocation40_spill] sm:$0xff] %v7546_v58 }
 0x4d6   :  { %2967 = vmatpush.msrb.mxu2 %v7435_v40  ;;  %2987 = vmatpush.msrb.mxu3 %v7438_v32  ;;  %v2486_v55 = vpop.f32.mrf.mxu0  ;;  %v2506_v44 = vpop.f32.mrf.mxu1  ;;  %9512 = vst [vmem:[#allocation41_spill] sm:$0xff] %v7549_v18 }
 0x4d7   :  { %2928 = vmatpush.msra.mxu0 %v7441_v21  ;;  %2948 = vmatpush.msrb.mxu1 %v7444_v6  ;;  %v2549_v20 = vadd.f32 %v2486_v55, %v206_v7  ;;  %v2550_v17 = vadd.f32 %v2506_v44, %v247_v0  ;;  %9513 = vst [vmem:[#allocation42_spill] sm:$0xff] %v7552_v15  ;;  %v7558_v7 = vld [vmem:[#allocation8 + $0xa8] sm:$0xff]  ;;  %v7561_v0 = vld [vmem:[#allocation8 + $0xb0] sm:$0xff]  ;;  %v7564_v55 = vld [vmem:[#allocation8 + $0xb8] sm:$0xff] }
 0x4d8   :  { %2968 = vmatpush.msrb.mxu2 %v7447_v11  ;;  %2988 = vmatpush.msrb.mxu3 %v7450_v30  ;;  %9515 = vst [vmem:[#allocation45_spill] sm:$0xff] %v7558_v7 }
 0x4d9   :  { %2929 = vmatpush.msra.mxu0 %v7453_v47  ;;  %2949 = vmatpush.msrb.mxu1 %v7456_v63  ;;  %v3572_v1 = vmul.f32 -1.442695, %v2549_v20  ;;  %v3573_v36 = vmul.f32 -1.442695, %v2550_v17  ;;  %9516 = vst [vmem:[#allocation46_spill] sm:$0xff] %v7561_v0  ;;  %v7567_v20 = vld [vmem:[#allocation8 + $0x80] sm:$0xff] }
 0x4da   :  { %2969 = vmatpush.msrb.mxu2 %v7459_v48  ;;  %2989 = vmatpush.msrb.mxu3 %v7462_v41  ;;  %9517 = vst [vmem:[#allocation47_spill] sm:$0xff] %v7564_v55  ;;  %v7570_v17 = vld [vmem:[#allocation8 + $0x88] sm:$0xff] }
 0x4db   :  { %2930 = vmatpush.msra.mxu0 %v7465_v34  ;;  %2950 = vmatpush.msrb.mxu1 %v7468_v46  ;;  %3784 = vpow2.f32 %v3572_v1  ;;  %9518 = vst [vmem:[#allocation48_spill] sm:$0xff] %v7567_v20 }
 0x4dc   :  { %2970 = vmatpush.msrb.mxu2 %v7471_v59  ;;  %2990 = vmatpush.msrb.mxu3 %v7474_v45  ;;  %3786 = vpow2.f32 %v3573_v36  ;;  %9519 = vst [vmem:[#allocation49_spill] sm:$0xff] %v7570_v17 }
 0x4dd   :  { %2931 = vmatpush.msra.mxu0 %v7477_v24  ;;  %2951 = vmatpush.msrb.mxu1 %v7480_v8  ;;  %v2546_v22 = vpop.f32.mrf.mxu3  ;;  %9520 = vst [vmem:[#allocation50_spill] sm:$0xff] %v7575_v14 }
 0x4de   :  { %2971 = vmatpush.msrb.mxu2 %v7483_v16  ;;  %2991 = vmatpush.msrb.mxu3 %v7486_v26  ;;  %v2552_v25 = vadd.f32 %v2546_v22, %v329_v9  ;;  %v7578_v9 = vld [vmem:[#allocation8 + $0x98] sm:$0xff]  ;;  %9523 = vst [vmem:[#allocation54_spill] sm:$0xff] %v7586_v42 }
 0x4df   :  { %2932 = vmatpush.msra.mxu0 %v7493_v12  ;;  %2952 = vmatpush.msrb.mxu1 %v7496_v10  ;;  %9521 = vst [vmem:[#allocation52_spill] sm:$0xff] %v7578_v9 }
 0x4e0   :  { %2972 = vmatpush.msrb.mxu2 %v7499_v23  ;;  %2992 = vmatpush.msrb.mxu3 %v7502_v52  ;;  %v3574_v3 = vmul.f32 -1.442695, %v2552_v25  ;;  %v7583_v25 = vld [vmem:[#allocation8 + $0x60] sm:$0xff] }
 0x4e1   :  { %2933 = vmatpush.msra.mxu0 %v7505_v56  ;;  %2953 = vmatpush.msrb.mxu1 %v7508_v29  ;;  %v3785_v44 = vpop.eup %3784  ;;  %9522 = vst [vmem:[#allocation53_spill] sm:$0xff] %v7583_v25 }
 0x4e2   :  { %2973 = vmatpush.msrb.mxu2 %v7511_v54  ;;  %2993 = vmatpush.msrb.mxu3 %v7514_v33  ;;  %v3787_v1 = vpop.eup %3786  ;;  %v7573_v36 = vadd.f32 1.0, %v3785_v44  ;;  %3788 = vpow2.f32 %v3574_v3  ;;  %v7590_v3 = vld [vmem:[#allocation8 + $0x70] sm:$0xff]  ;;  %v7593_v44 = vld [vmem:[#allocation8 + $0x78] sm:$0xff] }
 0x4e3   :  { %2934 = vmatpush.msra.mxu0 %v7517_v61  ;;  %2954 = vmatpush.msrb.mxu1 %v7520_v43  ;;  %v7581_v22 = vadd.f32 1.0, %v3787_v1  ;;  %9524 = vst [vmem:[#allocation55_spill] sm:$0xff] %v7590_v3  ;;  %v7597_v1 = vld [vmem:[#allocation8 + $0x40] sm:$0xff] }
 0x4e4   :  { %2974 = vmatpush.msrb.mxu2 %v7523_v31  ;;  %2994 = vmatpush.msrb.mxu3 %v7526_v38  ;;  %3790 = vrcp.f32 %v7573_v36  ;;  %9525 = vst [vmem:[#allocation56_spill] sm:$0xff] %v7593_v44  ;;  %vm2789_vm7 = vweird.f32 %v7573_v36 }
 0x4e5   :  { %2935 = vmatpush.msra.mxu0 %v7529_v27  ;;  %2955 = vmatpush.msrb.mxu1 %v7532_v2  ;;  %3792 = vrcp.f32 %v7581_v22  ;;  %9526 = vst [vmem:[#allocation57_spill] sm:$0xff] %v7597_v1  ;;  %vm2808_vm8 = vweird.f32 %v7581_v22 }
 0x4e6   :  { %2975 = vmatpush.msrb.mxu2 %v7537_v60  ;;  %2995 = vmatpush.msrb.mxu3 %v7540_v62 }
 0x4e7   :  { %2936 = vmatpush.msra.mxu0 %v7543_v51  ;;  %2956 = vmatpush.msrb.mxu1 %v7546_v58 }
 0x4e8   :  { %2976 = vmatpush.msrb.mxu2 %v7549_v18  ;;  %2996 = vmatpush.msrb.mxu3 %v7552_v15 }
 0x4e9   :  { %2937 = vmatpush.msra.mxu0 %v7555_v53  ;;  %2957 = vmatpush.msrb.mxu1 %v7558_v7 }
 0x4ea   :  { %2977 = vmatpush.msrb.mxu2 %v7561_v0  ;;  %2997 = vmatpush.msrb.mxu3 %v7564_v55 }
 0x4eb   :  { %2938 = vmatpush.msra.mxu0 %v7567_v20  ;;  %2958 = vmatpush.msrb.mxu1 %v7570_v17  ;;  %v7623_v17 = vld [vmem:[#allocation8] sm:$0xff] }
 0x4ec   :  { %2978 = vmatpush.msrb.mxu2 %v7575_v14  ;;  %2998 = vmatpush.msrb.mxu3 %v7578_v9  ;;  %v7617_v14 = vld [vmem:[#allocation8 + $0x30] sm:$0xff]  ;;  %9535 = vst [vmem:[#allocation67_spill] sm:$0xff] %v7623_v17 }
 0x4ed   :  { %2939 = vmatpush.msra.mxu0 %v7583_v25  ;;  %2959 = vmatpush.msrb.mxu1 %v7586_v42  ;;  %v7606_v42 = vld [vmem:[#allocation8 + $0x58] sm:$0xff]  ;;  %v7612_v25 = vld [vmem:[#allocation8 + $0x28] sm:$0xff]  ;;  %9533 = vst [vmem:[#allocation65_spill] sm:$0xff] %v7617_v14 }
 0x4ee   :  { %2979 = vmatpush.msrb.mxu2 %v7590_v3  ;;  %2999 = vmatpush.msrb.mxu3 %v7593_v44  ;;  %9529 = vst [vmem:[#allocation61_spill] sm:$0xff] %v7606_v42  ;;  %v2526_v3 = vpop.f32.mrf.mxu2  ;;  %v7609_v44 = vld [vmem:[#allocation8 + $0x20] sm:$0xff] }
 0x4ef   :  { %2940 = vmatpush.msra.mxu0 %v7597_v1  ;;  %2960 = vmatpush.msrb.mxu1 %v7600_v49  ;;  %9530 = vst [vmem:[#allocation63_spill] sm:$0xff] %v7609_v44  ;;  %v3789_v1 = vpop.eup %3788  ;;  %v9532_v49 = vld [vmem:[#allocation30_spill] sm:$0xff] }
 0x4f0   :  { %2980 = vmatpush.msrb.mxu2 %v7603_v13  ;;  %3000 = vmatpush.msrb.mxu3 %v7606_v42  ;;  %9531 = vst [vmem:[#allocation64_spill] sm:$0xff] %v7612_v25  ;;  %v288_v9 = vadd.f32 %v9532_v49, %v9437_v37  ;;  %v7620_v13 = vld [vmem:[#allocation8 + $0x38] sm:$0xff]  ;;  %v2822_v42 = vadd.f32 1.0, %v3789_v1  ;;  %v7629_v49 = vld [vmem:[#allocation8 + $0x10] sm:$0xff] }
 0x4f1   :  { %2941 = vmatpush.msra.mxu0 %v7609_v44  ;;  %2961 = vmatpush.msrb.mxu1 %v7612_v25  ;;  %9534 = vst [vmem:[#allocation66_spill] sm:$0xff] %v7620_v13  ;;  %v7626_v44 = vld [vmem:[#allocation8 + $0x8] sm:$0xff]  ;;  %v3791_v25 = vpop.eup %3790  ;;  %v7632_v37 = vld [vmem:[#allocation8 + $0x18] sm:$0xff] }
 0x4f2   :  { %2981 = vmatpush.msrb.mxu2 %v7617_v14  ;;  %3001 = vmatpush.msrb.mxu3 %v7620_v13  ;;  %9536 = vst [vmem:[#allocation68_spill] sm:$0xff] %v7626_v44  ;;  %v2551_v20 = vadd.f32 %v2526_v3, %v288_v9  ;;  %v3793_v13 = vpop.eup %3792  ;;  %v2785_v1 = vmul.f32 %v3791_v25, %v7573_v36  ;;  %3794 = vrcp.f32 %v2822_v42  ;;  %v2814_v9 = vand.u32 2147483648, %v7581_v22 }
 0x4f3   :  { %2942 = vmatpush.msra.mxu0 %v7623_v17  ;;  %2962 = vmatpush.msrb.mxu1 %v7626_v44  ;;  %9537 = vst [vmem:[#allocation69_spill] sm:$0xff] %v7629_v49  ;;  %v2804_v17 = vmul.f32 %v3793_v13, %v7581_v22  ;;  %v2795_v44 = vand.u32 2147483648, %v7573_v36  ;;  %vm2790_vm5 = vweird.f32 %v3791_v25  ;;  %vm2809_vm6 = vweird.f32 %v3793_v13 }
 0x4f4   :  { %2982 = vmatpush.msrb.mxu2 %v7629_v49  ;;  %9538 = vst [vmem:[#allocation71_spill] sm:$0xff] %v7632_v37  ;;  %3002 = vmatpush.msrb.mxu3 %v7632_v37  ;;  %v2786_v14 = vsub.f32 1.0, %v2785_v1  ;;  %3796 = vtanh.f32 %v2551_v20  ;;  %v2793_v49 = vand.u32 2147483647, %v7573_v36  ;;  %v2812_v37 = vand.u32 2147483647, %v7581_v22  ;;  %vm2791_vm9 = vmor %vm2789_vm7, %vm2790_vm5 }
 0x4f5   :  { %v2805_v55 = vsub.f32 1.0, %v2804_v17  ;;  %v2796_v17 = vor.u32 1.1754944e-38, %v2795_v44  ;;  %vm2810_vm10 = vmor %vm2808_vm8, %vm2809_vm6  ;;  %v2815_v15 = vor.u32 1.1754944e-38, %v2814_v9  ;;  %vm2828_vm14 = vweird.f32 %v2822_v42  ;;  %v7680_v9 = vld [vmem:[#allocation7 + $0x1a8] sm:$0xff] }
 0x4f6   :  { %v2787_v3 = vmul.f32 %v3791_v25, %v2786_v14  ;;  %vm2794_vm11 = vcmp.eq.f32.partialorder %v2793_v49, 8.507059e+37  ;;  %vm2813_vm12 = vcmp.eq.f32.partialorder %v2812_v37, 8.507059e+37  ;;  %v7677_v49 = vld [vmem:[#allocation7 + $0x1a0] sm:$0xff]  ;;  %9545 = vst [vmem:[#allocation79_spill] sm:$0xff] %v7680_v9 }
 0x4f7   :  { %v2806_v0 = vmul.f32 %v3793_v13, %v2805_v55  ;;  %9544 = vst [vmem:[#allocation78_spill] sm:$0xff] %v7677_v49 }
 0x4f8   :  { %v3795_v7 = vpop.eup %3794  ;;  %v2788_v53 = vadd.f32 %v3791_v25, %v2787_v3 }
 0x4f9   :  { %v2807_v1 = vadd.f32 %v3793_v13, %v2806_v0  ;;  %v2824_v20 = vmul.f32 %v3795_v7, %v2822_v42  ;;  %vm2829_vm13 = vweird.f32 %v3795_v7  ;;  %v2834_v0 = vand.u32 2147483648, %v2822_v42 }
 0x4fa   :  { %v2792_v14 = vsel %vm2791_vm9, %v3791_v25, %v2788_v53  ;;  %v3797_v18 = vpop.eup %3796  ;;  %v2832_v53 = vand.u32 2147483647, %v2822_v42  ;;  %vm2830_vm15 = vmor %vm2828_vm14, %vm2829_vm13  ;;  %v7656_v42 = vld [vmem:[#allocation7 + $0x1e8] sm:$0xff] }
 0x4fb   :  { %v2797_v58 = vsel %vm2794_vm11, %v2796_v17, %v2792_v14  ;;  %v2811_v55 = vsel %vm2810_vm10, %v3793_v13, %v2807_v1  ;;  %v2825_v51 = vsub.f32 1.0, %v2824_v20  ;;  %v2835_v44 = vor.u32 1.1754944e-38, %v2834_v0  ;;  %v7683_v17 = vld [vmem:[#allocation7 + $0x1b0] sm:$0xff]  ;;  %v7686_v1 = vld [vmem:[#allocation7 + $0x1b8] sm:$0xff]  ;;  %v7689_v20 = vld [vmem:[#allocation7 + $0x180] sm:$0xff] }
 0x4fc   :  { %v2816_v62 = vsel %vm2813_vm12, %v2815_v15, %v2811_v55  ;;  %v2839_v60 = vmul.f32 %v3797_v18, %v2797_v58  ;;  %vm2833_vm0 = vcmp.eq.f32.partialorder %v2832_v53, 8.507059e+37  ;;  %v7668_v58 = vld [vmem:[#allocation7 + $0x1c8] sm:$0xff]  ;;  %v7671_v18 = vld [vmem:[#allocation7 + $0x1d0] sm:$0xff]  ;;  %9546 = vst [vmem:[#allocation80_spill] sm:$0xff] %v7683_v17  ;;  %v7710_v53 = vld [vmem:[#allocation7 + $0x178] sm:$0xff] }
 0x4fd   :  { %v2838_v3 = vmul.f32 %v2816_v62, %v7338_v5  ;;  %v2826_v36 = vmul.f32 %v3795_v7, %v2825_v51  ;;  %v7653_v5 = vld [vmem:[#allocation7 + $0x1e0] sm:$0xff]  ;;  %v7662_v62 = vld [vmem:[#allocation7 + $0x1f8] sm:$0xff]  ;;  %9541 = vst [vmem:[#allocation74_spill] sm:$0xff] %v7668_v58  ;;  %v7692_v14 = vld [vmem:[#allocation7 + $0x188] sm:$0xff] }
 0x4fe   :  { %v7665_v51 = vld [vmem:[#allocation7 + $0x1c0] sm:$0xff]  ;;  %9542 = vst [vmem:[#allocation75_spill] sm:$0xff] %v7671_v18  ;;  %v7695_v55 = vld [vmem:[#allocation7 + $0x190] sm:$0xff] }
 0x4ff   :  { %v7644_v2 = vadd.f32 %v2839_v60, %v2838_v3  ;;  %v2827_v22 = vadd.f32 %v3795_v7, %v2826_v36  ;;  %v7659_v60 = vld [vmem:[#allocation7 + $0x1f0] sm:$0xff]  ;;  %9540 = vst [vmem:[#allocation73_spill] sm:$0xff] %v7665_v51  ;;  %v7698_v3 = vld [vmem:[#allocation7 + $0x198] sm:$0xff]  ;;  %v7701_v36 = vld [vmem:[#allocation7 + $0x160] sm:$0xff] }
 0x500   :  { %9547 = vst [vmem:[#allocation81_spill] sm:$0xff] %v7686_v1  ;;  %v7707_v0 = vld [vmem:[#allocation7 + $0x170] sm:$0xff] }
 0x501   :  { %9539 = vst [vmem:[#allocation72_spill] sm:$0xff] %v7644_v2  ;;  %3798 = vtanh.f32 %v7644_v2  ;;  %v2831_v25 = vsel %vm2830_vm15, %v3795_v7, %v2827_v22  ;;  %v7674_v7 = vld [vmem:[#allocation7 + $0x1d8] sm:$0xff]  ;;  %v7704_v22 = vld [vmem:[#allocation7 + $0x168] sm:$0xff]  ;;  %v7725_v2 = vld [vmem:[#allocation7 + $0x120] sm:$0xff] }
 0x502   :  { %v2836_v37 = vsel %vm2833_vm0, %v2835_v44, %v2831_v25  ;;  %9543 = vst [vmem:[#allocation77_spill] sm:$0xff] %v7674_v7  ;;  %v7713_v25 = vld [vmem:[#allocation7 + $0x140] sm:$0xff]  ;;  %v7716_v44 = vld [vmem:[#allocation7 + $0x148] sm:$0xff] }
 0x503   :  { %9548 = vst [vmem:[#allocation82_spill] sm:$0xff] %v7689_v20 }
 0x504   :  { %9549 = vst [vmem:[#allocation83_spill] sm:$0xff] %v7692_v14 }
 0x505   :  { %9550 = vst [vmem:[#allocation84_spill] sm:$0xff] %v7695_v55 }
 0x506   :  { %9551 = vst [vmem:[#allocation85_spill] sm:$0xff] %v7698_v3 }
 0x507   :  { %v3799_v13 = vpop.eup %3798  ;;  %9552 = vst [vmem:[#allocation86_spill] sm:$0xff] %v7701_v36 }
 0x508   :  { %v7647_v15 = vmul.f32 %v3799_v13, %v2836_v37  ;;  %9553 = vst [vmem:[#allocation87_spill] sm:$0xff] %v7704_v22  ;;  %v7719_v13 = vld [vmem:[#allocation7 + $0x150] sm:$0xff]  ;;  %v7722_v37 = vld [vmem:[#allocation7 + $0x158] sm:$0xff] }
 0x509   :  { %9554 = vst [vmem:[#allocation88_spill] sm:$0xff] %v7707_v0 }
 0x50a   :  { %2859 = vmatmul.f32.vlgmr.msrb.gmra.mxu0 %v7647_v15  ;;  %2879 = vmatmul.f32.vlgmr.msra.gmra.mxu1 %v7647_v15  ;;  %9555 = vst [vmem:[#allocation89_spill] sm:$0xff] %v7710_v53 }
 0x50b   :  { %2899 = vmatmul.f32.vlgmr.msra.gmra.mxu2 %v7647_v15  ;;  %2919 = vmatmul.f32.vlgmr.msra.gmra.mxu3 %v7647_v15  ;;  %9556 = vst [vmem:[#allocation90_spill] sm:$0xff] %v7713_v25 }
 0x50c   :  { %3007 = vmatpush.msrb.mxu0 %v7653_v5  ;;  %3027 = vmatpush.msra.mxu1 %v7656_v42  ;;  %9557 = vst [vmem:[#allocation92_spill] sm:$0xff] %v7716_v44 }
 0x50d   :  { %3047 = vmatpush.msra.mxu2 %v7659_v60  ;;  %3067 = vmatpush.msra.mxu3 %v7662_v62  ;;  %9558 = vst [vmem:[#allocation93_spill] sm:$0xff] %v7719_v13 }
 0x50e   :  { %3008 = vmatpush.msrb.mxu0 %v7665_v51  ;;  %3028 = vmatpush.msra.mxu1 %v7668_v58  ;;  %9559 = vst [vmem:[#allocation94_spill] sm:$0xff] %v7722_v37 }
 0x50f   :  { %3048 = vmatpush.msra.mxu2 %v7671_v18  ;;  %3068 = vmatpush.msra.mxu3 %v7674_v7  ;;  %9560 = vst [vmem:[#allocation95_spill] sm:$0xff] %v7725_v2 }
 0x510   :  { %3009 = vmatpush.msrb.mxu0 %v7677_v49  ;;  %3029 = vmatpush.msra.mxu1 %v7680_v9 }
 0x511   :  { %3049 = vmatpush.msra.mxu2 %v7683_v17  ;;  %3069 = vmatpush.msra.mxu3 %v7686_v1 }
 0x512   :  { %3010 = vmatpush.msrb.mxu0 %v7689_v20  ;;  %3030 = vmatpush.msra.mxu1 %v7692_v14 }
 0x513   :  { %3050 = vmatpush.msra.mxu2 %v7695_v55  ;;  %3070 = vmatpush.msra.mxu3 %v7698_v3 }
 0x514   :  { %3011 = vmatpush.msrb.mxu0 %v7701_v36  ;;  %3031 = vmatpush.msra.mxu1 %v7704_v22  ;;  %v7839_v22 = vld [vmem:[#allocation7 + $0x10] sm:$0xff] }
 0x515   :  { %3051 = vmatpush.msra.mxu2 %v7707_v0  ;;  %3071 = vmatpush.msra.mxu3 %v7710_v53  ;;  %v7728_v53 = vld [vmem:[#allocation7 + $0x128] sm:$0xff]  ;;  %9598 = vst [vmem:[#allocation130_spill] sm:$0xff] %v7839_v22 }
 0x516   :  { %3012 = vmatpush.msrb.mxu0 %v7713_v25  ;;  %3032 = vmatpush.msra.mxu1 %v7716_v44  ;;  %9561 = vst [vmem:[#allocation96_spill] sm:$0xff] %v7728_v53  ;;  %v7731_v25 = vld [vmem:[#allocation7 + $0x130] sm:$0xff]  ;;  %v7734_v44 = vld [vmem:[#allocation7 + $0x138] sm:$0xff] }
 0x517   :  { %3052 = vmatpush.msra.mxu2 %v7719_v13  ;;  %3072 = vmatpush.msra.mxu3 %v7722_v37  ;;  %9562 = vst [vmem:[#allocation97_spill] sm:$0xff] %v7731_v25  ;;  %v7737_v13 = vld [vmem:[#allocation7 + $0x100] sm:$0xff]  ;;  %v7740_v37 = vld [vmem:[#allocation7 + $0x108] sm:$0xff] }
 0x518   :  { %3013 = vmatpush.msrb.mxu0 %v7725_v2  ;;  %3033 = vmatpush.msra.mxu1 %v7728_v53  ;;  %9563 = vst [vmem:[#allocation98_spill] sm:$0xff] %v7734_v44  ;;  %v7743_v2 = vld [vmem:[#allocation7 + $0x110] sm:$0xff]  ;;  %v7746_v53 = vld [vmem:[#allocation7 + $0x118] sm:$0xff] }
 0x519   :  { %3053 = vmatpush.msra.mxu2 %v7731_v25  ;;  %3073 = vmatpush.msra.mxu3 %v7734_v44  ;;  %9564 = vst [vmem:[#allocation99_spill] sm:$0xff] %v7737_v13  ;;  %v7749_v25 = vld [vmem:[#allocation7 + $0xe0] sm:$0xff]  ;;  %v7752_v44 = vld [vmem:[#allocation7 + $0xe8] sm:$0xff] }
 0x51a   :  { %3014 = vmatpush.msrb.mxu0 %v7737_v13  ;;  %9565 = vst [vmem:[#allocation100_spill] sm:$0xff] %v7740_v37  ;;  %3034 = vmatpush.msra.mxu1 %v7740_v37  ;;  %v7755_v13 = vld [vmem:[#allocation7 + $0xf0] sm:$0xff]  ;;  %v7758_v37 = vld [vmem:[#allocation7 + $0xf8] sm:$0xff] }
 0x51b   :  { %9566 = vst [vmem:[#allocation101_spill] sm:$0xff] %v7743_v2  ;;  %3054 = vmatpush.msra.mxu2 %v7743_v2  ;;  %3074 = vmatpush.msra.mxu3 %v7746_v53  ;;  %v7761_v2 = vld [vmem:[#allocation7 + $0xc0] sm:$0xff] }
 0x51c   :  { %9567 = vst [vmem:[#allocation102_spill] sm:$0xff] %v7746_v53  ;;  %3015 = vmatpush.msrb.mxu0 %v7749_v25  ;;  %3035 = vmatpush.msra.mxu1 %v7752_v44  ;;  %v7764_v53 = vld [vmem:[#allocation7 + $0xc8] sm:$0xff] }
 0x51d   :  { %9568 = vst [vmem:[#allocation103_spill] sm:$0xff] %v7749_v25  ;;  %3055 = vmatpush.msra.mxu2 %v7755_v13  ;;  %3075 = vmatpush.msra.mxu3 %v7758_v37  ;;  %v7767_v25 = vld [vmem:[#allocation7 + $0xd0] sm:$0xff] }
 0x51e   :  { %9569 = vst [vmem:[#allocation104_spill] sm:$0xff] %v7752_v44  ;;  %3016 = vmatpush.msrb.mxu0 %v7761_v2  ;;  %3036 = vmatpush.msra.mxu1 %v7764_v53  ;;  %v7770_v44 = vld [vmem:[#allocation7 + $0xd8] sm:$0xff] }
 0x51f   :  { %9570 = vst [vmem:[#allocation105_spill] sm:$0xff] %v7755_v13  ;;  %3056 = vmatpush.msra.mxu2 %v7767_v25  ;;  %3076 = vmatpush.msra.mxu3 %v7770_v44  ;;  %v7773_v13 = vld [vmem:[#allocation7 + $0xa0] sm:$0xff] }
 0x520   :  { %9571 = vst [vmem:[#allocation106_spill] sm:$0xff] %v7758_v37  ;;  %3017 = vmatpush.msrb.mxu0 %v7773_v13  ;;  %v7776_v37 = vld [vmem:[#allocation7 + $0xa8] sm:$0xff] }
 0x521   :  { %9572 = vst [vmem:[#allocation107_spill] sm:$0xff] %v7761_v2  ;;  %3037 = vmatpush.msra.mxu1 %v7776_v37  ;;  %v7779_v2 = vld [vmem:[#allocation7 + $0xb0] sm:$0xff] }
 0x522   :  { %9573 = vst [vmem:[#allocation108_spill] sm:$0xff] %v7764_v53  ;;  %3057 = vmatpush.msra.mxu2 %v7779_v2  ;;  %v7782_v53 = vld [vmem:[#allocation7 + $0xb8] sm:$0xff] }
 0x523   :  { %9574 = vst [vmem:[#allocation51_spill] sm:$0xff] %v7767_v25  ;;  %3077 = vmatpush.msra.mxu3 %v7782_v53  ;;  %v7785_v25 = vld [vmem:[#allocation7 + $0x80] sm:$0xff] }
 0x524   :  { %9575 = vst [vmem:[#allocation21_spill] sm:$0xff] %v7770_v44  ;;  %3018 = vmatpush.msrb.mxu0 %v7785_v25  ;;  %v7788_v44 = vld [vmem:[#allocation7 + $0x88] sm:$0xff] }
 0x525   :  { %9576 = vst [vmem:[#allocation109_spill] sm:$0xff] %v7773_v13  ;;  %3038 = vmatpush.msra.mxu1 %v7788_v44  ;;  %v7791_v13 = vld [vmem:[#allocation7 + $0x90] sm:$0xff] }
 0x526   :  { %9577 = vst [vmem:[#allocation110_spill] sm:$0xff] %v7776_v37  ;;  %3058 = vmatpush.msra.mxu2 %v7791_v13  ;;  %v7794_v37 = vld [vmem:[#allocation7 + $0x98] sm:$0xff] }
 0x527   :  { %9578 = vst [vmem:[#allocation111_spill] sm:$0xff] %v7779_v2  ;;  %3078 = vmatpush.msra.mxu3 %v7794_v37  ;;  %v7797_v2 = vld [vmem:[#allocation7 + $0x60] sm:$0xff] }
 0x528   :  { %9579 = vst [vmem:[#allocation112_spill] sm:$0xff] %v7782_v53  ;;  %3019 = vmatpush.msrb.mxu0 %v7797_v2  ;;  %v7800_v53 = vld [vmem:[#allocation7 + $0x68] sm:$0xff] }
 0x529   :  { %9580 = vst [vmem:[#allocation113_spill] sm:$0xff] %v7785_v25  ;;  %3039 = vmatpush.msra.mxu1 %v7800_v53  ;;  %v7803_v25 = vld [vmem:[#allocation7 + $0x70] sm:$0xff] }
 0x52a   :  { %9581 = vst [vmem:[#allocation114_spill] sm:$0xff] %v7788_v44  ;;  %3059 = vmatpush.msra.mxu2 %v7803_v25  ;;  %v7806_v44 = vld [vmem:[#allocation7 + $0x78] sm:$0xff] }
 0x52b   :  { %9582 = vst [vmem:[#allocation115_spill] sm:$0xff] %v7791_v13  ;;  %3079 = vmatpush.msra.mxu3 %v7806_v44  ;;  %v7809_v13 = vld [vmem:[#allocation7 + $0x40] sm:$0xff] }
 0x52c   :  { %9583 = vst [vmem:[#allocation116_spill] sm:$0xff] %v7794_v37  ;;  %3020 = vmatpush.msrb.mxu0 %v7809_v13  ;;  %v7812_v37 = vld [vmem:[#allocation7 + $0x48] sm:$0xff] }
 0x52d   :  { %9584 = vst [vmem:[#allocation117_spill] sm:$0xff] %v7797_v2  ;;  %3040 = vmatpush.msra.mxu1 %v7812_v37  ;;  %v7815_v2 = vld [vmem:[#allocation7 + $0x50] sm:$0xff] }
 0x52e   :  { %9585 = vst [vmem:[#allocation118_spill] sm:$0xff] %v7800_v53  ;;  %3060 = vmatpush.msra.mxu2 %v7815_v2  ;;  %v7818_v53 = vld [vmem:[#allocation7 + $0x58] sm:$0xff]  ;;  %v2590_v0 = vpop.f32.mrf.mxu1 }
 0x52f   :  { %9586 = vst [vmem:[#allocation119_spill] sm:$0xff] %v7803_v25  ;;  %3080 = vmatpush.msra.mxu3 %v7818_v53  ;;  %v7821_v25 = vld [vmem:[#allocation7 + $0x20] sm:$0xff] }
 0x530   :  { %9587 = vst [vmem:[#allocation120_spill] sm:$0xff] %v7806_v44  ;;  %3021 = vmatpush.msrb.mxu0 %v7821_v25  ;;  %v7824_v44 = vld [vmem:[#allocation7 + $0x28] sm:$0xff] }
 0x531   :  { %9588 = vst [vmem:[#allocation121_spill] sm:$0xff] %v7809_v13  ;;  %3041 = vmatpush.msra.mxu1 %v7824_v44  ;;  %v7827_v13 = vld [vmem:[#allocation7 + $0x30] sm:$0xff] }
 0x532   :  { %9589 = vst [vmem:[#allocation122_spill] sm:$0xff] %v7812_v37  ;;  %3061 = vmatpush.msra.mxu2 %v7827_v13  ;;  %v7830_v37 = vld [vmem:[#allocation7 + $0x38] sm:$0xff] }
 0x533   :  { %9590 = vst [vmem:[#allocation23_spill] sm:$0xff] %v7815_v2  ;;  %3081 = vmatpush.msra.mxu3 %v7830_v37  ;;  %v7833_v2 = vld [vmem:[#allocation7] sm:$0xff] }
 0x534   :  { %9591 = vst [vmem:[#allocation123_spill] sm:$0xff] %v7818_v53  ;;  %3022 = vmatpush.msrb.mxu0 %v7833_v2  ;;  %v7836_v53 = vld [vmem:[#allocation7 + $0x8] sm:$0xff]  ;;  %3062 = vmatpush.msra.mxu2 %v7839_v22 }
 0x535   :  { %9592 = vst [vmem:[#allocation124_spill] sm:$0xff] %v7821_v25  ;;  %3042 = vmatpush.msra.mxu1 %v7836_v53  ;;  %v2570_v25 = vpop.f32.mrf.mxu0 }
 0x536   :  { %9593 = vst [vmem:[#allocation125_spill] sm:$0xff] %v7824_v44  ;;  %v7842_v44 = vld [vmem:[#allocation7 + $0x18] sm:$0xff]  ;;  %v2670_v36 = vpop.f32.mrf.mxu1 }
 0x537   :  { %9594 = vst [vmem:[#allocation126_spill] sm:$0xff] %v7827_v13  ;;  %3082 = vmatpush.msra.mxu3 %v7842_v44  ;;  %v2630_v13 = vpop.f32.mrf.mxu3  ;;  %v2671_v55 = vadd.f32 %v2670_v36, %v2590_v0 }
 0x538   :  { %9595 = vst [vmem:[#allocation127_spill] sm:$0xff] %v7830_v37 }
 0x539   :  { %9596 = vst [vmem:[#allocation128_spill] sm:$0xff] %v7833_v2  ;;  %v2714_v14 = vadd.f32 %v2671_v55, %v9501_v35 }
 0x53a   :  { %9597 = vst [vmem:[#allocation129_spill] sm:$0xff] %v7836_v53  ;;  %v2610_v53 = vpop.f32.mrf.mxu2 }
 0x53b   :  { %9599 = vst [vmem:[#allocation131_spill] sm:$0xff] %v7842_v44  ;;  %v3570_v1 = vmul.f32 -1.442695, %v2714_v14 }
 0x53d   :  { %v2650_v37 = vpop.f32.mrf.mxu0 }
 0x53e   :  { %v2651_v3 = vadd.f32 %v2650_v37, %v2570_v25 }
 0x53f   :  { %v2710_v17 = vpop.f32.mrf.mxu3 }
 0x540   :  { %v2713_v2 = vadd.f32 %v2651_v3, %v9500_v19  ;;  %v2711_v22 = vadd.f32 %v2710_v17, %v2630_v13 }
 0x542   :  { %v3569_v20 = vmul.f32 -1.442695, %v2713_v2  ;;  %v2716_v9 = vadd.f32 %v2711_v22, %v9502_v4  ;;  %v2690_v36 = vpop.f32.mrf.mxu2 }
 0x543   :  { %v2691_v3 = vadd.f32 %v2690_v36, %v2610_v53 }
 0x544   :  { %3800 = vpow2.f32 %v3569_v20  ;;  %v3571_v49 = vmul.f32 -1.442695, %v2716_v9 }
 0x545   :  { %3802 = vpow2.f32 %v3570_v1  ;;  %v2715_v20 = vadd.f32 %v2691_v3, %v9503_v28 }
 0x546   :  { %3804 = vpow2.f32 %v3571_v49 }
 0x54a   :  { %v3801_v44 = vpop.eup %3800 }
 0x54b   :  { %v3803_v7 = vpop.eup %3802  ;;  %v2720_v18 = vadd.f32 1.0, %v3801_v44 }
 0x54c   :  { %v2739_v25 = vadd.f32 1.0, %v3803_v7  ;;  %v3805_v55 = vpop.eup %3804 }
 0x54d   :  { %3806 = vrcp.f32 %v2720_v18  ;;  %v2759_v0 = vadd.f32 1.0, %v3805_v55  ;;  %v2732_v13 = vand.u32 2147483648, %v2720_v18  ;;  %v2730_v7 = vand.u32 2147483647, %v2720_v18 }
 0x54e   :  { %3808 = vrcp.f32 %v2739_v25  ;;  %v2751_v44 = vand.u32 2147483648, %v2739_v25  ;;  %v2749_v53 = vand.u32 2147483647, %v2739_v25  ;;  %vm2726_vm3 = vweird.f32 %v2720_v18 }
 0x54f   :  { %3810 = vrcp.f32 %v2759_v0  ;;  %vm2745_vm4 = vweird.f32 %v2739_v25  ;;  %v2733_v3 = vor.u32 1.1754944e-38, %v2732_v13  ;;  %vm2731_vm7 = vcmp.eq.f32.partialorder %v2730_v7, 8.507059e+37 }
 0x550   :  { %3812 = vtanh.f32 %v2715_v20  ;;  %vm2750_vm8 = vcmp.eq.f32.partialorder %v2749_v53, 8.507059e+37  ;;  %v2771_v13 = vand.u32 2147483648, %v2759_v0  ;;  %vm2765_vm10 = vweird.f32 %v2759_v0  ;;  %v9635_v53 = vld [vmem:[#allocation73_spill] sm:$0xff] }
 0x552   :  { %v2772_v7 = vor.u32 1.1754944e-38, %v2771_v13  ;;  %v9647_v13 = vld [vmem:[#allocation84_spill] sm:$0xff] }
 0x553   :  { %v3807_v2 = vpop.eup %3806 }
 0x554   :  { %v3809_v14 = vpop.eup %3808  ;;  %v2722_v1 = vmul.f32 %v3807_v2, %v2720_v18  ;;  %vm2727_vm1 = vweird.f32 %v3807_v2 }
 0x555   :  { %v2741_v17 = vmul.f32 %v3809_v14, %v2739_v25  ;;  %vm2746_vm2 = vweird.f32 %v3809_v14  ;;  %v3811_v36 = vpop.eup %3810  ;;  %vm2728_vm5 = vmor %vm2726_vm3, %vm2727_vm1 }
 0x556   :  { %v2723_v22 = vsub.f32 1.0, %v2722_v1  ;;  %v2761_v4 = vmul.f32 %v3811_v36, %v2759_v0  ;;  %vm2747_vm6 = vmor %vm2745_vm4, %vm2746_vm2  ;;  %v2752_v1 = vor.u32 1.1754944e-38, %v2751_v44  ;;  %v3813_v20 = vpop.eup %3812  ;;  %vm2766_vm9 = vweird.f32 %v3811_v36 }
 0x557   :  { %v2742_v9 = vsub.f32 1.0, %v2741_v17  ;;  %vm2767_vm11 = vmor %vm2765_vm10, %vm2766_vm9 }
 0x558   :  { %v2724_v49 = vmul.f32 %v3807_v2, %v2723_v22  ;;  %v2762_v19 = vsub.f32 1.0, %v2761_v4 }
 0x559   :  { %v2743_v37 = vmul.f32 %v3809_v14, %v2742_v9 }
 0x55a   :  { %v2725_v55 = vadd.f32 %v3807_v2, %v2724_v49  ;;  %v2763_v49 = vmul.f32 %v3811_v36, %v2762_v19  ;;  %v9600_v19 = vld [vmem:[#allocation22_spill] sm:$0xff] }
 0x55b   :  { %v2744_v28 = vadd.f32 %v3809_v14, %v2743_v37 }
 0x55c   :  { %v2729_v17 = vsel %vm2728_vm5, %v3807_v2, %v2725_v55  ;;  %v2764_v25 = vadd.f32 %v3811_v36, %v2763_v49  ;;  %v2769_v2 = vand.u32 2147483647, %v2759_v0  ;;  %v9637_v55 = vld [vmem:[#allocation75_spill] sm:$0xff] }
 0x55d   :  { %v2734_v35 = vsel %vm2731_vm7, %v2733_v3, %v2729_v17  ;;  %v2748_v22 = vsel %vm2747_vm6, %v3809_v14, %v2744_v28  ;;  %v9638_v3 = vld [vmem:[#allocation77_spill] sm:$0xff]  ;;  %v9639_v17 = vld [vmem:[#allocation78_spill] sm:$0xff]  ;;  %v9646_v49 = vld [vmem:[#allocation31_spill] sm:$0xff] }
 0x55e   :  { %v2753_v9 = vsel %vm2750_vm8, %v2752_v1, %v2748_v22  ;;  %v2776_v58 = vmul.f32 %v3813_v20, %v2734_v35  ;;  %v2768_v44 = vsel %vm2767_vm11, %v3811_v36, %v2764_v25  ;;  %vm2770_vm12 = vcmp.eq.f32.partialorder %v2769_v2, 8.507059e+37  ;;  %v9601_v35 = vld [vmem:[#allocation37_spill] sm:$0xff]  ;;  %v9636_v36 = vld [vmem:[#allocation74_spill] sm:$0xff]  ;;  %v9641_v20 = vld [vmem:[#allocation80_spill] sm:$0xff] }
 0x55f   :  { %v2775_v51 = vmul.f32 %v2753_v9, %v7416_v50  ;;  %v2773_v4 = vsel %vm2770_vm12, %v2772_v7, %v2768_v44  ;;  %v9602_v50 = vld [vmem:[#allocation38_spill] sm:$0xff]  ;;  %v9644_v22 = vld [vmem:[#allocation83_spill] sm:$0xff]  ;;  %v9648_v2 = vld [vmem:[#allocation85_spill] sm:$0xff] }
 0x560   :  { %v9645_v9 = vld [vmem:[#allocation70_spill] sm:$0xff] }
 0x561   :  { %v7850_v18 = vadd.f32 %v2776_v58, %v2775_v51  ;;  %v332_v25 = vadd.f32 %v9646_v49, %v9645_v9  ;;  %v9649_v7 = vld [vmem:[#allocation86_spill] sm:$0xff] }
 0x563   :  { %3814 = vtanh.f32 %v7850_v18 }
 0x569   :  { %v3815_v28 = vpop.eup %3814 }
 0x56a   :  { %v2779_v14 = vmul.f32 %v3815_v28, %v2773_v4  ;;  %v9650_v28 = vld [vmem:[#allocation87_spill] sm:$0xff] }
 0x56c   :  { %2943 = vmatmul.f32.vlgmr.msra.gmra.mxu0 %v2779_v14  ;;  %2963 = vmatmul.f32.vlgmr.msrb.gmra.mxu1 %v2779_v14 }
 0x56d   :  { %2983 = vmatmul.f32.vlgmr.msrb.gmra.mxu2 %v2779_v14  ;;  %3003 = vmatmul.f32.vlgmr.msrb.gmra.mxu3 %v2779_v14  ;;  %v9651_v14 = vld [vmem:[#allocation88_spill] sm:$0xff] }
 0x56e   :  { %3217 = vmatpush.msra.mxu0 %v7429_v57  ;;  %3237 = vmatpush.msrb.mxu1 %v7432_v39  ;;  %v9603_v57 = vld [vmem:[#allocation39_spill] sm:$0xff]  ;;  %v9604_v39 = vld [vmem:[#allocation40_spill] sm:$0xff] }
 0x56f   :  { %3257 = vmatpush.msrb.mxu2 %v7435_v40  ;;  %3277 = vmatpush.msrb.mxu3 %v7438_v32  ;;  %v9605_v40 = vld [vmem:[#allocation41_spill] sm:$0xff]  ;;  %v9606_v32 = vld [vmem:[#allocation42_spill] sm:$0xff] }
 0x570   :  { %3218 = vmatpush.msra.mxu0 %v7441_v21  ;;  %3238 = vmatpush.msrb.mxu1 %v7444_v6  ;;  %v9607_v21 = vld [vmem:[#allocation44_spill] sm:$0xff]  ;;  %v9608_v6 = vld [vmem:[#allocation45_spill] sm:$0xff] }
 0x571   :  { %3258 = vmatpush.msrb.mxu2 %v7447_v11  ;;  %3278 = vmatpush.msrb.mxu3 %v7450_v30  ;;  %v9609_v11 = vld [vmem:[#allocation46_spill] sm:$0xff]  ;;  %v9610_v30 = vld [vmem:[#allocation47_spill] sm:$0xff] }
 0x572   :  { %3219 = vmatpush.msra.mxu0 %v7453_v47  ;;  %3239 = vmatpush.msrb.mxu1 %v7456_v63  ;;  %v9611_v47 = vld [vmem:[#allocation48_spill] sm:$0xff]  ;;  %v9612_v63 = vld [vmem:[#allocation49_spill] sm:$0xff] }
 0x573   :  { %3259 = vmatpush.msrb.mxu2 %v7459_v48  ;;  %3279 = vmatpush.msrb.mxu3 %v7462_v41  ;;  %v9613_v48 = vld [vmem:[#allocation50_spill] sm:$0xff]  ;;  %v9614_v41 = vld [vmem:[#allocation52_spill] sm:$0xff] }
 0x574   :  { %3023 = vmatmul.f32.vlgmr.msrb.gmra.mxu0 %v7647_v15  ;;  %3043 = vmatmul.f32.vlgmr.msra.gmra.mxu1 %v7647_v15 }
 0x575   :  { %3063 = vmatmul.f32.vlgmr.msra.gmra.mxu2 %v7647_v15  ;;  %3083 = vmatmul.f32.vlgmr.msra.gmra.mxu3 %v7647_v15 }
 0x576   :  { %3220 = vmatpush.msra.mxu0 %v7465_v34  ;;  %3240 = vmatpush.msrb.mxu1 %v7468_v46  ;;  %v9615_v34 = vld [vmem:[#allocation53_spill] sm:$0xff]  ;;  %v9616_v46 = vld [vmem:[#allocation54_spill] sm:$0xff] }
 0x577   :  { %3260 = vmatpush.msrb.mxu2 %v7471_v59  ;;  %3280 = vmatpush.msrb.mxu3 %v7474_v45  ;;  %v9617_v59 = vld [vmem:[#allocation55_spill] sm:$0xff]  ;;  %v9618_v45 = vld [vmem:[#allocation56_spill] sm:$0xff] }
 0x578   :  { %3221 = vmatpush.msra.mxu0 %v7477_v24  ;;  %3241 = vmatpush.msrb.mxu1 %v7480_v8  ;;  %v9619_v24 = vld [vmem:[#allocation57_spill] sm:$0xff]  ;;  %v9620_v8 = vld [vmem:[#allocation58_spill] sm:$0xff] }
 0x579   :  { %3261 = vmatpush.msrb.mxu2 %v7483_v16  ;;  %3281 = vmatpush.msrb.mxu3 %v7486_v26  ;;  %v9621_v16 = vld [vmem:[#allocation60_spill] sm:$0xff]  ;;  %v9622_v26 = vld [vmem:[#allocation61_spill] sm:$0xff] }
 0x57a   :  { %3222 = vmatpush.msra.mxu0 %v7493_v12  ;;  %3242 = vmatpush.msrb.mxu1 %v7496_v10  ;;  %v9623_v12 = vld [vmem:[#allocation63_spill] sm:$0xff]  ;;  %v9624_v10 = vld [vmem:[#allocation64_spill] sm:$0xff] }
 0x57b   :  { %3262 = vmatpush.msrb.mxu2 %v7499_v23  ;;  %3282 = vmatpush.msrb.mxu3 %v7502_v52  ;;  %v9625_v23 = vld [vmem:[#allocation65_spill] sm:$0xff]  ;;  %v9626_v52 = vld [vmem:[#allocation66_spill] sm:$0xff] }
 0x57c   :  { %3223 = vmatpush.msra.mxu0 %v7505_v56  ;;  %3243 = vmatpush.msrb.mxu1 %v7508_v29  ;;  %v9627_v56 = vld [vmem:[#allocation67_spill] sm:$0xff]  ;;  %v9628_v29 = vld [vmem:[#allocation68_spill] sm:$0xff] }
 0x57d   :  { %3263 = vmatpush.msrb.mxu2 %v7511_v54  ;;  %3283 = vmatpush.msrb.mxu3 %v7514_v33  ;;  %v9629_v54 = vld [vmem:[#allocation69_spill] sm:$0xff]  ;;  %v9630_v33 = vld [vmem:[#allocation71_spill] sm:$0xff] }
 0x57e   :  { %3224 = vmatpush.msra.mxu0 %v7517_v61  ;;  %3244 = vmatpush.msrb.mxu1 %v7520_v43  ;;  %v9631_v61 = vld [vmem:[#allocation43_spill] sm:$0xff]  ;;  %v9632_v43 = vld [vmem:[#allocation62_spill] sm:$0xff] }
 0x57f   :  { %3264 = vmatpush.msrb.mxu2 %v7523_v31  ;;  %3284 = vmatpush.msrb.mxu3 %v7526_v38  ;;  %v209_v31 = vadd.f32 %v9632_v43, %v9631_v61  ;;  %v9633_v38 = vld [vmem:[#allocation59_spill] sm:$0xff]  ;;  %v9675_v43 = vld [vmem:[#allocation109_spill] sm:$0xff] }
 0x580   :  { %3225 = vmatpush.msra.mxu0 %v7529_v27  ;;  %3245 = vmatpush.msrb.mxu1 %v9600_v19  ;;  %v9634_v27 = vld [vmem:[#allocation29_spill] sm:$0xff] }
 0x581   :  { %3265 = vmatpush.msrb.mxu2 %v9601_v35  ;;  %3285 = vmatpush.msrb.mxu3 %v9602_v50  ;;  %v250_v15 = vadd.f32 %v9634_v27, %v9633_v38  ;;  %v9652_v19 = vld [vmem:[#allocation89_spill] sm:$0xff]  ;;  %v9653_v35 = vld [vmem:[#allocation90_spill] sm:$0xff]  ;;  %v9654_v50 = vld [vmem:[#allocation92_spill] sm:$0xff] }
 0x582   :  { %3226 = vmatpush.msra.mxu0 %v9603_v57  ;;  %3246 = vmatpush.msrb.mxu1 %v9604_v39  ;;  %v9655_v39 = vld [vmem:[#allocation93_spill] sm:$0xff] }
 0x583   :  { %3266 = vmatpush.msrb.mxu2 %v9605_v40  ;;  %3286 = vmatpush.msrb.mxu3 %v9606_v32  ;;  %v9656_v40 = vld [vmem:[#allocation94_spill] sm:$0xff] }
 0x584   :  { %3227 = vmatpush.msra.mxu0 %v9607_v21  ;;  %3247 = vmatpush.msrb.mxu1 %v9608_v6  ;;  %v9657_v21 = vld [vmem:[#allocation95_spill] sm:$0xff]  ;;  %v9658_v6 = vld [vmem:[#allocation96_spill] sm:$0xff] }
 0x585   :  { %3267 = vmatpush.msrb.mxu2 %v9609_v11  ;;  %3287 = vmatpush.msrb.mxu3 %v9610_v30 }
 0x586   :  { %3228 = vmatpush.msra.mxu0 %v9611_v47  ;;  %3248 = vmatpush.msrb.mxu1 %v9612_v63  ;;  %v9659_v47 = vld [vmem:[#allocation97_spill] sm:$0xff]  ;;  %v9660_v63 = vld [vmem:[#allocation98_spill] sm:$0xff] }
 0x587   :  { %3268 = vmatpush.msrb.mxu2 %v9613_v48  ;;  %3288 = vmatpush.msrb.mxu3 %v9614_v41  ;;  %v2860_v51 = vpop.f32.mrf.mxu0  ;;  %v2880_v58 = vpop.f32.mrf.mxu1  ;;  %v9661_v41 = vld [vmem:[#allocation99_spill] sm:$0xff] }
 0x588   :  { %3229 = vmatpush.msra.mxu0 %v9615_v34  ;;  %3249 = vmatpush.msrb.mxu1 %v9616_v46  ;;  %v2923_v0 = vadd.f32 %v2860_v51, %v209_v31  ;;  %v2924_v37 = vadd.f32 %v2880_v58, %v250_v15  ;;  %v9662_v34 = vld [vmem:[#allocation100_spill] sm:$0xff]  ;;  %v9663_v46 = vld [vmem:[#allocation101_spill] sm:$0xff]  ;;  %v9676_v31 = vld [vmem:[#allocation110_spill] sm:$0xff] }
 0x589   :  { %3269 = vmatpush.msrb.mxu2 %v9617_v59  ;;  %3289 = vmatpush.msrb.mxu3 %v9618_v45  ;;  %v9664_v59 = vld [vmem:[#allocation102_spill] sm:$0xff]  ;;  %v9665_v45 = vld [vmem:[#allocation103_spill] sm:$0xff]  ;;  %v9678_v51 = vld [vmem:[#allocation112_spill] sm:$0xff] }
 0x58a   :  { %3230 = vmatpush.msra.mxu0 %v9619_v24  ;;  %3250 = vmatpush.msrb.mxu1 %v9620_v8  ;;  %v3578_v1 = vmul.f32 -1.442695, %v2923_v0  ;;  %v9666_v24 = vld [vmem:[#allocation104_spill] sm:$0xff]  ;;  %v9667_v8 = vld [vmem:[#allocation105_spill] sm:$0xff]  ;;  %v9677_v15 = vld [vmem:[#allocation111_spill] sm:$0xff] }
 0x58b   :  { %3270 = vmatpush.msrb.mxu2 %v9621_v16  ;;  %3290 = vmatpush.msrb.mxu3 %v9622_v26  ;;  %v9668_v16 = vld [vmem:[#allocation106_spill] sm:$0xff] }
 0x58c   :  { %3231 = vmatpush.msra.mxu0 %v9623_v12  ;;  %3251 = vmatpush.msrb.mxu1 %v9624_v10  ;;  %3816 = vpow2.f32 %v3578_v1  ;;  %v9669_v12 = vld [vmem:[#allocation107_spill] sm:$0xff]  ;;  %v9670_v10 = vld [vmem:[#allocation108_spill] sm:$0xff] }
 0x58d   :  { %3271 = vmatpush.msrb.mxu2 %v9625_v23  ;;  %3291 = vmatpush.msrb.mxu3 %v9626_v52  ;;  %v9671_v52 = vld [vmem:[#allocation91_spill] sm:$0xff] }
 0x58e   :  { %3232 = vmatpush.msra.mxu0 %v9627_v56  ;;  %3252 = vmatpush.msrb.mxu1 %v9628_v29  ;;  %v2920_v44 = vpop.f32.mrf.mxu3  ;;  %v2900_v26 = vpop.f32.mrf.mxu2  ;;  %v9672_v56 = vld [vmem:[#allocation32_spill] sm:$0xff] }
 0x58f   :  { %3272 = vmatpush.msrb.mxu2 %v9629_v54  ;;  %3292 = vmatpush.msrb.mxu3 %v9630_v33  ;;  %v2926_v4 = vadd.f32 %v2920_v44, %v332_v25  ;;  %v291_v29 = vadd.f32 %v9672_v56, %v9671_v52  ;;  %v9673_v54 = vld [vmem:[#allocation51_spill] sm:$0xff]  ;;  %v9674_v33 = vld [vmem:[#allocation21_spill] sm:$0xff] }
 0x590   :  { %3297 = vmatpush.msrb.mxu0 %v7653_v5  ;;  %3317 = vmatpush.msra.mxu1 %v7656_v42  ;;  %v3579_v5 = vmul.f32 -1.442695, %v2924_v37  ;;  %v9640_v42 = vld [vmem:[#allocation79_spill] sm:$0xff]  ;;  %v9679_v37 = vld [vmem:[#allocation113_spill] sm:$0xff] }
 0x591   :  { %3337 = vmatpush.msra.mxu2 %v7659_v60  ;;  %3357 = vmatpush.msra.mxu3 %v7662_v62  ;;  %v9642_v60 = vld [vmem:[#allocation81_spill] sm:$0xff]  ;;  %v9643_v62 = vld [vmem:[#allocation82_spill] sm:$0xff]  ;;  %v3580_v57 = vmul.f32 -1.442695, %v2926_v4  ;;  %v2925_v27 = vadd.f32 %v2900_v26, %v291_v29 }
 0x592   :  { %3298 = vmatpush.msrb.mxu0 %v9635_v53  ;;  %3318 = vmatpush.msra.mxu1 %v9636_v36  ;;  %3818 = vpow2.f32 %v3579_v5  ;;  %v3817_v32 = vpop.eup %3816  ;;  %v9680_v53 = vld [vmem:[#allocation114_spill] sm:$0xff]  ;;  %v9683_v5 = vld [vmem:[#allocation117_spill] sm:$0xff] }
 0x593   :  { %3338 = vmatpush.msra.mxu2 %v9637_v55  ;;  %3358 = vmatpush.msra.mxu3 %v9638_v3  ;;  %v7953_v30 = vadd.f32 1.0, %v3817_v32  ;;  %3820 = vpow2.f32 %v3580_v57  ;;  %v9681_v55 = vld [vmem:[#allocation115_spill] sm:$0xff]  ;;  %v9682_v3 = vld [vmem:[#allocation116_spill] sm:$0xff]  ;;  %v9687_v25 = vld [vmem:[#allocation121_spill] sm:$0xff] }
 0x594   :  { %3299 = vmatpush.msrb.mxu0 %v9639_v17  ;;  %3319 = vmatpush.msra.mxu1 %v9640_v42  ;;  %v9684_v17 = vld [vmem:[#allocation118_spill] sm:$0xff]  ;;  %v9694_v32 = vld [vmem:[#allocation127_spill] sm:$0xff] }
 0x595   :  { %3339 = vmatpush.msra.mxu2 %v9641_v20  ;;  %3359 = vmatpush.msra.mxu3 %v9642_v60  ;;  %3822 = vrcp.f32 %v7953_v30  ;;  %v3169_v20 = vand.u32 2147483648, %v7953_v30  ;;  %v9685_v60 = vld [vmem:[#allocation119_spill] sm:$0xff]  ;;  %v3167_v49 = vand.u32 2147483647, %v7953_v30  ;;  %vm3163_vm15 = vweird.f32 %v7953_v30 }
 0x596   :  { %3300 = vmatpush.msrb.mxu0 %v9643_v62  ;;  %3320 = vmatpush.msra.mxu1 %v9644_v22  ;;  %v9686_v62 = vld [vmem:[#allocation120_spill] sm:$0xff] }
 0x597   :  { %3340 = vmatpush.msra.mxu2 %v9647_v13  ;;  %3360 = vmatpush.msra.mxu3 %v9648_v2  ;;  %v9688_v13 = vld [vmem:[#allocation122_spill] sm:$0xff]  ;;  %vm3168_vm3 = vcmp.eq.f32.partialorder %v3167_v49, 8.507059e+37 }
 0x598   :  { %3301 = vmatpush.msrb.mxu0 %v9649_v7  ;;  %3321 = vmatpush.msra.mxu1 %v9650_v28  ;;  %v3819_v11 = vpop.eup %3818  ;;  %v9689_v7 = vld [vmem:[#allocation23_spill] sm:$0xff] }
 0x599   :  { %3341 = vmatpush.msra.mxu2 %v9651_v14  ;;  %3361 = vmatpush.msra.mxu3 %v9652_v19  ;;  %v7957_v48 = vadd.f32 1.0, %v3819_v11  ;;  %v3821_v23 = vpop.eup %3820  ;;  %v9690_v28 = vld [vmem:[#allocation123_spill] sm:$0xff]  ;;  %v9691_v19 = vld [vmem:[#allocation124_spill] sm:$0xff] }
 0x59a   :  { %3302 = vmatpush.msrb.mxu0 %v9653_v35  ;;  %3322 = vmatpush.msra.mxu1 %v9654_v50  ;;  %v7975_v61 = vadd.f32 1.0, %v3821_v23  ;;  %v9692_v35 = vld [vmem:[#allocation125_spill] sm:$0xff]  ;;  %v3170_v50 = vor.u32 1.1754944e-38, %v3169_v20  ;;  %v9695_v11 = vld [vmem:[#allocation128_spill] sm:$0xff] }
 0x59b   :  { %3342 = vmatpush.msra.mxu2 %v9655_v39  ;;  %3362 = vmatpush.msra.mxu3 %v9656_v40  ;;  %3824 = vrcp.f32 %v7957_v48  ;;  %v3823_v38 = vpop.eup %3822  ;;  %v3188_v22 = vand.u32 2147483648, %v7957_v48  ;;  %v3186_v44 = vand.u32 2147483647, %v7957_v48  ;;  %vm3182_vm0 = vweird.f32 %v7957_v48  ;;  %v9693_v40 = vld [vmem:[#allocation126_spill] sm:$0xff] }
 0x59c   :  { %3303 = vmatpush.msrb.mxu0 %v9657_v21  ;;  %3323 = vmatpush.msra.mxu1 %v9658_v6  ;;  %v3159_v0 = vmul.f32 %v3823_v38, %v7953_v30  ;;  %3826 = vrcp.f32 %v7975_v61  ;;  %vm3164_vm13 = vweird.f32 %v3823_v38  ;;  %v9696_v30 = vld [vmem:[#allocation129_spill] sm:$0xff]  ;;  %vm3202_vm6 = vweird.f32 %v7975_v61 }
 0x59d   :  { %3343 = vmatpush.msra.mxu2 %v9659_v47  ;;  %3363 = vmatpush.msra.mxu3 %v9660_v63  ;;  %3828 = vtanh.f32 %v2925_v27  ;;  %vm3165_vm1 = vmor %vm3163_vm15, %vm3164_vm13  ;;  %v3189_v21 = vor.u32 1.1754944e-38, %v3188_v22  ;;  %vm3187_vm4 = vcmp.eq.f32.partialorder %v3186_v44, 8.507059e+37  ;;  %v3206_v23 = vand.u32 2147483647, %v7975_v61 }
 0x59e   :  { %3304 = vmatpush.msrb.mxu0 %v9661_v41  ;;  %3324 = vmatpush.msra.mxu1 %v9662_v34  ;;  %v3160_v1 = vsub.f32 1.0, %v3159_v0  ;;  %v9697_v34 = vld [vmem:[#allocation130_spill] sm:$0xff]  ;;  %v9700_v0 = vld [vmem:[#allocation33_spill] sm:$0xff] }
 0x59f   :  { %3344 = vmatpush.msra.mxu2 %v9663_v46  ;;  %3364 = vmatpush.msra.mxu3 %v9664_v59  ;;  %v9698_v46 = vld [vmem:[#allocation131_spill] sm:$0xff]  ;;  %vm3207_vm8 = vcmp.eq.f32.partialorder %v3206_v23, 8.507059e+37 }
 0x5a0   :  { %3305 = vmatpush.msrb.mxu0 %v9665_v45  ;;  %3325 = vmatpush.msra.mxu1 %v9666_v24  ;;  %v3161_v9 = vmul.f32 %v3823_v38, %v3160_v1  ;;  %v9699_v24 = vld [vmem:[#allocation72_spill] sm:$0xff] }
 0x5a1   :  { %3345 = vmatpush.msra.mxu2 %v9667_v8  ;;  %3365 = vmatpush.msra.mxu3 %v9668_v16  ;;  %v3825_v58 = vpop.eup %3824 }
 0x5a2   :  { %3306 = vmatpush.msrb.mxu0 %v9669_v12  ;;  %3326 = vmatpush.msra.mxu1 %v9670_v10  ;;  %v3178_v36 = vmul.f32 %v3825_v58, %v7957_v48  ;;  %vm3183_vm14 = vweird.f32 %v3825_v58  ;;  %v3827_v4 = vpop.eup %3826  ;;  %v3162_v14 = vadd.f32 %v3823_v38, %v3161_v9  ;;  %v3208_v10 = vand.u32 2147483648, %v7975_v61 }
 0x5a3   :  { %3346 = vmatpush.msra.mxu2 %v9673_v54  ;;  %3366 = vmatpush.msra.mxu3 %v9674_v33  ;;  %v3198_v39 = vmul.f32 %v3827_v4, %v7975_v61  ;;  %vm3184_vm2 = vmor %vm3182_vm0, %vm3183_vm14  ;;  %v3829_v47 = vpop.eup %3828  ;;  %vm3203_vm5 = vweird.f32 %v3827_v4 }
 0x5a4   :  { %3307 = vmatpush.msrb.mxu0 %v9675_v43  ;;  %3327 = vmatpush.msra.mxu1 %v9676_v31  ;;  %v3179_v42 = vsub.f32 1.0, %v3178_v36  ;;  %v3166_v6 = vsel %vm3165_vm1, %v3823_v38, %v3162_v14  ;;  %vm3204_vm7 = vmor %vm3202_vm6, %vm3203_vm5  ;;  %v3209_v56 = vor.u32 1.1754944e-38, %v3208_v10 }
 0x5a5   :  { %3347 = vmatpush.msra.mxu2 %v9677_v15  ;;  %3367 = vmatpush.msra.mxu3 %v9678_v51  ;;  %v3171_v63 = vsel %vm3168_vm3, %v3170_v50, %v3166_v6  ;;  %v3199_v41 = vsub.f32 1.0, %v3198_v39 }
 0x5a6   :  { %3308 = vmatpush.msrb.mxu0 %v9679_v37  ;;  %3328 = vmatpush.msra.mxu1 %v9680_v53  ;;  %v3180_v2 = vmul.f32 %v3825_v58, %v3179_v42  ;;  %v3213_v45 = vmul.f32 %v3829_v47, %v3171_v63  ;;  %v9701_v53 = vld [vmem:[#allocation34_spill] sm:$0xff] }
 0x5a7   :  { %3348 = vmatpush.msra.mxu2 %v9681_v55  ;;  %3368 = vmatpush.msra.mxu3 %v9682_v3  ;;  %v3200_v16 = vmul.f32 %v3827_v4, %v3199_v41 }
 0x5a8   :  { %3309 = vmatpush.msrb.mxu0 %v9683_v5  ;;  %3329 = vmatpush.msra.mxu1 %v9684_v17  ;;  %v3181_v57 = vadd.f32 %v3825_v58, %v3180_v2  ;;  %v9702_v17 = vld [vmem:[#allocation35_spill] sm:$0xff] }
 0x5a9   :  { %3349 = vmatpush.msra.mxu2 %v9685_v60  ;;  %3369 = vmatpush.msra.mxu3 %v9686_v62  ;;  %v3201_v12 = vadd.f32 %v3827_v4, %v3200_v16 }
 0x5aa   :  { %3310 = vmatpush.msrb.mxu0 %v9687_v25  ;;  %3330 = vmatpush.msra.mxu1 %v9688_v13  ;;  %v3185_v48 = vsel %vm3184_vm2, %v3825_v58, %v3181_v57 }
 0x5ab   :  { %3350 = vmatpush.msra.mxu2 %v9689_v7  ;;  %3370 = vmatpush.msra.mxu3 %v9690_v28  ;;  %v3190_v59 = vsel %vm3187_vm4, %v3189_v21, %v3185_v48  ;;  %v3205_v52 = vsel %vm3204_vm7, %v3827_v4, %v3201_v12  ;;  %v9703_v7 = vld [vmem:[#allocation36_spill] sm:$0xff] }
 0x5ac   :  { %3311 = vmatpush.msrb.mxu0 %v9691_v19  ;;  %3331 = vmatpush.msra.mxu1 %v9692_v35  ;;  %v3212_v8 = vmul.f32 %v3190_v59, %v9699_v24  ;;  %v3210_v54 = vsel %vm3207_vm8, %v3209_v56, %v3205_v52 }
 0x5ad   :  { %3351 = vmatpush.msra.mxu2 %v9693_v40  ;;  %3371 = vmatpush.msra.mxu3 %v9694_v32 }
 0x5ae   :  { %3312 = vmatpush.msrb.mxu0 %v9695_v11  ;;  %3332 = vmatpush.msra.mxu1 %v9696_v30  ;;  %v3214_v26 = vadd.f32 %v3213_v45, %v3212_v8 }
 0x5af   :  { %3352 = vmatpush.msra.mxu2 %v9697_v34  ;;  %3372 = vmatpush.msra.mxu3 %v9698_v46 }
 0x5b0   :  { %3830 = vtanh.f32 %v3214_v26 }
 0x5b6   :  { %v3831_v29 = vpop.eup %3830 }
 0x5b7   :  { %v8017_v33 = vmul.f32 %v3831_v29, %v3210_v54 }
 0x5e9   :  { %v2944_v43 = vpop.f32.mrf.mxu0  ;;  %v2964_v31 = vpop.f32.mrf.mxu1 }
 0x5f0   :  { %v3004_v38 = vpop.f32.mrf.mxu3  ;;  %v2984_v61 = vpop.f32.mrf.mxu2 }
 0x5f1   :  { %v3024_v27 = vpop.f32.mrf.mxu0  ;;  %v3044_v15 = vpop.f32.mrf.mxu1 }
 0x5f2   :  { %v3025_v51 = vadd.f32 %v3024_v27, %v2944_v43  ;;  %v3045_v58 = vadd.f32 %v3044_v15, %v2964_v31  ;;  %v3458_v27 = vld [vmem:[#allocation10 + $0x70] sm:$0xff]  ;;  %v3457_v15 = vld [vmem:[#allocation10 + $0x68] sm:$0xff] }
 0x5f4   :  { %v3087_v37 = vadd.f32 %v3025_v51, %v9700_v0  ;;  %v3088_v36 = vadd.f32 %v3045_v58, %v9701_v53  ;;  %v3456_v51 = vld [vmem:[#allocation10 + $0x60] sm:$0xff] }
 0x5f6   :  { %v3575_v55 = vmul.f32 -1.442695, %v3087_v37  ;;  %v3576_v3 = vmul.f32 -1.442695, %v3088_v36  ;;  %v3455_v36 = vld [vmem:[#allocation10 + $0x58] sm:$0xff] }
 0x5f8   :  { %3832 = vpow2.f32 %v3575_v55  ;;  %v3084_v1 = vpop.f32.mrf.mxu3  ;;  %v3064_v49 = vpop.f32.mrf.mxu2  ;;  %v3453_v55 = vld [vmem:[#allocation10 + $0x48] sm:$0xff] }
 0x5f9   :  { %3834 = vpow2.f32 %v3576_v3  ;;  %v3085_v5 = vadd.f32 %v3084_v1, %v3004_v38  ;;  %v3065_v25 = vadd.f32 %v3064_v49, %v2984_v61  ;;  %v3454_v61 = vld [vmem:[#allocation10 + $0x50] sm:$0xff]  ;;  %v3452_v3 = vld [vmem:[#allocation10 + $0x40] sm:$0xff]  ;;  %v3449_v49 = vld [vmem:[#allocation10 + $0x28] sm:$0xff] }
 0x5fb   :  { %v3090_v42 = vadd.f32 %v3085_v5, %v9702_v17  ;;  %v3089_v28 = vadd.f32 %v3065_v25, %v9703_v7 }
 0x5fd   :  { %v3577_v20 = vmul.f32 -1.442695, %v3090_v42  ;;  %v3451_v42 = vld [vmem:[#allocation10 + $0x38] sm:$0xff] }
 0x5fe   :  { %v3833_v60 = vpop.eup %3832 }
 0x5ff   :  { %v3835_v62 = vpop.eup %3834  ;;  %v3094_v22 = vadd.f32 1.0, %v3833_v60  ;;  %3836 = vpow2.f32 %v3577_v20 }
 0x600   :  { %v3113_v9 = vadd.f32 1.0, %v3835_v62  ;;  %v3450_v62 = vld [vmem:[#allocation10 + $0x30] sm:$0xff] }
 0x601   :  { %3838 = vrcp.f32 %v3094_v22  ;;  %v3106_v57 = vand.u32 2147483648, %v3094_v22  ;;  %v3104_v32 = vand.u32 2147483647, %v3094_v22  ;;  %vm3100_vm11 = vweird.f32 %v3094_v22 }
 0x602   :  { %3840 = vrcp.f32 %v3113_v9  ;;  %v3125_v39 = vand.u32 2147483648, %v3113_v9  ;;  %v3123_v6 = vand.u32 2147483647, %v3113_v9  ;;  %vm3119_vm12 = vweird.f32 %v3113_v9 }
 0x603   :  { %v3107_v47 = vor.u32 1.1754944e-38, %v3106_v57  ;;  %vm3105_vm15 = vcmp.eq.f32.partialorder %v3104_v32, 8.507059e+37 }
 0x604   :  { %v3126_v41 = vor.u32 1.1754944e-38, %v3125_v39  ;;  %vm3124_vm0 = vcmp.eq.f32.partialorder %v3123_v6, 8.507059e+37 }
 0x605   :  { %v3837_v13 = vpop.eup %3836 }
 0x606   :  { %v3133_v2 = vadd.f32 1.0, %v3837_v13 }
 0x607   :  { %v3839_v44 = vpop.eup %3838 }
 0x608   :  { %v3841_v4 = vpop.eup %3840  ;;  %v3096_v14 = vmul.f32 %v3839_v44, %v3094_v22  ;;  %3842 = vrcp.f32 %v3133_v2  ;;  %vm3101_vm9 = vweird.f32 %v3839_v44  ;;  %v3145_v52 = vand.u32 2147483648, %v3133_v2 }
 0x609   :  { %v3115_v19 = vmul.f32 %v3841_v4, %v3113_v9  ;;  %3844 = vtanh.f32 %v3089_v28  ;;  %vm3120_vm10 = vweird.f32 %v3841_v4  ;;  %vm3102_vm13 = vmor %vm3100_vm11, %vm3101_vm9  ;;  %vm3139_vm2 = vweird.f32 %v3133_v2  ;;  %v3447_v28 = vld [vmem:[#allocation10 + $0x18] sm:$0xff] }
 0x60a   :  { %v3097_v35 = vsub.f32 1.0, %v3096_v14  ;;  %vm3121_vm14 = vmor %vm3119_vm12, %vm3120_vm10  ;;  %v3143_v56 = vand.u32 2147483647, %v3133_v2  ;;  %v3146_v54 = vor.u32 1.1754944e-38, %v3145_v52 }
 0x60b   :  { %v3116_v50 = vsub.f32 1.0, %v3115_v19  ;;  %v3446_v19 = vld [vmem:[#allocation10 + $0x10] sm:$0xff] }
 0x60c   :  { %v3098_v40 = vmul.f32 %v3839_v44, %v3097_v35  ;;  %vm3144_vm4 = vcmp.eq.f32.partialorder %v3143_v56, 8.507059e+37 }
 0x60d   :  { %v3117_v21 = vmul.f32 %v3841_v4, %v3116_v50  ;;  %v3444_v50 = vld [vmem:[#allocation10] sm:$0xff] }
 0x60e   :  { %v3843_v11 = vpop.eup %3842  ;;  %v3099_v30 = vadd.f32 %v3839_v44, %v3098_v40 }
 0x60f   :  { %v3118_v63 = vadd.f32 %v3841_v4, %v3117_v21  ;;  %v3135_v48 = vmul.f32 %v3843_v11, %v3133_v2  ;;  %v3845_v46 = vpop.eup %3844  ;;  %vm3140_vm1 = vweird.f32 %v3843_v11 }
 0x610   :  { %v3103_v34 = vsel %vm3102_vm13, %v3839_v44, %v3099_v30  ;;  %vm3141_vm3 = vmor %vm3139_vm2, %vm3140_vm1  ;;  %v3448_v44 = vld [vmem:[#allocation10 + $0x20] sm:$0xff] }
 0x611   :  { %v3108_v59 = vsel %vm3105_vm15, %v3107_v47, %v3103_v34  ;;  %v3122_v45 = vsel %vm3121_vm14, %v3841_v4, %v3118_v63  ;;  %v3136_v24 = vsub.f32 1.0, %v3135_v48 }
 0x612   :  { %v3127_v8 = vsel %vm3124_vm0, %v3126_v41, %v3122_v45  ;;  %v3150_v16 = vmul.f32 %v3845_v46, %v3108_v59 }
 0x613   :  { %v3149_v26 = vmul.f32 %v3127_v8, %v7850_v18  ;;  %v3137_v12 = vmul.f32 %v3843_v11, %v3136_v24  ;;  %v3459_v18 = vld [vmem:[#allocation10 + $0x78] sm:$0xff] }
 0x615   :  { %v8024_v10 = vadd.f32 %v3150_v16, %v3149_v26  ;;  %v3138_v23 = vadd.f32 %v3843_v11, %v3137_v12 }
 0x617   :  { %3846 = vtanh.f32 %v8024_v10  ;;  %v3142_v29 = vsel %vm3141_vm3, %v3843_v11, %v3138_v23 }
 0x618   :  { %v3147_v31 = vsel %vm3144_vm4, %v3146_v54, %v3142_v29 }
 0x61d   :  { %v3847_v43 = vpop.eup %3846 }
 0x61e   :  { %v3153_v38 = vmul.f32 %v3847_v43, %v3147_v31 }
 0x620   :  { %3233 = vmatmul.f32.vlgmr.msra.gmra.mxu0 %v3153_v38  ;;  %3253 = vmatmul.f32.vlgmr.msrb.gmra.mxu1 %v3153_v38 }
 0x621   :  { %3273 = vmatmul.f32.vlgmr.msrb.gmra.mxu2 %v3153_v38  ;;  %3293 = vmatmul.f32.vlgmr.msrb.gmra.mxu3 %v3153_v38 }
 0x622   :  { %3464 = vmatpush.msra.mxu0 %v3459_v18 }
 0x624   :  { %3465 = vmatpush.msra.mxu0 %v3458_v27 }
 0x626   :  { %3466 = vmatpush.msra.mxu0 %v3457_v15 }
 0x628   :  { %3313 = vmatmul.f32.vlgmr.msrb.gmra.mxu0 %v8017_v33  ;;  %3333 = vmatmul.f32.vlgmr.msra.gmra.mxu1 %v8017_v33 }
 0x629   :  { %3353 = vmatmul.f32.vlgmr.msra.gmra.mxu2 %v8017_v33  ;;  %3373 = vmatmul.f32.vlgmr.msra.gmra.mxu3 %v8017_v33 }
 0x62a   :  { %3467 = vmatpush.msra.mxu0 %v3456_v51 }
 0x62c   :  { %3468 = vmatpush.msra.mxu0 %v3455_v36 }
 0x62e   :  { %3469 = vmatpush.msra.mxu0 %v3454_v61 }
 0x630   :  { %3470 = vmatpush.msra.mxu0 %v3453_v55 }
 0x632   :  { %3471 = vmatpush.msra.mxu0 %v3452_v3 }
 0x634   :  { %3472 = vmatpush.msra.mxu0 %v3451_v42 }
 0x636   :  { %3473 = vmatpush.msra.mxu0 %v3450_v62 }
 0x638   :  { %3474 = vmatpush.msra.mxu0 %v3449_v49 }
 0x63a   :  { %3475 = vmatpush.msra.mxu0 %v3448_v44 }
 0x63c   :  { %3476 = vmatpush.msra.mxu0 %v3447_v28 }
 0x63e   :  { %3477 = vmatpush.msra.mxu0 %v3446_v19 }
 0x69d   :  { %v3234_v58 = vpop.f32.mrf.mxu0  ;;  %v3254_v37 = vpop.f32.mrf.mxu1 }
 0x6a4   :  { %v3294_v1 = vpop.f32.mrf.mxu3  ;;  %v3274_v25 = vpop.f32.mrf.mxu2 }
 0x6a5   :  { %v3314_v33 = vpop.f32.mrf.mxu0  ;;  %v3334_v5 = vpop.f32.mrf.mxu1 }
 0x6a6   :  { %v3315_v20 = vadd.f32 %v3314_v33, %v3234_v58  ;;  %v3335_v60 = vadd.f32 %v3334_v5, %v3254_v37 }
 0x6a8   :  { %v3377_v22 = vadd.f32 %v3315_v20, %v9700_v0  ;;  %v3378_v9 = vadd.f32 %v3335_v60, %v9701_v53  ;;  %v3445_v0 = vld [vmem:[#allocation10 + $0x8] sm:$0xff] }
 0x6a9   :  { %3478 = vmatpush.msra.mxu0 %v3445_v0 }
 0x6aa   :  { %v3581_v13 = vmul.f32 -1.442695, %v3377_v22  ;;  %v3582_v2 = vmul.f32 -1.442695, %v3378_v9 }
 0x6ab   :  { %3479 = vmatpush.msra.mxu0 %v3444_v50 }
 0x6ac   :  { %3848 = vpow2.f32 %v3581_v13  ;;  %v3374_v4 = vpop.f32.mrf.mxu3  ;;  %v3354_v21 = vpop.f32.mrf.mxu2 }
 0x6ad   :  { %3850 = vpow2.f32 %v3582_v2  ;;  %v3375_v14 = vadd.f32 %v3374_v4, %v3294_v1  ;;  %v3355_v6 = vadd.f32 %v3354_v21, %v3274_v25 }
 0x6af   :  { %v3380_v35 = vadd.f32 %v3375_v14, %v9702_v17  ;;  %v3379_v17 = vadd.f32 %v3355_v6, %v9703_v7 }
 0x6b1   :  { %v3583_v53 = vmul.f32 -1.442695, %v3380_v35 }
 0x6b2   :  { %v3849_v57 = vpop.eup %3848 }
 0x6b3   :  { %v3851_v39 = vpop.eup %3850  ;;  %v3384_v40 = vadd.f32 1.0, %v3849_v57  ;;  %3852 = vpow2.f32 %v3583_v53 }
 0x6b4   :  { %v3403_v32 = vadd.f32 1.0, %v3851_v39 }
 0x6b5   :  { %3854 = vrcp.f32 %v3384_v40  ;;  %v3396_v59 = vand.u32 2147483648, %v3384_v40  ;;  %v3394_v8 = vand.u32 2147483647, %v3384_v40  ;;  %vm3390_vm7 = vweird.f32 %v3384_v40 }
 0x6b6   :  { %3856 = vrcp.f32 %v3403_v32  ;;  %v3415_v45 = vand.u32 2147483648, %v3403_v32  ;;  %v3413_v26 = vand.u32 2147483647, %v3403_v32  ;;  %vm3409_vm8 = vweird.f32 %v3403_v32 }
 0x6b7   :  { %v3397_v7 = vor.u32 1.1754944e-38, %v3396_v59  ;;  %vm3395_vm11 = vcmp.eq.f32.partialorder %v3394_v8, 8.507059e+37 }
 0x6b8   :  { %v3416_v29 = vor.u32 1.1754944e-38, %v3415_v45  ;;  %vm3414_vm12 = vcmp.eq.f32.partialorder %v3413_v26, 8.507059e+37 }
 0x6b9   :  { %v3853_v11 = vpop.eup %3852 }
 0x6ba   :  { %v3423_v30 = vadd.f32 1.0, %v3853_v11 }
 0x6bb   :  { %v3855_v47 = vpop.eup %3854 }
 0x6bc   :  { %v3857_v63 = vpop.eup %3856  ;;  %v3386_v48 = vmul.f32 %v3855_v47, %v3384_v40  ;;  %3858 = vrcp.f32 %v3423_v30  ;;  %vm3391_vm5 = vweird.f32 %v3855_v47  ;;  %v3435_v61 = vand.u32 2147483648, %v3423_v30 }
 0x6bd   :  { %v3405_v41 = vmul.f32 %v3857_v63, %v3403_v32  ;;  %3860 = vtanh.f32 %v3379_v17  ;;  %vm3410_vm6 = vweird.f32 %v3857_v63  ;;  %vm3392_vm9 = vmor %vm3390_vm7, %vm3391_vm5  ;;  %vm3429_vm14 = vweird.f32 %v3423_v30 }
 0x6be   :  { %v3387_v34 = vsub.f32 1.0, %v3386_v48  ;;  %vm3411_vm10 = vmor %vm3409_vm8, %vm3410_vm6  ;;  %v3433_v55 = vand.u32 2147483647, %v3423_v30  ;;  %v3436_v1 = vor.u32 1.1754944e-38, %v3435_v61 }
 0x6bf   :  { %v3406_v46 = vsub.f32 1.0, %v3405_v41 }
 0x6c0   :  { %v3388_v24 = vmul.f32 %v3855_v47, %v3387_v34  ;;  %vm3434_vm0 = vcmp.eq.f32.partialorder %v3433_v55, 8.507059e+37 }
 0x6c1   :  { %v3407_v16 = vmul.f32 %v3857_v63, %v3406_v46 }
 0x6c2   :  { %v3859_v12 = vpop.eup %3858  ;;  %v3389_v23 = vadd.f32 %v3855_v47, %v3388_v24 }
 0x6c3   :  { %v3408_v52 = vadd.f32 %v3857_v63, %v3407_v16  ;;  %v3425_v56 = vmul.f32 %v3859_v12, %v3423_v30  ;;  %v3861_v43 = vpop.eup %3860  ;;  %vm3430_vm13 = vweird.f32 %v3859_v12 }
 0x6c4   :  { %v3393_v54 = vsel %vm3392_vm9, %v3855_v47, %v3389_v23  ;;  %vm3431_vm15 = vmor %vm3429_vm14, %vm3430_vm13 }
 0x6c5   :  { %v3398_v31 = vsel %vm3395_vm11, %v3397_v7, %v3393_v54  ;;  %v3412_v38 = vsel %vm3411_vm10, %v3857_v63, %v3408_v52  ;;  %v3426_v18 = vsub.f32 1.0, %v3425_v56 }
 0x6c6   :  { %v3417_v27 = vsel %vm3414_vm12, %v3416_v29, %v3412_v38  ;;  %v3440_v15 = vmul.f32 %v3861_v43, %v3398_v31 }
 0x6c7   :  { %v3439_v51 = vmul.f32 %v3417_v27, %v8024_v10  ;;  %v3427_v58 = vmul.f32 %v3859_v12, %v3426_v18  ;;  %v3607_v10 = vld [vmem:[%s8050_s8] ss:$0 sm:$0xff] }
 0x6c9   :  { %v3441_v37 = vadd.f32 %v3440_v15, %v3439_v51  ;;  %v3428_v36 = vadd.f32 %v3859_v12, %v3427_v58 }
 0x6cb   :  { %3862 = vtanh.f32 %v3441_v37  ;;  %v3432_v3 = vsel %vm3431_vm15, %v3859_v12, %v3428_v36 }
 0x6cc   :  { %v3437_v5 = vsel %vm3434_vm0, %v3436_v1, %v3432_v3 }
 0x6d1   :  { %v3863_v33 = vpop.eup %3862 }
 0x6d2   :  { %v3443_v42 = vmul.f32 %v3863_v33, %v3437_v5 }
 0x6d4   :  { %3480 = vmatmul.f32.vlgmr.msra.gmra.mxu0 %v3443_v42 }
 0x751   :  { %v3481_v20 = vpop.f32.mrf.mxu0 }
 0x752   :  { %v3482_v60 = vadd.f32 %v3607_v10, %v3481_v20 }
 0x754   :  { %3484 = vst [vmem:[#allocation11] sm:$0xff] %v3482_v60 }
 0x755   :  { %3495 = dma.vmem_to_hbm [thread:$0]  %s3491_s30, 128, %s3493_s11, [#allocation4]  }
 0x756   :  { %4590 = dma.done.wait [#allocation4], 128  }
 0x757   :  { %4591 = vsyncadd [#allocation4], 4294967168 }
 0x758   :  { %3500 = vsyncpa [#allocation3], 1 }
 0x759   :  { %3501 = vsyncpa [#allocation6], 1 }
 0x75a   :  { %3502 = vsyncpa [#allocation9], 1 }
 0x75b   :  { %3503 = vsyncpa [#allocation4], 1 }

</bundles_post_ra>
